<compile_context>
chip_gen: v6e
topology: v6e:2x2x1
jax: 0.10.0
libtpu: 0.0.40
codegen_flags: <defaults>
</compile_context>

<pallas_src>
import jax
import jax.numpy as jnp
from jax.experimental import pallas as pl
from jax.experimental.pallas import tpu as pltpu

# GATv2Layer(in_channels=8, out_channels=8, heads=2, dropout=0.1, concat=True)
N_GRAPHS = 16
N_PER_GRAPH = 16
N_NODES = N_GRAPHS * N_PER_GRAPH      # 256 nodes in the block-diagonal batch
IN_CH = 8
OUT_CH = 8
HEADS = 2
HC = OUT_CH * HEADS                   # concat=True -> final feature dim (16)
NEG_SLOPE = 0.2                       # GATv2Conv default negative_slope
LN_EPS = 1e-5
NEG_BIG = -1e30                       # finite mask value (avoids inf-inf NaNs)
HIGHEST = jax.lax.Precision.HIGHEST

# One 128x128 diagonal [target, source] tile per grid step.  TILE must be a
# multiple of 8 (sublanes) and 128 (lanes) and of the per-graph node count so
# no edge crosses a tile boundary.  Scaling note: at large N re-derive the tile
# for v7x's 64 MiB physical / 32 MiB scoped VMEM (vs 128 MiB on v5e/v6e) and
# consider bf16 for the streamed edge-weight panel (the O(N*TILE) HBM term).
TILE = 128


def gatv2_kernel(xr_ref, xlT_ref, xl_ref, atxr_ref, atxlT_ref, mask_ref, ew_ref,
                 bias_ref, gamma_ref, beta_ref,
                 we_ref, coef_ref, atw_ref,
                 out_ref):
    xr_t = xr_ref[...]          # (T, HC)  target-side lin_r projections
    xlT = xlT_ref[...]          # (HC, T)  source-side lin_l projections (pre-transposed)
    xl_s = xl_ref[...]          # (T, HC)  source-side lin_l projections
    atxr = atxr_ref[...]        # (T, H)   slope * att . xr   (targets)
    atxlT = atxlT_ref[...]      # (H, T)   slope * att . xl   (sources)
    ew = ew_ref[...]            # (T, T)   dense edge weights [target, source]
    add_mask = mask_ref[...]    # (T, T)   0 where edge, -1e30 where no edge

    heads_out = []
    for h in range(HEADS):
        lo = h * OUT_CH
        # logits = att . LeakyReLU(xr_i + xl_j + w_ij*We), decomposed as
        #   slope*(att.xr_i + att.xl_j + w_ij*(att.We)) + sum_c (1-slope)*att_c*relu(s_c)
        # Linear branch + additive mask (precomputed, slope already folded in):
        logits = (atxr[:, h:h + 1] + atxlT[h:h + 1, :]
                  + atw_ref[h] * ew + add_mask)
        # Non-linear branch: per-channel relu accumulation (VPU loop).
        # TODO(synk): for larger OUT_CH, replace with an MXU contraction of the
        # relu panel against `att` instead of the unrolled c-loop.
        for c in range(OUT_CH):
            s = (xr_t[:, lo + c:lo + c + 1] + xlT[lo + c:lo + c + 1, :]
                 + ew * we_ref[lo + c])
            logits = logits + coef_ref[lo + c] * jnp.maximum(s, 0.0)

        # Plain row softmax over the single diagonal source tile.  Masked
        # entries sit at ~-1e30, so exp underflows to exactly 0 (no mask mul),
        # and every row has its self-loop in-tile so the denominator is >= 1.
        m = jnp.max(logits, axis=1, keepdims=True)
        p = jnp.exp(logits - m)
        l = jnp.sum(p, axis=1, keepdims=True)
        agg = jnp.dot(p, xl_s[:, lo:lo + OUT_CH],
                      preferred_element_type=jnp.float32, precision=HIGHEST)
        heads_out.append(agg / l)                  # exact division, once per tile

    out = jnp.concatenate(heads_out, axis=1) + bias_ref[...]      # (T, HC)

    # ELU activation.
    out = jnp.where(out > 0, out, jnp.exp(out) - 1.0)
    # TODO(synk): nn.Dropout / attention dropout are identity in eval mode;
    #             training-mode stochastic dropout is not implemented here.

    # LayerNorm over the feature axis.
    mean = jnp.mean(out, axis=1, keepdims=True)
    var = jnp.mean((out - mean) ** 2, axis=1, keepdims=True)
    out = (out - mean) * jax.lax.rsqrt(var + LN_EPS)
    # NOTE: HC=16 < 128 lanes -> masked partial stores; tiny output, so left as is.
    out_ref[...] = (out * gamma_ref[...] + beta_ref[...]).astype(out_ref.dtype)


def build_dense_graph(edge_index, edge_weight, num_nodes):
    """Replicate PyG remove_self_loops + add_self_loops(fill_value='mean'),
    then densify into an additive mask (0 / -1e30) and a dense [target, source]
    edge-weight matrix."""
    src, tgt = edge_index[0], edge_index[1]
    keep = (src != tgt).astype(jnp.float32)

    # Per-target mean of (non-self-loop) edge weights -> self-loop fill value.
    sums = jnp.zeros((num_nodes,), jnp.float32).at[tgt].add(edge_weight * keep)
    cnts = jnp.zeros((num_nodes,), jnp.float32).at[tgt].add(keep)
    loop_w = jnp.where(cnts > 0, sums / jnp.maximum(cnts, 1.0), 0.0)

    adj = jnp.zeros((num_nodes, num_nodes), jnp.float32).at[tgt, src].set(keep)
    ewm = jnp.zeros((num_nodes, num_nodes), jnp.float32).at[tgt, src].set(edge_weight * keep)
    diag = jnp.arange(num_nodes)
    adj = adj.at[diag, diag].set(1.0)
    ewm = ewm.at[diag, diag].set(loop_w)
    add_mask = jnp.where(adj > 0.5, 0.0, NEG_BIG).astype(jnp.float32)
    return add_mask, ewm


def gatv2_layer(x, edge_index, edge_weight, params):
    n = x.shape[0]
    assert n % TILE == 0

    add_mask, ewm = build_dense_graph(edge_index, edge_weight, n)

    # Diagonal-tile fast path: every edge must stay inside one aligned
    # TILE x TILE block (true for block-diagonal batches whose component size
    # divides TILE).
    src, tgt = edge_index[0], edge_index[1]
    assert bool(jnp.all(src // TILE == tgt // TILE)), \
        "edges must not cross aligned TILE x TILE diagonal blocks"
    # TODO(synk): for arbitrary graphs, fall back to a 2-D (target, source) grid
    # with a scalar-prefetched per-tile 'has edges' flag and an online softmax.

    assert params["att"].shape == (1, HC) and params["W_e"].shape == (1, HC)
    att = params["att"].reshape(HEADS, OUT_CH)     # PyG layout [heads, out_channels]
    we = params["W_e"].reshape(HEADS, OUT_CH)

    # Hoisted projections (one-off 256x8 @ 8x16 XLA matmuls, full f32 precision).
    xl = jnp.dot(x, params["W_l"], precision=HIGHEST) + params["b_l"]   # (N, HC) lin_l (sources)
    xr = jnp.dot(x, params["W_r"], precision=HIGHEST) + params["b_r"]   # (N, HC) lin_r (targets)
    xlT = xl.T                                                          # (HC, N)

    # Slope-scaled att contractions for the linear branch of the LeakyReLU split.
    atxr = NEG_SLOPE * (xr.reshape(n, HEADS, OUT_CH) * att[None]).sum(-1)        # (N, H)
    atxlT = (NEG_SLOPE * (xl.reshape(n, HEADS, OUT_CH) * att[None]).sum(-1)).T   # (H, N)
    atw = (NEG_SLOPE * (att * we).sum(-1)).astype(jnp.float32)                   # (H,)  SMEM
    coef = ((1.0 - NEG_SLOPE) * att).reshape(HC).astype(jnp.float32)             # (HC,) SMEM
    we_flat = we.reshape(HC).astype(jnp.float32)                                 # (HC,) SMEM

    grid = (n // TILE,)
    vmem = pltpu.MemorySpace.VMEM
    smem = pltpu.MemorySpace.SMEM

    return pl.pallas_call(
        gatv2_kernel,
        out_shape=jax.ShapeDtypeStruct((n, HC), jnp.float32),
        grid=grid,
        in_specs=[
            pl.BlockSpec((TILE, HC), lambda i: (i, 0), memory_space=vmem),     # xr (targets)
            pl.BlockSpec((HC, TILE), lambda i: (0, i), memory_space=vmem),     # xl^T (sources)
            pl.BlockSpec((TILE, HC), lambda i: (i, 0), memory_space=vmem),     # xl (sources)
            pl.BlockSpec((TILE, HEADS), lambda i: (i, 0), memory_space=vmem),  # slope*att.xr
            pl.BlockSpec((HEADS, TILE), lambda i: (0, i), memory_space=vmem),  # slope*att.xl (T)
            pl.BlockSpec((TILE, TILE), lambda i: (i, i), memory_space=vmem),   # additive mask
            pl.BlockSpec((TILE, TILE), lambda i: (i, i), memory_space=vmem),   # edge weights
            pl.BlockSpec((1, HC), lambda i: (0, 0), memory_space=vmem),        # conv bias
            pl.BlockSpec((1, HC), lambda i: (0, 0), memory_space=vmem),        # LN gamma
            pl.BlockSpec((1, HC), lambda i: (0, 0), memory_space=vmem),        # LN beta
            pl.BlockSpec(memory_space=smem),                                   # W_e scalars
            pl.BlockSpec(memory_space=smem),                                   # (1-slope)*att
            pl.BlockSpec(memory_space=smem),                                   # slope*att.W_e
        ],
        out_specs=pl.BlockSpec((TILE, HC), lambda i: (i, 0), memory_space=vmem),
        compiler_params=pltpu.CompilerParams(
            dimension_semantics=("parallel",)),     # v7x: one 128-row tile per TensorCore
    )(xr, xlT, xl, atxr, atxlT, add_mask, ewm,
      params["bias"], params["gamma"], params["beta"], we_flat, coef, atw)


def gatv2_ref(x, edge_index, edge_weight, p):
    """Pure-JAX reference (same math, dense broadcast form) for a sanity check."""
    n = x.shape[0]
    add_mask, ewm = build_dense_graph(edge_index, edge_weight, n)
    adj = (add_mask == 0.0).astype(jnp.float32)
    xl = (jnp.dot(x, p["W_l"], precision=HIGHEST) + p["b_l"]).reshape(n, HEADS, OUT_CH)
    xr = (jnp.dot(x, p["W_r"], precision=HIGHEST) + p["b_r"]).reshape(n, HEADS, OUT_CH)
    we = p["W_e"].reshape(HEADS, OUT_CH)
    att = p["att"].reshape(HEADS, OUT_CH)
    s = xr[:, None] + xl[None, :] + ewm[:, :, None, None] * we[None, None]   # [Nt,Ns,H,C]
    s = jnp.where(s > 0, s, NEG_SLOPE * s)
    logits = (s * att[None, None]).sum(-1)                                    # [Nt,Ns,H]
    masked = jnp.where(adj[:, :, None] > 0, logits, NEG_BIG)
    a = jnp.exp(masked - masked.max(1, keepdims=True)) * adj[:, :, None]
    a = a / jnp.maximum(a.sum(1, keepdims=True), 1e-16)
    out = jnp.einsum('tsh,shc->thc', a, xl, precision=HIGHEST).reshape(n, HC) + p["bias"]
    out = jnp.where(out > 0, out, jnp.exp(out) - 1.0)
    mean = out.mean(1, keepdims=True)
    var = ((out - mean) ** 2).mean(1, keepdims=True)
    return (out - mean) / jnp.sqrt(var + LN_EPS) * p["gamma"] + p["beta"]


def init_params(key):
    ks = jax.random.split(key, 4)

    def glorot(k, shape):
        fan_in, fan_out = shape[0], shape[1]
        lim = jnp.sqrt(6.0 / (fan_in + fan_out))
        return jax.random.uniform(k, shape, jnp.float32, -lim, lim)

    return {
        "W_l": glorot(ks[0], (IN_CH, HC)),          # lin_l weight
        "b_l": jnp.zeros((1, HC), jnp.float32),     # lin_l bias
        "W_r": glorot(ks[1], (IN_CH, HC)),          # lin_r weight
        "b_r": jnp.zeros((1, HC), jnp.float32),     # lin_r bias
        "W_e": glorot(ks[2], (1, HC)),              # lin_edge weight (edge_dim=1, no bias)
        "att": glorot(ks[3], (1, HC)),              # attention vector a, flattened [H, C]
        "bias": jnp.zeros((1, HC), jnp.float32),    # conv output bias
        "gamma": jnp.ones((1, HC), jnp.float32),    # LayerNorm weight
        "beta": jnp.zeros((1, HC), jnp.float32),    # LayerNorm bias
    }


if __name__ == "__main__":
    key = jax.random.PRNGKey(0)
    k_x, k_w, k_p = jax.random.split(key, 3)

    # Node features for the whole block-diagonal batch [N_NODES, in_channels].
    x = jax.random.normal(k_x, (N_NODES, IN_CH), jnp.float32)

    # N_GRAPHS disjoint bidirectional ring graphs, batched block-diagonally
    # (same batching PyG uses: one big graph with disjoint components).
    idx = jnp.arange(N_PER_GRAPH)
    src_l = jnp.concatenate([idx, (idx + 1) % N_PER_GRAPH])
    tgt_l = jnp.concatenate([(idx + 1) % N_PER_GRAPH, idx])
    offs = (jnp.arange(N_GRAPHS) * N_PER_GRAPH)[:, None]
    src = (src_l[None, :] + offs).reshape(-1)
    tgt = (tgt_l[None, :] + offs).reshape(-1)
    edge_index = jnp.stack([src, tgt]).astype(jnp.int32)            # [2, 512]
    edge_weight = jax.random.uniform(k_w, (edge_index.shape[1],), jnp.float32)

    params = init_params(k_p)

    out = gatv2_layer(x, edge_index, edge_weight, params)
    out = jax.block_until_ready(out)

    ref = gatv2_ref(x, edge_index, edge_weight, params)
    assert out.shape == (N_NODES, HC)
    assert bool(jnp.all(jnp.isfinite(out)))
    # Exact softmax division + HIGHEST-precision matmuls on both sides: the
    # kernel and reference agree far inside this tolerance.
    assert bool(jnp.allclose(out, ref, atol=1e-3, rtol=1e-3)), \
        float(jnp.max(jnp.abs(out - ref)))

    print("KERNEL_OK")
</pallas_src>

<mosaic_0001>
module attributes {stable_mosaic.version = 11 : i64} {
  func.func @gatv2_kernel(%arg0: i32, %arg1: memref<128x16xf32, #tpu.memory_space<vmem>>, %arg2: memref<16x128xf32, #tpu.memory_space<vmem>>, %arg3: memref<128x16xf32, #tpu.memory_space<vmem>>, %arg4: memref<128x2xf32, #tpu.memory_space<vmem>>, %arg5: memref<2x128xf32, #tpu.memory_space<vmem>>, %arg6: memref<128x128xf32, #tpu.memory_space<vmem>>, %arg7: memref<128x128xf32, #tpu.memory_space<vmem>>, %arg8: memref<1x16xf32, #tpu.memory_space<vmem>>, %arg9: memref<1x16xf32, #tpu.memory_space<vmem>>, %arg10: memref<1x16xf32, #tpu.memory_space<vmem>>, %arg11: memref<16xf32, #tpu.memory_space<smem>>, %arg12: memref<16xf32, #tpu.memory_space<smem>>, %arg13: memref<2xf32, #tpu.memory_space<smem>>, %arg14: memref<128x16xf32, #tpu.memory_space<vmem>>) attributes {dimension_semantics = [#tpu.dimension_semantics<parallel>], iteration_bounds = array<i64: 2>, scalar_prefetch = 0 : i64, scratch_operands = 0 : i64, tpu.core_type = #tpu.core_type<tc>, window_params = [{transform_indices = @transform_0, window_bounds = array<i64: 128, 16>}, {transform_indices = @transform_1, window_bounds = array<i64: 16, 128>}, {transform_indices = @transform_2, window_bounds = array<i64: 128, 16>}, {transform_indices = @transform_3, window_bounds = array<i64: 128, 2>}, {transform_indices = @transform_4, window_bounds = array<i64: 2, 128>}, {transform_indices = @transform_5, window_bounds = array<i64: 128, 128>}, {transform_indices = @transform_6, window_bounds = array<i64: 128, 128>}, {pipeline_mode = #tpu.pipeline_mode<synchronous>, transform_indices = @transform_7, window_bounds = array<i64: 1, 16>}, {pipeline_mode = #tpu.pipeline_mode<synchronous>, transform_indices = @transform_8, window_bounds = array<i64: 1, 16>}, {pipeline_mode = #tpu.pipeline_mode<synchronous>, transform_indices = @transform_9, window_bounds = array<i64: 1, 16>}, {transform_indices = @transform_10, window_bounds = array<i64: 16>}, {transform_indices = @transform_11, window_bounds = array<i64: 16>}, {transform_indices = @transform_12, window_bounds = array<i64: 2>}, {transform_indices = @transform_13, window_bounds = array<i64: 128, 16>}]} {
    %c0 = arith.constant 0 : index
    %c0_0 = arith.constant 0 : index
    %0 = vector.load %arg1[%c0, %c0_0] : memref<128x16xf32, #tpu.memory_space<vmem>>, vector<128x16xf32>
    %c0_1 = arith.constant 0 : index
    %c0_2 = arith.constant 0 : index
    %1 = vector.load %arg2[%c0_1, %c0_2] : memref<16x128xf32, #tpu.memory_space<vmem>>, vector<16x128xf32>
    %c0_3 = arith.constant 0 : index
    %c0_4 = arith.constant 0 : index
    %2 = vector.load %arg3[%c0_3, %c0_4] : memref<128x16xf32, #tpu.memory_space<vmem>>, vector<128x16xf32>
    %c0_5 = arith.constant 0 : index
    %c0_6 = arith.constant 0 : index
    %3 = vector.load %arg4[%c0_5, %c0_6] : memref<128x2xf32, #tpu.memory_space<vmem>>, vector<128x2xf32>
    %c0_7 = arith.constant 0 : index
    %c0_8 = arith.constant 0 : index
    %4 = vector.load %arg5[%c0_7, %c0_8] : memref<2x128xf32, #tpu.memory_space<vmem>>, vector<2x128xf32>
    %c0_9 = arith.constant 0 : index
    %c0_10 = arith.constant 0 : index
    %5 = vector.load %arg7[%c0_9, %c0_10] : memref<128x128xf32, #tpu.memory_space<vmem>>, vector<128x128xf32>
    %c0_11 = arith.constant 0 : index
    %c0_12 = arith.constant 0 : index
    %6 = vector.load %arg6[%c0_11, %c0_12] : memref<128x128xf32, #tpu.memory_space<vmem>>, vector<128x128xf32>
    %7 = vector.extract_strided_slice %3 {offsets = [0, 0], sizes = [128, 1], strides = [1, 1]} : vector<128x2xf32> to vector<128x1xf32>
    %8 = vector.extract_strided_slice %4 {offsets = [0, 0], sizes = [1, 128], strides = [1, 1]} : vector<2x128xf32> to vector<1x128xf32>
    %9 = vector.broadcast %7 : vector<128x1xf32> to vector<128x128xf32>
    %10 = vector.broadcast %8 : vector<1x128xf32> to vector<128x128xf32>
    %11 = arith.addf %9, %10 : vector<128x128xf32>
    %c0_13 = arith.constant 0 : index
    %12 = memref.load %arg13[%c0_13] : memref<2xf32, #tpu.memory_space<smem>>
    %13 = vector.broadcast %12 : f32 to vector<128x128xf32>
    %14 = arith.mulf %13, %5 : vector<128x128xf32>
    %15 = arith.addf %11, %14 : vector<128x128xf32>
    %16 = arith.addf %15, %6 : vector<128x128xf32>
    %17 = vector.extract_strided_slice %0 {offsets = [0, 0], sizes = [128, 1], strides = [1, 1]} : vector<128x16xf32> to vector<128x1xf32>
    %18 = vector.extract_strided_slice %1 {offsets = [0, 0], sizes = [1, 128], strides = [1, 1]} : vector<16x128xf32> to vector<1x128xf32>
    %19 = vector.broadcast %17 : vector<128x1xf32> to vector<128x128xf32>
    %20 = vector.broadcast %18 : vector<1x128xf32> to vector<128x128xf32>
    %21 = arith.addf %19, %20 : vector<128x128xf32>
    %c0_14 = arith.constant 0 : index
    %22 = memref.load %arg11[%c0_14] : memref<16xf32, #tpu.memory_space<smem>>
    %23 = vector.broadcast %22 : f32 to vector<128x128xf32>
    %24 = arith.mulf %5, %23 : vector<128x128xf32>
    %25 = arith.addf %21, %24 : vector<128x128xf32>
    %c0_15 = arith.constant 0 : index
    %26 = memref.load %arg12[%c0_15] : memref<16xf32, #tpu.memory_space<smem>>
    %cst = arith.constant 0.000000e+00 : f32
    %27 = vector.broadcast %cst : f32 to vector<128x128xf32>
    %28 = arith.maximumf %25, %27 : vector<128x128xf32>
    %29 = vector.broadcast %26 : f32 to vector<128x128xf32>
    %30 = arith.mulf %29, %28 : vector<128x128xf32>
    %31 = arith.addf %16, %30 : vector<128x128xf32>
    %32 = vector.extract_strided_slice %0 {offsets = [0, 1], sizes = [128, 1], strides = [1, 1]} : vector<128x16xf32> to vector<128x1xf32>
    %33 = vector.extract_strided_slice %1 {offsets = [1, 0], sizes = [1, 128], strides = [1, 1]} : vector<16x128xf32> to vector<1x128xf32>
    %34 = vector.broadcast %32 : vector<128x1xf32> to vector<128x128xf32>
    %35 = vector.broadcast %33 : vector<1x128xf32> to vector<128x128xf32>
    %36 = arith.addf %34, %35 : vector<128x128xf32>
    %c1 = arith.constant 1 : index
    %37 = memref.load %arg11[%c1] : memref<16xf32, #tpu.memory_space<smem>>
    %38 = vector.broadcast %37 : f32 to vector<128x128xf32>
    %39 = arith.mulf %5, %38 : vector<128x128xf32>
    %40 = arith.addf %36, %39 : vector<128x128xf32>
    %c1_16 = arith.constant 1 : index
    %41 = memref.load %arg12[%c1_16] : memref<16xf32, #tpu.memory_space<smem>>
    %cst_17 = arith.constant 0.000000e+00 : f32
    %42 = vector.broadcast %cst_17 : f32 to vector<128x128xf32>
    %43 = arith.maximumf %40, %42 : vector<128x128xf32>
    %44 = vector.broadcast %41 : f32 to vector<128x128xf32>
    %45 = arith.mulf %44, %43 : vector<128x128xf32>
    %46 = arith.addf %31, %45 : vector<128x128xf32>
    %47 = vector.extract_strided_slice %0 {offsets = [0, 2], sizes = [128, 1], strides = [1, 1]} : vector<128x16xf32> to vector<128x1xf32>
    %48 = vector.extract_strided_slice %1 {offsets = [2, 0], sizes = [1, 128], strides = [1, 1]} : vector<16x128xf32> to vector<1x128xf32>
    %49 = vector.broadcast %47 : vector<128x1xf32> to vector<128x128xf32>
    %50 = vector.broadcast %48 : vector<1x128xf32> to vector<128x128xf32>
    %51 = arith.addf %49, %50 : vector<128x128xf32>
    %c2 = arith.constant 2 : index
    %52 = memref.load %arg11[%c2] : memref<16xf32, #tpu.memory_space<smem>>
    %53 = vector.broadcast %52 : f32 to vector<128x128xf32>
    %54 = arith.mulf %5, %53 : vector<128x128xf32>
    %55 = arith.addf %51, %54 : vector<128x128xf32>
    %c2_18 = arith.constant 2 : index
    %56 = memref.load %arg12[%c2_18] : memref<16xf32, #tpu.memory_space<smem>>
    %cst_19 = arith.constant 0.000000e+00 : f32
    %57 = vector.broadcast %cst_19 : f32 to vector<128x128xf32>
    %58 = arith.maximumf %55, %57 : vector<128x128xf32>
    %59 = vector.broadcast %56 : f32 to vector<128x128xf32>
    %60 = arith.mulf %59, %58 : vector<128x128xf32>
    %61 = arith.addf %46, %60 : vector<128x128xf32>
    %62 = vector.extract_strided_slice %0 {offsets = [0, 3], sizes = [128, 1], strides = [1, 1]} : vector<128x16xf32> to vector<128x1xf32>
    %63 = vector.extract_strided_slice %1 {offsets = [3, 0], sizes = [1, 128], strides = [1, 1]} : vector<16x128xf32> to vector<1x128xf32>
    %64 = vector.broadcast %62 : vector<128x1xf32> to vector<128x128xf32>
    %65 = vector.broadcast %63 : vector<1x128xf32> to vector<128x128xf32>
    %66 = arith.addf %64, %65 : vector<128x128xf32>
    %c3 = arith.constant 3 : index
    %67 = memref.load %arg11[%c3] : memref<16xf32, #tpu.memory_space<smem>>
    %68 = vector.broadcast %67 : f32 to vector<128x128xf32>
    %69 = arith.mulf %5, %68 : vector<128x128xf32>
    %70 = arith.addf %66, %69 : vector<128x128xf32>
    %c3_20 = arith.constant 3 : index
    %71 = memref.load %arg12[%c3_20] : memref<16xf32, #tpu.memory_space<smem>>
    %cst_21 = arith.constant 0.000000e+00 : f32
    %72 = vector.broadcast %cst_21 : f32 to vector<128x128xf32>
    %73 = arith.maximumf %70, %72 : vector<128x128xf32>
    %74 = vector.broadcast %71 : f32 to vector<128x128xf32>
    %75 = arith.mulf %74, %73 : vector<128x128xf32>
    %76 = arith.addf %61, %75 : vector<128x128xf32>
    %77 = vector.extract_strided_slice %0 {offsets = [0, 4], sizes = [128, 1], strides = [1, 1]} : vector<128x16xf32> to vector<128x1xf32>
    %78 = vector.extract_strided_slice %1 {offsets = [4, 0], sizes = [1, 128], strides = [1, 1]} : vector<16x128xf32> to vector<1x128xf32>
    %79 = vector.broadcast %77 : vector<128x1xf32> to vector<128x128xf32>
    %80 = vector.broadcast %78 : vector<1x128xf32> to vector<128x128xf32>
    %81 = arith.addf %79, %80 : vector<128x128xf32>
    %c4 = arith.constant 4 : index
    %82 = memref.load %arg11[%c4] : memref<16xf32, #tpu.memory_space<smem>>
    %83 = vector.broadcast %82 : f32 to vector<128x128xf32>
    %84 = arith.mulf %5, %83 : vector<128x128xf32>
    %85 = arith.addf %81, %84 : vector<128x128xf32>
    %c4_22 = arith.constant 4 : index
    %86 = memref.load %arg12[%c4_22] : memref<16xf32, #tpu.memory_space<smem>>
    %cst_23 = arith.constant 0.000000e+00 : f32
    %87 = vector.broadcast %cst_23 : f32 to vector<128x128xf32>
    %88 = arith.maximumf %85, %87 : vector<128x128xf32>
    %89 = vector.broadcast %86 : f32 to vector<128x128xf32>
    %90 = arith.mulf %89, %88 : vector<128x128xf32>
    %91 = arith.addf %76, %90 : vector<128x128xf32>
    %92 = vector.extract_strided_slice %0 {offsets = [0, 5], sizes = [128, 1], strides = [1, 1]} : vector<128x16xf32> to vector<128x1xf32>
    %93 = vector.extract_strided_slice %1 {offsets = [5, 0], sizes = [1, 128], strides = [1, 1]} : vector<16x128xf32> to vector<1x128xf32>
    %94 = vector.broadcast %92 : vector<128x1xf32> to vector<128x128xf32>
    %95 = vector.broadcast %93 : vector<1x128xf32> to vector<128x128xf32>
    %96 = arith.addf %94, %95 : vector<128x128xf32>
    %c5 = arith.constant 5 : index
    %97 = memref.load %arg11[%c5] : memref<16xf32, #tpu.memory_space<smem>>
    %98 = vector.broadcast %97 : f32 to vector<128x128xf32>
    %99 = arith.mulf %5, %98 : vector<128x128xf32>
    %100 = arith.addf %96, %99 : vector<128x128xf32>
    %c5_24 = arith.constant 5 : index
    %101 = memref.load %arg12[%c5_24] : memref<16xf32, #tpu.memory_space<smem>>
    %cst_25 = arith.constant 0.000000e+00 : f32
    %102 = vector.broadcast %cst_25 : f32 to vector<128x128xf32>
    %103 = arith.maximumf %100, %102 : vector<128x128xf32>
    %104 = vector.broadcast %101 : f32 to vector<128x128xf32>
    %105 = arith.mulf %104, %103 : vector<128x128xf32>
    %106 = arith.addf %91, %105 : vector<128x128xf32>
    %107 = vector.extract_strided_slice %0 {offsets = [0, 6], sizes = [128, 1], strides = [1, 1]} : vector<128x16xf32> to vector<128x1xf32>
    %108 = vector.extract_strided_slice %1 {offsets = [6, 0], sizes = [1, 128], strides = [1, 1]} : vector<16x128xf32> to vector<1x128xf32>
    %109 = vector.broadcast %107 : vector<128x1xf32> to vector<128x128xf32>
    %110 = vector.broadcast %108 : vector<1x128xf32> to vector<128x128xf32>
    %111 = arith.addf %109, %110 : vector<128x128xf32>
    %c6 = arith.constant 6 : index
    %112 = memref.load %arg11[%c6] : memref<16xf32, #tpu.memory_space<smem>>
    %113 = vector.broadcast %112 : f32 to vector<128x128xf32>
    %114 = arith.mulf %5, %113 : vector<128x128xf32>
    %115 = arith.addf %111, %114 : vector<128x128xf32>
    %c6_26 = arith.constant 6 : index
    %116 = memref.load %arg12[%c6_26] : memref<16xf32, #tpu.memory_space<smem>>
    %cst_27 = arith.constant 0.000000e+00 : f32
    %117 = vector.broadcast %cst_27 : f32 to vector<128x128xf32>
    %118 = arith.maximumf %115, %117 : vector<128x128xf32>
    %119 = vector.broadcast %116 : f32 to vector<128x128xf32>
    %120 = arith.mulf %119, %118 : vector<128x128xf32>
    %121 = arith.addf %106, %120 : vector<128x128xf32>
    %122 = vector.extract_strided_slice %0 {offsets = [0, 7], sizes = [128, 1], strides = [1, 1]} : vector<128x16xf32> to vector<128x1xf32>
    %123 = vector.extract_strided_slice %1 {offsets = [7, 0], sizes = [1, 128], strides = [1, 1]} : vector<16x128xf32> to vector<1x128xf32>
    %124 = vector.broadcast %122 : vector<128x1xf32> to vector<128x128xf32>
    %125 = vector.broadcast %123 : vector<1x128xf32> to vector<128x128xf32>
    %126 = arith.addf %124, %125 : vector<128x128xf32>
    %c7 = arith.constant 7 : index
    %127 = memref.load %arg11[%c7] : memref<16xf32, #tpu.memory_space<smem>>
    %128 = vector.broadcast %127 : f32 to vector<128x128xf32>
    %129 = arith.mulf %5, %128 : vector<128x128xf32>
    %130 = arith.addf %126, %129 : vector<128x128xf32>
    %c7_28 = arith.constant 7 : index
    %131 = memref.load %arg12[%c7_28] : memref<16xf32, #tpu.memory_space<smem>>
    %cst_29 = arith.constant 0.000000e+00 : f32
    %132 = vector.broadcast %cst_29 : f32 to vector<128x128xf32>
    %133 = arith.maximumf %130, %132 : vector<128x128xf32>
    %134 = vector.broadcast %131 : f32 to vector<128x128xf32>
    %135 = arith.mulf %134, %133 : vector<128x128xf32>
    %136 = arith.addf %121, %135 : vector<128x128xf32>
    %cst_30 = arith.constant dense<0xFF800000> : vector<128xf32>
    %137 = vector.multi_reduction <maximumf>, %136, %cst_30 [1] : vector<128x128xf32> to vector<128xf32>
    %138 = vector.shape_cast %137 : vector<128xf32> to vector<128x1xf32>
    %139 = vector.broadcast %138 : vector<128x1xf32> to vector<128x128xf32>
    %140 = arith.subf %136, %139 : vector<128x128xf32>
    %141 = math.exp %140 : vector<128x128xf32>
    %cst_31 = arith.constant dense<0.000000e+00> : vector<128xf32>
    %142 = vector.multi_reduction <add>, %141, %cst_31 [1] : vector<128x128xf32> to vector<128xf32>
    %143 = vector.shape_cast %142 : vector<128xf32> to vector<128x1xf32>
    %144 = vector.extract_strided_slice %2 {offsets = [0, 0], sizes = [128, 8], strides = [1, 1]} : vector<128x16xf32> to vector<128x8xf32>
    %cst_32 = arith.constant dense<0.000000e+00> : vector<128x8xf32>
    %145 = tpu.matmul %141, %144, %cst_32 {dimension_numbers = #tpu.dot_dimension_numbers<[1], [0], [0], [1], [0, 0, 1, 1], [], []>, precision = #tpu.contract_precision<fp32>} : vector<128x128xf32>, vector<128x8xf32>, vector<128x8xf32> -> vector<128x8xf32>
    %146 = vector.broadcast %143 : vector<128x1xf32> to vector<128x8xf32>
    %147 = arith.divf %145, %146 : vector<128x8xf32>
    %148 = vector.extract_strided_slice %3 {offsets = [0, 1], sizes = [128, 1], strides = [1, 1]} : vector<128x2xf32> to vector<128x1xf32>
    %149 = vector.extract_strided_slice %4 {offsets = [1, 0], sizes = [1, 128], strides = [1, 1]} : vector<2x128xf32> to vector<1x128xf32>
    %150 = vector.broadcast %148 : vector<128x1xf32> to vector<128x128xf32>
    %151 = vector.broadcast %149 : vector<1x128xf32> to vector<128x128xf32>
    %152 = arith.addf %150, %151 : vector<128x128xf32>
    %c1_33 = arith.constant 1 : index
    %153 = memref.load %arg13[%c1_33] : memref<2xf32, #tpu.memory_space<smem>>
    %154 = vector.broadcast %153 : f32 to vector<128x128xf32>
    %155 = arith.mulf %154, %5 : vector<128x128xf32>
    %156 = arith.addf %152, %155 : vector<128x128xf32>
    %157 = arith.addf %156, %6 : vector<128x128xf32>
    %158 = vector.extract_strided_slice %0 {offsets = [0, 8], sizes = [128, 1], strides = [1, 1]} : vector<128x16xf32> to vector<128x1xf32>
    %159 = vector.extract_strided_slice %1 {offsets = [8, 0], sizes = [1, 128], strides = [1, 1]} : vector<16x128xf32> to vector<1x128xf32>
    %160 = vector.broadcast %158 : vector<128x1xf32> to vector<128x128xf32>
    %161 = vector.broadcast %159 : vector<1x128xf32> to vector<128x128xf32>
    %162 = arith.addf %160, %161 : vector<128x128xf32>
    %c8 = arith.constant 8 : index
    %163 = memref.load %arg11[%c8] : memref<16xf32, #tpu.memory_space<smem>>
    %164 = vector.broadcast %163 : f32 to vector<128x128xf32>
    %165 = arith.mulf %5, %164 : vector<128x128xf32>
    %166 = arith.addf %162, %165 : vector<128x128xf32>
    %c8_34 = arith.constant 8 : index
    %167 = memref.load %arg12[%c8_34] : memref<16xf32, #tpu.memory_space<smem>>
    %cst_35 = arith.constant 0.000000e+00 : f32
    %168 = vector.broadcast %cst_35 : f32 to vector<128x128xf32>
    %169 = arith.maximumf %166, %168 : vector<128x128xf32>
    %170 = vector.broadcast %167 : f32 to vector<128x128xf32>
    %171 = arith.mulf %170, %169 : vector<128x128xf32>
    %172 = arith.addf %157, %171 : vector<128x128xf32>
    %173 = vector.extract_strided_slice %0 {offsets = [0, 9], sizes = [128, 1], strides = [1, 1]} : vector<128x16xf32> to vector<128x1xf32>
    %174 = vector.extract_strided_slice %1 {offsets = [9, 0], sizes = [1, 128], strides = [1, 1]} : vector<16x128xf32> to vector<1x128xf32>
    %175 = vector.broadcast %173 : vector<128x1xf32> to vector<128x128xf32>
    %176 = vector.broadcast %174 : vector<1x128xf32> to vector<128x128xf32>
    %177 = arith.addf %175, %176 : vector<128x128xf32>
    %c9 = arith.constant 9 : index
    %178 = memref.load %arg11[%c9] : memref<16xf32, #tpu.memory_space<smem>>
    %179 = vector.broadcast %178 : f32 to vector<128x128xf32>
    %180 = arith.mulf %5, %179 : vector<128x128xf32>
    %181 = arith.addf %177, %180 : vector<128x128xf32>
    %c9_36 = arith.constant 9 : index
    %182 = memref.load %arg12[%c9_36] : memref<16xf32, #tpu.memory_space<smem>>
    %cst_37 = arith.constant 0.000000e+00 : f32
    %183 = vector.broadcast %cst_37 : f32 to vector<128x128xf32>
    %184 = arith.maximumf %181, %183 : vector<128x128xf32>
    %185 = vector.broadcast %182 : f32 to vector<128x128xf32>
    %186 = arith.mulf %185, %184 : vector<128x128xf32>
    %187 = arith.addf %172, %186 : vector<128x128xf32>
    %188 = vector.extract_strided_slice %0 {offsets = [0, 10], sizes = [128, 1], strides = [1, 1]} : vector<128x16xf32> to vector<128x1xf32>
    %189 = vector.extract_strided_slice %1 {offsets = [10, 0], sizes = [1, 128], strides = [1, 1]} : vector<16x128xf32> to vector<1x128xf32>
    %190 = vector.broadcast %188 : vector<128x1xf32> to vector<128x128xf32>
    %191 = vector.broadcast %189 : vector<1x128xf32> to vector<128x128xf32>
    %192 = arith.addf %190, %191 : vector<128x128xf32>
    %c10 = arith.constant 10 : index
    %193 = memref.load %arg11[%c10] : memref<16xf32, #tpu.memory_space<smem>>
    %194 = vector.broadcast %193 : f32 to vector<128x128xf32>
    %195 = arith.mulf %5, %194 : vector<128x128xf32>
    %196 = arith.addf %192, %195 : vector<128x128xf32>
    %c10_38 = arith.constant 10 : index
    %197 = memref.load %arg12[%c10_38] : memref<16xf32, #tpu.memory_space<smem>>
    %cst_39 = arith.constant 0.000000e+00 : f32
    %198 = vector.broadcast %cst_39 : f32 to vector<128x128xf32>
    %199 = arith.maximumf %196, %198 : vector<128x128xf32>
    %200 = vector.broadcast %197 : f32 to vector<128x128xf32>
    %201 = arith.mulf %200, %199 : vector<128x128xf32>
    %202 = arith.addf %187, %201 : vector<128x128xf32>
    %203 = vector.extract_strided_slice %0 {offsets = [0, 11], sizes = [128, 1], strides = [1, 1]} : vector<128x16xf32> to vector<128x1xf32>
    %204 = vector.extract_strided_slice %1 {offsets = [11, 0], sizes = [1, 128], strides = [1, 1]} : vector<16x128xf32> to vector<1x128xf32>
    %205 = vector.broadcast %203 : vector<128x1xf32> to vector<128x128xf32>
    %206 = vector.broadcast %204 : vector<1x128xf32> to vector<128x128xf32>
    %207 = arith.addf %205, %206 : vector<128x128xf32>
    %c11 = arith.constant 11 : index
    %208 = memref.load %arg11[%c11] : memref<16xf32, #tpu.memory_space<smem>>
    %209 = vector.broadcast %208 : f32 to vector<128x128xf32>
    %210 = arith.mulf %5, %209 : vector<128x128xf32>
    %211 = arith.addf %207, %210 : vector<128x128xf32>
    %c11_40 = arith.constant 11 : index
    %212 = memref.load %arg12[%c11_40] : memref<16xf32, #tpu.memory_space<smem>>
    %cst_41 = arith.constant 0.000000e+00 : f32
    %213 = vector.broadcast %cst_41 : f32 to vector<128x128xf32>
    %214 = arith.maximumf %211, %213 : vector<128x128xf32>
    %215 = vector.broadcast %212 : f32 to vector<128x128xf32>
    %216 = arith.mulf %215, %214 : vector<128x128xf32>
    %217 = arith.addf %202, %216 : vector<128x128xf32>
    %218 = vector.extract_strided_slice %0 {offsets = [0, 12], sizes = [128, 1], strides = [1, 1]} : vector<128x16xf32> to vector<128x1xf32>
    %219 = vector.extract_strided_slice %1 {offsets = [12, 0], sizes = [1, 128], strides = [1, 1]} : vector<16x128xf32> to vector<1x128xf32>
    %220 = vector.broadcast %218 : vector<128x1xf32> to vector<128x128xf32>
    %221 = vector.broadcast %219 : vector<1x128xf32> to vector<128x128xf32>
    %222 = arith.addf %220, %221 : vector<128x128xf32>
    %c12 = arith.constant 12 : index
    %223 = memref.load %arg11[%c12] : memref<16xf32, #tpu.memory_space<smem>>
    %224 = vector.broadcast %223 : f32 to vector<128x128xf32>
    %225 = arith.mulf %5, %224 : vector<128x128xf32>
    %226 = arith.addf %222, %225 : vector<128x128xf32>
    %c12_42 = arith.constant 12 : index
    %227 = memref.load %arg12[%c12_42] : memref<16xf32, #tpu.memory_space<smem>>
    %cst_43 = arith.constant 0.000000e+00 : f32
    %228 = vector.broadcast %cst_43 : f32 to vector<128x128xf32>
    %229 = arith.maximumf %226, %228 : vector<128x128xf32>
    %230 = vector.broadcast %227 : f32 to vector<128x128xf32>
    %231 = arith.mulf %230, %229 : vector<128x128xf32>
    %232 = arith.addf %217, %231 : vector<128x128xf32>
    %233 = vector.extract_strided_slice %0 {offsets = [0, 13], sizes = [128, 1], strides = [1, 1]} : vector<128x16xf32> to vector<128x1xf32>
    %234 = vector.extract_strided_slice %1 {offsets = [13, 0], sizes = [1, 128], strides = [1, 1]} : vector<16x128xf32> to vector<1x128xf32>
    %235 = vector.broadcast %233 : vector<128x1xf32> to vector<128x128xf32>
    %236 = vector.broadcast %234 : vector<1x128xf32> to vector<128x128xf32>
    %237 = arith.addf %235, %236 : vector<128x128xf32>
    %c13 = arith.constant 13 : index
    %238 = memref.load %arg11[%c13] : memref<16xf32, #tpu.memory_space<smem>>
    %239 = vector.broadcast %238 : f32 to vector<128x128xf32>
    %240 = arith.mulf %5, %239 : vector<128x128xf32>
    %241 = arith.addf %237, %240 : vector<128x128xf32>
    %c13_44 = arith.constant 13 : index
    %242 = memref.load %arg12[%c13_44] : memref<16xf32, #tpu.memory_space<smem>>
    %cst_45 = arith.constant 0.000000e+00 : f32
    %243 = vector.broadcast %cst_45 : f32 to vector<128x128xf32>
    %244 = arith.maximumf %241, %243 : vector<128x128xf32>
    %245 = vector.broadcast %242 : f32 to vector<128x128xf32>
    %246 = arith.mulf %245, %244 : vector<128x128xf32>
    %247 = arith.addf %232, %246 : vector<128x128xf32>
    %248 = vector.extract_strided_slice %0 {offsets = [0, 14], sizes = [128, 1], strides = [1, 1]} : vector<128x16xf32> to vector<128x1xf32>
    %249 = vector.extract_strided_slice %1 {offsets = [14, 0], sizes = [1, 128], strides = [1, 1]} : vector<16x128xf32> to vector<1x128xf32>
    %250 = vector.broadcast %248 : vector<128x1xf32> to vector<128x128xf32>
    %251 = vector.broadcast %249 : vector<1x128xf32> to vector<128x128xf32>
    %252 = arith.addf %250, %251 : vector<128x128xf32>
    %c14 = arith.constant 14 : index
    %253 = memref.load %arg11[%c14] : memref<16xf32, #tpu.memory_space<smem>>
    %254 = vector.broadcast %253 : f32 to vector<128x128xf32>
    %255 = arith.mulf %5, %254 : vector<128x128xf32>
    %256 = arith.addf %252, %255 : vector<128x128xf32>
    %c14_46 = arith.constant 14 : index
    %257 = memref.load %arg12[%c14_46] : memref<16xf32, #tpu.memory_space<smem>>
    %cst_47 = arith.constant 0.000000e+00 : f32
    %258 = vector.broadcast %cst_47 : f32 to vector<128x128xf32>
    %259 = arith.maximumf %256, %258 : vector<128x128xf32>
    %260 = vector.broadcast %257 : f32 to vector<128x128xf32>
    %261 = arith.mulf %260, %259 : vector<128x128xf32>
    %262 = arith.addf %247, %261 : vector<128x128xf32>
    %263 = vector.extract_strided_slice %0 {offsets = [0, 15], sizes = [128, 1], strides = [1, 1]} : vector<128x16xf32> to vector<128x1xf32>
    %264 = vector.extract_strided_slice %1 {offsets = [15, 0], sizes = [1, 128], strides = [1, 1]} : vector<16x128xf32> to vector<1x128xf32>
    %265 = vector.broadcast %263 : vector<128x1xf32> to vector<128x128xf32>
    %266 = vector.broadcast %264 : vector<1x128xf32> to vector<128x128xf32>
    %267 = arith.addf %265, %266 : vector<128x128xf32>
    %c15 = arith.constant 15 : index
    %268 = memref.load %arg11[%c15] : memref<16xf32, #tpu.memory_space<smem>>
    %269 = vector.broadcast %268 : f32 to vector<128x128xf32>
    %270 = arith.mulf %5, %269 : vector<128x128xf32>
    %271 = arith.addf %267, %270 : vector<128x128xf32>
    %c15_48 = arith.constant 15 : index
    %272 = memref.load %arg12[%c15_48] : memref<16xf32, #tpu.memory_space<smem>>
    %cst_49 = arith.constant 0.000000e+00 : f32
    %273 = vector.broadcast %cst_49 : f32 to vector<128x128xf32>
    %274 = arith.maximumf %271, %273 : vector<128x128xf32>
    %275 = vector.broadcast %272 : f32 to vector<128x128xf32>
    %276 = arith.mulf %275, %274 : vector<128x128xf32>
    %277 = arith.addf %262, %276 : vector<128x128xf32>
    %cst_50 = arith.constant dense<0xFF800000> : vector<128xf32>
    %278 = vector.multi_reduction <maximumf>, %277, %cst_50 [1] : vector<128x128xf32> to vector<128xf32>
    %279 = vector.shape_cast %278 : vector<128xf32> to vector<128x1xf32>
    %280 = vector.broadcast %279 : vector<128x1xf32> to vector<128x128xf32>
    %281 = arith.subf %277, %280 : vector<128x128xf32>
    %282 = math.exp %281 : vector<128x128xf32>
    %cst_51 = arith.constant dense<0.000000e+00> : vector<128xf32>
    %283 = vector.multi_reduction <add>, %282, %cst_51 [1] : vector<128x128xf32> to vector<128xf32>
    %284 = vector.shape_cast %283 : vector<128xf32> to vector<128x1xf32>
    %285 = vector.extract_strided_slice %2 {offsets = [0, 8], sizes = [128, 8], strides = [1, 1]} : vector<128x16xf32> to vector<128x8xf32>
    %cst_52 = arith.constant dense<0.000000e+00> : vector<128x8xf32>
    %286 = tpu.matmul %282, %285, %cst_52 {dimension_numbers = #tpu.dot_dimension_numbers<[1], [0], [0], [1], [0, 0, 1, 1], [], []>, precision = #tpu.contract_precision<fp32>} : vector<128x128xf32>, vector<128x8xf32>, vector<128x8xf32> -> vector<128x8xf32>
    %287 = vector.broadcast %284 : vector<128x1xf32> to vector<128x8xf32>
    %288 = arith.divf %286, %287 : vector<128x8xf32>
    %289 = tpu.concatenate %147, %288 in 1 : vector<128x8xf32>, vector<128x8xf32> -> vector<128x16xf32>
    %c0_53 = arith.constant 0 : index
    %c0_54 = arith.constant 0 : index
    %290 = vector.load %arg8[%c0_53, %c0_54] : memref<1x16xf32, #tpu.memory_space<vmem>>, vector<1x16xf32>
    %291 = vector.broadcast %290 : vector<1x16xf32> to vector<128x16xf32>
    %292 = arith.addf %289, %291 : vector<128x16xf32>
    %cst_55 = arith.constant 0.000000e+00 : f32
    %293 = vector.broadcast %cst_55 : f32 to vector<128x16xf32>
    %294 = arith.cmpf ogt, %292, %293 : vector<128x16xf32>
    %295 = math.exp %292 : vector<128x16xf32>
    %cst_56 = arith.constant 1.000000e+00 : f32
    %296 = vector.broadcast %cst_56 : f32 to vector<128x16xf32>
    %297 = arith.subf %295, %296 : vector<128x16xf32>
    %298 = arith.select %294, %292, %297 : vector<128x16xi1>, vector<128x16xf32>
    %cst_57 = arith.constant dense<0.000000e+00> : vector<128xf32>
    %299 = vector.multi_reduction <add>, %298, %cst_57 [1] : vector<128x16xf32> to vector<128xf32>
    %300 = vector.shape_cast %299 : vector<128xf32> to vector<128x1xf32>
    %cst_58 = arith.constant 1.600000e+01 : f32
    %301 = vector.broadcast %cst_58 : f32 to vector<128x1xf32>
    %302 = arith.divf %300, %301 : vector<128x1xf32>
    %303 = vector.broadcast %302 : vector<128x1xf32> to vector<128x16xf32>
    %304 = arith.subf %298, %303 : vector<128x16xf32>
    %305 = arith.mulf %304, %304 : vector<128x16xf32>
    %cst_59 = arith.constant dense<0.000000e+00> : vector<128xf32>
    %306 = vector.multi_reduction <add>, %305, %cst_59 [1] : vector<128x16xf32> to vector<128xf32>
    %307 = vector.shape_cast %306 : vector<128xf32> to vector<128x1xf32>
    %cst_60 = arith.constant 1.600000e+01 : f32
    %308 = vector.broadcast %cst_60 : f32 to vector<128x1xf32>
    %309 = arith.divf %307, %308 : vector<128x1xf32>
    %310 = vector.broadcast %302 : vector<128x1xf32> to vector<128x16xf32>
    %311 = arith.subf %298, %310 : vector<128x16xf32>
    %cst_61 = arith.constant 9.99999974E-6 : f32
    %312 = vector.broadcast %cst_61 : f32 to vector<128x1xf32>
    %313 = arith.addf %309, %312 : vector<128x1xf32>
    %314 = math.rsqrt %313 : vector<128x1xf32>
    %315 = vector.broadcast %314 : vector<128x1xf32> to vector<128x16xf32>
    %316 = arith.mulf %311, %315 : vector<128x16xf32>
    %c0_62 = arith.constant 0 : index
    %c0_63 = arith.constant 0 : index
    %317 = vector.load %arg9[%c0_62, %c0_63] : memref<1x16xf32, #tpu.memory_space<vmem>>, vector<1x16xf32>
    %318 = vector.broadcast %317 : vector<1x16xf32> to vector<128x16xf32>
    %319 = arith.mulf %316, %318 : vector<128x16xf32>
    %c0_64 = arith.constant 0 : index
    %c0_65 = arith.constant 0 : index
    %320 = vector.load %arg10[%c0_64, %c0_65] : memref<1x16xf32, #tpu.memory_space<vmem>>, vector<1x16xf32>
    %321 = vector.broadcast %320 : vector<1x16xf32> to vector<128x16xf32>
    %322 = arith.addf %319, %321 : vector<128x16xf32>
    %c0_66 = arith.constant 0 : index
    %c0_67 = arith.constant 0 : index
    %323 = vector.load %arg14[%c0_66, %c0_67] : memref<128x16xf32, #tpu.memory_space<vmem>>, vector<128x16xf32>
    tpu.vector_store %arg14[%c0_66, %c0_67], %322 {strides = array<i32>} : memref<128x16xf32, #tpu.memory_space<vmem>>, vector<128x16xf32>,
    return
  }
  func.func @transform_0(%arg0: i32) -> (i32, i32) {
    %c0_i32 = arith.constant 0 : i32
    %c0_i32_0 = arith.constant 0 : i32
    return %arg0, %c0_i32 : i32, i32
  }
  func.func @transform_1(%arg0: i32) -> (i32, i32) {
    %c0_i32 = arith.constant 0 : i32
    %c0_i32_0 = arith.constant 0 : i32
    return %c0_i32, %arg0 : i32, i32
  }
  func.func @transform_2(%arg0: i32) -> (i32, i32) {
    %c0_i32 = arith.constant 0 : i32
    %c0_i32_0 = arith.constant 0 : i32
    return %arg0, %c0_i32 : i32, i32
  }
  func.func @transform_3(%arg0: i32) -> (i32, i32) {
    %c0_i32 = arith.constant 0 : i32
    %c0_i32_0 = arith.constant 0 : i32
    return %arg0, %c0_i32 : i32, i32
  }
  func.func @transform_4(%arg0: i32) -> (i32, i32) {
    %c0_i32 = arith.constant 0 : i32
    %c0_i32_0 = arith.constant 0 : i32
    return %c0_i32, %arg0 : i32, i32
  }
  func.func @transform_5(%arg0: i32) -> (i32, i32) {
    %c0_i32 = arith.constant 0 : i32
    return %arg0, %arg0 : i32, i32
  }
  func.func @transform_6(%arg0: i32) -> (i32, i32) {
    %c0_i32 = arith.constant 0 : i32
    return %arg0, %arg0 : i32, i32
  }
  func.func @transform_7(%arg0: i32) -> (i32, i32) {
    %c0_i32 = arith.constant 0 : i32
    %c0_i32_0 = arith.constant 0 : i32
    %c0_i32_1 = arith.constant 0 : i32
    return %c0_i32, %c0_i32_0 : i32, i32
  }
  func.func @transform_8(%arg0: i32) -> (i32, i32) {
    %c0_i32 = arith.constant 0 : i32
    %c0_i32_0 = arith.constant 0 : i32
    %c0_i32_1 = arith.constant 0 : i32
    return %c0_i32, %c0_i32_0 : i32, i32
  }
  func.func @transform_9(%arg0: i32) -> (i32, i32) {
    %c0_i32 = arith.constant 0 : i32
    %c0_i32_0 = arith.constant 0 : i32
    %c0_i32_1 = arith.constant 0 : i32
    return %c0_i32, %c0_i32_0 : i32, i32
  }
  func.func @transform_10(%arg0: i32) -> i32 {
    %c0_i32 = arith.constant 0 : i32
    %c0_i32_0 = arith.constant 0 : i32
    return %c0_i32 : i32
  }
  func.func @transform_11(%arg0: i32) -> i32 {
    %c0_i32 = arith.constant 0 : i32
    %c0_i32_0 = arith.constant 0 : i32
    return %c0_i32 : i32
  }
  func.func @transform_12(%arg0: i32) -> i32 {
    %c0_i32 = arith.constant 0 : i32
    %c0_i32_0 = arith.constant 0 : i32
    return %c0_i32 : i32
  }
  func.func @transform_13(%arg0: i32) -> (i32, i32) {
    %c0_i32 = arith.constant 0 : i32
    %c0_i32_0 = arith.constant 0 : i32
    return %arg0, %c0_i32 : i32, i32
  }
}

</mosaic_0001>

<bundles_post_ra>
// kernel: tpu_custom_call.1
= control target key start
LH: loop header
LB: loop body
LE: loop exit
PB: predicated region body
PF: predicated region fallthrough
CT: control target
= control target key end

     0   :  { %s15059_s0 = inlined_call_operand.vmem [shape: f32[256,16], index: 0, kind: input, shape index: {}]   ;;  %s15060_s1 = inlined_call_operand.vmem [shape: f32[16,256], index: 1, kind: input, shape index: {}]   ;;  %s15061_s2 = inlined_call_operand.vmem [shape: f32[256,16], index: 2, kind: input, shape index: {}]   ;;  %s15062_s3 = inlined_call_operand.vmem [shape: f32[256,2], index: 3, kind: input, shape index: {}]   ;;  %s15063_s4 = inlined_call_operand.vmem [shape: f32[2,256], index: 4, kind: input, shape index: {}]   ;;  %s15064_s5 = inlined_call_operand.vmem [shape: f32[256,256], index: 5, kind: input, shape index: {}]   ;;  %s15065_s6 = inlined_call_operand.hbm [shape: f32[256,256], index: 6, kind: input, shape index: {}]   ;;  %s15066_s7 = inlined_call_operand.vmem [shape: f32[1,16], index: 7, kind: input, shape index: {}]   ;;  %s15067_s8 = inlined_call_operand.vmem [shape: f32[1,16], index: 8, kind: input, shape index: {}]   ;;  %s15068_s9 = inlined_call_operand.vmem [shape: f32[1,16], index: 9, kind: input, shape index: {}]   ;;  %s15069_s10 = inlined_call_operand.vmem [shape: f32[16], index: 10, kind: input, shape index: {}]   ;;  %s15070_s11 = inlined_call_operand.vmem [shape: f32[16], index: 11, kind: input, shape index: {}]   ;;  %s15071_s12 = inlined_call_operand.vmem [shape: f32[2], index: 12, kind: input, shape index: {}]   ;;  %s15072_s13 = inlined_call_operand.vmem [shape: f32[256,16], index: 13, kind: output, shape index: {}]  }
   0x1   :  { %15244 = sst [smem:[#allocation138_spill]] %s15060_s1 }
   0x2   :  { %15245 = sst [smem:[#allocation139_spill]] %s15068_s9 }
   0x3   :  { %15246 = sst [smem:[#allocation140_spill]] %s15069_s10 }
   0x4   :  { %15247 = sst [smem:[#allocation141_spill]] %s15070_s11 }
   0x5   :  { %15248 = sst [smem:[#allocation142_spill]] %s15072_s13 }
   0x6   :  { %18 = vsyncpa [#allocation5], 0 }
   0x7   :  { %20 = vsyncpa [#allocation5 + $0x1], 0 }
   0x8   :  { %21 = vsyncpa [#allocation6], 0 }
   0x9   :  { %22 = vsyncpa [#allocation9], 0  ;;  %s9306_s25 = smov 0   ;;  %s9308_s26 = smov 0  }
   0xa   :  { %s9310_s27 = smov 0   ;;  %s9312_s28 = smov 0  }
   0xb   :  { %s9314_s29 = smov 0   ;;  %s9316_s30 = smov 0  }
   0xc LB: > { %s9335_s14 = sadd.s32 4294967295, %s9209_s30   ;;  %s9338_s15 = sadd.s32 1, %s9209_s30   ;;  %s9209_s30 = sphi %s9316_s30, %s16201_s30   ;;  %s9205_s29 = sphi %s9314_s29, %s16208_s29   ;;  %s9201_s28 = sphi %s9312_s28, %s16207_s28   ;;  %s9197_s27 = sphi %s9310_s27, %s16206_s27   ;;  %s9193_s26 = sphi %s9308_s26, %s16205_s26   ;;  %s9189_s25 = sphi %s9306_s25, %s16204_s25  }
   0xd   : > { %15249 = sst [smem:[#allocation14_spill]] %s9338_s15  ;;  %s58_s16 = ssub.s32 %s9209_s30, %s9338_s15 }
   0xe   : > { %s61_s17 = sadd.s32 1, %s9205_s29  ;;  %p59_p0 = scmp.eq.s32.totalorder %s58_s16, 0 }
   0xf   : > { %p68_p1 = scmp.ne.s32.totalorder %s9205_s29, %s9201_s28  ;;  %p69_p2 = scmp.eq.s32.totalorder %s9209_s30, 0 }
  0x10   : > { %s164_s18 = sor.u32 %s58_s16, %s58_s16  ;;  %s167_s21 = sadd.s32 1, %s9197_s27 }
  0x11   : > { %s9347_s19 = scalar_select %p59_p0, %s9205_s29, %s61_s17  }
  0x12   : > { %p9349_p3 = por %p69_p2, %p68_p1  ;;  %p165_p4 = scmp.eq.s32.totalorder %s164_s18, 0 }
  0x13   : > { %15250 = sst [smem:[#allocation15_spill]] %s9347_s19  ;;  %p174_p5 = scmp.ne.s32.totalorder %s9197_s27, %s9193_s26 }
  0x14   : > { %s15251_s20 = scalar_select %p9349_p3, 1, 0 }
  0x15   : > { %s9357_s22 = scalar_select %p165_p4, %s9197_s27, %s167_s21  }
  0x16   : > { %p9359_p6 = por %p174_p5, %p69_p2  ;;  %p208_p7 = scmp.ne.s32.totalorder %s9193_s26, %s9189_s25 }
  0x17   : > { %15252 = sst [smem:[#allocation16_spill]] %s9357_s22  ;;  %p15075_p8 = scmp.eq.s32.totalorder %s9335_s14, 0 }
  0x18   : > { %s15253_s23 = scalar_select %p9359_p6, 1, 0 }
  0x19   : > { %p7408_p9 = scmp.ge.s32.totalorder %s9209_s30, 1  ;;  %p371_p10 = scmp.lt.s32.totalorder %s9209_s30, 3 }
  0x1a   : > { %p9369_p11 = por %p15075_p8, %p208_p7  ;;  %s15255_s11 = sld [smem:[#allocation141_spill]] }
  0x1b   : > { %p9376_p12 = pnand %p7408_p9, %p371_p10  ;;  %s15257_s10 = sld [smem:[#allocation140_spill]] }
  0x1c   : > { %s15254_s24 = scalar_select %p9369_p11, 1, 0 }
  0x1d   : > { %s15256_s21 = scalar_select %p9376_p12, 1, 0 }
  0x1e   : > { %p8563_p13 = pneg %p9376_p12  ;;  %s415_s9 = sshll.u32 %s15071_s12, 4  ;;  %s9394_s9 = int_to_ptr.vmem [resolvable:$true] %s415_s9 }
  0x20   : > { %s404_s18 = sshll.u32 %s15255_s11, 4  ;;  %p9390_p0 = pnand %p8563_p13, %p15075_p8  ;;  %s405_s18 = int_to_ptr.vmem [resolvable:$true] %s404_s18 }
  0x21   : > { %s393_s25 = sshll.u32 %s15257_s10, 4  ;;  %s9080_s19 = scalar_lea.vmem %s405_s18, 16  ;;  %s394_s25 = int_to_ptr.vmem [resolvable:$true] %s393_s25 }
  0x22   : > { %p9081_p1 = scmp.ne.s32.totalorder %s405_s18, %s9080_s19  ;;  %p9082_p2 = pneg %p9390_p0 }
  0x23   : > { %p9088_p7 = scmp.lt.s32.totalorder %s405_s18, %s405_s18  ;;  %p9089_p9 = scmp.lt.s32.totalorder %s9080_s19, %s9080_s19 }
  0x24   : > { %p9083_p4 = pnand %p9082_p2, %p9081_p1 }
  0x25   : > { %p9090_p10 = por %p9089_p9, %p9088_p7 }
  0x26   : > { %p9084_p5 = pneg %p9083_p4 }
  0x28   : > { %p9091_p13 = pnand %p9090_p10, %p9084_p5 }
  0x2a   : > { %9094 = shalt.err (!%p9091_p13)
}
  0x2b   : > { %s9211_s13 = smov [#allocation8]   ;;  %s9095_s15 = scalar_lea.vmem %s394_s25, 16 }
  0x2c   : > { %8569 = dma.vmem_to_smem (!%p9390_p0), %s405_s18, 16, %s9211_s13, [#allocation9]  }
  0x2d   : > { %p9096_p8 = scmp.ne.s32.totalorder %s394_s25, %s9095_s15  ;;  %p9103_p6 = scmp.lt.s32.totalorder %s394_s25, %s394_s25 }
  0x2e   : > { %p9104_p3 = scmp.lt.s32.totalorder %s9095_s15, %s9095_s15 }
  0x2f   : > { %p9098_p11 = pnand %p9096_p8, %p9082_p2 }
  0x30   : > { %p9105_p1 = por %p9104_p3, %p9103_p6 }
  0x31   : > { %p9099_p12 = pneg %p9098_p11 }
  0x33   : > { %p9106_p4 = pnand %p9105_p1, %p9099_p12 }
  0x35   : > { %9109 = shalt.err (!%p9106_p4)
}
  0x36   : > { %s9212_s22 = smov [#allocation7]   ;;  %s9110_s17 = scalar_lea.vmem %s9394_s9, 16 }
  0x37   : > { %8566 = dma.vmem_to_smem (!%p9390_p0), %s394_s25, 16, %s9212_s22, [#allocation6]  }
  0x38   : > { %p9111_p5 = scmp.ne.s32.totalorder %s9394_s9, %s9110_s17  ;;  %p9118_p11 = scmp.lt.s32.totalorder %s9394_s9, %s9394_s9 }
  0x39   : > { %p9119_p9 = scmp.lt.s32.totalorder %s9110_s17, %s9110_s17 }
  0x3a   : > { %p9113_p7 = pnand %p9111_p5, %p9082_p2 }
  0x3b   : > { %p9120_p3 = por %p9119_p9, %p9118_p11 }
  0x3c   : > { %p9114_p8 = pneg %p9113_p7 }
  0x3e   : > { %p9121_p6 = pnand %p9120_p3, %p9114_p8 }
  0x40   : > { %9124 = shalt.err (!%p9121_p6)
}
  0x41   : > { %s9213_s18 = smov [#allocation10]   ;;  %p7412_p12 = scmp.ge.s32.totalorder %s9209_s30, 2 }
  0x42   : > { %8572 = dma.vmem_to_smem (!%p9390_p0), %s9394_s9, 16, %s9213_s18, [#allocation9]  }
  0x43   : > { %422 = sbr.rel (%p7412_p12) target bundleno = 125 (0x7d), region = 40  ;;  %p15259_p10 = scmp.ne.s32.totalorder (!%p7412_p12), %s15251_s20, 0 }
  0x48   : > { %434 = sbr.rel (!%p15259_p10) target bundleno = 83 (0x53), region = 48  ;;  %s436_s25 = sand.u32 (%p15259_p10), 1, %s9205_s29  }
  0x49   : > { %s7414_s19 = sshll.u32 (%p15259_p10), %s9209_s30, 3  ;;  %s7413_s13 = sshll.u32 (%p15259_p10), %s436_s25, 4 }
  0x4a   : > { %s15260_s1 = sld [smem:[#allocation138_spill]] (%p15259_p10)  ;;  %s438_s16 = scalar_lea.vmem (%p15259_p10), [#allocation2], %s7413_s13 }
  0x50   : > { %s440_s17 = scalar_lea.vmem %s15260_s1, %s7414_s19 }
  0x51   : > { %v471_v0 = vld [vmem:[%s440_s17] sm:$0xff]  ;;  %v473_v1 = vld [vmem:[%s440_s17 + $0x10] sm:$0xff] }
  0x52   : > { %472 = vst [vmem:[%s438_s16] sm:$0xff] %v471_v0  ;;  %474 = vst [vmem:[%s438_s16 + $0x8] sm:$0xff] %v473_v1 }
  0x53 PF: > { %p15261_p0 = scmp.ne.s32.totalorder %s15253_s23, 0 }
  0x54   : > { %s507_s9 = sand.u32 (%p15261_p0), 1, %s9197_s27   ;;  %s7491_s20 = sshll.u32 (%p15261_p0), %s9209_s30, 5 }
  0x55   : > { %505 = sbr.rel (!%p15261_p0) target bundleno = 98 (0x62), region = 98  ;;  %s7415_s18 = sshll.u32 (%p15261_p0), %s507_s9, 7 }
  0x56   : > { %s512_s25 = sadd.s32 (%p15261_p0), %s9209_s30, %s7491_s20  ;;  %s509_s13 = scalar_lea.vmem (%p15261_p0), [#allocation3], %s7415_s18 }
  0x57   : > { %s7418_s10 = sshll.u32 (%p15261_p0), %s512_s25, 3 }
  0x58   : > { %s9434_s19 = scalar_lea.vmem (%p15261_p0), %s15064_s5, %s7418_s10 }
  0x59   : > { %v573_v2 = vld [vmem:[%s9434_s19] sm:$0xff] (%p15261_p0)  ;;  %v575_v3 = vld [vmem:[%s9434_s19 + $0x10] sm:$0xff] (%p15261_p0) }
  0x5a   : > { %v577_v4 = vld [vmem:[%s9434_s19 + $0x20] sm:$0xff]  ;;  %574 = vst [vmem:[%s509_s13] sm:$0xff] %v573_v2  ;;  %576 = vst [vmem:[%s509_s13 + $0x8] sm:$0xff] %v575_v3  ;;  %v579_v5 = vld [vmem:[%s9434_s19 + $0x30] sm:$0xff] }
  0x5b   : > { %578 = vst [vmem:[%s509_s13 + $0x10] sm:$0xff] %v577_v4  ;;  %v581_v6 = vld [vmem:[%s9434_s19 + $0x40] sm:$0xff]  ;;  %v583_v7 = vld [vmem:[%s9434_s19 + $0x50] sm:$0xff]  ;;  %580 = vst [vmem:[%s509_s13 + $0x18] sm:$0xff] %v579_v5 }
  0x5c   : > { %582 = vst [vmem:[%s509_s13 + $0x20] sm:$0xff] %v581_v6  ;;  %584 = vst [vmem:[%s509_s13 + $0x28] sm:$0xff] %v583_v7  ;;  %v585_v8 = vld [vmem:[%s9434_s19 + $0x60] sm:$0xff]  ;;  %v587_v9 = vld [vmem:[%s9434_s19 + $0x70] sm:$0xff] }
  0x5d   : > { %v589_v10 = vld [vmem:[%s9434_s19 + $0x80] sm:$0xff]  ;;  %586 = vst [vmem:[%s509_s13 + $0x30] sm:$0xff] %v585_v8  ;;  %588 = vst [vmem:[%s509_s13 + $0x38] sm:$0xff] %v587_v9  ;;  %v591_v11 = vld [vmem:[%s9434_s19 + $0x90] sm:$0xff] }
  0x5e   : > { %590 = vst [vmem:[%s509_s13 + $0x40] sm:$0xff] %v589_v10  ;;  %v593_v12 = vld [vmem:[%s9434_s19 + $0xa0] sm:$0xff]  ;;  %v595_v13 = vld [vmem:[%s9434_s19 + $0xb0] sm:$0xff]  ;;  %592 = vst [vmem:[%s509_s13 + $0x48] sm:$0xff] %v591_v11 }
  0x5f   : > { %594 = vst [vmem:[%s509_s13 + $0x50] sm:$0xff] %v593_v12  ;;  %596 = vst [vmem:[%s509_s13 + $0x58] sm:$0xff] %v595_v13  ;;  %v597_v14 = vld [vmem:[%s9434_s19 + $0xc0] sm:$0xff]  ;;  %v599_v15 = vld [vmem:[%s9434_s19 + $0xd0] sm:$0xff] }
  0x60   : > { %v601_v16 = vld [vmem:[%s9434_s19 + $0xe0] sm:$0xff]  ;;  %598 = vst [vmem:[%s509_s13 + $0x60] sm:$0xff] %v597_v14  ;;  %600 = vst [vmem:[%s509_s13 + $0x68] sm:$0xff] %v599_v15  ;;  %v603_v17 = vld [vmem:[%s9434_s19 + $0xf0] sm:$0xff] }
  0x61   : > { %602 = vst [vmem:[%s509_s13 + $0x70] sm:$0xff] %v601_v16  ;;  %604 = vst [vmem:[%s509_s13 + $0x78] sm:$0xff] %v603_v17 }
  0x62 PF: > { %s611_s10 = sand.u32 1, %s9197_s27   ;;  %s7492_s11 = sshll.u32 %s9209_s30, 5 }
  0x63   : > { %s7419_s22 = sshll.u32 %s611_s10, 7  ;;  %s621_s17 = sadd.s32 %s9209_s30, %s7492_s11 }
  0x64   : > { %s7422_s16 = sshll.u32 %s621_s17, 7  ;;  %s615_s9 = scalar_lea.vmem [#allocation4], %s7419_s22 }
  0x65   : > { %s624_s20 = sshll.u32 %s615_s9, 4  ;;  %s9458_s15 = scalar_lea.hbm %s15065_s6, %s7422_s16  ;;  %s9460_s20 = int_to_ptr.vmem [resolvable:$true] %s624_s20 }
  0x66   : > { %s9462_s19 = scalar_lea.sflag [#allocation5], %s611_s10  ;;  %s9125_s13 = scalar_lea.hbm %s9458_s15, 2048 }
  0x67   : > { %p9126_p2 = scmp.ne.s32.totalorder %s9458_s15, %s9125_s13  ;;  %p15262_p13 = scmp.ne.s32.totalorder %s15253_s23, 0 }
  0x68   : > { %s9129_s22 = scalar_lea.hbm %s15065_s6, 8192  ;;  %p9130_p5 = scmp.lt.s32.totalorder %s9458_s15, %s15065_s6 }
  0x69   : > { %p9127_p1 = pnand %p9126_p2, %p15262_p13  ;;  %p9131_p7 = scmp.lt.s32.totalorder %s9129_s22, %s9125_s13 }
  0x6b   : > { %p9128_p4 = pneg %p9127_p1  ;;  %p9132_p8 = por %p9131_p7, %p9130_p5 }
  0x6d   : > { %p9133_p11 = pnand %p9132_p8, %p9128_p4 }
  0x6f   : > { %9136 = shalt.err (!%p9133_p11)
}
  0x70   : > { %s9137_s10 = scalar_lea.vmem %s9460_s20, 2048  ;;  %s9214_s16 = smov [#allocation4]  }
  0x71   : > { %p9138_p9 = scmp.ne.s32.totalorder %s9460_s20, %s9137_s10  ;;  %s9141_s18 = sshll.u32 %s9214_s16, 4  ;;  %s9142_s18 = int_to_ptr.vmem [resolvable:$false] %s9141_s18 }
  0x72   : > { %s9143_s25 = scalar_lea.vmem %s9142_s18, 4096  ;;  %p9144_p12 = scmp.lt.s32.totalorder %s9460_s20, %s9142_s18 }
  0x73   : > { %p9139_p3 = pnand %p9138_p9, %p15262_p13  ;;  %p9145_p10 = scmp.lt.s32.totalorder %s9143_s25, %s9137_s10 }
  0x75   : > { %p9140_p6 = pneg %p9139_p3  ;;  %p9146_p0 = por %p9145_p10, %p9144_p12 }
  0x77   : > { %p9147_p2 = pnand %p9146_p0, %p9140_p6 }
  0x79   : > { %9150 = shalt.err (!%p9147_p2)
}
  0x7a   : > { %s9215_s13 = smov 256   ;;  %s9216_s30 = smov 128  }
  0x7b   : > { %s9217_s11 = smov 8  }
  0x7c   : > { %8555 = dma.hbm_to_vmem [thread:$0]  (%p15262_p13), %s9458_s15, 2048, %s9460_s20, %s9462_s19, %s9215_s13, %s9216_s30, %s9217_s11  }
  0x7d PF: > { %p15263_p1 = scmp.ne.s32.totalorder %s15256_s21, 0 }
  0x7f   : > { %636 = sbr.rel (%p15263_p1) target bundleno = 2605 (0xa2d), region = 140 }
  0x84   : > { %s639_s22 = sand.u32 1, %s9201_s28   ;;  %s646_s17 = sand.u32 1, %s9193_s26  }
  0x85   : > { %s9489_s9 = sshll.u32 %s639_s22, 4  ;;  %s7425_s10 = sshll.u32 %s646_s17, 7 }
  0x86   : > { %s641_s16 = scalar_lea.vmem [#allocation2], %s9489_s9  ;;  %s9492_s18 = scalar_lea.vmem [#allocation3], %s7425_s10 }
  0x87   : > { %s653_s25 = scalar_lea.sflag [#allocation5], %s646_s17  ;;  %s9494_s1 = scalar_lea.vmem [#allocation4], %s7425_s10 }
  0x88   : > { %p15264_p13 = scmp.ne.s32.totalorder %s15254_s24, 0 }
  0x8a   : > { %9176 = dma.done.wait (%p15264_p13), %s653_s25, 2048  }
  0x8b   : > { %9178 = vsyncadd (%p15264_p13), %s653_s25, 4294965248  ;;  %p15265_p4 = scmp.eq.s32.totalorder %s9335_s14, 0 }
  0x8d   : > { %9180 = dma.done.wait (%p15265_p4), [#allocation6], 16   ;;  %p15266_p5 = pmov %p15265_p4 }
  0x8e   : > { %p15267_p7 = pmov %p15265_p4 }
  0x8f   : > { %9182 = vsyncadd (%p15266_p5), [#allocation6], 4294967280 }
  0x90   : > { %9184 = dma.done.wait (%p15267_p7), [#allocation9], 32   ;;  %p15268_p8 = pmov %p15265_p4 }
  0x92   : > { %9186 = vsyncadd (%p15268_p8), [#allocation9], 4294967264 }
  0x93   : > { %673 = sfence }
  0x94   : > { %s7430_s28 = sshll.u32 %s9335_s14, 4  ;;  %v9218_v18 = vmov 0   ;;  %v15079_v51 = vmov 1   ;;  %v9220_v52 = vmov 2   ;;  %v9221_v53 = vmov 3   ;;  %p757_p9 = scmp.lt.s32.totalorder %s9335_s14, 1 }
  0x95   : > { %8652 = vset.pattern.permute.xlu1 %v9218_v18  ;;  %8651 = vset.pattern.permute.xlu0 %v9218_v18  ;;  %p740_p11 = scmp.lt.s32.totalorder %s7430_s28, 31  ;;  %v9222_v56 = vmov 4   ;;  %v15082_v8 = vmov 5   ;;  %s952_s30 = sld [smem:[#allocation10]]  ;;  %vm6828_vm0 = vcmask 64512   ;;  %vm6948_vm1 = vcmask 130048  }
  0x96   : > { %s16212_s14 = smov (!%p757_p9, %s9335_s14), 1  ;;  %s9790_s25 = sld [smem:[#allocation8]] }
  0x97   : > { %s16210_s28 = smov (!%p740_p11, %s7430_s28), 31  ;;  %s7436_s11 = sshll.u32 %s16212_s14, 1 }
  0x98   : > { %s9509_s23 = sshll.u32 %s16210_s28, 3  ;;  %s9754_s10 = scalar_lea.vmem %s15063_s4, %s7436_s11 }
  0x99   : > { %s9515_s20 = scalar_lea.vmem %s15062_s3, %s9509_s23  ;;  %s9537_s13 = scalar_lea.vmem %s15059_s0, %s9509_s23 }
  0x9a   : > { %v805_v19 = vld [vmem:[%s9515_s20 + $0x10] sm:$0xff]  ;;  %v803_v20 = vld [vmem:[%s9515_s20] sm:$0xff]  ;;  %v806_v21 = vld [vmem:[%s9515_s20 + $0x18] sm:$0xff]  ;;  %s9757_s14 = sld [smem:[#allocation7]] }
  0x9b   : > { %864 = vperm.xlu1 %8652, %v805_v19   ;;  %854 = vperm.xlu0 %8651, %v803_v20   ;;  %v804_v22 = vld [vmem:[%s9515_s20 + $0x8] sm:$0xff]  ;;  %v807_v24 = vld [vmem:[%s9515_s20 + $0x20] sm:$0xff]  ;;  %v810_v25 = vld [vmem:[%s9515_s20 + $0x38] sm:$0xff]  ;;  %s9801_s28 = sld [smem:[#allocation7 + $0x1]] }
  0x9c   : > { %v808_v23 = vld [vmem:[%s9515_s20 + $0x28] sm:$0xff]  ;;  %v809_v26 = vld [vmem:[%s9515_s20 + $0x30] sm:$0xff]  ;;  %v811_v28 = vld [vmem:[%s9515_s20 + $0x40] sm:$0xff]  ;;  %s9823_s24 = sld [smem:[#allocation7 + $0x2]] }
  0x9d   : > { %v812_v27 = vld [vmem:[%s9515_s20 + $0x48] sm:$0xff]  ;;  %v814_v29 = vld [vmem:[%s9515_s20 + $0x58] sm:$0xff]  ;;  %v813_v30 = vld [vmem:[%s9515_s20 + $0x50] sm:$0xff]  ;;  %s9874_s21 = sld [smem:[#allocation8 + $0x1]] }
  0x9e   : > { %v816_v31 = vld [vmem:[%s9515_s20 + $0x68] sm:$0xff]  ;;  %v815_v32 = vld [vmem:[%s9515_s20 + $0x60] sm:$0xff]  ;;  %v818_v33 = vld [vmem:[%s9515_s20 + $0x78] sm:$0xff]  ;;  %s9892_s15 = sld [smem:[#allocation8 + $0x2]] }
  0x9f   : > { %869 = vperm.xlu1 %8652, %v806_v21   ;;  %859 = vperm.xlu0 %8651, %v804_v22   ;;  %v817_v34 = vld [vmem:[%s9515_s20 + $0x70] sm:$0xff]  ;;  %v9540_v35 = vld [vmem:[%s9537_s13 + $0x8] sm:$0xff]  ;;  %v9543_v36 = vld [vmem:[%s9537_s13] sm:$0xff]  ;;  %s9921_s19 = sld [smem:[#allocation7 + $0x3]] }
  0xa0   : > { %v9548_v37 = vld [vmem:[%s9537_s13 + $0x18] sm:$0xff]  ;;  %v9551_v38 = vld [vmem:[%s9537_s13 + $0x10] sm:$0xff]  ;;  %v9556_v39 = vld [vmem:[%s9537_s13 + $0x28] sm:$0xff]  ;;  %s10057_s11 = sld [smem:[#allocation7 + $0x4]] }
  0xa1   : > { %15269 = vst [vmem:[#allocation17_spill] sm:$0xff] %v9551_v38  ;;  %v9559_v40 = vld [vmem:[%s9537_s13 + $0x20] sm:$0xff]  ;;  %v9564_v41 = vld [vmem:[%s9537_s13 + $0x38] sm:$0xff]  ;;  %v9567_v42 = vld [vmem:[%s9537_s13 + $0x30] sm:$0xff]  ;;  %s10121_s22 = sld [smem:[#allocation8 + $0x4]] }
  0xa2   : > { %v9572_v43 = vld [vmem:[%s9537_s13 + $0x48] sm:$0xff]  ;;  %v9575_v44 = vld [vmem:[%s9537_s13 + $0x40] sm:$0xff]  ;;  %v9580_v45 = vld [vmem:[%s9537_s13 + $0x58] sm:$0xff]  ;;  %s10299_s17 = sld [smem:[#allocation7 + $0x5]] }
  0xa3   : > { %879 = vperm.xlu1 %8652, %v808_v23   ;;  %874 = vperm.xlu0 %8651, %v807_v24   ;;  %15270 = vst [vmem:[#allocation18_spill] sm:$0xff] %v9572_v43  ;;  %15271 = vst [vmem:[#allocation19_spill] sm:$0xff] %v9580_v45  ;;  %v9583_v46 = vld [vmem:[%s9537_s13 + $0x50] sm:$0xff]  ;;  %v9588_v47 = vld [vmem:[%s9537_s13 + $0x68] sm:$0xff]  ;;  %s12772_s9 = sld [smem:[#allocation7 + $0xd]] }
  0xa4   : > { %15272 = vst [vmem:[#allocation20_spill] sm:$0xff] %v9588_v47  ;;  %v9591_v48 = vld [vmem:[%s9537_s13 + $0x60] sm:$0xff]  ;;  %v9596_v49 = vld [vmem:[%s9537_s13 + $0x78] sm:$0xff]  ;;  %v9599_v50 = vld [vmem:[%s9537_s13 + $0x70] sm:$0xff] }
  0xa5   : > { %15273 = vst [vmem:[#allocation21_spill] sm:$0xff] %v9596_v49 }
  0xa7   : > { %889 = vperm.xlu1 %8652, %v810_v25   ;;  %884 = vperm.xlu0 %8651, %v809_v26   ;;  %v15081_v26 = vmov 6  }
  0xab   : > { %899 = vperm.xlu1 %8652, %v812_v27   ;;  %894 = vperm.xlu0 %8651, %v811_v28  }
  0xaf   : > { %909 = vperm.xlu1 %8652, %v814_v29   ;;  %904 = vperm.xlu0 %8651, %v813_v30   ;;  %v932_v29 = vlaneseq }
  0xb3   : > { %919 = vperm.xlu1 %8652, %v816_v31   ;;  %914 = vperm.xlu0 %8651, %v815_v32   ;;  %v9749_v32 = vshrl.u32 %v932_v29, 7  ;;  %v953_v29 = vstv %s952_s30  ;;  %s9973_s30 = sld [smem:[#allocation8 + $0x3]] }
  0xb5   : > { %15298 = vst [vmem:[#allocation46_spill] sm:$0xff] %v9749_v32 }
  0xb7   : > { %929 = vperm.xlu1 %8652, %v818_v33   ;;  %924 = vperm.xlu0 %8651, %v817_v34  }
  0xbb   : > { %1009 = vperm.xlu1 %8652, %v9540_v35   ;;  %1004 = vperm.xlu0 %8651, %v9543_v36  }
  0xbf   : > { %1019 = vperm.xlu1 %8652, %v9548_v37   ;;  %1014 = vperm.xlu0 %8651, %v9551_v38  }
  0xc3   : > { %1029 = vperm.xlu1 %8652, %v9556_v39   ;;  %1024 = vperm.xlu0 %8651, %v9559_v40  }
  0xc7   : > { %1039 = vperm.xlu1 %8652, %v9564_v41   ;;  %1034 = vperm.xlu0 %8651, %v9567_v42  }
  0xcb   : > { %1049 = vperm.xlu1 %8652, %v9572_v43   ;;  %1044 = vperm.xlu0 %8651, %v9575_v44  }
  0xcf   : > { %1059 = vperm.xlu1 %8652, %v9580_v45   ;;  %1054 = vperm.xlu0 %8651, %v9583_v46  }
  0xd3   : > { %1069 = vperm.xlu1 %8652, %v9588_v47   ;;  %1064 = vperm.xlu0 %8651, %v9591_v48  }
  0xd7   : > { %1079 = vperm.xlu1 %8652, %v9596_v49   ;;  %1074 = vperm.xlu0 %8651, %v9599_v50  }
  0xdb   : > { %8653 = vset.pattern.permute.xlu1 %v15079_v51  ;;  %8655 = vset.pattern.permute.xlu0 %v9220_v52  ;;  %v9772_v51 = vld [vmem:[%s9494_s1] sm:$0xff] }
  0xdc   : > { %1191 = vperm.xlu1 %8653, %v9540_v35   ;;  %1359 = vperm.xlu0 %8655, %v9540_v35  }
  0xe0   : > { %1195 = vperm.xlu1 %8653, %v9551_v38   ;;  %1371 = vperm.xlu0 %8655, %v9559_v40  }
  0xe4   : > { %1203 = vperm.xlu1 %8653, %v9559_v40   ;;  %1379 = vperm.xlu0 %8655, %v9567_v42  }
  0xe8   : > { %1211 = vperm.xlu1 %8653, %v9567_v42   ;;  %1387 = vperm.xlu0 %8655, %v9575_v44  }
  0xec   : > { %1219 = vperm.xlu1 %8653, %v9575_v44   ;;  %1395 = vperm.xlu0 %8655, %v9583_v46  }
  0xf0   : > { %1227 = vperm.xlu1 %8653, %v9583_v46   ;;  %1403 = vperm.xlu0 %8655, %v9591_v48  }
  0xf4   : > { %1235 = vperm.xlu1 %8653, %v9591_v48   ;;  %1411 = vperm.xlu0 %8655, %v9599_v50  }
  0xf8   : > { %1243 = vperm.xlu1 %8653, %v9599_v50   ;;  %8656 = vset.pattern.permute.xlu0 %v9221_v53 }
  0xf9   : > { %1523 = vperm.xlu0 %8656, %v9543_v36  }
  0xfc   : > { %8654 = vset.pattern.permute.xlu1 %v9220_v52  ;;  %v819_v52 = vld [vmem:[%s9754_s10] sm:$0x3] }
  0xfd   : > { %1355 = vperm.xlu1 %8654, %v9543_v36   ;;  %1535 = vperm.xlu0 %8656, %v9548_v37  }
 0x101   : > { %1363 = vperm.xlu1 %8654, %v9551_v38   ;;  %1543 = vperm.xlu0 %8656, %v9556_v39  }
 0x105   : > { %1367 = vperm.xlu1 %8654, %v9548_v37   ;;  %1551 = vperm.xlu0 %8656, %v9564_v41  }
 0x109   : > { %1375 = vperm.xlu1 %8654, %v9556_v39   ;;  %1559 = vperm.xlu0 %8656, %v9572_v43  }
 0x10d   : > { %1383 = vperm.xlu1 %8654, %v9564_v41   ;;  %1567 = vperm.xlu0 %8656, %v9580_v45  }
 0x111   : > { %1391 = vperm.xlu1 %8654, %v9572_v43   ;;  %1575 = vperm.xlu0 %8656, %v9588_v47  }
 0x115   : > { %1399 = vperm.xlu1 %8654, %v9580_v45   ;;  %1583 = vperm.xlu0 %8656, %v9596_v49  }
 0x116   : > { %v9634_v54 = vpop.permute.xlu1 %864  ;;  %v9636_v55 = vpop.permute.xlu0 %854 }
 0x119   : > { %1407 = vperm.xlu1 %8654, %v9588_v47   ;;  %8659 = vset.pattern.permute.xlu0 %v9222_v56 }
 0x11a   : > { %v9639_v57 = vpop.permute.xlu1 %869  ;;  %v9641_v58 = vpop.permute.xlu0 %859  ;;  %1695 = vperm.xlu0 %8659, %v9540_v35  }
 0x11d   : > { %1415 = vperm.xlu1 %8654, %v9596_v49  }
 0x11e   : > { %v9645_v59 = vpop.permute.xlu1 %879  ;;  %v9647_v60 = vpop.permute.xlu0 %874  ;;  %1707 = vperm.xlu0 %8659, %v9559_v40  }
 0x121   : > { %8657 = vset.pattern.permute.xlu1 %v9221_v53  ;;  %v9766_v53 = vld [vmem:[%s9494_s1 + $0x10] sm:$0xff] }
 0x122   : > { %v9650_v61 = vpop.permute.xlu1 %889  ;;  %v9652_v62 = vpop.permute.xlu0 %884  ;;  %1527 = vperm.xlu1 %8657, %v9540_v35   ;;  %1715 = vperm.xlu0 %8659, %v9567_v42  }
 0x126   : > { %v9656_v63 = vpop.permute.xlu1 %899  ;;  %v9658_v0 = vpop.permute.xlu0 %894  ;;  %1531 = vperm.xlu1 %8657, %v9551_v38   ;;  %1723 = vperm.xlu0 %8659, %v9575_v44  }
 0x12a   : > { %v9662_v1 = vpop.permute.xlu1 %909  ;;  %v9664_v2 = vpop.permute.xlu0 %904  ;;  %1539 = vperm.xlu1 %8657, %v9559_v40   ;;  %1731 = vperm.xlu0 %8659, %v9583_v46  }
 0x12e   : > { %v9668_v3 = vpop.permute.xlu1 %919  ;;  %v9670_v4 = vpop.permute.xlu0 %914  ;;  %1547 = vperm.xlu1 %8657, %v9567_v42   ;;  %1739 = vperm.xlu0 %8659, %v9591_v48  }
 0x12f   : > { %15274 = vst [vmem:[#allocation22_spill] sm:$0xff] %v9668_v3  ;;  %15275 = vst [vmem:[#allocation23_spill] sm:$0xff] %v9670_v4 }
 0x132   : > { %v9674_v5 = vpop.permute.xlu1 %929  ;;  %v9676_v6 = vpop.permute.xlu0 %924  ;;  %1555 = vperm.xlu1 %8657, %v9575_v44   ;;  %1747 = vperm.xlu0 %8659, %v9599_v50  }
 0x133   : > { %15276 = vst [vmem:[#allocation24_spill] sm:$0xff] %v9674_v5  ;;  %15277 = vst [vmem:[#allocation25_spill] sm:$0xff] %v9676_v6 }
 0x136   : > { %v9680_v7 = vpop.permute.xlu1 %1009  ;;  %1563 = vperm.xlu1 %8657, %v9583_v46   ;;  %8660 = vset.pattern.permute.xlu0 %v15082_v8  ;;  %v9684_v9 = vpop.permute.xlu0 %1004  ;;  %v9778_v8 = vld [vmem:[%s9494_s1 + $0x8] sm:$0xff] }
 0x137   : > { %1859 = vperm.xlu0 %8660, %v9543_v36   ;;  %15302 = vst [vmem:[#allocation50_spill] sm:$0xff] %v9778_v8 }
 0x13a   : > { %v9687_v10 = vpop.permute.xlu1 %1019  ;;  %1571 = vperm.xlu1 %8657, %v9591_v48   ;;  %v9690_v11 = vpop.permute.xlu0 %1014 }
 0x13b   : > { %15278 = vst [vmem:[#allocation26_spill] sm:$0xff] %v9687_v10  ;;  %15279 = vst [vmem:[#allocation27_spill] sm:$0xff] %v9690_v11  ;;  %1871 = vperm.xlu0 %8660, %v9548_v37  }
 0x13e   : > { %v9693_v12 = vpop.permute.xlu1 %1029  ;;  %1579 = vperm.xlu1 %8657, %v9599_v50   ;;  %v9696_v13 = vpop.permute.xlu0 %1024 }
 0x13f   : > { %15280 = vst [vmem:[#allocation28_spill] sm:$0xff] %v9693_v12  ;;  %15281 = vst [vmem:[#allocation29_spill] sm:$0xff] %v9696_v13  ;;  %1879 = vperm.xlu0 %8660, %v9556_v39   ;;  %v9859_v13 = vld [vmem:[%s641_s16] sm:$0xff] }
 0x142   : > { %v9699_v14 = vpop.permute.xlu1 %1039  ;;  %8658 = vset.pattern.permute.xlu1 %v9222_v56  ;;  %v9701_v15 = vpop.permute.xlu0 %1034  ;;  %v9769_v56 = vsub.s32 0, %v9749_v32 }
 0x143   : > { %15282 = vst [vmem:[#allocation30_spill] sm:$0xff] %v9699_v14  ;;  %15283 = vst [vmem:[#allocation31_spill] sm:$0xff] %v9701_v15  ;;  %1691 = vperm.xlu1 %8658, %v9543_v36   ;;  %1887 = vperm.xlu0 %8660, %v9564_v41  }
 0x144   : > { %15301 = vst [vmem:[#allocation49_spill] sm:$0xff] %v9769_v56 }
 0x146   : > { %v9705_v16 = vpop.permute.xlu1 %1049  ;;  %v9707_v17 = vpop.permute.xlu0 %1044 }
 0x147   : > { %15284 = vst [vmem:[#allocation32_spill] sm:$0xff] %v9705_v16  ;;  %15285 = vst [vmem:[#allocation33_spill] sm:$0xff] %v9707_v17  ;;  %1699 = vperm.xlu1 %8658, %v9551_v38   ;;  %1895 = vperm.xlu0 %8660, %v9572_v43   ;;  %v9839_v17 = vld [vmem:[%s9494_s1 + $0x60] sm:$0xff]  ;;  %v9842_v16 = vld [vmem:[%s9494_s1 + $0x78] sm:$0xff] }
 0x148   : > { %v9887_v3 = vmul.f32 %v953_v29, %v9842_v16 }
 0x14a   : > { %v9711_v18 = vpop.permute.xlu1 %1059  ;;  %v9713_v19 = vpop.permute.xlu0 %1054  ;;  %15316 = vst [vmem:[#allocation63_spill] sm:$0xff] %v9887_v3 }
 0x14b   : > { %15286 = vst [vmem:[#allocation34_spill] sm:$0xff] %v9711_v18  ;;  %15287 = vst [vmem:[#allocation35_spill] sm:$0xff] %v9713_v19  ;;  %1703 = vperm.xlu1 %8658, %v9548_v37   ;;  %1903 = vperm.xlu0 %8660, %v9580_v45   ;;  %v9818_v19 = vld [vmem:[%s9494_s1 + $0x50] sm:$0xff]  ;;  %v9821_v18 = vld [vmem:[%s9494_s1 + $0x68] sm:$0xff] }
 0x14c   : > { %v9872_v5 = vmul.f32 %v953_v29, %v9818_v19  ;;  %v9881_v4 = vmul.f32 %v953_v29, %v9821_v18 }
 0x14e   : > { %v9717_v20 = vpop.permute.xlu1 %1069  ;;  %v9719_v21 = vpop.permute.xlu0 %1064  ;;  %15311 = vst [vmem:[#allocation58_spill] sm:$0xff] %v9872_v5  ;;  %15314 = vst [vmem:[#allocation61_spill] sm:$0xff] %v9881_v4 }
 0x14f   : > { %15288 = vst [vmem:[#allocation36_spill] sm:$0xff] %v9717_v20  ;;  %15289 = vst [vmem:[#allocation37_spill] sm:$0xff] %v9719_v21  ;;  %1711 = vperm.xlu1 %8658, %v9556_v39   ;;  %1911 = vperm.xlu0 %8660, %v9588_v47   ;;  %v9812_v21 = vmul.f32 %v953_v29, %v9766_v53  ;;  %v9815_v20 = vld [vmem:[%s9494_s1 + $0x58] sm:$0xff] }
 0x150   : > { %v9869_v6 = vmul.f32 %v953_v29, %v9815_v20 }
 0x152   : > { %v9723_v22 = vpop.permute.xlu1 %1079  ;;  %v9725_v23 = vpop.permute.xlu0 %1074  ;;  %15310 = vst [vmem:[#allocation57_spill] sm:$0xff] %v9869_v6 }
 0x153   : > { %15290 = vst [vmem:[#allocation38_spill] sm:$0xff] %v9723_v22  ;;  %15291 = vst [vmem:[#allocation39_spill] sm:$0xff] %v9725_v23  ;;  %1719 = vperm.xlu1 %8658, %v9564_v41   ;;  %1919 = vperm.xlu0 %8660, %v9596_v49   ;;  %v9809_v22 = vrot.slane %v819_v52, %v9769_v56 }
 0x157   : > { %v9730_v24 = vpop.permute.xlu1 %1191  ;;  %1727 = vperm.xlu1 %8658, %v9572_v43   ;;  %v9733_v25 = vpop.permute.xlu0 %1359  ;;  %8663 = vset.pattern.permute.xlu0 %v15081_v26  ;;  %v9775_v26 = vld [vmem:[%s9494_s1 + $0x18] sm:$0xff]  ;;  %v9884_v43 = vmul.f32 %v953_v29, %v9839_v17 }
 0x158   : > { %15292 = vst [vmem:[#allocation40_spill] sm:$0xff] %v9730_v24  ;;  %15293 = vst [vmem:[#allocation41_spill] sm:$0xff] %v9733_v25  ;;  %2031 = vperm.xlu0 %8663, %v9540_v35   ;;  %v15307_v24 = vmov 5   ;;  %v9830_v52 = vmul.f32 %v953_v29, %v9775_v26 }
 0x159   : > { %15315 = vst [vmem:[#allocation62_spill] sm:$0xff] %v9884_v43 }
 0x15b   : > { %v9738_v27 = vpop.permute.xlu1 %1195  ;;  %1735 = vperm.xlu1 %8658, %v9580_v45   ;;  %v9741_v28 = vpop.permute.xlu0 %1371 }
 0x15c   : > { %15294 = vst [vmem:[#allocation42_spill] sm:$0xff] %v9738_v27  ;;  %15295 = vst [vmem:[#allocation43_spill] sm:$0xff] %v9741_v28  ;;  %2043 = vperm.xlu0 %8663, %v9559_v40   ;;  %v9796_v28 = vld [vmem:[%s9494_s1 + $0x48] sm:$0xff]  ;;  %v9799_v27 = vld [vmem:[%s9494_s1 + $0x40] sm:$0xff] }
 0x15d   : > { %15305 = vst [vmem:[#allocation53_spill] sm:$0xff] %v9799_v27  ;;  %v9863_v12 = vmul.f32 %v953_v29, %v9796_v28  ;;  %v9866_v45 = vmul.f32 %v953_v29, %v9799_v27 }
 0x15f   : > { %v9744_v30 = vpop.permute.xlu1 %1203  ;;  %1743 = vperm.xlu1 %8658, %v9588_v47   ;;  %v9747_v31 = vpop.permute.xlu0 %1379  ;;  %v1103_v47 = vstv %s9757_s14  ;;  %15309 = vst [vmem:[#allocation56_spill] sm:$0xff] %v9866_v45  ;;  %v9944_v45 = vstv %s9801_s28  ;;  %s10327_s14 = sld [smem:[#allocation8 + $0x5]] }
 0x160   : > { %15296 = vst [vmem:[#allocation44_spill] sm:$0xff] %v9744_v30  ;;  %15297 = vst [vmem:[#allocation45_spill] sm:$0xff] %v9747_v31  ;;  %2051 = vperm.xlu0 %8663, %v9567_v42   ;;  %v9782_v31 = vld [vmem:[%s9494_s1 + $0x28] sm:$0xff]  ;;  %v9793_v30 = vld [vmem:[%s9494_s1 + $0x30] sm:$0xff]  ;;  %v9903_v4 = vmul.f32 %v1103_v47, %v9772_v51  ;;  %v9906_v3 = vmul.f32 %v1103_v47, %v9775_v26  ;;  %s10560_s28 = sld [smem:[#allocation8 + $0x6]] }
 0x161   : > { %15304 = vst [vmem:[#allocation52_spill] sm:$0xff] %v9793_v30  ;;  %v9855_v14 = vmul.f32 %v953_v29, %v9793_v30  ;;  %v9930_v5 = vmul.f32 %v1103_v47, %v9793_v30  ;;  %15330 = vst [vmem:[#allocation77_spill] sm:$0xff] %v9944_v45 }
 0x162   : > { %15319 = vst [vmem:[#allocation66_spill] sm:$0xff] %v9903_v4  ;;  %15320 = vst [vmem:[#allocation67_spill] sm:$0xff] %v9906_v3 }
 0x163   : > { %v9759_v33 = vpop.permute.xlu1 %1211  ;;  %1751 = vperm.xlu1 %8658, %v9596_v49   ;;  %v9762_v34 = vpop.permute.xlu0 %1387  ;;  %v9845_v49 = vld [vmem:[%s9494_s1 + $0x70] sm:$0xff] }
 0x164   : > { %15299 = vst [vmem:[#allocation47_spill] sm:$0xff] %v9759_v33  ;;  %15300 = vst [vmem:[#allocation48_spill] sm:$0xff] %v9762_v34  ;;  %2059 = vperm.xlu0 %8663, %v9575_v44   ;;  %v9785_v34 = vld [vmem:[%s9494_s1 + $0x20] sm:$0xff]  ;;  %v9788_v33 = vld [vmem:[%s9494_s1 + $0x38] sm:$0xff]  ;;  %v9890_v6 = vmul.f32 %v953_v29, %v9845_v49 }
 0x165   : > { %15303 = vst [vmem:[#allocation51_spill] sm:$0xff] %v9785_v34  ;;  %v9852_v15 = vmul.f32 %v953_v29, %v9788_v33  ;;  %v9924_v43 = vmul.f32 %v1103_v47, %v9785_v34  ;;  %v9927_v3 = vmul.f32 %v1103_v47, %v9788_v33 }
 0x166   : > { %15317 = vst [vmem:[#allocation64_spill] sm:$0xff] %v9890_v6  ;;  %v9919_v6 = vsub.s32 1, %v9749_v32 }
 0x167   : > { %v9803_v25 = vpop.permute.xlu1 %1219  ;;  %8661 = vset.pattern.permute.xlu1 %v15307_v24  ;;  %v9806_v23 = vpop.permute.xlu0 %1395  ;;  %v9827_v24 = vmul.f32 %v953_v29, %v9772_v51  ;;  %15325 = vst [vmem:[#allocation72_spill] sm:$0xff] %v9924_v43  ;;  %v9947_v43 = vstv %s9823_s24  ;;  %s10715_s24 = sld [smem:[#allocation7 + $0x7]] }
 0x168   : > { %15306 = vst [vmem:[#allocation54_spill] sm:$0xff] %v9803_v25  ;;  %15308 = vst [vmem:[#allocation55_spill] sm:$0xff] %v9806_v23  ;;  %1863 = vperm.xlu1 %8661, %v9540_v35   ;;  %v9833_v23 = vmul.f32 %v953_v29, %v9778_v8  ;;  %v9836_v25 = vmul.f32 %v953_v29, %v9782_v31  ;;  %2067 = vperm.xlu0 %8663, %v9583_v46  }
 0x169   : > { %v9849_v35 = vmul.f32 %v953_v29, %v9785_v34  ;;  %v9910_v29 = vstv %s9790_s25  ;;  %15324 = vst [vmem:[#allocation71_spill] sm:$0xff] %v9919_v6  ;;  %s10518_s25 = sld [smem:[#allocation7 + $0x6]] }
 0x16a   : > { %15321 = vst [vmem:[#allocation68_spill] sm:$0xff] %v9910_v29  ;;  %v9951_v29 = vmul.f32 %v1103_v47, %v9815_v20 }
 0x16b   : > { %v9876_v11 = vpop.permute.xlu1 %1227  ;;  %v9878_v10 = vpop.permute.xlu0 %1403 }
 0x16c   : > { %15312 = vst [vmem:[#allocation59_spill] sm:$0xff] %v9876_v11  ;;  %15313 = vst [vmem:[#allocation60_spill] sm:$0xff] %v9878_v10  ;;  %1867 = vperm.xlu1 %8661, %v9551_v38   ;;  %v9897_v11 = vrot.slane %v9859_v13, %v9769_v56  ;;  %v9900_v10 = vmul.f32 %v1103_v47, %v9778_v8  ;;  %2075 = vperm.xlu0 %8663, %v9591_v48  }
 0x16d   : > { %v9913_v38 = vmul.f32 %v1103_v47, %v9766_v53  ;;  %v9916_v56 = vmul.f32 %v1103_v47, %v9782_v31  ;;  %15331 = vst [vmem:[#allocation78_spill] sm:$0xff] %v9951_v29  ;;  %v9971_v29 = vrot.slane %v9859_v13, %v9919_v6 }
 0x16e   : > { %15318 = vst [vmem:[#allocation65_spill] sm:$0xff] %v9900_v10  ;;  %v9941_v10 = vmul.f32 %v1103_v47, %v9799_v27 }
 0x16f   : > { %15322 = vst [vmem:[#allocation69_spill] sm:$0xff] %v9913_v38  ;;  %15323 = vst [vmem:[#allocation70_spill] sm:$0xff] %v9916_v56  ;;  %v9933_v38 = vpop.permute.xlu1 %1235  ;;  %v9935_v4 = vpop.permute.xlu0 %1411  ;;  %v9938_v56 = vmul.f32 %v1103_v47, %v9796_v28 }
 0x170   : > { %15326 = vst [vmem:[#allocation73_spill] sm:$0xff] %v9933_v38  ;;  %15327 = vst [vmem:[#allocation74_spill] sm:$0xff] %v9935_v4  ;;  %1875 = vperm.xlu1 %8661, %v9559_v40   ;;  %v9954_v38 = vmul.f32 %v1103_v47, %v9818_v19  ;;  %v9957_v4 = vmul.f32 %v1103_v47, %v9821_v18  ;;  %2083 = vperm.xlu0 %8663, %v9599_v50  }
 0x171   : > { %15328 = vst [vmem:[#allocation75_spill] sm:$0xff] %v9938_v56  ;;  %15329 = vst [vmem:[#allocation76_spill] sm:$0xff] %v9941_v10  ;;  %v9960_v56 = vmul.f32 %v1103_v47, %v9839_v17  ;;  %v9964_v10 = vmul.f32 %v1103_v47, %v9842_v16  ;;  %v9967_v40 = vmul.f32 %v1103_v47, %v9845_v49 }
 0x172   : > { %15332 = vst [vmem:[#allocation79_spill] sm:$0xff] %v9954_v38  ;;  %15333 = vst [vmem:[#allocation80_spill] sm:$0xff] %v9957_v4  ;;  %v9977_v4 = vmul.f32 %v9944_v45, %v9778_v8  ;;  %v9990_v47 = vmul.f32 %v9944_v45, %v9766_v53 }
 0x173   : > { %15334 = vst [vmem:[#allocation81_spill] sm:$0xff] %v9960_v56  ;;  %15335 = vst [vmem:[#allocation82_spill] sm:$0xff] %v9964_v10  ;;  %v15339_v56 = vsub.s32 2, %v9749_v32  ;;  %v9986_v10 = vmul.f32 %v9947_v43, %v9778_v8  ;;  %v9992_v6 = vpop.permute.xlu1 %1243 }
 0x174   : > { %15336 = vst [vmem:[#allocation83_spill] sm:$0xff] %v9967_v40  ;;  %15337 = vst [vmem:[#allocation84_spill] sm:$0xff] %v9971_v29  ;;  %v9995_v40 = vstv %s9874_s21  ;;  %v9998_v29 = vstv %s9892_s15  ;;  %1883 = vperm.xlu1 %8661, %v9567_v42   ;;  %v15097_v42 = vmov 7   ;;  %s10788_s21 = sld [smem:[#allocation8 + $0x7]] }
 0x175   : > { %15338 = vst [vmem:[#allocation85_spill] sm:$0xff] %v9977_v4  ;;  %v9982_v38 = vrot.slane %v9859_v13, %v15339_v56  ;;  %15340 = vst [vmem:[#allocation86_spill] sm:$0xff] %v9986_v10  ;;  %v10002_v4 = vmul.f32 %v9944_v45, %v9785_v34  ;;  %v10006_v10 = vpop.permute.xlu0 %1523  ;;  %8664 = vset.pattern.permute.xlu0 %v15097_v42  ;;  %v10027_v56 = vmul.f32 %v9944_v45, %v9799_v27  ;;  %s12864_s15 = sld [smem:[#allocation8 + $0xc]] }
 0x176   : > { %15341 = vst [vmem:[#allocation87_spill] sm:$0xff] %v9990_v47  ;;  %15342 = vst [vmem:[#allocation88_spill] sm:$0xff] %v9992_v6  ;;  %v10010_v47 = vmul.f32 %v9947_v43, %v9785_v34  ;;  %v10014_v6 = vmul.f32 %v9947_v43, %v9793_v30  ;;  %2195 = vperm.xlu0 %8664, %v9543_v36   ;;  %v10047_v42 = vmul.f32 %v9944_v45, %v9839_v17 }
 0x177   : > { %15343 = vst [vmem:[#allocation89_spill] sm:$0xff] %v9995_v40  ;;  %15344 = vst [vmem:[#allocation90_spill] sm:$0xff] %v9998_v29  ;;  %v10018_v29 = vmul.f32 %v9944_v45, %v9793_v30 }
 0x178   : > { %15345 = vst [vmem:[#allocation91_spill] sm:$0xff] %v10002_v4  ;;  %15346 = vst [vmem:[#allocation92_spill] sm:$0xff] %v10006_v10  ;;  %v10022_v4 = vmul.f32 %v9947_v43, %v9799_v27  ;;  %v10031_v10 = vmul.f32 %v9947_v43, %v9818_v19  ;;  %1891 = vperm.xlu1 %8661, %v9575_v44   ;;  %v10087_v44 = vmul.f32 %v9947_v43, %v9766_v53 }
 0x179   : > { %15347 = vst [vmem:[#allocation93_spill] sm:$0xff] %v10010_v47  ;;  %15348 = vst [vmem:[#allocation94_spill] sm:$0xff] %v10014_v6  ;;  %v10035_v6 = vmul.f32 %v9944_v45, %v9818_v19  ;;  %v15358_v47 = vsub.s32 3, %v9749_v32 }
 0x17a   : > { %15349 = vst [vmem:[#allocation95_spill] sm:$0xff] %v10018_v29  ;;  %15350 = vst [vmem:[#allocation96_spill] sm:$0xff] %v10022_v4  ;;  %v10038_v29 = vstv %s9921_s19  ;;  %v10043_v4 = vmul.f32 %v9947_v43, %v9839_v17  ;;  %2207 = vperm.xlu0 %8664, %v9548_v37   ;;  %s12873_s19 = sld [smem:[#allocation8 + $0xd]] }
 0x17b   : > { %15351 = vst [vmem:[#allocation97_spill] sm:$0xff] %v10027_v56  ;;  %15352 = vst [vmem:[#allocation98_spill] sm:$0xff] %v10031_v10  ;;  %v10051_v10 = vmul.f32 %v9947_v43, %v9845_v49  ;;  %v938_v56 = vadd.f32 %v9809_v22, %v9634_v54  ;;  %v939_v54 = vadd.f32 %v9809_v22, %v9639_v57 }
 0x17c   : > { %15353 = vst [vmem:[#allocation99_spill] sm:$0xff] %v10035_v6  ;;  %15354 = vst [vmem:[#allocation100_spill] sm:$0xff] %v10043_v4  ;;  %v10055_v6 = vmul.f32 %v9944_v45, %v9845_v49  ;;  %v936_v4 = vadd.f32 %v9809_v22, %v9636_v55  ;;  %v10073_v45 = vpop.permute.xlu1 %1355  ;;  %v937_v55 = vadd.f32 %v9809_v22, %v9641_v58  ;;  %1899 = vperm.xlu1 %8661, %v9583_v46  }
 0x17d   : > { %15355 = vst [vmem:[#allocation101_spill] sm:$0xff] %v10047_v42  ;;  %15356 = vst [vmem:[#allocation102_spill] sm:$0xff] %v10051_v10  ;;  %v10066_v42 = vrot.slane %v9859_v13, %v15358_v47  ;;  %v10071_v10 = vmul.f32 %v9947_v43, %v9772_v51  ;;  %v10083_v47 = vmul.f32 %v10038_v29, %v9772_v51 }
 0x17e   : > { %15357 = vst [vmem:[#allocation103_spill] sm:$0xff] %v10055_v6  ;;  %15361 = vst [vmem:[#allocation106_spill] sm:$0xff] %v10073_v45  ;;  %v10075_v6 = vpop.permute.xlu0 %1535  ;;  %v10099_v57 = vmul.f32 %v10038_v29, %v9782_v31  ;;  %v10103_v58 = vmul.f32 %v9947_v43, %v9775_v26  ;;  %v836_v45 = vld [vmem:[%s9492_s18] sm:$0xff]  ;;  %2215 = vperm.xlu0 %8664, %v9556_v39   ;;  %v10173_v46 = vmul.f32 %v9947_v43, %v9842_v16 }
 0x17f   : > { %15359 = vst [vmem:[#allocation104_spill] sm:$0xff] %v10066_v42  ;;  %15360 = vst [vmem:[#allocation105_spill] sm:$0xff] %v10071_v10  ;;  %v10090_v42 = vstv %s9973_s30  ;;  %v10094_v10 = vmul.f32 %v10038_v29, %v9775_v26  ;;  %s11465_s30 = scalar_lea.vmem %s15061_s2, %s9509_s23 }
 0x180   : > { %15362 = vst [vmem:[#allocation107_spill] sm:$0xff] %v10075_v6  ;;  %15363 = vst [vmem:[#allocation108_spill] sm:$0xff] %v10083_v47  ;;  %v941_v47 = vadd.f32 %v9809_v22, %v9645_v59  ;;  %v10134_v6 = vmul.f32 %v10038_v29, %v9815_v20  ;;  %v940_v59 = vadd.f32 %v9809_v22, %v9647_v60  ;;  %1907 = vperm.xlu1 %8661, %v9591_v48  }
 0x181   : > { %15364 = vst [vmem:[#allocation109_spill] sm:$0xff] %v10087_v44  ;;  %15365 = vst [vmem:[#allocation110_spill] sm:$0xff] %v10090_v42  ;;  %v10107_v44 = vmul.f32 %v10038_v29, %v9788_v33  ;;  %v10111_v42 = vmul.f32 %v9947_v43, %v9782_v31  ;;  %v10160_v60 = vmul.f32 %v10038_v29, %v9842_v16 }
 0x182   : > { %15366 = vst [vmem:[#allocation111_spill] sm:$0xff] %v10094_v10  ;;  %15367 = vst [vmem:[#allocation112_spill] sm:$0xff] %v10099_v57  ;;  %v10115_v10 = vmul.f32 %v10038_v29, %v9796_v28  ;;  %v10119_v57 = vmul.f32 %v9947_v43, %v9788_v33  ;;  %v945_v48 = vadd.f32 %v9809_v22, %v9656_v63  ;;  %2223 = vperm.xlu0 %8664, %v9564_v41  }
 0x183   : > { %15368 = vst [vmem:[#allocation113_spill] sm:$0xff] %v10103_v58  ;;  %15369 = vst [vmem:[#allocation114_spill] sm:$0xff] %v10107_v44  ;;  %v972_v58 = vadd.f32 %v9812_v21, %v938_v56  ;;  %v970_v44 = vadd.f32 %v9827_v24, %v936_v4  ;;  %v973_v21 = vadd.f32 %v9830_v52, %v939_v54  ;;  %v839_v24 = vld [vmem:[%s9492_s18 + $0x18] sm:$0xff]  ;;  %v837_v56 = vld [vmem:[%s9492_s18 + $0x8] sm:$0xff]  ;;  %v10216_v63 = vstv %s10121_s22  ;;  %s7458_s22 = sld [smem:[#allocation7 + $0xa]] }
 0x184   : > { %15370 = vst [vmem:[#allocation115_spill] sm:$0xff] %v10111_v42  ;;  %15371 = vst [vmem:[#allocation116_spill] sm:$0xff] %v10115_v10  ;;  %v10128_v42 = vpop.permute.xlu1 %1363  ;;  %v10130_v10 = vpop.permute.xlu0 %1543  ;;  %v971_v4 = vadd.f32 %v9833_v23, %v937_v55  ;;  %v10156_v23 = vmul.f32 %v9947_v43, %v9815_v20  ;;  %v943_v52 = vadd.f32 %v9809_v22, %v9650_v61  ;;  %v10169_v55 = vstv %s10057_s11  ;;  %s7456_s11 = sld [smem:[#allocation7 + $0x9]] }
 0x185   : > { %15372 = vst [vmem:[#allocation117_spill] sm:$0xff] %v10119_v57  ;;  %15373 = vst [vmem:[#allocation118_spill] sm:$0xff] %v10128_v42  ;;  %v838_v57 = vld [vmem:[%s9492_s18 + $0x10] sm:$0xff]  ;;  %v10166_v54 = vmul.f32 %v9947_v43, %v9821_v18  ;;  %v942_v61 = vadd.f32 %v9809_v22, %v9652_v62  ;;  %v10187_v42 = vadd.f32 %v973_v21, %v839_v24  ;;  %v840_v62 = vld [vmem:[%s9492_s18 + $0x20] sm:$0xff]  ;;  %1915 = vperm.xlu1 %8661, %v9599_v50  }
 0x186   : > { %15374 = vst [vmem:[#allocation119_spill] sm:$0xff] %v10130_v10  ;;  %15375 = vst [vmem:[#allocation120_spill] sm:$0xff] %v10134_v6  ;;  %v10148_v10 = vmul.f32 %v9947_v43, %v9796_v28  ;;  %v10152_v6 = vmul.f32 %v10038_v29, %v9821_v18  ;;  %v10189_v43 = vadd.f32 %v971_v4, %v837_v56  ;;  %v843_v24 = vld [vmem:[%s9492_s18 + $0x38] sm:$0xff] }
 0x187   : > { %15378 = vst [vmem:[#allocation123_spill] sm:$0xff] %v10156_v23  ;;  %15379 = vst [vmem:[#allocation124_spill] sm:$0xff] %v10160_v60  ;;  %v10177_v23 = vadd.f32 %v970_v44, %v836_v45  ;;  %v975_v60 = vadd.f32 %v9836_v25, %v941_v47  ;;  %v974_v45 = vadd.f32 %v9849_v35, %v940_v59  ;;  %v15384_v25 = vsub.s32 4, %v9749_v32 }
 0x188   : > { %15376 = vst [vmem:[#allocation121_spill] sm:$0xff] %v10148_v10  ;;  %15377 = vst [vmem:[#allocation122_spill] sm:$0xff] %v10152_v6  ;;  %v10175_v6 = vadd.f32 %v972_v58, %v838_v57  ;;  %v10183_v10 = vpop.permute.xlu1 %1367  ;;  %v841_v57 = vld [vmem:[%s9492_s18 + $0x28] sm:$0xff]  ;;  %v944_v44 = vadd.f32 %v9809_v22, %v9658_v0  ;;  %v10206_v58 = vmul.f32 %v10169_v55, %v9778_v8 }
 0x189   : > { %15380 = vst [vmem:[#allocation125_spill] sm:$0xff] %v10166_v54  ;;  %15381 = vst [vmem:[#allocation126_spill] sm:$0xff] %v10173_v46  ;;  %v10185_v54 = vpop.permute.xlu0 %1551  ;;  %v10196_v47 = vrot.slane %v9859_v13, %v15384_v25  ;;  %v10210_v35 = vmul.f32 %v10038_v29, %v9778_v8  ;;  %v977_v21 = vadd.f32 %v9852_v15, %v943_v52  ;;  %v844_v46 = vld [vmem:[%s9492_s18 + $0x40] sm:$0xff]  ;;  %v15408_v8 = vld [vmem:[#allocation24_spill] sm:$0xff] }
 0x18a   : > { %15382 = vst [vmem:[#allocation127_spill] sm:$0xff] %v10183_v10  ;;  %15383 = vst [vmem:[#allocation128_spill] sm:$0xff] %v10185_v54  ;;  %v1087_v4 = vadd.f32 %v9897_v11, %v9680_v7  ;;  %v10220_v0 = vmul.f32 %v10169_v55, %v9785_v34  ;;  %v10222_v59 = vadd.f32 %v975_v60, %v841_v57  ;;  %v842_v60 = vld [vmem:[%s9492_s18 + $0x30] sm:$0xff] }
 0x18b   : > { %15385 = vst [vmem:[#allocation129_spill] sm:$0xff] %v10196_v47  ;;  %15386 = vst [vmem:[#allocation130_spill] sm:$0xff] %v10206_v58  ;;  %v976_v56 = vadd.f32 %v9855_v14, %v942_v61  ;;  %v947_v25 = vadd.f32 %v9809_v22, %v9662_v1  ;;  %v1086_v15 = vadd.f32 %v9897_v11, %v9684_v9  ;;  %v15394_v61 = vld [vmem:[#allocation56_spill] sm:$0xff]  ;;  %v15398_v58 = vld [vmem:[#allocation23_spill] sm:$0xff] }
 0x18c   : > { %15387 = vst [vmem:[#allocation131_spill] sm:$0xff] %v10210_v35  ;;  %15388 = vst [vmem:[#allocation132_spill] sm:$0xff] %v10216_v63  ;;  %v10231_v7 = vpop.permute.xlu1 %1375  ;;  %v10235_v63 = vadd.f32 %v974_v45, %v840_v62  ;;  %v946_v14 = vadd.f32 %v9809_v22, %v9664_v2  ;;  %v10242_v1 = vmul.f32 %v10169_v55, %v9793_v30  ;;  %v15395_v35 = vld [vmem:[#allocation22_spill] sm:$0xff]  ;;  %v15401_v47 = vld [vmem:[#allocation57_spill] sm:$0xff] }
 0x18d   : > { %15389 = vst [vmem:[#allocation133_spill] sm:$0xff] %v10220_v0  ;;  %15390 = vst [vmem:[#allocation134_spill] sm:$0xff] %v10231_v7  ;;  %v10233_v52 = vpop.permute.xlu0 %1559  ;;  %v10246_v9 = vmul.f32 %v10038_v29, %v9766_v53  ;;  %v979_v50 = vadd.f32 %v9863_v12, %v945_v48  ;;  %v978_v57 = vadd.f32 %v15394_v61, %v944_v44  ;;  %v15396_v62 = vld [vmem:[#allocation18_spill] sm:$0xff]  ;;  %v15399_v12 = vld [vmem:[#allocation65_spill] sm:$0xff] }
 0x18e   : > { %15391 = vst [vmem:[#allocation135_spill] sm:$0xff] %v10233_v52  ;;  %15392 = vst [vmem:[#allocation136_spill] sm:$0xff] %v10242_v1  ;;  %v949_v45 = vadd.f32 %v9809_v22, %v15395_v35  ;;  %2231 = vperm.xlu0 %8664, %v15396_v62   ;;  %v10255_v2 = vmul.f32 %v10169_v55, %v9799_v27  ;;  %v10257_v0 = vadd.f32 %v977_v21, %v843_v24  ;;  %v845_v1 = vld [vmem:[%s9492_s18 + $0x48] sm:$0xff]  ;;  %v15404_v24 = vmov 6  }
 0x18f   : > { %15393 = vst [vmem:[#allocation137_spill] sm:$0xff] %v10246_v9  ;;  %v948_v9 = vadd.f32 %v9809_v22, %v15398_v58  ;;  %v1121_v48 = vadd.f32 %v15399_v12, %v1087_v4  ;;  %v15400_v44 = vld [vmem:[#allocation26_spill] sm:$0xff]  ;;  %v10266_v35 = vadd.f32 %v976_v56, %v842_v60  ;;  %v981_v52 = vadd.f32 %v15401_v47, %v947_v25  ;;  %v847_v4 = vld [vmem:[%s9492_s18 + $0x58] sm:$0xff]  ;;  %v15409_v60 = vld [vmem:[#allocation25_spill] sm:$0xff] }
 0x190   : > { %15397 = vst [vmem:[#allocation56_spill] sm:$0xff] %v10255_v2  ;;  %v1089_v61 = vadd.f32 %v9897_v11, %v15400_v44  ;;  %v15402_v7 = vld [vmem:[#allocation66_spill] sm:$0xff]  ;;  %v15403_v2 = vld [vmem:[#allocation27_spill] sm:$0xff]  ;;  %8662 = vset.pattern.permute.xlu1 %v15404_v24  ;;  %v10273_v10 = vpop.permute.xlu1 %1383  ;;  %v951_v56 = vadd.f32 %v9809_v22, %v15408_v8  ;;  %v950_v47 = vadd.f32 %v9809_v22, %v15409_v60  ;;  %v15411_v24 = vld [vmem:[#allocation61_spill] sm:$0xff] }
 0x191   : > { %v1120_v54 = vadd.f32 %v15402_v7, %v1086_v15  ;;  %v1088_v21 = vadd.f32 %v9897_v11, %v15403_v2  ;;  %15405 = vst [vmem:[#allocation22_spill] sm:$0xff] %v10273_v10  ;;  %v10275_v58 = vpop.permute.xlu0 %1567  ;;  %v15407_v12 = vld [vmem:[#allocation58_spill] sm:$0xff]  ;;  %2027 = vperm.xlu1 %8662, %v9543_v36   ;;  %v10286_v25 = vmul.f32 %v10038_v29, %v9785_v34  ;;  %v846_v2 = vld [vmem:[%s9492_s18 + $0x50] sm:$0xff]  ;;  %v1138_v10 = vmax.f32 %v1121_v48, 0.0 }
 0x192   : > { %15406 = vst [vmem:[#allocation18_spill] sm:$0xff] %v10275_v58  ;;  %v980_v44 = vadd.f32 %v15407_v12, %v946_v14  ;;  %v10288_v15 = vadd.f32 %v979_v50, %v845_v1  ;;  %v10290_v7 = vadd.f32 %v978_v57, %v844_v46  ;;  %v983_v14 = vadd.f32 %v15411_v24, %v949_v45  ;;  %v15412_v12 = vld [vmem:[#allocation19_spill] sm:$0xff]  ;;  %v849_v22 = vld [vmem:[%s9492_s18 + $0x68] sm:$0xff]  ;;  %v848_v57 = vld [vmem:[%s9492_s18 + $0x60] sm:$0xff] }
 0x193   : > { %15410 = vst [vmem:[#allocation23_spill] sm:$0xff] %v10286_v25  ;;  %2239 = vperm.xlu0 %8664, %v15412_v12   ;;  %v10297_v8 = vmul.f32 %v10169_v55, %v9818_v19  ;;  %v15414_v60 = vld [vmem:[#allocation62_spill] sm:$0xff]  ;;  %v15415_v25 = vld [vmem:[#allocation67_spill] sm:$0xff]  ;;  %v10306_v46 = vmul.f32 %v10038_v29, %v9793_v30  ;;  %v10308_v50 = vadd.f32 %v981_v52, %v847_v4  ;;  %v1137_v45 = vmax.f32 %v1120_v54, 0.0  ;;  %v15417_v24 = vld [vmem:[#allocation69_spill] sm:$0xff] }
 0x194   : > { %v982_v58 = vadd.f32 %v15414_v60, %v948_v9  ;;  %v1123_v1 = vadd.f32 %v15415_v25, %v1089_v61  ;;  %v10312_v34 = vpop.permute.xlu1 %1391  ;;  %v10318_v9 = vmul.f32 %v10169_v55, %v9839_v17  ;;  %v10320_v48 = vadd.f32 %v980_v44, %v846_v2  ;;  %v15421_v61 = vld [vmem:[#allocation63_spill] sm:$0xff]  ;;  %v15422_v60 = vld [vmem:[#allocation64_spill] sm:$0xff]  ;;  %v15424_v54 = vld [vmem:[#allocation17_spill] sm:$0xff] }
 0x195   : > { %15413 = vst [vmem:[#allocation65_spill] sm:$0xff] %v10297_v8  ;;  %15416 = vst [vmem:[#allocation26_spill] sm:$0xff] %v10306_v46  ;;  %v1122_v8 = vadd.f32 %v15417_v24, %v1088_v21  ;;  %v10314_v40 = vpop.permute.xlu0 %1575  ;;  %v985_v25 = vadd.f32 %v15421_v61, %v951_v56  ;;  %v984_v46 = vadd.f32 %v15422_v60, %v950_v47  ;;  %v15423_v52 = vld [vmem:[#allocation28_spill] sm:$0xff]  ;;  %2035 = vperm.xlu1 %8662, %v15424_v54   ;;  %v15435_v47 = vld [vmem:[#allocation31_spill] sm:$0xff] }
 0x196   : > { %15418 = vst [vmem:[#allocation57_spill] sm:$0xff] %v10312_v34  ;;  %15419 = vst [vmem:[#allocation66_spill] sm:$0xff] %v10314_v40  ;;  %v1091_v4 = vadd.f32 %v9897_v11, %v15423_v52  ;;  %v10329_v21 = vadd.f32 %v983_v14, %v849_v22  ;;  %v851_v24 = vld [vmem:[%s9492_s18 + $0x78] sm:$0xff]  ;;  %v850_v40 = vld [vmem:[%s9492_s18 + $0x70] sm:$0xff]  ;;  %v10336_v44 = vmul.f32 %v10038_v29, %v9799_v27  ;;  %v1140_v14 = vmax.f32 %v1123_v1, 0.0 }
 0x197   : > { %15420 = vst [vmem:[#allocation27_spill] sm:$0xff] %v10318_v9  ;;  %v15425_v34 = vld [vmem:[#allocation20_spill] sm:$0xff]  ;;  %v10340_v56 = vmul.f32 %v10169_v55, %v9845_v49  ;;  %v10343_v2 = vadd.f32 %v982_v58, %v848_v57  ;;  %v15429_v22 = vld [vmem:[#allocation29_spill] sm:$0xff]  ;;  %v1139_v9 = vmax.f32 %v1122_v8, 0.0  ;;  %v15430_v27 = vld [vmem:[#allocation30_spill] sm:$0xff]  ;;  %v10357_v58 = vmul.f32 %v10038_v29, %v9818_v19 }
 0x198   : > { %2247 = vperm.xlu0 %8664, %v15425_v34   ;;  %15426 = vst [vmem:[#allocation58_spill] sm:$0xff] %v10336_v44  ;;  %v15428_v61 = vld [vmem:[#allocation68_spill] sm:$0xff]  ;;  %v1090_v52 = vadd.f32 %v9897_v11, %v15429_v22  ;;  %v1093_v44 = vadd.f32 %v9897_v11, %v15430_v27  ;;  %v10351_v30 = vpop.permute.xlu1 %1399  ;;  %v10361_v1 = vadd.f32 %v984_v46, %v850_v40  ;;  %v15434_v57 = vld [vmem:[#allocation70_spill] sm:$0xff]  ;;  %v15436_v27 = vld [vmem:[#allocation21_spill] sm:$0xff] }
 0x199   : > { %15427 = vst [vmem:[#allocation24_spill] sm:$0xff] %v10340_v56  ;;  %v1155_v60 = vmul.f32 %v15428_v61, %v1138_v10  ;;  %v1154_v54 = vmul.f32 %v15428_v61, %v1137_v45  ;;  %15431 = vst [vmem:[#allocation25_spill] sm:$0xff] %v10351_v30  ;;  %v10353_v56 = vpop.permute.xlu0 %1583  ;;  %v10359_v10 = vadd.f32 %v985_v25, %v851_v24  ;;  %2039 = vperm.xlu1 %8662, %v9548_v37   ;;  %v15441_v24 = vld [vmem:[#allocation72_spill] sm:$0xff] }
 0x19a   : > { %15432 = vst [vmem:[#allocation61_spill] sm:$0xff] %v10353_v56  ;;  %15433 = vst [vmem:[#allocation19_spill] sm:$0xff] %v10357_v58  ;;  %v1125_v22 = vadd.f32 %v15434_v57, %v1091_v4  ;;  %v1092_v8 = vadd.f32 %v9897_v11, %v15435_v47  ;;  %v15437_v45 = vsub.s32 5, %v9749_v32  ;;  %v10374_v30 = vstv %s10299_s17  ;;  %v15442_v57 = vld [vmem:[#allocation32_spill] sm:$0xff]  ;;  %v15444_v58 = vld [vmem:[#allocation33_spill] sm:$0xff]  ;;  %s7460_s17 = sld [smem:[#allocation7 + $0xb]] }
 0x19b   : > { %v10378_v40 = vmul.f32 %v10038_v29, %v9839_v17  ;;  %v10382_v46 = vmul.f32 %v10038_v29, %v9845_v49  ;;  %v10385_v25 = vadd.f32 %v1155_v60, %v10189_v43  ;;  %v1157_v4 = vmul.f32 %v15428_v61, %v1140_v14 }
 0x19c   : > { %2255 = vperm.xlu0 %8664, %v15436_v27   ;;  %v10371_v56 = vrot.slane %v9859_v13, %v15437_v45  ;;  %v1124_v47 = vadd.f32 %v15441_v24, %v1090_v52  ;;  %v1095_v27 = vadd.f32 %v9897_v11, %v15442_v57  ;;  %v10392_v45 = vadd.f32 %v1154_v54, %v10177_v23  ;;  %v15455_v57 = vld [vmem:[#allocation75_spill] sm:$0xff] }
 0x19d   : > { %15439 = vst [vmem:[#allocation67_spill] sm:$0xff] %v10378_v40  ;;  %15440 = vst [vmem:[#allocation69_spill] sm:$0xff] %v10382_v46  ;;  %v1156_v40 = vmul.f32 %v15428_v61, %v1139_v9  ;;  %v1094_v29 = vadd.f32 %v9897_v11, %v15444_v58  ;;  %v10398_v46 = vpop.permute.xlu1 %1407  ;;  %v1142_v43 = vmax.f32 %v1125_v22, 0.0  ;;  %v1126_v60 = vadd.f32 %v9930_v5, %v1092_v8  ;;  %v10402_v14 = vpop.permute.xlu0 %1695  ;;  %v15449_v9 = vld [vmem:[#allocation34_spill] sm:$0xff] }
 0x19e   : > { %15438 = vst [vmem:[#allocation62_spill] sm:$0xff] %v10371_v56  ;;  %15443 = vst [vmem:[#allocation63_spill] sm:$0xff] %v10392_v45  ;;  %v1127_v56 = vadd.f32 %v9927_v3, %v1093_v44  ;;  %2047 = vperm.xlu1 %8662, %v9556_v39   ;;  %v10406_v23 = vmul.f32 %v10374_v30, %v9772_v51  ;;  %v10409_v52 = vstv %s10327_s14  ;;  %v15450_v44 = vld [vmem:[#allocation35_spill] sm:$0xff]  ;;  %v15451_v58 = vmov 1   ;;  %s7462_s14 = sld [smem:[#allocation7 + $0xc]] }
 0x19f   : > { %15445 = vst [vmem:[#allocation64_spill] sm:$0xff] %v10398_v46  ;;  %15446 = vst [vmem:[#allocation28_spill] sm:$0xff] %v10402_v14  ;;  %v1097_v3 = vadd.f32 %v9897_v11, %v15449_v9  ;;  %v1096_v54 = vadd.f32 %v9897_v11, %v15450_v44  ;;  %v10418_v5 = vmul.f32 %v10374_v30, %v9775_v26  ;;  %v1141_v24 = vmax.f32 %v1124_v47, 0.0 }
 0x1a0   : > { %15447 = vst [vmem:[#allocation17_spill] sm:$0xff] %v10406_v23  ;;  %15448 = vst [vmem:[#allocation20_spill] sm:$0xff] %v10409_v52  ;;  %8666 = vset.pattern.permute.xlu0 %v15451_v58  ;;  %v10422_v22 = vmul.f32 %v10374_v30, %v9782_v31  ;;  %v10425_v8 = vadd.f32 %v1157_v4, %v10187_v42  ;;  %v1129_v45 = vadd.f32 %v15455_v57, %v1095_v27  ;;  %v15458_v58 = vld [vmem:[#allocation36_spill] sm:$0xff]  ;;  %v15460_v27 = vld [vmem:[#allocation37_spill] sm:$0xff] }
 0x1a1   : > { %15452 = vst [vmem:[#allocation68_spill] sm:$0xff] %v10418_v5  ;;  %1187 = vperm.xlu0 %8666, %v9543_v36   ;;  %v10431_v9 = vmul.f32 %v10169_v55, %v9772_v51  ;;  %v10434_v44 = vadd.f32 %v1156_v40, %v10175_v6  ;;  %v1144_v52 = vmax.f32 %v1127_v56, 0.0  ;;  %v15457_v5 = vld [vmem:[#allocation76_spill] sm:$0xff]  ;;  %v10439_v42 = vpop.permute.xlu1 %1415  ;;  %v1159_v4 = vmul.f32 %v15428_v61, %v1142_v43  ;;  %v15461_v57 = vld [vmem:[#allocation38_spill] sm:$0xff]  ;;  %v10447_v6 = vpop.permute.xlu0 %1707 }
 0x1a2   : > { %15453 = vst [vmem:[#allocation29_spill] sm:$0xff] %v10422_v22  ;;  %15454 = vst [vmem:[#allocation30_spill] sm:$0xff] %v10425_v8  ;;  %v1128_v23 = vadd.f32 %v15457_v5, %v1094_v29  ;;  %v1099_v22 = vadd.f32 %v9897_v11, %v15458_v58  ;;  %v1143_v47 = vmax.f32 %v1126_v60, 0.0  ;;  %v1098_v36 = vadd.f32 %v9897_v11, %v15460_v27  ;;  %v15463_v56 = vld [vmem:[#allocation78_spill] sm:$0xff]  ;;  %v15464_v29 = vld [vmem:[#allocation79_spill] sm:$0xff] }
 0x1a3   : > { %15456 = vst [vmem:[#allocation70_spill] sm:$0xff] %v10431_v9  ;;  %15459 = vst [vmem:[#allocation31_spill] sm:$0xff] %v10439_v42  ;;  %v1101_v8 = vadd.f32 %v9897_v11, %v15461_v57  ;;  %2055 = vperm.xlu1 %8662, %v9564_v41   ;;  %v1131_v40 = vadd.f32 %v15463_v56, %v1097_v3  ;;  %v1130_v5 = vadd.f32 %v15464_v29, %v1096_v54  ;;  %v15465_v58 = vld [vmem:[#allocation39_spill] sm:$0xff]  ;;  %v15467_v42 = vld [vmem:[#allocation40_spill] sm:$0xff] }
 0x1a4   : > { %15462 = vst [vmem:[#allocation21_spill] sm:$0xff] %v10447_v6  ;;  %v1100_v9 = vadd.f32 %v9897_v11, %v15465_v58  ;;  %v10455_v43 = vmul.f32 %v10374_v30, %v9788_v33  ;;  %v1158_v60 = vmul.f32 %v15428_v61, %v1141_v24  ;;  %v1146_v27 = vmax.f32 %v1129_v45, 0.0  ;;  %v15468_v57 = vld [vmem:[#allocation84_spill] sm:$0xff] }
 0x1a5   : > { %v1255_v14 = vadd.f32 %v15468_v57, %v15467_v42  ;;  %1199 = vperm.xlu0 %8666, %v9548_v37   ;;  %v10463_v3 = vmul.f32 %v10169_v55, %v9766_v53  ;;  %v1161_v54 = vmul.f32 %v15428_v61, %v1144_v52  ;;  %v1145_v56 = vmax.f32 %v1128_v23, 0.0  ;;  %v15470_v11 = vld [vmem:[#allocation80_spill] sm:$0xff]  ;;  %v15473_v42 = vld [vmem:[#allocation81_spill] sm:$0xff]  ;;  %v10480_v23 = vpop.permute.xlu0 %1715 }
 0x1a6   : > { %15466 = vst [vmem:[#allocation72_spill] sm:$0xff] %v10455_v43  ;;  %v1133_v29 = vadd.f32 %v15470_v11, %v1099_v22  ;;  %v10469_v58 = vmul.f32 %v10374_v30, %v9796_v28  ;;  %v10472_v45 = vadd.f32 %v1159_v4, %v10222_v59  ;;  %v1160_v24 = vmul.f32 %v15428_v61, %v1143_v47  ;;  %v15474_v43 = vld [vmem:[#allocation82_spill] sm:$0xff]  ;;  %v15475_v11 = vld [vmem:[#allocation83_spill] sm:$0xff] }
 0x1a7   : > { %15469 = vst [vmem:[#allocation32_spill] sm:$0xff] %v10463_v3  ;;  %v1132_v37 = vadd.f32 %v15473_v42, %v1098_v36  ;;  %v1135_v6 = vadd.f32 %v15474_v43, %v1101_v8  ;;  %2063 = vperm.xlu1 %8662, %v15396_v62   ;;  %v10478_v3 = vpop.permute.xlu1 %1527  ;;  %v1148_v52 = vmax.f32 %v1131_v40, 0.0  ;;  %v1147_v22 = vmax.f32 %v1130_v5, 0.0  ;;  %v15477_v36 = vld [vmem:[#allocation85_spill] sm:$0xff] }
 0x1a8   : > { %15471 = vst [vmem:[#allocation33_spill] sm:$0xff] %v10469_v58  ;;  %15472 = vst [vmem:[#allocation34_spill] sm:$0xff] %v10472_v45  ;;  %v1134_v46 = vadd.f32 %v15475_v11, %v1100_v9  ;;  %v15476_v58 = vld [vmem:[#allocation41_spill] sm:$0xff]  ;;  %v10486_v4 = vadd.f32 %v1158_v60, %v10235_v63  ;;  %v1163_v47 = vmul.f32 %v15428_v61, %v1146_v27  ;;  %v1150_v5 = vmax.f32 %v1133_v29, 0.0 }
 0x1a9   : > { %v1423_v59 = vadd.f32 %v9982_v38, %v15476_v58  ;;  %v1289_v8 = vadd.f32 %v15477_v36, %v1255_v14  ;;  %1207 = vperm.xlu0 %8666, %v9556_v39   ;;  %v10493_v62 = vmul.f32 %v10169_v55, %v9775_v26  ;;  %v10496_v40 = vadd.f32 %v1161_v54, %v10257_v0  ;;  %v10509_v27 = vpop.permute.xlu0 %1723  ;;  %v15482_v58 = vld [vmem:[#allocation86_spill] sm:$0xff] }
 0x1aa   : > { %v1162_v9 = vmul.f32 %v15428_v61, %v1145_v56  ;;  %v10501_v63 = vmul.f32 %v10374_v30, %v9815_v20  ;;  %v10504_v43 = vadd.f32 %v1160_v24, %v10266_v35  ;;  %v1149_v14 = vmax.f32 %v1132_v37, 0.0  ;;  %v15484_v24 = vld [vmem:[#allocation42_spill] sm:$0xff] }
 0x1ab   : > { %15478 = vst [vmem:[#allocation35_spill] sm:$0xff] %v10493_v62  ;;  %15479 = vst [vmem:[#allocation75_spill] sm:$0xff] %v10496_v40  ;;  %v1152_v60 = vmax.f32 %v1135_v6, 0.0  ;;  %2071 = vperm.xlu1 %8662, %v15412_v12   ;;  %v10507_v39 = vpop.permute.xlu1 %1531  ;;  %v10513_v0 = vmul.f32 %v10169_v55, %v9782_v31  ;;  %v1165_v54 = vmul.f32 %v15428_v61, %v1148_v52  ;;  %v1151_v29 = vmax.f32 %v1134_v46, 0.0  ;;  %v8948_v40 = vld [vmem:[%s9537_s13 + $0x48] sm:$0xff] }
 0x1ac   : > { %15480 = vst [vmem:[#allocation76_spill] sm:$0xff] %v10501_v63  ;;  %v1164_v56 = vmul.f32 %v15428_v61, %v1147_v22  ;;  %v1457_v35 = vadd.f32 %v15482_v58, %v1423_v59  ;;  %v10521_v6 = vadd.f32 %v1163_v47, %v10288_v15  ;;  %v1306_v12 = vmax.f32 %v1289_v8, 0.0  ;;  %v15486_v22 = vld [vmem:[#allocation43_spill] sm:$0xff]  ;;  %v15487_v15 = vld [vmem:[#allocation44_spill] sm:$0xff]  ;;  %v15491_v58 = vld [vmem:[#allocation89_spill] sm:$0xff] }
 0x1ad   : > { %15481 = vst [vmem:[#allocation36_spill] sm:$0xff] %v10513_v0  ;;  %v1256_v42 = vadd.f32 %v15468_v57, %v15484_v24  ;;  %1215 = vperm.xlu0 %8666, %v9564_v41   ;;  %v10528_v37 = vmul.f32 %v10374_v30, %v9821_v18  ;;  %v10531_v52 = vadd.f32 %v1162_v9, %v10290_v7  ;;  %v10543_v8 = vpop.permute.xlu0 %1731  ;;  %v8953_v63 = vld [vmem:[%s9537_s13 + $0x10] sm:$0xff] }
 0x1ae   : > { %15483 = vst [vmem:[#allocation37_spill] sm:$0xff] %v10521_v6  ;;  %v1167_v46 = vmul.f32 %v15428_v61, %v1150_v5  ;;  %v1426_v11 = vadd.f32 %v9982_v38, %v15486_v22  ;;  %v1258_v59 = vadd.f32 %v15468_v57, %v15487_v15  ;;  %v1166_v47 = vmul.f32 %v15428_v61, %v1149_v14  ;;  %v15493_v15 = vld [vmem:[#allocation47_spill] sm:$0xff] }
 0x1af   : > { %15485 = vst [vmem:[#allocation38_spill] sm:$0xff] %v10528_v37  ;;  %v1169_v41 = vmul.f32 %v15428_v61, %v1152_v60  ;;  %2079 = vperm.xlu1 %8662, %v15425_v34   ;;  %v10541_v36 = vpop.permute.xlu1 %1539  ;;  %v10547_v7 = vmul.f32 %v10169_v55, %v9788_v33  ;;  %v10551_v9 = vmul.f32 %v10374_v30, %v9842_v16  ;;  %v1474_v60 = vmax.f32 %v1457_v35, 0.0  ;;  %v15492_v33 = vld [vmem:[#allocation87_spill] sm:$0xff] }
 0x1b0   : > { %v10554_v5 = vadd.f32 %v1165_v54, %v10308_v50  ;;  %v10557_v14 = vadd.f32 %v1164_v56, %v10320_v48  ;;  %v1168_v34 = vmul.f32 %v15428_v61, %v1151_v29  ;;  %v1323_v24 = vmul.f32 %v15491_v58, %v1306_v12  ;;  %v15496_v61 = vld [vmem:[#allocation93_spill] sm:$0xff]  ;;  %v15497_v56 = vld [vmem:[#allocation91_spill] sm:$0xff] }
 0x1b1   : > { %15488 = vst [vmem:[#allocation78_spill] sm:$0xff] %v10547_v7  ;;  %15489 = vst [vmem:[#allocation79_spill] sm:$0xff] %v10551_v9  ;;  %v1290_v22 = vadd.f32 %v15492_v33, %v1256_v42  ;;  %v1260_v6 = vadd.f32 %v15468_v57, %v15493_v15  ;;  %1223 = vperm.xlu0 %8666, %v8948_v40   ;;  %v10569_v50 = vmul.f32 %v10169_v55, %v9796_v28  ;;  %v15499_v42 = vld [vmem:[#allocation45_spill] sm:$0xff]  ;;  %v8949_v33 = vld [vmem:[%s9537_s13 + $0x78] sm:$0xff] }
 0x1b2   : > { %15490 = vst [vmem:[#allocation39_spill] sm:$0xff] %v10554_v5  ;;  %v10572_v48 = vadd.f32 %v1167_v46, %v10329_v21  ;;  %v1460_v54 = vadd.f32 %v15496_v61, %v1426_v11  ;;  %v1292_v29 = vadd.f32 %v15497_v56, %v1258_v59  ;;  %v10578_v12 = vadd.f32 %v1166_v47, %v10343_v2  ;;  %v10588_v46 = vpop.permute.xlu0 %1739  ;;  %v15501_v59 = vld [vmem:[#allocation90_spill] sm:$0xff] }
 0x1b3   : > { %15494 = vst [vmem:[#allocation40_spill] sm:$0xff] %v10569_v50  ;;  %v10581_v40 = vadd.f32 %v1169_v41, %v10359_v10  ;;  %v1428_v28 = vadd.f32 %v9982_v38, %v15499_v42  ;;  %2087 = vperm.xlu1 %8662, %v8949_v33   ;;  %v10586_v21 = vpop.permute.xlu1 %1547  ;;  %v10592_v11 = vmul.f32 %v10169_v55, %v9815_v20  ;;  %v15502_v10 = vld [vmem:[#allocation54_spill] sm:$0xff]  ;;  %v10601_v15 = vstv %s10518_s25  ;;  %v15503_v42 = vld [vmem:[#allocation95_spill] sm:$0xff]  ;;  %v8950_v20 = vld [vmem:[%s9537_s13 + $0x58] sm:$0xff]  ;;  %s12795_s25 = sld [smem:[#allocation8 + $0x8]] }
 0x1b4   : > { %15495 = vst [vmem:[#allocation80_spill] sm:$0xff] %v10572_v48  ;;  %v10595_v2 = vadd.f32 %v1168_v34, %v10361_v1  ;;  %v1491_v47 = vmul.f32 %v15501_v59, %v1474_v60  ;;  %v1262_v41 = vadd.f32 %v15468_v57, %v15502_v10  ;;  %v1339_v61 = vadd.f32 %v1323_v24, %v10385_v25  ;;  %v15505_v60 = vld [vmem:[#allocation48_spill] sm:$0xff]  ;;  %v15508_v25 = vld [vmem:[#allocation94_spill] sm:$0xff]  ;;  %v15517_v50 = vld [vmem:[#allocation51_spill] sm:$0xff] }
 0x1b5   : > { %15498 = vst [vmem:[#allocation81_spill] sm:$0xff] %v10581_v40  ;;  %15500 = vst [vmem:[#allocation82_spill] sm:$0xff] %v10592_v11  ;;  %v1307_v56 = vmax.f32 %v1290_v22, 0.0  ;;  %v1294_v35 = vadd.f32 %v15503_v42, %v1260_v6  ;;  %v15504_v40 = vld [vmem:[#allocation59_spill] sm:$0xff]  ;;  %1231 = vperm.xlu0 %8666, %v8950_v20   ;;  %v1477_v1 = vmax.f32 %v1460_v54, 0.0  ;;  %v1309_v34 = vmax.f32 %v1292_v29, 0.0 }
 0x1b6   : > { %v1264_v48 = vadd.f32 %v15468_v57, %v15504_v40  ;;  %v1430_v5 = vadd.f32 %v9982_v38, %v15505_v60  ;;  %v15506_v10 = vsub.s32 6, %v9749_v32  ;;  %v1462_v24 = vadd.f32 %v15508_v25, %v1428_v28  ;;  %v15509_v6 = vld [vmem:[#allocation73_spill] sm:$0xff]  ;;  %v10621_v54 = vpop.permute.xlu0 %1747  ;;  %v15511_v29 = vld [vmem:[#allocation50_spill] sm:$0xff]  ;;  %v15515_v25 = vld [vmem:[#allocation88_spill] sm:$0xff] }
 0x1b7   : > { %v1266_v22 = vadd.f32 %v15468_v57, %v15509_v6  ;;  %v15510_v40 = vmov 7   ;;  %v10619_v42 = vpop.permute.xlu1 %1555  ;;  %v10625_v20 = vmul.f32 %v10601_v15, %v15511_v29  ;;  %v10629_v60 = vmul.f32 %v10169_v55, %v9821_v18  ;;  %v8951_v11 = vld [vmem:[%s9537_s13 + $0x8] sm:$0xff] }
 0x1b8   : > { %v10613_v45 = vrot.slane %v9859_v13, %v15506_v10  ;;  %8665 = vset.pattern.permute.xlu1 %v15510_v40  ;;  %v15514_v10 = vld [vmem:[#allocation97_spill] sm:$0xff]  ;;  %v1268_v6 = vadd.f32 %v15468_v57, %v15515_v25  ;;  %v10636_v40 = vstv %s10560_s28  ;;  %v10640_v9 = vmul.f32 %v10601_v15, %v15517_v50  ;;  %v15520_v25 = vld [vmem:[#allocation96_spill] sm:$0xff]  ;;  %s12816_s28 = sld [smem:[#allocation8 + $0x9]] }
 0x1b9   : > { %15512 = vst [vmem:[#allocation41_spill] sm:$0xff] %v10625_v20  ;;  %15513 = vst [vmem:[#allocation85_spill] sm:$0xff] %v10629_v60  ;;  %v1296_v28 = vadd.f32 %v15514_v10, %v1262_v41  ;;  %2199 = vperm.xlu1 %8665, %v8951_v11   ;;  %v1324_v20 = vmul.f32 %v15491_v58, %v1307_v56  ;;  %v1311_v18 = vmax.f32 %v1294_v35, 0.0  ;;  %v15519_v60 = vld [vmem:[#allocation99_spill] sm:$0xff]  ;;  %v8952_v41 = vld [vmem:[%s9537_s13 + $0x68] sm:$0xff] }
 0x1ba   : > { %15507 = vst [vmem:[#allocation83_spill] sm:$0xff] %v10613_v45  ;;  %15516 = vst [vmem:[#allocation86_spill] sm:$0xff] %v10636_v40  ;;  %v10642_v45 = vadd.f32 %v1491_v47, %v1339_v61  ;;  %v1298_v7 = vadd.f32 %v15519_v60, %v1264_v48  ;;  %1239 = vperm.xlu0 %8666, %v8952_v41   ;;  %v1494_v10 = vmul.f32 %v15501_v59, %v1477_v1  ;;  %v15521_v40 = vld [vmem:[#allocation55_spill] sm:$0xff]  ;;  %v15522_v47 = vld [vmem:[#allocation60_spill] sm:$0xff] }
 0x1bb   : > { %15518 = vst [vmem:[#allocation42_spill] sm:$0xff] %v10640_v9  ;;  %v1326_v11 = vmul.f32 %v15491_v58, %v1309_v34  ;;  %v1464_v57 = vadd.f32 %v15520_v25, %v1430_v5  ;;  %v1432_v37 = vadd.f32 %v9982_v38, %v15521_v40  ;;  %v1479_v9 = vmax.f32 %v1462_v24, 0.0  ;;  %v15523_v56 = vld [vmem:[#allocation101_spill] sm:$0xff]  ;;  %v10655_v35 = vpop.permute.xlu1 %1563  ;;  %v15524_v48 = vld [vmem:[#allocation52_spill] sm:$0xff]  ;;  %v15526_v41 = vld [vmem:[#allocation103_spill] sm:$0xff]  ;;  %v10663_v5 = vpop.permute.xlu0 %1859 }
 0x1bc   : > { %v1434_v61 = vadd.f32 %v9982_v38, %v15522_v47  ;;  %v1300_v0 = vadd.f32 %v15523_v56, %v1266_v22  ;;  %v10659_v60 = vmul.f32 %v10601_v15, %v15524_v48  ;;  %v1313_v1 = vmax.f32 %v1296_v28, 0.0  ;;  %v15528_v40 = vld [vmem:[#allocation53_spill] sm:$0xff] }
 0x1bd   : > { %v1302_v34 = vadd.f32 %v15526_v41, %v1268_v6  ;;  %2203 = vperm.xlu1 %8665, %v8953_v63   ;;  %v10667_v24 = vmul.f32 %v10169_v55, %v9842_v16  ;;  %v10671_v22 = vmul.f32 %v10601_v15, %v15528_v40  ;;  %v10674_v25 = vadd.f32 %v1324_v20, %v10434_v44  ;;  %v15530_v6 = vld [vmem:[#allocation74_spill] sm:$0xff]  ;;  %v15533_v20 = vld [vmem:[#allocation100_spill] sm:$0xff] }
 0x1be   : > { %15525 = vst [vmem:[#allocation43_spill] sm:$0xff] %v10659_v60  ;;  %v1328_v47 = vmul.f32 %v15491_v58, %v1311_v18  ;;  %v1315_v28 = vmax.f32 %v1298_v7, 0.0  ;;  %v1436_v63 = vadd.f32 %v9982_v38, %v15530_v6  ;;  %1247 = vperm.xlu0 %8666, %v8949_v33   ;;  %v1342_v56 = vadd.f32 %v1326_v11, %v10486_v4  ;;  %v15531_v16 = vld [vmem:[#allocation98_spill] sm:$0xff]  ;;  %v15535_v33 = vld [vmem:[#allocation92_spill] sm:$0xff]  ;;  %v8954_v6 = vld [vmem:[%s9537_s13 + $0x20] sm:$0xff] }
 0x1bf   : > { %15527 = vst [vmem:[#allocation44_spill] sm:$0xff] %v10667_v24  ;;  %15529 = vst [vmem:[#allocation87_spill] sm:$0xff] %v10671_v22  ;;  %v1481_v41 = vmax.f32 %v1464_v57, 0.0  ;;  %v1466_v55 = vadd.f32 %v15531_v16, %v1432_v37  ;;  %v10683_v24 = vmul.f32 %v10374_v30, %v15511_v29  ;;  %v1496_v44 = vmul.f32 %v15501_v59, %v1479_v9  ;;  %v10687_v60 = vpop.permute.xlu1 %1571  ;;  %v15536_v37 = vld [vmem:[#allocation104_spill] sm:$0xff]  ;;  %v10697_v29 = vpop.permute.xlu0 %1871  ;;  %v15538_v16 = vld [vmem:[#allocation102_spill] sm:$0xff] }
 0x1c0   : > { %v1468_v22 = vadd.f32 %v15533_v20, %v1434_v61  ;;  %v1317_v18 = vmax.f32 %v1300_v0, 0.0  ;;  %v10691_v7 = vmul.f32 %v10601_v15, %v9818_v19  ;;  %v1330_v4 = vmul.f32 %v15491_v58, %v1313_v1 }
 0x1c1   : > { %15532 = vst [vmem:[#allocation47_spill] sm:$0xff] %v10683_v24  ;;  %v1319_v57 = vmax.f32 %v1302_v34, 0.0  ;;  %v1590_v11 = vadd.f32 %v15536_v37, %v15535_v33  ;;  %2211 = vperm.xlu1 %8665, %v8954_v6   ;;  %v10701_v9 = vmul.f32 %v10374_v30, %v9766_v53  ;;  %v1344_v0 = vadd.f32 %v1328_v47, %v10504_v43  ;;  %v15540_v6 = vld [vmem:[#allocation106_spill] sm:$0xff]  ;;  %v15541_v47 = vld [vmem:[#allocation107_spill] sm:$0xff] }
 0x1c2   : > { %15534 = vst [vmem:[#allocation93_spill] sm:$0xff] %v10691_v7  ;;  %v1332_v61 = vmul.f32 %v15491_v58, %v1315_v28  ;;  %v1470_v20 = vadd.f32 %v15538_v16, %v1436_v63  ;;  %v10708_v1 = vmul.f32 %v10601_v15, %v9839_v17  ;;  %v1498_v34 = vmul.f32 %v15501_v59, %v1481_v41 }
 0x1c3   : > { %15537 = vst [vmem:[#allocation91_spill] sm:$0xff] %v10701_v9  ;;  %v1483_v33 = vmax.f32 %v1466_v55, 0.0  ;;  %v1422_v7 = vadd.f32 %v9982_v38, %v15540_v6  ;;  %v10713_v24 = vadd.f32 %v1494_v10, %v1342_v56  ;;  %v1485_v53 = vmax.f32 %v1468_v22, 0.0  ;;  %v10720_v63 = vpop.permute.xlu1 %1579  ;;  %v15543_v10 = vld [vmem:[#allocation108_spill] sm:$0xff]  ;;  %v15544_v6 = vld [vmem:[#allocation118_spill] sm:$0xff] }
 0x1c4   : > { %15539 = vst [vmem:[#allocation45_spill] sm:$0xff] %v10708_v1  ;;  %v1334_v43 = vmul.f32 %v15491_v58, %v1317_v18  ;;  %v1593_v28 = vadd.f32 %v15536_v37, %v15541_v47  ;;  %v10724_v16 = vmul.f32 %v10374_v30, %v15517_v50  ;;  %v1346_v41 = vadd.f32 %v1330_v4, %v10531_v52  ;;  %v8955_v1 = vld [vmem:[%s9537_s13 + $0x30] sm:$0xff]  ;;  %v10732_v18 = vpop.permute.xlu0 %1879  ;;  %v15546_v4 = vld [vmem:[#allocation105_spill] sm:$0xff] }
 0x1c5   : > { %v1336_v55 = vmul.f32 %v15491_v58, %v1319_v57  ;;  %v1624_v56 = vadd.f32 %v15543_v10, %v1590_v11  ;;  %v1424_v22 = vadd.f32 %v9982_v38, %v15544_v6  ;;  %2219 = vperm.xlu1 %8665, %v8955_v1   ;;  %v1348_v47 = vadd.f32 %v1332_v61, %v10557_v14  ;;  %v15547_v11 = vld [vmem:[#allocation119_spill] sm:$0xff] }
 0x1c6   : > { %15542 = vst [vmem:[#allocation90_spill] sm:$0xff] %v10724_v16  ;;  %v1487_v9 = vmax.f32 %v1470_v20, 0.0  ;;  %v10735_v62 = vadd.f32 %v1496_v44, %v1344_v0  ;;  %v10739_v52 = vmul.f32 %v10601_v15, %v9845_v49  ;;  %v1500_v50 = vmul.f32 %v15501_v59, %v1483_v33  ;;  %v15549_v0 = vld [vmem:[#allocation111_spill] sm:$0xff]  ;;  %v15597_v16 = vld [vmem:[#allocation28_spill] sm:$0xff] }
 0x1c7   : > { %v1456_v57 = vadd.f32 %v15546_v4, %v1422_v7  ;;  %v1595_v10 = vadd.f32 %v15536_v37, %v15547_v11  ;;  %v10747_v1 = vmul.f32 %v10374_v30, %v15524_v48  ;;  %v1502_v14 = vmul.f32 %v15501_v59, %v1485_v53  ;;  %v15550_v7 = vld [vmem:[#allocation109_spill] sm:$0xff]  ;;  %v10758_v48 = vpop.permute.xlu1 %1691 }
 0x1c8   : > { %15545 = vst [vmem:[#allocation54_spill] sm:$0xff] %v10739_v52  ;;  %v1350_v44 = vadd.f32 %v1334_v43, %v10578_v12  ;;  %v1627_v61 = vadd.f32 %v15549_v0, %v1593_v28  ;;  %v15119_v20 = vsub.s32 7, %v9749_v32  ;;  %v1352_v33 = vadd.f32 %v1336_v55, %v10595_v2  ;;  %v8956_v11 = vld [vmem:[%s9537_s13 + $0x40] sm:$0xff]  ;;  %v15551_v52 = vld [vmem:[#allocation127_spill] sm:$0xff]  ;;  %v10765_v28 = vpop.permute.xlu0 %1887  ;;  %v15569_v32 = vld [vmem:[#allocation18_spill] sm:$0xff] }
 0x1c9   : > { %15548 = vst [vmem:[#allocation95_spill] sm:$0xff] %v10747_v1  ;;  %v1641_v6 = vmax.f32 %v1624_v56, 0.0  ;;  %v1458_v4 = vadd.f32 %v15550_v7, %v1424_v22  ;;  %v10755_v58 = vadd.f32 %v1498_v34, %v1346_v41  ;;  %2227 = vperm.xlu1 %8665, %v8956_v11   ;;  %v1504_v53 = vmul.f32 %v15501_v59, %v1487_v9  ;;  %v15553_v41 = vld [vmem:[#allocation112_spill] sm:$0xff] }
 0x1ca   : > { %v1425_v12 = vadd.f32 %v9982_v38, %v15551_v52  ;;  %v10763_v43 = vadd.f32 %v1500_v50, %v1348_v47  ;;  %v10769_v2 = vmul.f32 %v10374_v30, %v15528_v40  ;;  %v1473_v34 = vmax.f32 %v1456_v57, 0.0  ;;  %v15554_v56 = vld [vmem:[#allocation128_spill] sm:$0xff]  ;;  %v15557_v52 = vld [vmem:[#allocation110_spill] sm:$0xff] }
 0x1cb   : > { %v1629_v55 = vadd.f32 %v15553_v41, %v1595_v10  ;;  %v1597_v22 = vadd.f32 %v15536_v37, %v15554_v56  ;;  %v10775_v0 = vstv %s10715_s24  ;;  %v1644_v9 = vmax.f32 %v1627_v61, 0.0  ;;  %v15559_v10 = vld [vmem:[#allocation134_spill] sm:$0xff]  ;;  %v10798_v11 = vpop.permute.xlu1 %1699  ;;  %v15561_v56 = vld [vmem:[#allocation135_spill] sm:$0xff]  ;;  %s12830_s24 = sld [smem:[#allocation8 + $0xa]] }
 0x1cc   : > { %15552 = vst [vmem:[#allocation59_spill] sm:$0xff] %v10769_v2  ;;  %v10777_v7 = vadd.f32 %v1502_v14, %v1350_v44  ;;  %v10782_v47 = vrot.slane %v9859_v13, %v15119_v20  ;;  %v10786_v40 = vmul.f32 %v10374_v30, %v9818_v19  ;;  %v10791_v50 = vmul.f32 %v15557_v52, %v1641_v6  ;;  %v8957_v44 = vld [vmem:[%s9537_s13 + $0x50] sm:$0xff]  ;;  %v15560_v13 = vld [vmem:[#allocation113_spill] sm:$0xff]  ;;  %v10803_v20 = vpop.permute.xlu0 %1895  ;;  %v15596_v2 = vld [vmem:[#allocation124_spill] sm:$0xff] }
 0x1cd   : > { %v1475_v57 = vmax.f32 %v1458_v4, 0.0  ;;  %v1427_v61 = vadd.f32 %v9982_v38, %v15559_v10  ;;  %v10795_v14 = vadd.f32 %v1504_v53, %v1352_v33  ;;  %2235 = vperm.xlu1 %8665, %v8957_v44   ;;  %v1459_v41 = vadd.f32 %v15560_v13, %v1425_v12  ;;  %v15565_v12 = vld [vmem:[#allocation114_spill] sm:$0xff] }
 0x1ce   : > { %15555 = vst [vmem:[#allocation48_spill] sm:$0xff] %v10782_v47  ;;  %15556 = vst [vmem:[#allocation94_spill] sm:$0xff] %v10786_v40  ;;  %v1599_v19 = vadd.f32 %v15536_v37, %v15561_v56  ;;  %v10807_v6 = vmul.f32 %v10775_v0, %v9772_v51  ;;  %v10811_v33 = vmul.f32 %v10775_v0, %v9775_v26  ;;  %v1646_v53 = vmax.f32 %v1629_v55, 0.0  ;;  %v15568_v51 = vld [vmem:[#allocation22_spill] sm:$0xff]  ;;  %v8961_v47 = vld [vmem:[%s9537_s13 + $0x70] sm:$0xff] }
 0x1cf   : > { %15558 = vst [vmem:[#allocation73_spill] sm:$0xff] %v10791_v50  ;;  %v10814_v4 = vmul.f32 %v15501_v59, %v1473_v34  ;;  %v1631_v10 = vadd.f32 %v15565_v12, %v1597_v22  ;;  %v10819_v44 = vmul.f32 %v10775_v0, %v9782_v31  ;;  %v10822_v13 = vmul.f32 %v15557_v52, %v1644_v9  ;;  %v15571_v22 = vld [vmem:[#allocation115_spill] sm:$0xff]  ;;  %v15572_v31 = vld [vmem:[#allocation57_spill] sm:$0xff] }
 0x1d0   : > { %15562 = vst [vmem:[#allocation50_spill] sm:$0xff] %v10807_v6  ;;  %15563 = vst [vmem:[#allocation97_spill] sm:$0xff] %v10811_v33  ;;  %v1429_v56 = vadd.f32 %v9982_v38, %v15568_v51  ;;  %v1601_v26 = vadd.f32 %v15536_v37, %v15569_v32  ;;  %v10830_v34 = vmul.f32 %v10374_v30, %v9839_v17  ;;  %v8958_v9 = vld [vmem:[%s9537_s13 + $0x60] sm:$0xff]  ;;  %v10840_v51 = vld [vmem:[%s9494_s1 + $0x38] sm:$0xff]  ;;  %v1476_v17 = vmax.f32 %v1459_v41, 0.0 }
 0x1d1   : > { %15564 = vst [vmem:[#allocation88_spill] sm:$0xff] %v10814_v4  ;;  %15566 = vst [vmem:[#allocation51_spill] sm:$0xff] %v10819_v44  ;;  %v1492_v55 = vmul.f32 %v15501_v59, %v1475_v57  ;;  %v1461_v12 = vadd.f32 %v15571_v22, %v1427_v61  ;;  %v1431_v50 = vadd.f32 %v9982_v38, %v15572_v31  ;;  %2243 = vperm.xlu1 %8665, %v8958_v9   ;;  %v15574_v4 = vld [vmem:[#allocation116_spill] sm:$0xff]  ;;  %v15575_v44 = vld [vmem:[#allocation66_spill] sm:$0xff]  ;;  %v10849_v22 = vpop.permute.xlu0 %1903 }
 0x1d2   : > { %15567 = vst [vmem:[#allocation99_spill] sm:$0xff] %v10822_v13  ;;  %15570 = vst [vmem:[#allocation96_spill] sm:$0xff] %v10830_v34  ;;  %v10837_v13 = vpop.permute.xlu1 %1703  ;;  %v10844_v32 = vmul.f32 %v10840_v51, %v10775_v0  ;;  %v1633_v57 = vadd.f32 %v15574_v4, %v1599_v19  ;;  %v1603_v61 = vadd.f32 %v15536_v37, %v15575_v44  ;;  %v1648_v33 = vmax.f32 %v1631_v10, 0.0  ;;  %v15579_v6 = vld [vmem:[#allocation25_spill] sm:$0xff]  ;;  %v15582_v34 = vld [vmem:[#allocation120_spill] sm:$0xff] }
 0x1d3   : > { %15576 = vst [vmem:[#allocation60_spill] sm:$0xff] %v10849_v22  ;;  %v10853_v31 = vmul.f32 %v10374_v30, %v9845_v49  ;;  %v10856_v9 = vmul.f32 %v15557_v52, %v1646_v53  ;;  %v1433_v41 = vadd.f32 %v9982_v38, %v15579_v6  ;;  %v15581_v4 = vld [vmem:[#allocation117_spill] sm:$0xff]  ;;  %v1635_v49 = vadd.f32 %v15582_v34, %v1601_v26 }
 0x1d4   : > { %15573 = vst [vmem:[#allocation55_spill] sm:$0xff] %v10844_v32  ;;  %v10861_v32 = vld [vmem:[%s9494_s1 + $0x48] sm:$0xff]  ;;  %v1463_v44 = vadd.f32 %v15581_v4, %v1429_v56  ;;  %v15583_v30 = vld [vmem:[#allocation61_spill] sm:$0xff]  ;;  %v10872_v53 = vstv %s10788_s21  ;;  %v10875_v10 = vadd.f32 %v1492_v55, %v10674_v25  ;;  %v1478_v6 = vmax.f32 %v1461_v12, 0.0  ;;  %v10892_v55 = vld [vmem:[%s9494_s1 + $0x58] sm:$0xff]  ;;  %s12848_s21 = sld [smem:[#allocation8 + $0xb]] }
 0x1d5   : > { %15577 = vst [vmem:[#allocation101_spill] sm:$0xff] %v10853_v31  ;;  %15578 = vst [vmem:[#allocation52_spill] sm:$0xff] %v10856_v9  ;;  %v10865_v19 = vmul.f32 %v10861_v32, %v10775_v0  ;;  %v1605_v31 = vadd.f32 %v15536_v37, %v15583_v30  ;;  %v15585_v9 = vld [vmem:[#allocation121_spill] sm:$0xff]  ;;  %2251 = vperm.xlu1 %8665, %v8961_v47   ;;  %v10886_v26 = vmul.f32 %v15501_v59, %v1476_v17  ;;  %v15589_v30 = vld [vmem:[#allocation122_spill] sm:$0xff]  ;;  %v10889_v25 = vpop.permute.xlu0 %1911 }
 0x1d6   : > { %15584 = vst [vmem:[#allocation53_spill] sm:$0xff] %v10872_v53  ;;  %v1465_v40 = vadd.f32 %v15585_v9, %v1431_v50  ;;  %v8962_v56 = vld [vmem:[%s9494_s1] sm:$0xff]  ;;  %v1650_v34 = vmax.f32 %v1633_v57, 0.0  ;;  %v1637_v53 = vadd.f32 %v15589_v30, %v1603_v61  ;;  %15590 = vst [vmem:[#allocation92_spill] sm:$0xff] %v10889_v25  ;;  %v10896_v47 = vmul.f32 %v10892_v55, %v10775_v0  ;;  %v15593_v12 = vld [vmem:[#allocation123_spill] sm:$0xff] }
 0x1d7   : > { %15580 = vst [vmem:[#allocation103_spill] sm:$0xff] %v10865_v19  ;;  %v10879_v19 = vpop.permute.xlu1 %1711  ;;  %v10883_v4 = vmul.f32 %v8962_v56, %v10601_v15  ;;  %15588 = vst [vmem:[#allocation100_spill] sm:$0xff] %v10886_v26  ;;  %v10899_v50 = vmul.f32 %v15557_v52, %v1648_v33  ;;  %v1467_v9 = vadd.f32 %v15593_v12, %v1433_v41  ;;  %v10905_v57 = vld [vmem:[%s9494_s1 + $0x10] sm:$0xff]  ;;  %v1480_v30 = vmax.f32 %v1463_v44, 0.0 }
 0x1d8   : > { %15586 = vst [vmem:[#allocation74_spill] sm:$0xff] %v10879_v19  ;;  %15591 = vst [vmem:[#allocation104_spill] sm:$0xff] %v10896_v47  ;;  %v10909_v61 = vmul.f32 %v10905_v57, %v10601_v15  ;;  %v1652_v26 = vmax.f32 %v1635_v49, 0.0  ;;  %v1639_v1 = vadd.f32 %v15596_v2, %v1605_v31  ;;  %v15598_v47 = vld [vmem:[#allocation129_spill] sm:$0xff]  ;;  %v1482_v41 = vmax.f32 %v1465_v40, 0.0  ;;  %v10922_v19 = vld [vmem:[%s9494_s1 + $0x68] sm:$0xff] }
 0x1d9   : > { %15587 = vst [vmem:[#allocation98_spill] sm:$0xff] %v10883_v4  ;;  %15592 = vst [vmem:[#allocation102_spill] sm:$0xff] %v10899_v50  ;;  %v15594_v4 = vld [vmem:[#allocation64_spill] sm:$0xff]  ;;  %v1759_v33 = vadd.f32 %v15598_v47, %v15597_v16  ;;  %v10915_v50 = vmul.f32 %v15501_v59, %v1478_v6  ;;  %v10926_v44 = vmul.f32 %v10922_v19, %v10775_v0  ;;  %v15603_v2 = vmov 1   ;;  %v15605_v49 = vld [vmem:[#allocation21_spill] sm:$0xff]  ;;  %v10936_v6 = vpop.permute.xlu0 %1919 }
 0x1da   : > { %v1435_v17 = vadd.f32 %v9982_v38, %v15594_v4  ;;  %15595 = vst [vmem:[#allocation106_spill] sm:$0xff] %v10909_v61  ;;  %v15600_v4 = vld [vmem:[#allocation31_spill] sm:$0xff]  ;;  %8667 = vset.pattern.permute.xlu1 %v15603_v2  ;;  %v10930_v16 = vmul.f32 %v15557_v52, %v1650_v34  ;;  %v1654_v31 = vmax.f32 %v1637_v53, 0.0  ;;  %v1762_v40 = vadd.f32 %v15598_v47, %v15605_v49  ;;  %v10944_v2 = vld [vmem:[%s9494_s1 + $0x78] sm:$0xff] }
 0x1db   : > { %15599 = vst [vmem:[#allocation107_spill] sm:$0xff] %v10915_v50  ;;  %v1437_v12 = vadd.f32 %v9982_v38, %v15600_v4  ;;  %v10919_v25 = vpop.permute.xlu1 %1719  ;;  %15602 = vst [vmem:[#allocation118_spill] sm:$0xff] %v10926_v44  ;;  %v1591_v38 = vadd.f32 %v15536_v37, %v10478_v3  ;;  %v1484_v4 = vmax.f32 %v1467_v9, 0.0  ;;  %v15607_v50 = vld [vmem:[#allocation125_spill] sm:$0xff]  ;;  %v10948_v53 = vmul.f32 %v10944_v2, %v10775_v0  ;;  %v15612_v9 = vld [vmem:[#allocation130_spill] sm:$0xff] }
 0x1dc   : > { %15601 = vst [vmem:[#allocation108_spill] sm:$0xff] %v10919_v25  ;;  %15604 = vst [vmem:[#allocation105_spill] sm:$0xff] %v10930_v16  ;;  %v1469_v61 = vadd.f32 %v15607_v50, %v1435_v17  ;;  %v8966_v25 = vld [vmem:[%s9494_s1 + $0x18] sm:$0xff]  ;;  %v10951_v34 = vmul.f32 %v15501_v59, %v1480_v30  ;;  %v10954_v3 = vmul.f32 %v15557_v52, %v1652_v26  ;;  %v1656_v49 = vmax.f32 %v1639_v1, 0.0  ;;  %v15614_v17 = vld [vmem:[#allocation126_spill] sm:$0xff] }
 0x1dd   : > { %15606 = vst [vmem:[#allocation119_spill] sm:$0xff] %v10936_v6  ;;  %v10941_v44 = vmul.f32 %v8966_v25, %v10601_v15  ;;  %15609 = vst [vmem:[#allocation109_spill] sm:$0xff] %v10948_v53  ;;  %v1793_v16 = vadd.f32 %v15612_v9, %v1759_v33  ;;  %v10958_v50 = vmul.f32 %v15501_v59, %v1482_v41  ;;  %v8968_v53 = vld [vmem:[%s9494_s1 + $0x28] sm:$0xff]  ;;  %v15617_v1 = vld [vmem:[#allocation133_spill] sm:$0xff] }
 0x1de   : > { %15610 = vst [vmem:[#allocation127_spill] sm:$0xff] %v10951_v34  ;;  %15611 = vst [vmem:[#allocation112_spill] sm:$0xff] %v10954_v3  ;;  %v1764_v6 = vadd.f32 %v15598_v47, %v10480_v23  ;;  %v10967_v30 = vmul.f32 %v8968_v53, %v10601_v15  ;;  %v10970_v26 = vmul.f32 %v15557_v52, %v1654_v31  ;;  %v15618_v33 = vld [vmem:[#allocation131_spill] sm:$0xff]  ;;  %v1486_v23 = vmax.f32 %v1469_v61, 0.0 }
 0x1df   : > { %15608 = vst [vmem:[#allocation111_spill] sm:$0xff] %v10941_v44  ;;  %15613 = vst [vmem:[#allocation128_spill] sm:$0xff] %v10958_v50  ;;  %v1471_v44 = vadd.f32 %v15614_v17, %v1437_v12  ;;  %v10963_v22 = vpop.permute.xlu1 %1727  ;;  %v1796_v3 = vadd.f32 %v15617_v1, %v1762_v40  ;;  %v1625_v9 = vadd.f32 %v15618_v33, %v1591_v38  ;;  %v10979_v17 = vpop.permute.xlu0 %2031  ;;  %v15620_v50 = vld [vmem:[#allocation77_spill] sm:$0xff]  ;;  %v1810_v38 = vmax.f32 %v1793_v16, 0.0  ;;  %v15623_v1 = vld [vmem:[#allocation136_spill] sm:$0xff] }
 0x1e0   : > { %15615 = vst [vmem:[#allocation110_spill] sm:$0xff] %v10967_v30  ;;  %15616 = vst [vmem:[#allocation134_spill] sm:$0xff] %v10970_v26  ;;  %v1592_v41 = vadd.f32 %v15536_v37, %v10507_v39  ;;  %v10977_v12 = vmul.f32 %v15501_v59, %v1484_v4  ;;  %v10982_v34 = vmul.f32 %v8962_v56, %v15620_v50  ;;  %v15625_v16 = vld [vmem:[#allocation137_spill] sm:$0xff]  ;;  %v15632_v30 = vld [vmem:[#allocation26_spill] sm:$0xff] }
 0x1e1   : > { %v10986_v31 = vmul.f32 %v10840_v51, %v10601_v15  ;;  %v10989_v40 = vmul.f32 %v15557_v52, %v1656_v49  ;;  %v1766_v39 = vadd.f32 %v15598_v47, %v10509_v27  ;;  %v1594_v4 = vadd.f32 %v15536_v37, %v10541_v36 }
 0x1e2   : > { %15619 = vst [vmem:[#allocation113_spill] sm:$0xff] %v10977_v12  ;;  %v1488_v61 = vmax.f32 %v1471_v44, 0.0  ;;  %v1798_v33 = vadd.f32 %v15623_v1, %v1764_v6  ;;  %v1596_v56 = vadd.f32 %v15536_v37, %v10586_v21  ;;  %v11001_v12 = vmul.f32 %v8966_v25, %v15620_v50 }
 0x1e3   : > { %15621 = vst [vmem:[#allocation135_spill] sm:$0xff] %v10986_v31  ;;  %15622 = vst [vmem:[#allocation114_spill] sm:$0xff] %v10989_v40  ;;  %v10998_v26 = vpop.permute.xlu1 %1735  ;;  %v1813_v49 = vmax.f32 %v1796_v3, 0.0  ;;  %v1642_v40 = vmax.f32 %v1625_v9, 0.0  ;;  %v1626_v31 = vadd.f32 %v15625_v16, %v1592_v41  ;;  %v11006_v27 = vmul.f32 %v10861_v32, %v10601_v15  ;;  %v11015_v6 = vpop.permute.xlu0 %2043  ;;  %v15628_v3 = vld [vmem:[#allocation132_spill] sm:$0xff]  ;;  %v15630_v16 = vld [vmem:[#allocation23_spill] sm:$0xff] }
 0x1e4   : > { %15624 = vst [vmem:[#allocation22_spill] sm:$0xff] %v11001_v12  ;;  %v11009_v36 = vmul.f32 %v15501_v59, %v1486_v23  ;;  %v1768_v44 = vadd.f32 %v15598_v47, %v10543_v8  ;;  %v1598_v21 = vadd.f32 %v15536_v37, %v10619_v42  ;;  %v11018_v25 = vmul.f32 %v8968_v53, %v15620_v50  ;;  %v15629_v41 = vld [vmem:[#allocation56_spill] sm:$0xff] }
 0x1e5   : > { %15626 = vst [vmem:[#allocation18_spill] sm:$0xff] %v11006_v27  ;;  %v1827_v9 = vmul.f32 %v15628_v3, %v1810_v38  ;;  %v1800_v1 = vadd.f32 %v15629_v41, %v1766_v39  ;;  %v1628_v27 = vadd.f32 %v15630_v16, %v1594_v4  ;;  %v1770_v23 = vadd.f32 %v15598_v47, %v10588_v46 }
 0x1e6   : > { %15627 = vst [vmem:[#allocation115_spill] sm:$0xff] %v11009_v36  ;;  %v11026_v36 = vmul.f32 %v15501_v59, %v1488_v61  ;;  %v1815_v8 = vmax.f32 %v1798_v33, 0.0  ;;  %v1630_v42 = vadd.f32 %v15632_v30, %v1596_v56  ;;  %v1600_v12 = vadd.f32 %v15536_v37, %v10655_v35  ;;  %v15634_v59 = vld [vmem:[#allocation65_spill] sm:$0xff]  ;;  %v15635_v33 = vld [vmem:[#allocation58_spill] sm:$0xff] }
 0x1e7   : > { %v11031_v53 = vpop.permute.xlu1 %1743  ;;  %v11034_v38 = vmul.f32 %v15628_v3, %v1813_v49  ;;  %v1659_v39 = vmul.f32 %v15557_v52, %v1642_v40  ;;  %v1643_v4 = vmax.f32 %v1626_v31, 0.0  ;;  %v11039_v46 = vmul.f32 %v10892_v55, %v10601_v15  ;;  %v11043_v30 = vpop.permute.xlu0 %2051  ;;  %v15637_v49 = vld [vmem:[#allocation27_spill] sm:$0xff] }
 0x1e8   : > { %15631 = vst [vmem:[#allocation57_spill] sm:$0xff] %v11026_v36  ;;  %v1802_v61 = vadd.f32 %v15634_v59, %v1768_v44  ;;  %v1632_v41 = vadd.f32 %v15635_v33, %v1598_v21  ;;  %v11047_v35 = vmul.f32 %v10840_v51, %v15620_v50  ;;  %v11051_v56 = vmul.f32 %v10922_v19, %v10601_v15  ;;  %v15638_v59 = vld [vmem:[#allocation19_spill] sm:$0xff] }
 0x1e9   : > { %15633 = vst [vmem:[#allocation116_spill] sm:$0xff] %v11039_v46  ;;  %v1817_v40 = vmax.f32 %v1800_v1, 0.0  ;;  %v1645_v31 = vmax.f32 %v1628_v27, 0.0  ;;  %v1804_v16 = vadd.f32 %v15637_v49, %v1770_v23  ;;  %v1602_v36 = vadd.f32 %v15536_v37, %v10687_v60 }
 0x1ea   : > { %15636 = vst [vmem:[#allocation66_spill] sm:$0xff] %v11047_v35  ;;  %v1832_v44 = vmul.f32 %v15628_v3, %v1815_v8  ;;  %v1647_v21 = vmax.f32 %v1630_v42, 0.0  ;;  %v1634_v33 = vadd.f32 %v15638_v59, %v1600_v12  ;;  %v1604_v51 = vadd.f32 %v15536_v37, %v10720_v63  ;;  %v15639_v12 = vld [vmem:[#allocation62_spill] sm:$0xff] }
 0x1eb   : > { %v11060_v35 = vpop.permute.xlu1 %1751  ;;  %v1675_v46 = vadd.f32 %v1659_v39, %v10642_v45  ;;  %v1660_v1 = vmul.f32 %v15557_v52, %v1643_v4  ;;  %v1772_v27 = vadd.f32 %v15598_v47, %v10621_v54  ;;  %v11068_v60 = vmul.f32 %v10861_v32, %v15620_v50  ;;  %v11072_v49 = vpop.permute.xlu0 %2059  ;;  %v15641_v39 = vld [vmem:[#allocation67_spill] sm:$0xff] }
 0x1ec   : > { %v1819_v23 = vmax.f32 %v1802_v61, 0.0  ;;  %v1649_v8 = vmax.f32 %v1632_v41, 0.0  ;;  %v1926_v42 = vadd.f32 %v15639_v12, %v10663_v5  ;;  %v11076_v37 = vmul.f32 %v10944_v2, %v10601_v15  ;;  %v15642_v41 = vld [vmem:[#allocation69_spill] sm:$0xff] }
 0x1ed   : > { %v1834_v45 = vmul.f32 %v15628_v3, %v1817_v40  ;;  %v1662_v63 = vmul.f32 %v15557_v52, %v1645_v31  ;;  %v1821_v54 = vmax.f32 %v1804_v16, 0.0  ;;  %v1636_v32 = vadd.f32 %v15641_v39, %v1602_v36 }
 0x1ee   : > { %15640 = vst [vmem:[#allocation25_spill] sm:$0xff] %v11076_v37  ;;  %v1664_v4 = vmul.f32 %v15557_v52, %v1647_v21  ;;  %v1651_v61 = vmax.f32 %v1634_v33, 0.0  ;;  %v1638_v59 = vadd.f32 %v15642_v41, %v1604_v51  ;;  %v11085_v5 = vmul.f32 %v10892_v55, %v15620_v50  ;;  %v15643_v37 = vld [vmem:[#allocation24_spill] sm:$0xff]  ;;  %v15644_v51 = vld [vmem:[#allocation17_spill] sm:$0xff]  ;;  %v8969_v41 = vld [vmem:[%s9494_s1 + $0x8] sm:$0xff] }
 0x1ef   : > { %v11088_v15 = vadd.f32 %v1660_v1, %v10875_v10  ;;  %v1806_v40 = vadd.f32 %v15643_v37, %v1772_v27  ;;  %v1929_v31 = vadd.f32 %v15639_v12, %v10697_v29  ;;  %v11093_v16 = vpop.permute.xlu1 %1863  ;;  %v11095_v36 = vadd.f32 %v1827_v9, %v1675_v46  ;;  %v11100_v55 = vpop.permute.xlu0 %2067 }
 0x1f0   : > { %v1836_v21 = vmul.f32 %v15628_v3, %v1819_v23  ;;  %v1666_v33 = vmul.f32 %v15557_v52, %v1649_v8  ;;  %v1960_v39 = vadd.f32 %v15644_v51, %v1926_v42  ;;  %v11104_v10 = vmul.f32 %v8969_v41, %v10775_v0  ;;  %v15645_v51 = vld [vmem:[#allocation68_spill] sm:$0xff] }
 0x1f1   : > { %v1678_v1 = vadd.f32 %v1662_v63, %v10713_v24  ;;  %v1838_v29 = vmul.f32 %v15628_v3, %v1821_v54  ;;  %v1653_v27 = vmax.f32 %v1636_v32, 0.0  ;;  %v11110_v9 = vmul.f32 %v10922_v19, %v15620_v50 }
 0x1f2   : > { %v1680_v46 = vadd.f32 %v1664_v4, %v10735_v62  ;;  %v1668_v23 = vmul.f32 %v15557_v52, %v1651_v61  ;;  %v1655_v8 = vmax.f32 %v1638_v59, 0.0  ;;  %v1931_v42 = vadd.f32 %v15639_v12, %v10732_v18 }
 0x1f3   : > { %v1823_v37 = vmax.f32 %v1806_v40, 0.0  ;;  %v1963_v41 = vadd.f32 %v15645_v51, %v1929_v31  ;;  %v1758_v24 = vadd.f32 %v15598_v47, %v10758_v48  ;;  %v11119_v63 = vpop.permute.xlu1 %1867  ;;  %v11123_v19 = vmul.f32 %v10905_v57, %v10775_v0  ;;  %v11128_v18 = vpop.permute.xlu0 %2075  ;;  %v8970_v57 = vld [vmem:[%s9494_s1 + $0x20] sm:$0xff] }
 0x1f4   : > { %v1682_v62 = vadd.f32 %v1666_v33, %v10755_v58  ;;  %v1977_v54 = vmax.f32 %v1960_v39, 0.0  ;;  %v1933_v32 = vadd.f32 %v15639_v12, %v10765_v28  ;;  %v11132_v4 = vmul.f32 %v10944_v2, %v15620_v50  ;;  %v15649_v31 = vld [vmem:[#allocation29_spill] sm:$0xff] }
 0x1f5   : > { %15646 = vst [vmem:[#allocation117_spill] sm:$0xff] %v11123_v19  ;;  %v1670_v48 = vmul.f32 %v15557_v52, %v1653_v27  ;;  %v1760_v61 = vadd.f32 %v15598_v47, %v10798_v11  ;;  %v11139_v59 = vmul.f32 %v8970_v57, %v10775_v0  ;;  %v11142_v58 = vadd.f32 %v11034_v38, %v1678_v1  ;;  %v15650_v11 = vld [vmem:[#allocation70_spill] sm:$0xff]  ;;  %v8971_v57 = vld [vmem:[%s9494_s1 + $0x30] sm:$0xff]  ;;  %v15652_v1 = vld [vmem:[#allocation20_spill] sm:$0xff] }
 0x1f6   : > { %15647 = vst [vmem:[#allocation120_spill] sm:$0xff] %v11132_v4  ;;  %v1684_v28 = vadd.f32 %v1668_v23, %v10763_v43  ;;  %v1672_v40 = vmul.f32 %v15557_v52, %v1655_v8  ;;  %v1965_v33 = vadd.f32 %v15649_v31, %v1931_v42  ;;  %v11147_v2 = vadd.f32 %v1832_v44, %v1680_v46  ;;  %v15653_v52 = vld [vmem:[#allocation72_spill] sm:$0xff]  ;;  %v8972_v31 = vld [vmem:[%s9494_s1 + $0x40] sm:$0xff] }
 0x1f7   : > { %15648 = vst [vmem:[#allocation61_spill] sm:$0xff] %v11139_v59  ;;  %v1840_v50 = vmul.f32 %v15628_v3, %v1823_v37  ;;  %v1980_v39 = vmax.f32 %v1963_v41, 0.0  ;;  %v1792_v27 = vadd.f32 %v15650_v11, %v1758_v24  ;;  %v11151_v51 = vpop.permute.xlu1 %1875  ;;  %v11155_v38 = vmul.f32 %v8971_v57, %v10775_v0  ;;  %v11163_v46 = vpop.permute.xlu0 %2083  ;;  %v15654_v37 = vld [vmem:[#allocation32_spill] sm:$0xff] }
 0x1f8   : > { %v11158_v43 = vmul.f32 %v15652_v1, %v1977_v54  ;;  %v1967_v23 = vadd.f32 %v15653_v52, %v1933_v32  ;;  %v1935_v44 = vadd.f32 %v15639_v12, %v10803_v20  ;;  %v11165_v8 = vadd.f32 %v1834_v45, %v1682_v62  ;;  %v15656_v20 = vld [vmem:[#allocation60_spill] sm:$0xff] }
 0x1f9   : > { %15651 = vst [vmem:[#allocation121_spill] sm:$0xff] %v11155_v38  ;;  %v1686_v42 = vadd.f32 %v1670_v48, %v10777_v7  ;;  %v1794_v41 = vadd.f32 %v15654_v37, %v1760_v61  ;;  %v1761_v24 = vadd.f32 %v15598_v47, %v10837_v13  ;;  %v11173_v54 = vmul.f32 %v8972_v31, %v10775_v0  ;;  %v15657_v48 = vld [vmem:[#allocation74_spill] sm:$0xff]  ;;  %v15658_v61 = vld [vmem:[#allocation92_spill] sm:$0xff]  ;;  %v15663_v38 = vld [vmem:[#allocation119_spill] sm:$0xff] }
 0x1fa   : > { %v1688_v32 = vadd.f32 %v1672_v40, %v10795_v14  ;;  %v1982_v11 = vmax.f32 %v1965_v33, 0.0  ;;  %v1937_v57 = vadd.f32 %v15639_v12, %v15656_v20  ;;  %v11178_v45 = vadd.f32 %v1836_v21, %v1684_v28  ;;  %v15659_v40 = vld [vmem:[#allocation33_spill] sm:$0xff]  ;;  %v15660_v31 = vld [vmem:[#allocation108_spill] sm:$0xff]  ;;  %v8973_v28 = vld [vmem:[%s9494_s1 + $0x50] sm:$0xff] }
 0x1fb   : > { %15655 = vst [vmem:[#allocation122_spill] sm:$0xff] %v11173_v54  ;;  %v11181_v7 = vmul.f32 %v15652_v1, %v1980_v39  ;;  %v1809_v62 = vmax.f32 %v1792_v27, 0.0  ;;  %v1763_v13 = vadd.f32 %v15598_v47, %v15657_v48  ;;  %v1939_v52 = vadd.f32 %v15639_v12, %v15658_v61  ;;  %v11187_v37 = vpop.permute.xlu1 %1883  ;;  %v15662_v20 = vld [vmem:[#allocation35_spill] sm:$0xff]  ;;  %v11199_v59 = vpop.permute.xlu0 %2195 }
 0x1fc   : > { %v1984_v14 = vmax.f32 %v1967_v23, 0.0  ;;  %v1969_v33 = vadd.f32 %v15659_v40, %v1935_v44  ;;  %v1765_v21 = vadd.f32 %v15598_v47, %v15660_v31  ;;  %v11194_v39 = vmul.f32 %v8973_v28, %v10775_v0  ;;  %v15664_v44 = vld [vmem:[#allocation76_spill] sm:$0xff]  ;;  %v8974_v31 = vld [vmem:[%s9494_s1 + $0x60] sm:$0xff] }
 0x1fd   : > { %v1811_v27 = vmax.f32 %v1794_v41, 0.0  ;;  %v1795_v54 = vadd.f32 %v15662_v20, %v1761_v24  ;;  %v1941_v48 = vadd.f32 %v15639_v12, %v15663_v38  ;;  %v11201_v61 = vadd.f32 %v1838_v29, %v1686_v42  ;;  %v15666_v24 = vld [vmem:[#allocation36_spill] sm:$0xff]  ;;  %v15667_v20 = vld [vmem:[#allocation38_spill] sm:$0xff] }
 0x1fe   : > { %15661 = vst [vmem:[#allocation123_spill] sm:$0xff] %v11194_v39  ;;  %v11204_v23 = vmul.f32 %v15652_v1, %v1982_v11  ;;  %v1971_v40 = vadd.f32 %v15664_v44, %v1937_v57  ;;  %v11209_v4 = vmul.f32 %v8974_v31, %v10775_v0  ;;  %v11211_v28 = vadd.f32 %v1840_v50, %v1688_v32  ;;  %v15669_v31 = vld [vmem:[#allocation78_spill] sm:$0xff]  ;;  %v15670_v50 = vld [vmem:[#allocation83_spill] sm:$0xff] }
 0x1ff   : > { %v11214_v41 = vmul.f32 %v15628_v3, %v1809_v62  ;;  %v1797_v38 = vadd.f32 %v15666_v24, %v1763_v13  ;;  %v1973_v29 = vadd.f32 %v15667_v20, %v1939_v52  ;;  %v1767_v42 = vadd.f32 %v15598_v47, %v10963_v22  ;;  %v1892_v11 = vpop.permute.xlu1 %1891  ;;  %v15671_v13 = vld [vmem:[#allocation79_spill] sm:$0xff]  ;;  %v11230_v20 = vpop.permute.xlu0 %2207 }
 0x200   : > { %15665 = vst [vmem:[#allocation64_spill] sm:$0xff] %v11209_v4  ;;  %v11221_v57 = vmul.f32 %v15652_v1, %v1984_v14  ;;  %v1986_v44 = vmax.f32 %v1969_v33, 0.0  ;;  %v1799_v4 = vadd.f32 %v15669_v31, %v1765_v21  ;;  %v2095_v32 = vadd.f32 %v15670_v50, %v10979_v17  ;;  %v8975_v21 = vld [vmem:[%s9494_s1 + $0x70] sm:$0xff]  ;;  %v15673_v31 = vld [vmem:[#allocation40_spill] sm:$0xff] }
 0x201   : > { %v1828_v62 = vmul.f32 %v15628_v3, %v1811_v27  ;;  %v1812_v39 = vmax.f32 %v1795_v54, 0.0  ;;  %v1975_v24 = vadd.f32 %v15671_v13, %v1941_v48  ;;  %v1769_v52 = vadd.f32 %v15598_v47, %v10998_v26 }
 0x202   : > { %15668 = vst [vmem:[#allocation124_spill] sm:$0xff] %v11221_v57  ;;  %v1988_v22 = vmax.f32 %v1971_v40, 0.0  ;;  %v2098_v14 = vadd.f32 %v15670_v50, %v11015_v6  ;;  %v1771_v33 = vadd.f32 %v15598_v47, %v11031_v53  ;;  %v11238_v17 = vmul.f32 %v8975_v21, %v10775_v0  ;;  %v15675_v6 = vld [vmem:[#allocation41_spill] sm:$0xff] }
 0x203   : > { %v1814_v27 = vmax.f32 %v1797_v38, 0.0  ;;  %v1990_v54 = vmax.f32 %v1973_v29, 0.0  ;;  %v1801_v48 = vadd.f32 %v15673_v31, %v1767_v42  ;;  %v1927_v26 = vadd.f32 %v15639_v12, %v11093_v16  ;;  %v1900_v13 = vpop.permute.xlu1 %1899  ;;  %v15676_v42 = vld [vmem:[#allocation82_spill] sm:$0xff]  ;;  %v11256_v16 = vpop.permute.xlu0 %2215 }
 0x204   : > { %15672 = vst [vmem:[#allocation28_spill] sm:$0xff] %v11238_v17  ;;  %v11244_v40 = vmul.f32 %v15652_v1, %v1986_v44  ;;  %v1816_v19 = vmax.f32 %v1799_v4, 0.0  ;;  %v2129_v57 = vadd.f32 %v15675_v6, %v2095_v32  ;;  %v2100_v53 = vadd.f32 %v15670_v50, %v11043_v30  ;;  %v15678_v4 = vld [vmem:[#allocation42_spill] sm:$0xff]  ;;  %v15679_v32 = vld [vmem:[#allocation85_spill] sm:$0xff] }
 0x205   : > { %v11250_v0 = vadd.f32 %v1828_v62, %v11088_v15  ;;  %v11253_v38 = vmul.f32 %v15628_v3, %v1812_v39  ;;  %v1992_v29 = vmax.f32 %v1975_v24, 0.0  ;;  %v1803_v21 = vadd.f32 %v15676_v42, %v1769_v52  ;;  %v15681_v24 = vld [vmem:[#allocation47_spill] sm:$0xff] }
 0x206   : > { %15674 = vst [vmem:[#allocation129_spill] sm:$0xff] %v11244_v40  ;;  %v11259_v44 = vmul.f32 %v15652_v1, %v1988_v22  ;;  %v2132_v31 = vadd.f32 %v15678_v4, %v2098_v14  ;;  %v1805_v6 = vadd.f32 %v15679_v32, %v1771_v33  ;;  %v1773_v30 = vadd.f32 %v15598_v47, %v11060_v35  ;;  %v15682_v14 = vld [vmem:[#allocation43_spill] sm:$0xff]  ;;  %v15684_v32 = vld [vmem:[#allocation44_spill] sm:$0xff] }
 0x207   : > { %v11266_v15 = vmul.f32 %v15628_v3, %v1814_v27  ;;  %v11269_v39 = vmul.f32 %v15652_v1, %v1990_v54  ;;  %v1818_v62 = vmax.f32 %v1801_v48, 0.0  ;;  %v1961_v52 = vadd.f32 %v15681_v24, %v1927_v26  ;;  %v1908_v42 = vpop.permute.xlu1 %1907  ;;  %v2224_v48 = vpop.permute.xlu0 %2223 }
 0x208   : > { %15677 = vst [vmem:[#allocation31_spill] sm:$0xff] %v11259_v44  ;;  %v11273_v22 = vmul.f32 %v15628_v3, %v1816_v19  ;;  %v2146_v17 = vmax.f32 %v2129_v57, 0.0  ;;  %v2134_v4 = vadd.f32 %v15682_v14, %v2100_v53  ;;  %v1930_v33 = vadd.f32 %v15639_v12, %v11151_v51  ;;  %v15686_v14 = vld [vmem:[#allocation86_spill] sm:$0xff] }
 0x209   : > { %15680 = vst [vmem:[#allocation21_spill] sm:$0xff] %v11269_v39  ;;  %v11279_v47 = vmul.f32 %v15652_v1, %v1992_v29  ;;  %v1820_v35 = vmax.f32 %v1803_v21, 0.0  ;;  %v2102_v27 = vadd.f32 %v15670_v50, %v11072_v49  ;;  %v1932_v54 = vadd.f32 %v15639_v12, %v11187_v37 }
 0x20a   : > { %v2149_v26 = vmax.f32 %v2132_v31, 0.0  ;;  %v1822_v19 = vmax.f32 %v1805_v6, 0.0  ;;  %v1807_v57 = vadd.f32 %v15684_v32, %v1773_v30  ;;  %v1928_v53 = vadd.f32 %v15639_v12, %v11119_v63  ;;  %v15687_v6 = vld [vmem:[#allocation90_spill] sm:$0xff] }
 0x20b   : > { %15683 = vst [vmem:[#allocation125_spill] sm:$0xff] %v11279_v47  ;;  %v11289_v51 = vmul.f32 %v15628_v3, %v1818_v62  ;;  %v1978_v29 = vmax.f32 %v1961_v52, 0.0  ;;  %v2104_v21 = vadd.f32 %v15670_v50, %v11100_v55  ;;  %v1934_v49 = vadd.f32 %v15639_v12, %v1892_v11  ;;  %v1916_v24 = vpop.permute.xlu1 %1915  ;;  %v15689_v62 = vld [vmem:[#allocation87_spill] sm:$0xff]  ;;  %v2232_v44 = vpop.permute.xlu0 %2231 }
 0x20c   : > { %v2163_v37 = vmul.f32 %v15686_v14, %v2146_v17  ;;  %v2151_v47 = vmax.f32 %v2134_v4, 0.0  ;;  %v2106_v31 = vadd.f32 %v15670_v50, %v11128_v18  ;;  %v1964_v30 = vadd.f32 %v15687_v6, %v1930_v33  ;;  %v15690_v52 = vld [vmem:[#allocation95_spill] sm:$0xff] }
 0x20d   : > { %15685 = vst [vmem:[#allocation130_spill] sm:$0xff] %v11289_v51  ;;  %v11299_v63 = vmul.f32 %v15628_v3, %v1820_v35  ;;  %v2136_v32 = vadd.f32 %v15689_v62, %v2102_v27  ;;  %v1966_v39 = vadd.f32 %v15690_v52, %v1932_v54  ;;  %v1936_v55 = vadd.f32 %v15639_v12, %v1900_v13  ;;  %v15692_v18 = vld [vmem:[#allocation91_spill] sm:$0xff]  ;;  %v15693_v35 = vld [vmem:[#allocation93_spill] sm:$0xff] }
 0x20e   : > { %v11305_v11 = vmul.f32 %v15686_v14, %v2149_v26  ;;  %v11308_v17 = vmul.f32 %v15628_v3, %v1822_v19  ;;  %v1824_v4 = vmax.f32 %v1807_v57, 0.0  ;;  %v1962_v40 = vadd.f32 %v15692_v18, %v1928_v53  ;;  %v15694_v54 = vld [vmem:[#allocation59_spill] sm:$0xff]  ;;  %v15695_v52 = vld [vmem:[#allocation45_spill] sm:$0xff]  ;;  %v15696_v53 = vld [vmem:[#allocation48_spill] sm:$0xff] }
 0x20f   : > { %15688 = vst [vmem:[#allocation126_spill] sm:$0xff] %v11299_v63  ;;  %v1995_v33 = vmul.f32 %v15652_v1, %v1978_v29  ;;  %v2138_v6 = vadd.f32 %v15693_v35, %v2104_v21  ;;  %v2108_v27 = vadd.f32 %v15670_v50, %v11163_v46  ;;  %v1968_v62 = vadd.f32 %v15694_v54, %v1934_v49  ;;  %v15697_v18 = vld [vmem:[#allocation94_spill] sm:$0xff]  ;;  %v2240_v35 = vpop.permute.xlu0 %2239 }
 0x210   : > { %15691 = vst [vmem:[#allocation133_spill] sm:$0xff] %v11308_v17  ;;  %v2168_v13 = vmul.f32 %v15686_v14, %v2151_v47  ;;  %v2140_v26 = vadd.f32 %v15695_v52, %v2106_v31  ;;  %v1981_v63 = vmax.f32 %v1964_v30, 0.0  ;;  %v1938_v19 = vadd.f32 %v15639_v12, %v1908_v42  ;;  %v2028_v17 = vpop.permute.xlu1 %2027  ;;  %v15699_v42 = vld [vmem:[#allocation54_spill] sm:$0xff] }
 0x211   : > { %v2153_v57 = vmax.f32 %v2136_v32, 0.0  ;;  %v1983_v51 = vmax.f32 %v1966_v39, 0.0  ;;  %v2262_v29 = vadd.f32 %v15696_v53, %v11199_v59  ;;  %v1970_v21 = vadd.f32 %v15697_v18, %v1936_v55 }
 0x212   : > { %v11323_v46 = vmul.f32 %v15628_v3, %v1824_v4  ;;  %v1979_v49 = vmax.f32 %v1962_v40, 0.0  ;;  %v2265_v47 = vadd.f32 %v15696_v53, %v11230_v20  ;;  %v1940_v31 = vadd.f32 %v15639_v12, %v1916_v24  ;;  %v15700_v3 = vld [vmem:[#allocation96_spill] sm:$0xff]  ;;  %v15701_v12 = vld [vmem:[#allocation50_spill] sm:$0xff] }
 0x213   : > { %v2155_v30 = vmax.f32 %v2138_v6, 0.0  ;;  %v2142_v54 = vadd.f32 %v15699_v42, %v2108_v27  ;;  %v1985_v32 = vmax.f32 %v1968_v62, 0.0  ;;  %v2011_v39 = vadd.f32 %v1995_v33, %v11095_v36  ;;  %v2248_v27 = vpop.permute.xlu0 %2247  ;;  %v15702_v36 = vld [vmem:[#allocation97_spill] sm:$0xff] }
 0x214   : > { %15698 = vst [vmem:[#allocation131_spill] sm:$0xff] %v11323_v46  ;;  %v2157_v52 = vmax.f32 %v2140_v26, 0.0  ;;  %v1998_v59 = vmul.f32 %v15652_v1, %v1981_v63  ;;  %v2267_v55 = vadd.f32 %v15696_v53, %v11256_v16  ;;  %v1972_v4 = vadd.f32 %v15700_v3, %v1938_v19  ;;  %v2036_v40 = vpop.permute.xlu1 %2035  ;;  %v15703_v26 = vld [vmem:[#allocation101_spill] sm:$0xff] }
 0x215   : > { %v2170_v18 = vmul.f32 %v15686_v14, %v2153_v57  ;;  %v2000_v20 = vmul.f32 %v15652_v1, %v1983_v51  ;;  %v2296_v24 = vadd.f32 %v15701_v12, %v2262_v29  ;;  %v1987_v6 = vmax.f32 %v1970_v21, 0.0  ;;  %v15704_v29 = vld [vmem:[#allocation51_spill] sm:$0xff] }
 0x216   : > { %v1996_v62 = vmul.f32 %v15652_v1, %v1979_v49  ;;  %v2299_v33 = vadd.f32 %v15702_v36, %v2265_v47  ;;  %v2269_v63 = vadd.f32 %v15696_v53, %v2224_v48  ;;  %v1974_v42 = vadd.f32 %v15703_v26, %v1940_v31 }
 0x217   : > { %v2172_v16 = vmul.f32 %v15686_v14, %v2155_v30  ;;  %v2159_v19 = vmax.f32 %v2142_v54, 0.0  ;;  %v2002_v3 = vmul.f32 %v15652_v1, %v1985_v32  ;;  %v11343_v57 = vadd.f32 %v2163_v37, %v2011_v39  ;;  %v2256_v36 = vpop.permute.xlu0 %2255  ;;  %v15705_v32 = vld [vmem:[#allocation55_spill] sm:$0xff] }
 0x218   : > { %v2174_v51 = vmul.f32 %v15686_v14, %v2157_v52  ;;  %v2301_v21 = vadd.f32 %v15704_v29, %v2267_v55  ;;  %v1989_v12 = vmax.f32 %v1972_v4, 0.0  ;;  %v2040_v46 = vpop.permute.xlu1 %2039  ;;  %v2014_v49 = vadd.f32 %v1998_v59, %v11142_v58  ;;  %v15709_v29 = vld [vmem:[#allocation106_spill] sm:$0xff] }
 0x219   : > { %v2313_v47 = vmax.f32 %v2296_v24, 0.0  ;;  %v2004_v48 = vmul.f32 %v15652_v1, %v1987_v6  ;;  %v2271_v31 = vadd.f32 %v15696_v53, %v2232_v44  ;;  %v2016_v30 = vadd.f32 %v2000_v20, %v11147_v2 }
 0x21a   : > { %v2316_v54 = vmax.f32 %v2299_v33, 0.0  ;;  %v2303_v37 = vadd.f32 %v15705_v32, %v2269_v63  ;;  %v1991_v39 = vmax.f32 %v1974_v42, 0.0  ;;  %v11353_v52 = vadd.f32 %v1996_v62, %v11250_v0  ;;  %v15706_v33 = vld [vmem:[#allocation103_spill] sm:$0xff]  ;;  %v15707_v62 = vld [vmem:[#allocation53_spill] sm:$0xff] }
 0x21b   : > { %v2176_v55 = vmul.f32 %v15686_v14, %v2159_v19  ;;  %v2094_v4 = vadd.f32 %v15670_v50, %v2028_v17  ;;  %v2096_v58 = vadd.f32 %v15670_v50, %v2036_v40  ;;  %v2018_v59 = vadd.f32 %v2002_v3, %v11165_v8 }
 0x21c   : > { %v2318_v24 = vmax.f32 %v2301_v21, 0.0  ;;  %v2006_v44 = vmul.f32 %v15652_v1, %v1989_v12  ;;  %v2273_v2 = vadd.f32 %v15696_v53, %v2240_v35  ;;  %v2048_v20 = vpop.permute.xlu1 %2047  ;;  %v11362_v6 = vadd.f32 %v11305_v11, %v2014_v49  ;;  %v1188_v19 = vpop.permute.xlu0 %1187  ;;  %v15708_v11 = vld [vmem:[#allocation98_spill] sm:$0xff]  ;;  %v15710_v12 = vld [vmem:[#allocation84_spill] sm:$0xff] }
 0x21d   : > { %v2305_v0 = vadd.f32 %v15706_v33, %v2271_v31  ;;  %v11366_v63 = vmul.f32 %v15707_v62, %v2313_v47  ;;  %v11368_v26 = vadd.f32 %v2168_v13, %v2016_v30  ;;  %v2020_v17 = vadd.f32 %v2004_v48, %v11178_v45  ;;  %v15711_v13 = vld [vmem:[#allocation104_spill] sm:$0xff]  ;;  %v15713_v33 = vld [vmem:[#allocation111_spill] sm:$0xff] }
 0x21e   : > { %v2320_v40 = vmax.f32 %v2303_v37, 0.0  ;;  %v2008_v8 = vmul.f32 %v15652_v1, %v1991_v39  ;;  %v2275_v42 = vadd.f32 %v15696_v53, %v2248_v27  ;;  %v11374_v35 = vmul.f32 %v15707_v62, %v2316_v54  ;;  %v15712_v39 = vld [vmem:[#allocation118_spill] sm:$0xff] }
 0x21f   : > { %v2128_v3 = vadd.f32 %v15708_v11, %v2094_v4  ;;  %v2130_v21 = vadd.f32 %v15709_v29, %v2096_v58  ;;  %v1254_v49 = vadd.f32 %v15710_v12, %v1188_v19  ;;  %v11379_v47 = vadd.f32 %v2170_v18, %v2018_v59  ;;  %v15715_v19 = vld [vmem:[#allocation89_spill] sm:$0xff]  ;;  %v15716_v11 = vld [vmem:[#allocation22_spill] sm:$0xff] }
 0x220   : > { %v2307_v31 = vadd.f32 %v15711_v13, %v2273_v2  ;;  %v2097_v45 = vadd.f32 %v15670_v50, %v2040_v46  ;;  %v2056_v48 = vpop.permute.xlu1 %2055  ;;  %v11384_v1 = vmul.f32 %v15707_v62, %v2318_v24  ;;  %v2022_v27 = vadd.f32 %v2006_v44, %v11201_v61  ;;  %v1200_v58 = vpop.permute.xlu0 %1199 }
 0x221   : > { %v2322_v30 = vmax.f32 %v2305_v0, 0.0  ;;  %v2277_v54 = vadd.f32 %v15696_v53, %v2256_v36  ;;  %v1288_v32 = vadd.f32 %v10982_v34, %v1254_v49  ;;  %v11389_v37 = vadd.f32 %v2172_v16, %v2020_v17 }
 0x222   : > { %v2309_v18 = vadd.f32 %v15712_v39, %v2275_v42  ;;  %v2099_v4 = vadd.f32 %v15670_v50, %v2048_v20  ;;  %v11394_v46 = vmul.f32 %v15707_v62, %v2320_v40  ;;  %v2024_v59 = vadd.f32 %v2008_v8, %v11211_v28  ;;  %v15714_v20 = vld [vmem:[#allocation109_spill] sm:$0xff]  ;;  %v15719_v39 = vld [vmem:[#allocation135_spill] sm:$0xff] }
 0x223   : > { %v2145_v24 = vmax.f32 %v2128_v3, 0.0  ;;  %v2147_v2 = vmax.f32 %v2130_v21, 0.0  ;;  %v1305_v61 = vmax.f32 %v1288_v32, 0.0  ;;  %v1257_v44 = vadd.f32 %v15710_v12, %v1200_v58  ;;  %v15717_v3 = vld [vmem:[#allocation110_spill] sm:$0xff] }
 0x224   : > { %v2324_v36 = vmax.f32 %v2307_v31, 0.0  ;;  %v2131_v34 = vadd.f32 %v15713_v33, %v2097_v45  ;;  %v2101_v16 = vadd.f32 %v15670_v50, %v2056_v48  ;;  %v2064_v0 = vpop.permute.xlu1 %2063  ;;  %v11400_v17 = vadd.f32 %v2174_v51, %v2022_v27  ;;  %v1208_v13 = vpop.permute.xlu0 %1207  ;;  %v15718_v48 = vld [vmem:[#allocation63_spill] sm:$0xff]  ;;  %v15721_v33 = vld [vmem:[#allocation18_spill] sm:$0xff] }
 0x225   : > { %v2311_v42 = vadd.f32 %v15714_v20, %v2277_v54  ;;  %v1322_v40 = vmul.f32 %v15715_v19, %v1305_v61  ;;  %v1291_v29 = vadd.f32 %v15716_v11, %v1257_v44  ;;  %v11406_v28 = vmul.f32 %v15707_v62, %v2322_v30  ;;  %v15720_v44 = vld [vmem:[#allocation88_spill] sm:$0xff] }
 0x226   : > { %v2326_v8 = vmax.f32 %v2309_v18, 0.0  ;;  %v2133_v21 = vadd.f32 %v15717_v3, %v2099_v4  ;;  %v2103_v49 = vadd.f32 %v15670_v50, %v2064_v0  ;;  %v11410_v31 = vadd.f32 %v2176_v55, %v2024_v59 }
 0x227   : > { %v2162_v51 = vmul.f32 %v15686_v14, %v2145_v24  ;;  %v2164_v45 = vmul.f32 %v15686_v14, %v2147_v2  ;;  %v1338_v27 = vadd.f32 %v1322_v40, %v15718_v48  ;;  %v1308_v54 = vmax.f32 %v1291_v29, 0.0  ;;  %v15722_v40 = vld [vmem:[#allocation30_spill] sm:$0xff] }
 0x228   : > { %v2148_v32 = vmax.f32 %v2131_v34, 0.0  ;;  %v2135_v58 = vadd.f32 %v15719_v39, %v2101_v16  ;;  %v1259_v30 = vadd.f32 %v15710_v12, %v1208_v13  ;;  %v2072_v18 = vpop.permute.xlu1 %2071  ;;  %v11418_v4 = vmul.f32 %v15707_v62, %v2324_v36  ;;  %v1216_v20 = vpop.permute.xlu0 %1215  ;;  %v15723_v36 = vld [vmem:[#allocation116_spill] sm:$0xff] }
 0x229   : > { %v2328_v61 = vmax.f32 %v2311_v42, 0.0  ;;  %v1506_v55 = vadd.f32 %v15720_v44, %v1338_v27  ;;  %v1325_v59 = vmul.f32 %v15715_v19, %v1308_v54  ;;  %v2105_v24 = vadd.f32 %v15670_v50, %v2072_v18  ;;  %v15724_v27 = vld [vmem:[#allocation73_spill] sm:$0xff]  ;;  %v15725_v54 = vld [vmem:[#allocation100_spill] sm:$0xff] }
 0x22a   : > { %v2150_v2 = vmax.f32 %v2133_v21, 0.0  ;;  %v2137_v0 = vadd.f32 %v15721_v33, %v2103_v49  ;;  %v1293_v34 = vadd.f32 %v11018_v25, %v1259_v30  ;;  %v11426_v16 = vmul.f32 %v15707_v62, %v2326_v8  ;;  %v15726_v8 = vld [vmem:[#allocation66_spill] sm:$0xff] }
 0x22b   : > { %v1341_v11 = vadd.f32 %v1325_v59, %v15722_v40  ;;  %v2139_v29 = vadd.f32 %v15723_v36, %v2105_v24  ;;  %v1261_v42 = vadd.f32 %v15710_v12, %v1216_v20  ;;  %v11432_v3 = vadd.f32 %v2164_v45, %v11353_v52 }
 0x22c   : > { %v2165_v13 = vmul.f32 %v15686_v14, %v2148_v32  ;;  %v2152_v21 = vmax.f32 %v2135_v58, 0.0  ;;  %v1310_v48 = vmax.f32 %v1293_v34, 0.0  ;;  %v2080_v49 = vpop.permute.xlu1 %2079  ;;  %v1674_v25 = vadd.f32 %v15724_v27, %v1506_v55  ;;  %v1224_v32 = vpop.permute.xlu0 %1223 }
 0x22d   : > { %v1509_v39 = vadd.f32 %v15725_v54, %v1341_v11  ;;  %v1295_v30 = vadd.f32 %v15726_v8, %v1261_v42  ;;  %v2107_v18 = vadd.f32 %v15670_v50, %v2080_v49  ;;  %v11440_v44 = vmul.f32 %v15707_v62, %v2328_v61  ;;  %v15727_v61 = vld [vmem:[#allocation34_spill] sm:$0xff]  ;;  %v15729_v49 = vld [vmem:[#allocation107_spill] sm:$0xff]  ;;  %v15731_v8 = vld [vmem:[#allocation25_spill] sm:$0xff] }
 0x22e   : > { %v2167_v59 = vmul.f32 %v15686_v14, %v2150_v2  ;;  %v2154_v52 = vmax.f32 %v2137_v0, 0.0  ;;  %v1327_v45 = vmul.f32 %v15715_v19, %v1310_v48  ;;  %v1842_v58 = vadd.f32 %v11214_v41, %v1674_v25  ;;  %v15728_v0 = vld [vmem:[#allocation99_spill] sm:$0xff] }
 0x22f   : > { %v2156_v24 = vmax.f32 %v2139_v29, 0.0  ;;  %v1312_v33 = vmax.f32 %v1295_v30, 0.0  ;;  %v2141_v55 = vadd.f32 %v11051_v56, %v2107_v18  ;;  %v1263_v34 = vadd.f32 %v15710_v12, %v1224_v32  ;;  %v15733_v32 = vld [vmem:[#allocation127_spill] sm:$0xff] }
 0x230   : > { %v11448_v20 = vmul.f32 %v15686_v14, %v2152_v21  ;;  %v1343_v40 = vadd.f32 %v1327_v45, %v15727_v61  ;;  %v2088_v11 = vpop.permute.xlu1 %2087  ;;  %v2010_v2 = vadd.f32 %v11158_v43, %v1842_v58  ;;  %v1677_v36 = vadd.f32 %v15728_v0, %v1509_v39  ;;  %v1232_v27 = vpop.permute.xlu0 %1231  ;;  %v15734_v0 = vld [vmem:[#allocation37_spill] sm:$0xff] }
 0x231   : > { %v1329_v42 = vmul.f32 %v15715_v19, %v1312_v33  ;;  %v2158_v41 = vmax.f32 %v2141_v55, 0.0  ;;  %v1297_v29 = vadd.f32 %v11068_v60, %v1263_v34  ;;  %v2109_v56 = vadd.f32 %v15670_v50, %v2088_v11  ;;  %v15730_v60 = vld [vmem:[#allocation75_spill] sm:$0xff] }
 0x232   : > { %v11457_v48 = vmul.f32 %v15686_v14, %v2154_v52  ;;  %v1511_v21 = vadd.f32 %v15729_v49, %v1343_v40  ;;  %v2178_v25 = vadd.f32 %v2162_v51, %v2010_v2  ;;  %v1845_v54 = vadd.f32 %v11253_v38, %v1677_v36  ;;  %v15732_v52 = vld [vmem:[#allocation52_spill] sm:$0xff] }
 0x233   : > { %v11468_v43 = vmul.f32 %v15686_v14, %v2156_v24  ;;  %v1345_v39 = vadd.f32 %v1329_v42, %v15730_v60  ;;  %v1314_v50 = vmax.f32 %v1297_v29, 0.0  ;;  %v2143_v30 = vadd.f32 %v15731_v8, %v2109_v56  ;;  %v802_v2 = vld [vmem:[%s11465_s30 + $0x78] sm:$0xff]  ;;  %v15735_v29 = vld [vmem:[#allocation102_spill] sm:$0xff] }
 0x234   : > { %v1265_v18 = vadd.f32 %v15710_v12, %v1232_v27  ;;  %v11474_v51 = vadd.f32 %v11366_v63, %v2178_v25  ;;  %v2013_v38 = vadd.f32 %v11181_v7, %v1845_v54  ;;  %v1679_v45 = vadd.f32 %v15732_v52, %v1511_v21  ;;  %v2200_v34 = vpop.permute.xlu1 %2199  ;;  %v15736_v27 = vld [vmem:[#allocation128_spill] sm:$0xff] }
 0x235   : > { %v1513_v58 = vadd.f32 %v15733_v32, %v1345_v39  ;;  %v11480_v24 = vmul.f32 %v15686_v14, %v2158_v41  ;;  %v1331_v33 = vmul.f32 %v15715_v19, %v1314_v50  ;;  %v2160_v55 = vmax.f32 %v2143_v30, 0.0  ;;  %v1240_v40 = vpop.permute.xlu0 %1239  ;;  %v15740_v32 = vld [vmem:[#allocation117_spill] sm:$0xff] }
 0x236   : > { %v1299_v61 = vadd.f32 %v11085_v5, %v1265_v18  ;;  %2362 = vmax.xlane.f32.xlu1 %v11474_v51  ;;  %v2263_v63 = vadd.f32 %v15696_v53, %v2200_v34  ;;  %v2181_v11 = vadd.f32 %v2165_v13, %v2013_v38  ;;  %v1847_v7 = vadd.f32 %v11266_v15, %v1679_v45  ;;  %v15737_v18 = vld [vmem:[#allocation124_spill] sm:$0xff] }
 0x237   : > { %v1347_v36 = vadd.f32 %v1331_v33, %v15734_v0  ;;  %v11490_v42 = vmul.f32 %v15686_v14, %v2160_v55  ;;  %v1267_v41 = vadd.f32 %v15710_v12, %v1240_v40  ;;  %v1681_v56 = vadd.f32 %v15735_v29, %v1513_v58  ;;  %v15742_v40 = vld [vmem:[#allocation130_spill] sm:$0xff]  ;;  %v801_v29 = vld [vmem:[%s11465_s30 + $0x70] sm:$0xff] }
 0x238   : > { %v1316_v49 = vmax.f32 %v1299_v61, 0.0  ;;  %v2297_v5 = vadd.f32 %v11104_v10, %v2263_v63  ;;  %v11496_v21 = vadd.f32 %v11374_v35, %v2181_v11  ;;  %v2015_v13 = vadd.f32 %v11204_v23, %v1847_v7  ;;  %v2204_v54 = vpop.permute.xlu1 %2203  ;;  %v15743_v7 = vld [vmem:[#allocation113_spill] sm:$0xff] }
 0x239   : > { %v1515_v15 = vadd.f32 %v15736_v27, %v1347_v36  ;;  %v1301_v25 = vadd.f32 %v11110_v9, %v1267_v41  ;;  %v1849_v14 = vadd.f32 %v11273_v22, %v1681_v56  ;;  %v11502_v60 = vand.u32 4294901760, %v802_v2  ;;  %v1248_v35 = vpop.permute.xlu0 %1247  ;;  %v15738_v9 = vld [vmem:[#allocation105_spill] sm:$0xff]  ;;  %v15739_v22 = vld [vmem:[#allocation39_spill] sm:$0xff]  ;;  %v15744_v56 = vld [vmem:[#allocation80_spill] sm:$0xff] }
 0x23a   : > { %v1333_v39 = vmul.f32 %v15715_v19, %v1316_v49  ;;  %v2314_v50 = vmax.f32 %v2297_v5, 0.0  ;;  %2368 = vmax.xlane.f32.xlu1 %v11496_v21  ;;  %v2264_v10 = vadd.f32 %v15696_v53, %v2204_v54  ;;  %v2183_v8 = vadd.f32 %v2167_v59, %v2015_v13  ;;  %v15741_v59 = vld [vmem:[#allocation120_spill] sm:$0xff] }
 0x23b   : > { %v1318_v30 = vmax.f32 %v1301_v25, 0.0  ;;  %v1269_v23 = vadd.f32 %v15710_v12, %v1248_v35  ;;  %v2017_v38 = vadd.f32 %v15737_v18, %v1849_v14  ;;  %v1683_v52 = vadd.f32 %v15738_v9, %v1515_v15  ;;  %7877 = vmatprep.subr.mxu0 %v11502_v60  ;;  %v15746_v15 = vld [vmem:[#allocation61_spill] sm:$0xff]  ;;  %v15747_v14 = vld [vmem:[#allocation112_spill] sm:$0xff]  ;;  %v15749_v9 = vld [vmem:[#allocation126_spill] sm:$0xff] }
 0x23c   : > { %v1349_v45 = vadd.f32 %v1333_v39, %v15739_v22  ;;  %v2298_v58 = vadd.f32 %v15740_v32, %v2264_v10  ;;  %v11514_v33 = vadd.f32 %v11384_v1, %v2183_v8  ;;  %v2331_v55 = vmul.f32 %v15707_v62, %v2314_v50  ;;  %7878 = vmatpush3.msra.mxu0 %v11502_v60  ;;  %v2212_v61 = vpop.permute.xlu1 %2211  ;;  %v15748_v50 = vld [vmem:[#allocation115_spill] sm:$0xff]  ;;  %v15750_v22 = vld [vmem:[#allocation81_spill] sm:$0xff]  ;;  %v15751_v32 = vld [vmem:[#allocation134_spill] sm:$0xff] }
 0x23d   : > { %v1335_v12 = vmul.f32 %v15715_v19, %v1318_v30  ;;  %v1303_v34 = vadd.f32 %v15741_v59, %v1269_v23  ;;  %v2185_v63 = vadd.f32 %v11448_v20, %v2017_v38  ;;  %v1851_v11 = vadd.f32 %v15742_v40, %v1683_v52  ;;  %v15745_v20 = vld [vmem:[#allocation129_spill] sm:$0xff]  ;;  %v800_v52 = vld [vmem:[%s11465_s30 + $0x68] sm:$0xff]  ;;  %v15753_v59 = vld [vmem:[#allocation31_spill] sm:$0xff] }
 0x23e   : > { %v1517_v0 = vadd.f32 %v15743_v7, %v1349_v45  ;;  %v2315_v36 = vmax.f32 %v2298_v58, 0.0  ;;  %2372 = vmax.xlane.f32.xlu1 %v11514_v33  ;;  %v2266_v1 = vadd.f32 %v15696_v53, %v2212_v61  ;;  %v11526_v41 = vadd.f32 %v2331_v55, %v11343_v57  ;;  %v15752_v55 = vld [vmem:[#allocation121_spill] sm:$0xff] }
 0x23f   : > { %v1351_v49 = vadd.f32 %v1335_v12, %v15744_v56  ;;  %v1320_v5 = vmax.f32 %v1303_v34, 0.0  ;;  %v11531_v13 = vadd.f32 %v11394_v46, %v2185_v63  ;;  %v2019_v27 = vadd.f32 %v15745_v20, %v1851_v11  ;;  %v15755_v11 = vld [vmem:[#allocation133_spill] sm:$0xff] }
 0x240   : > { %v2300_v25 = vadd.f32 %v15746_v15, %v2266_v1  ;;  %2364 = vmax.xlane.f32.xlu0 %v11526_v41  ;;  %v2332_v54 = vmul.f32 %v15707_v62, %v2315_v36  ;;  %v1685_v39 = vadd.f32 %v15747_v14, %v1517_v0  ;;  %v11539_v57 = vsub.f32 %v802_v2, %v11502_v60  ;;  %v2220_v46 = vpop.permute.xlu1 %2219  ;;  %v15756_v20 = vld [vmem:[#allocation21_spill] sm:$0xff]  ;;  %v15757_v15 = vld [vmem:[#allocation114_spill] sm:$0xff] }
 0x241   : > { %v1519_v10 = vadd.f32 %v15748_v50, %v1351_v49  ;;  %v1337_v35 = vmul.f32 %v15715_v19, %v1320_v5  ;;  %v2187_v8 = vadd.f32 %v11457_v48, %v2019_v27  ;;  %v11544_v30 = vand.u32 4294901760, %v801_v29  ;;  %v799_v5 = vld [vmem:[%s11465_s30 + $0x60] sm:$0xff] }
 0x242   : > { %v2317_v23 = vmax.f32 %v2300_v25, 0.0  ;;  %2376 = vmax.xlane.f32.xlu1 %v11531_v13  ;;  %v2268_v18 = vadd.f32 %v15696_v53, %v2220_v46  ;;  %v11549_v38 = vadd.f32 %v2332_v54, %v11432_v3  ;;  %v1853_v2 = vadd.f32 %v15749_v9, %v1685_v39  ;;  %v15758_v39 = vld [vmem:[#allocation122_spill] sm:$0xff] }
 0x243   : > { %v1353_v45 = vadd.f32 %v1337_v35, %v15750_v22  ;;  %v11555_v19 = vadd.f32 %v11406_v28, %v2187_v8  ;;  %v1687_v48 = vadd.f32 %v15751_v32, %v1519_v10  ;;  %v11559_v58 = vand.u32 4294901760, %v11539_v57  ;;  %7879 = vmatprep.subr.mxu0 %v11544_v30  ;;  %v15754_v28 = vld [vmem:[#allocation57_spill] sm:$0xff]  ;;  %v15759_v8 = vld [vmem:[#allocation131_spill] sm:$0xff]  ;;  %v796_v32 = vld [vmem:[%s11465_s30 + $0x48] sm:$0xff] }
 0x244   : > { %v2302_v12 = vadd.f32 %v15752_v55, %v2268_v18  ;;  %2366 = vmax.xlane.f32.xlu0 %v11549_v38  ;;  %v2334_v3 = vmul.f32 %v15707_v62, %v2317_v23  ;;  %v2021_v34 = vadd.f32 %v15753_v59, %v1853_v2  ;;  %v11567_v61 = vsub.f32 %v801_v29, %v11544_v30  ;;  %v2228_v40 = vpop.permute.xlu1 %2227  ;;  %v15761_v55 = vld [vmem:[#allocation125_spill] sm:$0xff] }
 0x245   : > { %v1521_v63 = vadd.f32 %v15754_v28, %v1353_v45  ;;  %v1855_v7 = vadd.f32 %v15755_v11, %v1687_v48  ;;  %v2719_v0 = vsub.f32 %v11539_v57, %v11559_v58  ;;  %v11573_v36 = vand.u32 4294901760, %v800_v52  ;;  %7880 = vmatpush3.msra.mxu0 %v11544_v30  ;;  %v797_v45 = vld [vmem:[%s11465_s30 + $0x50] sm:$0xff] }
 0x246   : > { %v2319_v1 = vmax.f32 %v2302_v12, 0.0  ;;  %2380 = vmax.xlane.f32.xlu1 %v11555_v19  ;;  %v2270_v56 = vadd.f32 %v15696_v53, %v2228_v40  ;;  %v11579_v29 = vadd.f32 %v2334_v3, %v11362_v6  ;;  %v2189_v49 = vadd.f32 %v11468_v43, %v2021_v34 }
 0x247   : > { %v2023_v27 = vadd.f32 %v15756_v20, %v1855_v7  ;;  %v1689_v25 = vadd.f32 %v15757_v15, %v1521_v63  ;;  %v2720_v54 = vand.u32 4294901760, %v2719_v0  ;;  %v11586_v14 = vand.u32 4294901760, %v11567_v61  ;;  %7881 = vmatprep.subr.mxu0 %v11573_v36 }
 0x248   : > { %v2304_v50 = vadd.f32 %v15758_v39, %v2270_v56  ;;  %2370 = vmax.xlane.f32.xlu0 %v11579_v29  ;;  %v11592_v6 = vadd.f32 %v11418_v4, %v2189_v49  ;;  %v2336_v43 = vmul.f32 %v15707_v62, %v2319_v1  ;;  %v11596_v10 = vsub.f32 %v800_v52, %v11573_v36  ;;  %v2236_v35 = vpop.permute.xlu1 %2235  ;;  %v798_v4 = vld [vmem:[%s11465_s30 + $0x58] sm:$0xff]  ;;  %v795_v56 = vld [vmem:[%s11465_s30 + $0x40] sm:$0xff] }
 0x249   : > { %v2191_v46 = vadd.f32 %v11480_v24, %v2023_v27  ;;  %v1857_v23 = vadd.f32 %v15759_v8, %v1689_v25  ;;  %7933 = vmatprep.subr.mxu1 %v2720_v54  ;;  %v2726_v18 = vsub.f32 %v11567_v61, %v11586_v14  ;;  %v11602_v9 = vand.u32 4294901760, %v799_v5  ;;  %7882 = vmatpush3.msra.mxu0 %v11573_v36 }
 0x24a   : > { %v2321_v2 = vmax.f32 %v2304_v50, 0.0  ;;  %2384 = vmax.xlane.f32.xlu1 %v11592_v6  ;;  %v2272_v52 = vadd.f32 %v15696_v53, %v2236_v35  ;;  %v11609_v22 = vadd.f32 %v2336_v43, %v11368_v26  ;;  %7934 = vmatpush3.msra.mxu1 %v2720_v54  ;;  %v11612_v24 = vand.u32 4294901760, %v11596_v10  ;;  %v15762_v26 = vld [vmem:[#allocation123_spill] sm:$0xff] }
 0x24b   : > { %v11617_v48 = vadd.f32 %v11426_v16, %v2191_v46  ;;  %v2025_v12 = vadd.f32 %v15761_v55, %v1857_v23  ;;  %v2727_v3 = vand.u32 4294901760, %v2726_v18  ;;  %v11621_v59 = vsub.f32 %v799_v5, %v11602_v9  ;;  %7883 = vmatprep.subr.mxu0 %v11602_v9 }
 0x24c   : > { %15760 = vst [vmem:[#allocation77_spill] sm:$0xff] %v11612_v24  ;;  %v2306_v34 = vadd.f32 %v15762_v26, %v2272_v52  ;;  %2374 = vmax.xlane.f32.xlu0 %v11609_v22  ;;  %v2338_v28 = vmul.f32 %v15707_v62, %v2321_v2  ;;  %v2733_v63 = vsub.f32 %v11596_v10, %v11612_v24  ;;  %v11629_v16 = vand.u32 4294901760, %v798_v4  ;;  %v2244_v40 = vpop.permute.xlu1 %2243  ;;  %v793_v2 = vld [vmem:[%s11465_s30 + $0x30] sm:$0xff] }
 0x24d   : > { %7884 = vmatpush3.msra.mxu0 %v11602_v9  ;;  %v2193_v11 = vadd.f32 %v11490_v42, %v2025_v12  ;;  %7935 = vmatprep.subr.mxu1 %v2727_v3  ;;  %v11634_v7 = vand.u32 4294901760, %v11621_v59  ;;  %v11636_v0 = vand.u32 4294901760, %v797_v45  ;;  %v11638_v1 = vand.u32 4294901760, %v796_v32  ;;  %v794_v42 = vld [vmem:[%s11465_s30 + $0x38] sm:$0xff] }
 0x24e   : > { %v2323_v49 = vmax.f32 %v2306_v34, 0.0  ;;  %2388 = vmax.xlane.f32.xlu1 %v11617_v48  ;;  %v2274_v5 = vadd.f32 %v15696_v53, %v2244_v40  ;;  %v11644_v20 = vadd.f32 %v2338_v28, %v11379_v47  ;;  %7936 = vmatpush3.msra.mxu1 %v2727_v3  ;;  %v2734_v27 = vand.u32 4294901760, %v2733_v63  ;;  %v15764_v47 = vld [vmem:[#allocation64_spill] sm:$0xff] }
 0x24f   : > { %15763 = vst [vmem:[#allocation136_spill] sm:$0xff] %v11634_v7  ;;  %v11648_v15 = vadd.f32 %v11440_v44, %v2193_v11  ;;  %v2740_v25 = vsub.f32 %v11621_v59, %v11634_v7  ;;  %v11653_v54 = vsub.f32 %v798_v4, %v11629_v16  ;;  %v11656_v39 = vsub.f32 %v797_v45, %v11636_v0  ;;  %v792_v11 = vld [vmem:[%s11465_s30 + $0x28] sm:$0xff] }
 0x250   : > { %7885 = vmatprep.subr.mxu0 %v11629_v16  ;;  %v2308_v50 = vadd.f32 %v15764_v47, %v2274_v5  ;;  %2378 = vmax.xlane.f32.xlu0 %v11644_v20  ;;  %v2340_v43 = vmul.f32 %v15707_v62, %v2323_v49  ;;  %v11663_v44 = vsub.f32 %v796_v32, %v11638_v1  ;;  %v11665_v35 = vand.u32 4294901760, %v795_v56  ;;  %v2252_v46 = vpop.permute.xlu1 %2251  ;;  %v791_v49 = vld [vmem:[%s11465_s30 + $0x20] sm:$0xff]  ;;  %v789_v47 = vld [vmem:[%s11465_s30 + $0x10] sm:$0xff] }
 0x251   : > { %7937 = vmatprep.subr.mxu1 %v2734_v27  ;;  %v2741_v8 = vand.u32 4294901760, %v2740_v25  ;;  %v11668_v23 = vand.u32 4294901760, %v11653_v54  ;;  %v11671_v18 = vand.u32 4294901760, %v11656_v39  ;;  %v11673_v4 = vand.u32 4294901760, %v794_v42  ;;  %7886 = vmatpush3.msra.mxu0 %v11629_v16  ;;  %v790_v25 = vld [vmem:[%s11465_s30 + $0x18] sm:$0xff] }
 0x252   : > { %7938 = vmatpush3.msra.mxu1 %v2734_v27  ;;  %v2325_v52 = vmax.f32 %v2308_v50, 0.0  ;;  %2392 = vmax.xlane.f32.xlu1 %v11648_v15  ;;  %v2276_v45 = vadd.f32 %v15696_v53, %v2252_v46  ;;  %v11680_v32 = vadd.f32 %v2340_v43, %v11389_v37  ;;  %v11683_v55 = vand.u32 4294901760, %v11663_v44  ;;  %v15768_v37 = vld [vmem:[#allocation28_spill] sm:$0xff] }
 0x253   : > { %15765 = vst [vmem:[#allocation137_spill] sm:$0xff] %v11668_v23  ;;  %15766 = vst [vmem:[#allocation132_spill] sm:$0xff] %v11671_v18  ;;  %7887 = vmatprep.subr.mxu0 %v11636_v0  ;;  %7939 = vmatprep.subr.mxu1 %v2741_v8  ;;  %v2747_v12 = vsub.f32 %v11653_v54, %v11668_v23  ;;  %v2754_v3 = vsub.f32 %v11656_v39, %v11671_v18  ;;  %v11701_v40 = vand.u32 4294901760, %v793_v2 }
 0x254   : > { %15767 = vst [vmem:[#allocation56_spill] sm:$0xff] %v11683_v55  ;;  %v11691_v26 = vsub.f32 %v795_v56, %v11665_v35  ;;  %v11694_v53 = vsub.f32 %v794_v42, %v11673_v4  ;;  %v2310_v34 = vadd.f32 %v15768_v37, %v2276_v45  ;;  %2382 = vmax.xlane.f32.xlu0 %v11680_v32 }
 0x255   : > { %v2342_v28 = vmul.f32 %v15707_v62, %v2325_v52  ;;  %7940 = vmatpush3.msra.mxu1 %v2741_v8  ;;  %v2761_v63 = vsub.f32 %v11663_v44, %v11683_v55  ;;  %v2748_v56 = vand.u32 4294901760, %v2747_v12  ;;  %v2755_v5 = vand.u32 4294901760, %v2754_v3  ;;  %7888 = vmatpush3.msra.mxu0 %v11636_v0  ;;  %v788_v3 = vld [vmem:[%s11465_s30 + $0x8] sm:$0xff] }
 0x256   : > { %v11706_v27 = vand.u32 4294901760, %v11691_v26  ;;  %v11709_v42 = vand.u32 4294901760, %v11694_v53  ;;  %v2327_v50 = vmax.f32 %v2310_v34, 0.0  ;;  %v11718_v8 = vsub.f32 %v793_v2, %v11701_v40  ;;  %7889 = vmatprep.subr.mxu0 %v11638_v1 }
 0x257   : > { %v11715_v43 = vadd.f32 %v2342_v28, %v11400_v17  ;;  %v2762_v46 = vand.u32 4294901760, %v2761_v63  ;;  %7941 = vmatprep.subr.mxu1 %v2748_v56  ;;  %v11725_v12 = vand.u32 4294901760, %v792_v11  ;;  %7890 = vmatpush3.msra.mxu0 %v11638_v1  ;;  %v11728_v17 = vand.u32 4294901760, %v791_v49  ;;  %v787_v63 = vld [vmem:[%s11465_s30] sm:$0xff] }
 0x258   : > { %15769 = vst [vmem:[#allocation23_spill] sm:$0xff] %v11706_v27  ;;  %15770 = vst [vmem:[#allocation26_spill] sm:$0xff] %v11709_v42  ;;  %v2768_v52 = vsub.f32 %v11691_v26, %v11706_v27  ;;  %v2775_v45 = vsub.f32 %v11694_v53, %v11709_v42  ;;  %v2344_v2 = vmul.f32 %v15707_v62, %v2327_v50  ;;  %7942 = vmatpush3.msra.mxu1 %v2748_v56 }
 0x259   : > { %2386 = vmax.xlane.f32.xlu0 %v11715_v43  ;;  %v11734_v37 = vand.u32 4294901760, %v11718_v8  ;;  %v11736_v34 = vand.u32 4294901760, %v790_v25  ;;  %v11738_v28 = vand.u32 4294901760, %v789_v47  ;;  %7943 = vmatprep.subr.mxu1 %v2755_v5  ;;  %v11742_v55 = vsub.f32 %v792_v11, %v11725_v12 }
 0x25a   : > { %v2769_v42 = vand.u32 4294901760, %v2768_v52  ;;  %v2776_v27 = vand.u32 4294901760, %v2775_v45  ;;  %7891 = vmatprep.subr.mxu0 %v11665_v35  ;;  %v11746_v18 = vsub.f32 %v791_v49, %v11728_v17  ;;  %v11749_v62 = vadd.f32 %v2344_v2, %v11410_v31  ;;  %7944 = vmatpush3.msra.mxu1 %v2755_v5 }
 0x25b   : > { %15771 = vst [vmem:[#allocation65_spill] sm:$0xff] %v11734_v37  ;;  %v2782_v56 = vsub.f32 %v11718_v8, %v11734_v37  ;;  %7892 = vmatpush3.msra.mxu0 %v11665_v35  ;;  %v11755_v50 = vsub.f32 %v790_v25, %v11736_v34  ;;  %v11757_v52 = vand.u32 4294901760, %v788_v3  ;;  %7945 = vmatprep.subr.mxu1 %v2762_v46  ;;  %v11760_v11 = vand.u32 4294901760, %v11742_v55 }
 0x25c   : > { %v11763_v49 = vand.u32 4294901760, %v11746_v18  ;;  %7893 = vmatprep.subr.mxu0 %v11673_v4  ;;  %v11767_v31 = vsub.f32 %v789_v47, %v11738_v28  ;;  %v11769_v5 = vand.u32 4294901760, %v787_v63  ;;  %7946 = vmatpush3.msra.mxu1 %v2762_v46 }
 0x25d   : > { %15772 = vst [vmem:[#allocation58_spill] sm:$0xff] %v11760_v11  ;;  %2390 = vmax.xlane.f32.xlu0 %v11749_v62  ;;  %v2783_v25 = vand.u32 4294901760, %v2782_v56  ;;  %v11773_v45 = vand.u32 4294901760, %v11755_v50  ;;  %v11776_v2 = vsub.f32 %v788_v3, %v11757_v52  ;;  %7947 = vmatprep.subr.mxu1 %v2769_v42  ;;  %v2789_v37 = vsub.f32 %v11742_v55, %v11760_v11 }
 0x25e   : > { %15773 = vst [vmem:[#allocation27_spill] sm:$0xff] %v11763_v49  ;;  %v2796_v47 = vsub.f32 %v11746_v18, %v11763_v49  ;;  %7894 = vmatpush3.msra.mxu0 %v11673_v4  ;;  %v11784_v23 = vand.u32 4294901760, %v11767_v31  ;;  %v11787_v46 = vsub.f32 %v787_v63, %v11769_v5  ;;  %7948 = vmatpush3.msra.mxu1 %v2769_v42 }
 0x25f   : > { %15774 = vst [vmem:[#allocation19_spill] sm:$0xff] %v11773_v45  ;;  %7895 = vmatprep.subr.mxu0 %v11701_v40  ;;  %7949 = vmatprep.subr.mxu1 %v2776_v27  ;;  %v2790_v3 = vand.u32 4294901760, %v2789_v37  ;;  %v2803_v56 = vsub.f32 %v11755_v50, %v11773_v45  ;;  %v11794_v49 = vand.u32 4294901760, %v11776_v2 }
 0x260   : > { %15775 = vst [vmem:[#allocation62_spill] sm:$0xff] %v11784_v23  ;;  %7896 = vmatpush3.msra.mxu0 %v11701_v40  ;;  %7950 = vmatpush3.msra.mxu1 %v2776_v27  ;;  %v2797_v11 = vand.u32 4294901760, %v2796_v47  ;;  %v2810_v42 = vsub.f32 %v11767_v31, %v11784_v23  ;;  %v11801_v37 = vand.u32 4294901760, %v11787_v46 }
 0x261   : > { %15776 = vst [vmem:[#allocation67_spill] sm:$0xff] %v11794_v49  ;;  %7897 = vmatprep.subr.mxu0 %v11725_v12  ;;  %7951 = vmatprep.subr.mxu1 %v2783_v25  ;;  %v2804_v63 = vand.u32 4294901760, %v2803_v56  ;;  %v2817_v27 = vsub.f32 %v11776_v2, %v11794_v49 }
 0x262   : > { %7898 = vmatpush3.msra.mxu0 %v11725_v12  ;;  %15777 = vst [vmem:[#allocation69_spill] sm:$0xff] %v11801_v37  ;;  %7952 = vmatpush3.msra.mxu1 %v2783_v25  ;;  %v2811_v47 = vand.u32 4294901760, %v2810_v42  ;;  %v2824_v23 = vsub.f32 %v11787_v46, %v11801_v37 }
 0x263   : > { %7899 = vmatprep.subr.mxu0 %v11728_v17  ;;  %7953 = vmatprep.subr.mxu1 %v2790_v3  ;;  %v2818_v25 = vand.u32 4294901760, %v2817_v27 }
 0x264   : > { %7900 = vmatpush3.msra.mxu0 %v11728_v17  ;;  %7954 = vmatpush3.msra.mxu1 %v2790_v3  ;;  %v2825_v3 = vand.u32 4294901760, %v2824_v23 }
 0x265   : > { %7901 = vmatprep.subr.mxu0 %v11736_v34  ;;  %7955 = vmatprep.subr.mxu1 %v2797_v11 }
 0x266   : > { %7902 = vmatpush3.msra.mxu0 %v11736_v34  ;;  %7956 = vmatpush3.msra.mxu1 %v2797_v11 }
 0x267   : > { %7903 = vmatprep.subr.mxu0 %v11738_v28  ;;  %7957 = vmatprep.subr.mxu1 %v2804_v63 }
 0x268   : > { %7904 = vmatpush3.msra.mxu0 %v11738_v28  ;;  %7958 = vmatpush3.msra.mxu1 %v2804_v63 }
 0x269   : > { %7905 = vmatprep.subr.mxu0 %v11757_v52  ;;  %7959 = vmatprep.subr.mxu1 %v2811_v47 }
 0x26a   : > { %7906 = vmatpush3.msra.mxu0 %v11757_v52  ;;  %7960 = vmatpush3.msra.mxu1 %v2811_v47 }
 0x26b   : > { %7907 = vmatprep.subr.mxu0 %v11769_v5  ;;  %7961 = vmatprep.subr.mxu1 %v2818_v25 }
 0x26c   : > { %7908 = vmatpush3.msra.mxu0 %v11769_v5  ;;  %7962 = vmatpush3.msra.mxu1 %v2818_v25 }
 0x26d   : > { %7989 = vmatprep.subr.mxu0 %v11539_v57  ;;  %7963 = vmatprep.subr.mxu1 %v2825_v3 }
 0x26e   : > { %7964 = vmatpush3.msra.mxu1 %v2825_v3 }
 0x26f   : > { %8045 = vmatprep.subr.mxu1 %v11502_v60 }
 0x2bf   : > { %v2363_v11 = vpop.xlane.xlu1 %2362 }
 0x2c0   : > { %v2394_v56 = vsub.f32 %v11474_v51, %v2363_v11 }
 0x2c2   : > { %v2410_v42 = vmul.f32 1.442695, %v2394_v56 }
 0x2c3   : > { %v2369_v23 = vpop.xlane.xlu1 %2368 }
 0x2c4   : > { %8756 = vpow2.f32 %v2410_v42  ;;  %v2397_v63 = vsub.f32 %v11496_v21, %v2369_v23 }
 0x2c6   : > { %v2416_v27 = vmul.f32 1.442695, %v2397_v63 }
 0x2c7   : > { %v2373_v47 = vpop.xlane.xlu1 %2372 }
 0x2c8   : > { %v2399_v37 = vsub.f32 %v11514_v33, %v2373_v47  ;;  %8758 = vpow2.f32 %v2416_v27 }
 0x2c9   : > { %v2365_v49 = vpop.xlane.xlu0 %2364 }
 0x2ca   : > { %v2395_v25 = vsub.f32 %v11526_v41, %v2365_v49  ;;  %v2420_v3 = vmul.f32 1.442695, %v2399_v37 }
 0x2cb   : > { %v2377_v24 = vpop.xlane.xlu1 %2376 }
 0x2cc   : > { %v2412_v45 = vmul.f32 1.442695, %v2395_v25  ;;  %v2401_v21 = vsub.f32 %v11531_v13, %v2377_v24 }
 0x2cd   : > { %v2367_v7 = vpop.xlane.xlu0 %2366 }
 0x2ce   : > { %8760 = vpow2.f32 %v2412_v45  ;;  %v2396_v51 = vsub.f32 %v11549_v38, %v2367_v7  ;;  %v2424_v45 = vmul.f32 1.442695, %v2401_v21 }
 0x2cf   : > { %8762 = vpow2.f32 %v2420_v3  ;;  %v2381_v38 = vpop.xlane.xlu1 %2380 }
 0x2d0   : > { %v2414_v11 = vmul.f32 1.442695, %v2396_v51  ;;  %v2403_v63 = vsub.f32 %v11555_v19, %v2381_v38 }
 0x2d1   : > { %v8757_v56 = vpop.eup %8756  ;;  %v2371_v42 = vpop.xlane.xlu0 %2370 }
 0x2d2   : > { %8764 = vpow2.f32 %v2414_v11  ;;  %2442 = vadd.xlane.f32.xlu0 %v8757_v56  ;;  %v2398_v33 = vsub.f32 %v11579_v29, %v2371_v42  ;;  %v11826_v23 = vand.u32 4294901760, %v8757_v56 }
 0x2d4   : > { %v2418_v41 = vmul.f32 1.442695, %v2398_v33  ;;  %7965 = vmatprep.mubr.f32.mxu1 %v11826_v23  ;;  %v11830_v49 = vsub.f32 %v8757_v56, %v11826_v23  ;;  %v2385_v56 = vpop.xlane.xlu1 %2384 }
 0x2d5   : > { %v2375_v7 = vpop.xlane.xlu0 %2374  ;;  %v8759_v24 = vpop.eup %8758  ;;  %v2405_v38 = vsub.f32 %v11592_v6, %v2385_v56 }
 0x2d6   : > { %8766 = vpow2.f32 %v2418_v41  ;;  %v2400_v37 = vsub.f32 %v11609_v22, %v2375_v7  ;;  %v15155_v13 = vand.u32 4294901760, %v11830_v49  ;;  %v11839_v11 = vand.u32 4294901760, %v8759_v24 }
 0x2d7   : > { %8768 = vpow2.f32 %v2424_v45  ;;  %v2428_v22 = vmul.f32 1.442695, %v2403_v63 }
 0x2d8   : > { %v2422_v29 = vmul.f32 1.442695, %v2400_v37  ;;  %v2558_v27 = vsub.f32 %v11830_v49, %v15155_v13  ;;  %v11851_v7 = vsub.f32 %v8759_v24, %v11839_v11 }
 0x2d9   : > { %v2379_v47 = vpop.xlane.xlu0 %2378 }
 0x2da   : > { %8770 = vpow2.f32 %v2422_v29  ;;  %v2402_v25 = vsub.f32 %v11644_v20, %v2379_v47  ;;  %v2559_v3 = vand.u32 4294901760, %v2558_v27  ;;  %v2389_v27 = vpop.xlane.xlu1 %2388 }
 0x2db   : > { %v8761_v51 = vpop.eup %8760 }
 0x2dc   : > { %v2426_v21 = vmul.f32 1.442695, %v2402_v25  ;;  %7909 = vmatprep.mubr.f32.mxu0 %v2559_v3  ;;  %2444 = vadd.xlane.f32.xlu1 %v8761_v51  ;;  %v11841_v19 = vand.u32 4294901760, %v8761_v51  ;;  %v8763_v33 = vpop.eup %8762 }
 0x2dd   : > { %v2383_v42 = vpop.xlane.xlu0 %2382 }
 0x2de   : > { %8772 = vpow2.f32 %v2426_v21  ;;  %v2404_v41 = vsub.f32 %v11680_v32, %v2383_v42  ;;  %7966 = vmatmul.mubr.f32.vlgmr.msra.gmra.mxu1 %v11841_v19  ;;  %v11846_v20 = vsub.f32 %v8761_v51, %v11841_v19  ;;  %v2432_v51 = vmul.f32 1.442695, %v2405_v38 }
 0x2df   : > { %v8765_v45 = vpop.eup %8764  ;;  %8046 = vmatpush3.msra.mxu1 %v11502_v60  ;;  %8774 = vpow2.f32 %v2428_v22  ;;  %v2407_v42 = vsub.f32 %v11617_v48, %v2389_v27 }
 0x2e0   : > { %v2430_v37 = vmul.f32 1.442695, %v2404_v41  ;;  %2448 = vadd.xlane.f32.xlu1 %v8759_v24  ;;  %2446 = vadd.xlane.f32.xlu0 %v8765_v45  ;;  %v11853_v63 = vand.u32 4294901760, %v8765_v45  ;;  %v15154_v32 = vand.u32 4294901760, %v11846_v20  ;;  %v11863_v24 = vand.u32 4294901760, %v8763_v33 }
 0x2e1   : > { %8047 = vmatprep.subr.mxu1 %v11544_v30 }
 0x2e2   : > { %v2387_v29 = vpop.xlane.xlu0 %2386  ;;  %7968 = vmatprep.mubr.f32.mxu1 %v11853_v63  ;;  %8048 = vmatpush3.msra.mxu1 %v11544_v30  ;;  %v2568_v6 = vsub.f32 %v11846_v20, %v15154_v32  ;;  %v11866_v25 = vsub.f32 %v8765_v45, %v11853_v63  ;;  %8776 = vpow2.f32 %v2430_v37 }
 0x2e3   : > { %v2406_v47 = vsub.f32 %v11715_v43, %v2387_v29  ;;  %v8767_v3 = vpop.eup %8766  ;;  %7969 = vmatmul.mubr.f32.gmra.mxu1 %v11839_v11  ;;  %8049 = vmatprep.subr.mxu1 %v11573_v36  ;;  %v15153_v43 = vand.u32 4294901760, %v11851_v7  ;;  %8778 = vpow2.f32 %v2432_v51 }
 0x2e4   : > { %2452 = vadd.xlane.f32.xlu1 %v8763_v33  ;;  %8050 = vmatpush3.msra.mxu1 %v11573_v36  ;;  %v2569_v22 = vand.u32 4294901760, %v2568_v6  ;;  %v11872_v56 = vand.u32 4294901760, %v8767_v3  ;;  %v15152_v21 = vand.u32 4294901760, %v11866_v25  ;;  %v8769_v45 = vpop.eup %8768  ;;  %v11885_v6 = vsub.f32 %v8763_v33, %v11863_v24 }
 0x2e5   : > { %2450 = vadd.xlane.f32.xlu0 %v8767_v3  ;;  %8051 = vmatprep.subr.mxu1 %v11602_v9  ;;  %v2434_v38 = vmul.f32 1.442695, %v2406_v47  ;;  %v2588_v27 = vsub.f32 %v11851_v7, %v15153_v43  ;;  %v2393_v47 = vpop.xlane.xlu1 %2392 }
 0x2e6   : > { %v2391_v41 = vpop.xlane.xlu0 %2390  ;;  %7910 = vmatmul.mubr.f32.vlgmr.msra.gmra.mxu0 %v2569_v22  ;;  %7971 = vmatprep.mubr.f32.mxu1 %v11872_v56  ;;  %v2578_v37 = vsub.f32 %v11866_v25, %v15152_v21  ;;  %v11882_v29 = vsub.f32 %v8767_v3, %v11872_v56  ;;  %v2436_v21 = vmul.f32 1.442695, %v2407_v42  ;;  %v2409_v42 = vsub.f32 %v11648_v15, %v2393_v47 }
 0x2e7   : > { %v8771_v48 = vpop.eup %8770  ;;  %8052 = vmatpush3.msra.mxu1 %v11602_v9  ;;  %7990 = vmatpush3.msra.mxu0 %v11539_v57  ;;  %v2408_v22 = vsub.f32 %v11749_v62, %v2391_v41  ;;  %v11899_v57 = vand.u32 4294901760, %v8769_v45  ;;  %8780 = vpow2.f32 %v2434_v38  ;;  %v15160_v41 = vand.u32 4294901760, %v11885_v6 }
 0x2e8   : > { %7972 = vmatmul.mubr.f32.gmra.mxu1 %v11863_v24  ;;  %8053 = vmatprep.subr.mxu1 %v11629_v16  ;;  %v2579_v3 = vand.u32 4294901760, %v2578_v37  ;;  %v11895_v33 = vand.u32 4294901760, %v8771_v48  ;;  %v15156_v51 = vand.u32 4294901760, %v11882_v29  ;;  %v2589_v32 = vand.u32 4294901760, %v2588_v27 }
 0x2e9   : > { %2456 = vadd.xlane.f32.xlu1 %v8769_v45  ;;  %8054 = vmatpush3.msra.mxu1 %v11629_v16  ;;  %v2438_v38 = vmul.f32 1.442695, %v2408_v22  ;;  %8782 = vpow2.f32 %v2436_v21  ;;  %v11918_v15 = vsub.f32 %v8769_v45, %v11899_v57  ;;  %v2440_v47 = vmul.f32 1.442695, %v2409_v42 }
 0x2ea   : > { %2454 = vadd.xlane.f32.xlu0 %v8771_v48  ;;  %7991 = vmatprep.subr.mxu0 %v11567_v61  ;;  %v2598_v62 = vsub.f32 %v11882_v29, %v15156_v51  ;;  %v11907_v37 = vsub.f32 %v8771_v48, %v11895_v33 }
 0x2eb   : > { %v8773_v43 = vpop.eup %8772  ;;  %8055 = vmatprep.subr.mxu1 %v11636_v0  ;;  %7912 = vmatprep.mubr.f32.mxu0 %v2579_v3  ;;  %8784 = vpow2.f32 %v2438_v38  ;;  %v15157_v3 = vand.u32 4294901760, %v11918_v15 }
 0x2ec   : > { %7974 = vmatprep.mubr.f32.mxu1 %v11895_v33  ;;  %7992 = vmatpush3.msra.mxu0 %v11567_v61  ;;  %v11913_v13 = vand.u32 4294901760, %v8773_v43  ;;  %v8775_v51 = vpop.eup %8774  ;;  %v15158_v48 = vand.u32 4294901760, %v11907_v37  ;;  %v2599_v27 = vand.u32 4294901760, %v2598_v62  ;;  %v2608_v61 = vsub.f32 %v11885_v6, %v15160_v41 }
 0x2ed   : > { %8056 = vmatpush3.msra.mxu1 %v11636_v0  ;;  %7913 = vmatmul.mubr.f32.gmra.mxu0 %v2589_v32  ;;  %v11928_v32 = vand.u32 4294901760, %v8775_v51  ;;  %8786 = vpow2.f32 %v2440_v47 }
 0x2ee   : > { %7975 = vmatmul.mubr.f32.gmra.mxu1 %v11899_v57  ;;  %7993 = vmatprep.subr.mxu0 %v11596_v10  ;;  %v11931_v45 = vsub.f32 %v8773_v43, %v11913_v13  ;;  %v2618_v22 = vsub.f32 %v11907_v37, %v15158_v48 }
 0x2ef   : > { %8057 = vmatprep.subr.mxu1 %v11638_v1  ;;  %2460 = vadd.xlane.f32.xlu1 %v8775_v51  ;;  %v8777_v21 = vpop.eup %8776  ;;  %v11946_v38 = vsub.f32 %v8775_v51, %v11928_v32 }
 0x2f0   : > { %7994 = vmatpush3.msra.mxu0 %v11596_v10  ;;  %8058 = vmatpush3.msra.mxu1 %v11638_v1  ;;  %v2609_v10 = vand.u32 4294901760, %v2608_v61  ;;  %v11941_v62 = vand.u32 4294901760, %v8777_v21  ;;  %v15159_v42 = vand.u32 4294901760, %v11931_v45 }
 0x2f1   : > { %2458 = vadd.xlane.f32.xlu0 %v8773_v43  ;;  %7995 = vmatprep.subr.mxu0 %v11621_v59  ;;  %v8779_v43 = vpop.eup %8778 }
 0x2f2   : > { %8059 = vmatprep.subr.mxu1 %v11665_v35  ;;  %7915 = vmatprep.mubr.f32.mxu0 %v2599_v27  ;;  %v2619_v27 = vand.u32 4294901760, %v2618_v22  ;;  %v11956_v47 = vand.u32 4294901760, %v8779_v43  ;;  %v11959_v51 = vsub.f32 %v8777_v21, %v11941_v62  ;;  %v2638_v22 = vsub.f32 %v11931_v45, %v15159_v42 }
 0x2f3   : > { %7977 = vmatprep.mubr.f32.mxu1 %v11913_v13  ;;  %7996 = vmatpush3.msra.mxu0 %v11621_v59  ;;  %v2628_v59 = vsub.f32 %v11918_v15, %v15157_v3 }
 0x2f4   : > { %8060 = vmatpush3.msra.mxu1 %v11665_v35  ;;  %7916 = vmatmul.mubr.f32.gmra.mxu0 %v2609_v10  ;;  %v8781_v61 = vpop.eup %8780  ;;  %15778 = vst [vmem:[#allocation24_spill] sm:$0xff] %v11956_v47  ;;  %v15161_v10 = vand.u32 4294901760, %v11946_v38  ;;  %v11974_v42 = vsub.f32 %v8779_v43, %v11956_v47 }
 0x2f5   : > { %7978 = vmatmul.mubr.f32.gmra.mxu1 %v11928_v32  ;;  %7997 = vmatprep.subr.mxu0 %v11653_v54  ;;  %v11969_v48 = vand.u32 4294901760, %v8781_v61 }
 0x2f6   : > { %8061 = vmatprep.subr.mxu1 %v11673_v4  ;;  %2464 = vadd.xlane.f32.xlu1 %v8779_v43  ;;  %v8783_v3 = vpop.eup %8782 }
 0x2f7   : > { %7998 = vmatpush3.msra.mxu0 %v11653_v54  ;;  %8062 = vmatpush3.msra.mxu1 %v11673_v4  ;;  %v2629_v54 = vand.u32 4294901760, %v2628_v59  ;;  %15779 = vst [vmem:[#allocation17_spill] sm:$0xff] %v11969_v48  ;;  %v2648_v59 = vsub.f32 %v11946_v38, %v15161_v10  ;;  %v11982_v41 = vand.u32 4294901760, %v8783_v3  ;;  %v11987_v43 = vsub.f32 %v8781_v61, %v11969_v48 }
 0x2f8   : > { %2462 = vadd.xlane.f32.xlu0 %v8777_v21  ;;  %7999 = vmatprep.subr.mxu0 %v11656_v39  ;;  %v15164_v21 = vand.u32 4294901760, %v11959_v51 }
 0x2f9   : > { %8063 = vmatprep.subr.mxu1 %v11701_v40  ;;  %7918 = vmatprep.mubr.f32.mxu0 %v2619_v27  ;;  %v2639_v27 = vand.u32 4294901760, %v2638_v22 }
 0x2fa   : > { %7980 = vmatprep.mubr.f32.mxu1 %v11941_v62  ;;  %8000 = vmatpush3.msra.mxu0 %v11656_v39  ;;  %v8785_v39 = vpop.eup %8784  ;;  %v2658_v22 = vsub.f32 %v11959_v51, %v15164_v21  ;;  %v2677_v21 = vand.u32 4294901760, %v11987_v43 }
 0x2fb   : > { %8064 = vmatpush3.msra.mxu1 %v11701_v40  ;;  %7919 = vmatmul.mubr.f32.gmra.mxu0 %v2629_v54  ;;  %v15167_v54 = vand.u32 4294901760, %v11974_v42  ;;  %v8787_v10 = vpop.eup %8786 }
 0x2fc   : > { %7981 = vmatmul.mubr.f32.gmra.mxu1 %v11956_v47  ;;  %8001 = vmatprep.subr.mxu0 %v11663_v44  ;;  %v2649_v47 = vand.u32 4294901760, %v2648_v59 }
 0x2fd   : > { %8065 = vmatprep.subr.mxu1 %v11725_v12  ;;  %2468 = vadd.xlane.f32.xlu1 %v8783_v3  ;;  %v2668_v59 = vsub.f32 %v11974_v42, %v15167_v54 }
 0x2fe   : > { %8002 = vmatpush3.msra.mxu0 %v11663_v44  ;;  %8066 = vmatpush3.msra.mxu1 %v11725_v12  ;;  %v11995_v44 = vand.u32 4294901760, %v8785_v39 }
 0x2ff   : > { %2466 = vadd.xlane.f32.xlu0 %v8781_v61  ;;  %8003 = vmatprep.subr.mxu0 %v11691_v26  ;;  %v12000_v61 = vsub.f32 %v8783_v3, %v11982_v41 }
 0x300   : > { %8067 = vmatprep.subr.mxu1 %v11728_v17  ;;  %7921 = vmatprep.mubr.f32.mxu0 %v2639_v27  ;;  %v2659_v27 = vand.u32 4294901760, %v2658_v22  ;;  %v2669_v22 = vand.u32 4294901760, %v2668_v59 }
 0x301   : > { %7983 = vmatprep.mubr.f32.mxu1 %v11969_v48  ;;  %8004 = vmatpush3.msra.mxu0 %v11691_v26  ;;  %v12009_v48 = vand.u32 4294901760, %v8787_v10  ;;  %v12013_v26 = vsub.f32 %v8785_v39, %v11995_v44  ;;  %v2687_v3 = vand.u32 4294901760, %v12000_v61 }
 0x302   : > { %8068 = vmatpush3.msra.mxu1 %v11728_v17  ;;  %7922 = vmatmul.mubr.f32.gmra.mxu0 %v2649_v47  ;;  %v2678_v47 = vsub.f32 %v11987_v43, %v2677_v21 }
 0x303   : > { %7984 = vmatmul.mubr.f32.gmra.mxu1 %v11982_v41  ;;  %8005 = vmatprep.subr.mxu0 %v11694_v53  ;;  %v12024_v54 = vsub.f32 %v8787_v10, %v12009_v48 }
 0x304   : > { %8069 = vmatprep.subr.mxu1 %v11736_v34  ;;  %2472 = vadd.xlane.f32.xlu1 %v8787_v10  ;;  %v15780_v10 = vand.u32 4294901760, %v11830_v49 }
 0x305   : > { %8006 = vmatpush3.msra.mxu0 %v11694_v53  ;;  %8070 = vmatpush3.msra.mxu1 %v11736_v34  ;;  %v2697_v53 = vand.u32 4294901760, %v12013_v26 }
 0x306   : > { %2470 = vadd.xlane.f32.xlu0 %v8785_v39  ;;  %8007 = vmatprep.subr.mxu0 %v11718_v8  ;;  %v2688_v39 = vsub.f32 %v12000_v61, %v2687_v3 }
 0x307   : > { %8071 = vmatprep.subr.mxu1 %v11738_v28  ;;  %7924 = vmatprep.mubr.f32.mxu0 %v2659_v27  ;;  %v2679_v27 = vand.u32 4294901760, %v2678_v47  ;;  %v2698_v59 = vsub.f32 %v12013_v26, %v2697_v53 }
 0x308   : > { %7986 = vmatprep.mubr.f32.mxu1 %v11995_v44  ;;  %8008 = vmatpush3.msra.mxu0 %v11718_v8  ;;  %v2707_v8 = vand.u32 4294901760, %v12024_v54  ;;  %v2689_v47 = vand.u32 4294901760, %v2688_v39  ;;  %v15782_v39 = vand.u32 4294901760, %v11866_v25 }
 0x309   : > { %8072 = vmatpush3.msra.mxu1 %v11738_v28  ;;  %7925 = vmatmul.mubr.f32.gmra.mxu0 %v2669_v22  ;;  %v15781_v22 = vand.u32 4294901760, %v11846_v20 }
 0x30a   : > { %7987 = vmatmul.mubr.f32.gmra.mxu1 %v12009_v48  ;;  %8009 = vmatprep.subr.mxu0 %v11742_v55 }
 0x30b   : > { %8073 = vmatprep.subr.mxu1 %v11757_v52  ;;  %8010 = vmatpush3.msra.mxu0 %v11742_v55  ;;  %v2708_v55 = vsub.f32 %v12024_v54, %v2707_v8 }
 0x30c   : > { %8074 = vmatpush3.msra.mxu1 %v11757_v52  ;;  %8077 = vmatprep.mubr.f32.mxu1 %v15780_v10  ;;  %v2699_v10 = vand.u32 4294901760, %v2698_v59  ;;  %v12231_v59 = vld [vmem:[%s9537_s13] sm:$0xff] }
 0x30d   : > { %8011 = vmatprep.subr.mxu0 %v11746_v18  ;;  %8075 = vmatprep.subr.mxu1 %v11769_v5 }
 0x30e   : > { %7927 = vmatprep.mubr.f32.mxu0 %v2679_v27  ;;  %8012 = vmatpush3.msra.mxu0 %v11746_v18  ;;  %v2709_v18 = vand.u32 4294901760, %v2708_v55  ;;  %v12223_v27 = vld [vmem:[%s9537_s13 + $0x18] sm:$0xff]  ;;  %v12268_v55 = vld [vmem:[%s9537_s13 + $0x60] sm:$0xff] }
 0x30f   : > { %8076 = vmatpush3.msra.mxu1 %v11769_v5  ;;  %7928 = vmatmul.mubr.f32.gmra.mxu0 %v2689_v47  ;;  %v12262_v47 = vld [vmem:[%s9537_s13 + $0x58] sm:$0xff] }
 0x310   : > { %8013 = vmatprep.subr.mxu0 %v11755_v50  ;;  %8078 = vmatmul.mubr.f32.vlgmr.msra.gmra.mxu1 %v15781_v22  ;;  %v12284_v22 = vld [vmem:[%s9537_s13 + $0x48] sm:$0xff] }
 0x311   : > { %8157 = vmatprep.subr.mxu1 %v11502_v60  ;;  %8014 = vmatpush3.msra.mxu0 %v11755_v50  ;;  %v15783_v50 = vand.u32 4294901760, %v11851_v7 }
 0x312   : > { %8080 = vmatprep.mubr.f32.mxu1 %v15782_v39  ;;  %8158 = vmatpush3.msra.mxu1 %v11502_v60  ;;  %v15784_v60 = vand.u32 4294901760, %v11882_v29 }
 0x313   : > { %8015 = vmatprep.subr.mxu0 %v11767_v31  ;;  %8159 = vmatprep.subr.mxu1 %v11544_v30 }
 0x314   : > { %7930 = vmatprep.mubr.f32.mxu0 %v2699_v10  ;;  %8016 = vmatpush3.msra.mxu0 %v11767_v31  ;;  %v15787_v31 = vand.u32 4294901760, %v11918_v15  ;;  %v15176_v10 = vmov 11  }
 0x315   : > { %8160 = vmatpush3.msra.mxu1 %v11544_v30  ;;  %7931 = vmatmul.mubr.f32.gmra.mxu0 %v2709_v18  ;;  %v15785_v30 = vand.u32 4294901760, %v11885_v6  ;;  %v12292_v18 = vld [vmem:[%s9537_s13 + $0x50] sm:$0xff] }
 0x316   : > { %8017 = vmatprep.subr.mxu0 %v11776_v2  ;;  %8081 = vmatmul.mubr.f32.gmra.mxu1 %v15783_v50 }
 0x317   : > { %8161 = vmatprep.subr.mxu1 %v11573_v36  ;;  %8018 = vmatpush3.msra.mxu0 %v11776_v2  ;;  %v8978_v2 = vld [vmem:[%s9515_s20] sm:$0xff] }
 0x318   : > { %8021 = vmatprep.mubr.f32.mxu0 %v11830_v49  ;;  %8083 = vmatprep.mubr.f32.mxu1 %v15784_v60  ;;  %v15793_v49 = vand.u32 4294901760, %v11959_v51  ;;  %v12299_v60 = vld [vmem:[%s9537_s13 + $0x78] sm:$0xff] }
 0x319   : > { %8162 = vmatpush3.msra.mxu1 %v11573_v36  ;;  %8019 = vmatprep.subr.mxu0 %v11787_v46  ;;  %v15786_v36 = vand.u32 4294901760, %v11907_v37 }
 0x31a   : > { %8163 = vmatprep.subr.mxu1 %v11602_v9  ;;  %8020 = vmatpush3.msra.mxu0 %v11787_v46  ;;  %v15791_v46 = vand.u32 4294901760, %v11946_v38 }
 0x31b   : > { %8164 = vmatpush3.msra.mxu1 %v11602_v9  ;;  %8022 = vmatmul.mubr.f32.vlgmr.msra.gmra.mxu0 %v11846_v20  ;;  %v8976_v9 = vld [vmem:[%s9515_s20 + $0x8] sm:$0xff]  ;;  %v8979_v20 = vld [vmem:[%s9515_s20 + $0x18] sm:$0xff] }
 0x31c   : > { %8084 = vmatmul.mubr.f32.gmra.mxu1 %v15785_v30  ;;  %8101 = vmatprep.subr.mxu0 %v11559_v58 }
 0x31d   : > { %8165 = vmatprep.subr.mxu1 %v11629_v16  ;;  %8024 = vmatprep.mubr.f32.mxu0 %v11866_v25  ;;  %v15795_v25 = vand.u32 4294901760, %v11974_v42 }
 0x31e   : > { %8086 = vmatprep.mubr.f32.mxu1 %v15786_v36  ;;  %8102 = vmatpush3.msra.mxu0 %v11559_v58  ;;  %v15788_v58 = vld [vmem:[#allocation77_spill] sm:$0xff] }
 0x31f   : > { %8166 = vmatpush3.msra.mxu1 %v11629_v16  ;;  %3797 = vperm.xlu1 %8667, %v8976_v9   ;;  %v15789_v16 = vand.u32 4294901760, %v11931_v45 }
 0x320   : > { %8103 = vmatprep.subr.mxu0 %v11586_v14  ;;  %8167 = vmatprep.subr.mxu1 %v11636_v0 }
 0x321   : > { %8104 = vmatpush3.msra.mxu0 %v11586_v14  ;;  %8168 = vmatpush3.msra.mxu1 %v11636_v0  ;;  %v8977_v14 = vld [vmem:[%s9515_s20 + $0x10] sm:$0xff]  ;;  %v15790_v0 = vld [vmem:[#allocation136_spill] sm:$0xff] }
 0x322   : > { %8025 = vmatmul.mubr.f32.gmra.mxu0 %v11851_v7  ;;  %8087 = vmatmul.mubr.f32.gmra.mxu1 %v15787_v31  ;;  %v8980_v7 = vld [vmem:[%s9515_s20 + $0x48] sm:$0xff] }
 0x323   : > { %8105 = vmatprep.subr.mxu0 %v15788_v58  ;;  %8169 = vmatprep.subr.mxu1 %v11638_v1 }
 0x324   : > { %8027 = vmatprep.mubr.f32.mxu0 %v11882_v29  ;;  %8089 = vmatprep.mubr.f32.mxu1 %v15789_v16  ;;  %v8981_v29 = vld [vmem:[%s9515_s20 + $0x20] sm:$0xff] }
 0x325   : > { %8106 = vmatpush3.msra.mxu0 %v15788_v58  ;;  %8170 = vmatpush3.msra.mxu1 %v11638_v1  ;;  %v15792_v1 = vld [vmem:[#allocation137_spill] sm:$0xff]  ;;  %v12319_v58 = vld [vmem:[%s9537_s13 + $0x68] sm:$0xff] }
 0x326   : > { %3801 = vperm.xlu1 %8667, %v8977_v14   ;;  %8107 = vmatprep.subr.mxu0 %v15790_v0 }
 0x327   : > { %8171 = vmatprep.subr.mxu1 %v11665_v35  ;;  %3793 = vperm.xlu0 %8666, %v8978_v2  }
 0x328   : > { %8108 = vmatpush3.msra.mxu0 %v15790_v0  ;;  %8172 = vmatpush3.msra.mxu1 %v11665_v35  ;;  %v15794_v35 = vld [vmem:[#allocation132_spill] sm:$0xff] }
 0x329   : > { %8028 = vmatmul.mubr.f32.gmra.mxu0 %v11885_v6  ;;  %8090 = vmatmul.mubr.f32.gmra.mxu1 %v15791_v46  ;;  %v8982_v6 = vld [vmem:[%s9515_s20 + $0x58] sm:$0xff] }
 0x32a   : > { %8109 = vmatprep.subr.mxu0 %v15792_v1  ;;  %8173 = vmatprep.subr.mxu1 %v11673_v4 }
 0x32b   : > { %8030 = vmatprep.mubr.f32.mxu0 %v11907_v37  ;;  %8092 = vmatprep.mubr.f32.mxu1 %v15793_v49  ;;  %v8983_v37 = vld [vmem:[%s9515_s20 + $0x28] sm:$0xff]  ;;  %v15822_v49 = vld [vmem:[#allocation71_spill] sm:$0xff] }
 0x32c   : > { %8110 = vmatpush3.msra.mxu0 %v15792_v1  ;;  %8174 = vmatpush3.msra.mxu1 %v11673_v4  ;;  %v15796_v4 = vld [vmem:[#allocation56_spill] sm:$0xff]  ;;  %v9007_v1 = vld [vmem:[%s9754_s10] sm:$0x3]  ;;  %s7454_s10 = sld [smem:[#allocation7 + $0x8]] }
 0x32d   : > { %3805 = vperm.xlu1 %8667, %v8979_v20   ;;  %8111 = vmatprep.subr.mxu0 %v15794_v35  ;;  %v12341_v20 = vrot.slane %v9007_v1, %v15822_v49 }
 0x32e   : > { %8175 = vmatprep.subr.mxu1 %v11701_v40  ;;  %3829 = vperm.xlu0 %8666, %v8980_v7   ;;  %v9008_v7 = vld [vmem:[%s9494_s1 + $0x8] sm:$0xff] }
 0x32f   : > { %8112 = vmatpush3.msra.mxu0 %v15794_v35  ;;  %8176 = vmatpush3.msra.mxu1 %v11701_v40  ;;  %v15797_v40 = vld [vmem:[#allocation23_spill] sm:$0xff] }
 0x330   : > { %8031 = vmatmul.mubr.f32.gmra.mxu0 %v11918_v15  ;;  %8093 = vmatmul.mubr.f32.gmra.mxu1 %v15795_v25  ;;  %v8984_v15 = vld [vmem:[%s9515_s20 + $0x68] sm:$0xff] }
 0x331   : > { %8113 = vmatprep.subr.mxu0 %v15796_v4  ;;  %8177 = vmatprep.subr.mxu1 %v11725_v12 }
 0x332   : > { %8033 = vmatprep.mubr.f32.mxu0 %v11931_v45  ;;  %8095 = vmatprep.mubr.f32.mxu1 %v2677_v21  ;;  %v8985_v45 = vld [vmem:[%s9515_s20 + $0x30] sm:$0xff]  ;;  %v15180_v21 = vmov 12  }
 0x333   : > { %8114 = vmatpush3.msra.mxu0 %v15796_v4  ;;  %8178 = vmatpush3.msra.mxu1 %v11725_v12  ;;  %v15798_v12 = vld [vmem:[#allocation26_spill] sm:$0xff] }
 0x334   : > { %3809 = vperm.xlu1 %8667, %v8981_v29   ;;  %8115 = vmatprep.subr.mxu0 %v15797_v40 }
 0x335   : > { %8179 = vmatprep.subr.mxu1 %v11728_v17  ;;  %3837 = vperm.xlu0 %8666, %v8982_v6  }
 0x336   : > { %8116 = vmatpush3.msra.mxu0 %v15797_v40  ;;  %8180 = vmatpush3.msra.mxu1 %v11728_v17  ;;  %v15799_v17 = vld [vmem:[#allocation65_spill] sm:$0xff]  ;;  %v15172_v40 = vmov 13  }
 0x337   : > { %8034 = vmatmul.mubr.f32.gmra.mxu0 %v11946_v38  ;;  %8096 = vmatmul.mubr.f32.gmra.mxu1 %v2687_v3  ;;  %v15802_v38 = vld [vmem:[#allocation19_spill] sm:$0xff]  ;;  %v12193_v3 = vld [vmem:[%s9537_s13 + $0x38] sm:$0xff] }
 0x338   : > { %8117 = vmatprep.subr.mxu0 %v15798_v12  ;;  %8181 = vmatprep.subr.mxu1 %v11736_v34 }
 0x339   : > { %8036 = vmatprep.mubr.f32.mxu0 %v11959_v51  ;;  %8098 = vmatprep.mubr.f32.mxu1 %v2697_v53  ;;  %v15803_v51 = vld [vmem:[#allocation62_spill] sm:$0xff]  ;;  %v15170_v53 = vmov 9  }
 0x33a   : > { %8118 = vmatpush3.msra.mxu0 %v15798_v12  ;;  %8182 = vmatpush3.msra.mxu1 %v11736_v34  ;;  %v15800_v34 = vld [vmem:[#allocation58_spill] sm:$0xff] }
 0x33b   : > { %3813 = vperm.xlu1 %8667, %v8983_v37   ;;  %8119 = vmatprep.subr.mxu0 %v15799_v17 }
 0x33c   : > { %8183 = vmatprep.subr.mxu1 %v11738_v28  ;;  %3845 = vperm.xlu0 %8666, %v8984_v15  }
 0x33d   : > { %8120 = vmatpush3.msra.mxu0 %v15799_v17  ;;  %8184 = vmatpush3.msra.mxu1 %v11738_v28  ;;  %v15801_v28 = vld [vmem:[#allocation27_spill] sm:$0xff] }
 0x33e   : > { %8037 = vmatmul.mubr.f32.gmra.mxu0 %v11974_v42  ;;  %8099 = vmatmul.mubr.f32.gmra.mxu1 %v2707_v8  ;;  %v8986_v42 = vld [vmem:[%s9515_s20 + $0x78] sm:$0xff]  ;;  %v15807_v8 = vld [vmem:[#allocation17_spill] sm:$0xff] }
 0x33f   : > { %8121 = vmatprep.subr.mxu0 %v15800_v34  ;;  %8185 = vmatprep.subr.mxu1 %v11757_v52 }
 0x340   : > { %8039 = vmatprep.mubr.f32.mxu0 %v11987_v43  ;;  %8122 = vmatpush3.msra.mxu0 %v15800_v34  ;;  %v15804_v43 = vld [vmem:[#allocation67_spill] sm:$0xff] }
 0x341   : > { %8186 = vmatpush3.msra.mxu1 %v11757_v52  ;;  %8189 = vmatprep.mubr.f32.mxu1 %v11826_v23  ;;  %v8987_v52 = vld [vmem:[%s9515_s20 + $0x38] sm:$0xff] }
 0x342   : > { %3817 = vperm.xlu1 %8667, %v8985_v45   ;;  %8123 = vmatprep.subr.mxu0 %v15801_v28 }
 0x343   : > { %8187 = vmatprep.subr.mxu1 %v11769_v5  ;;  %3853 = vperm.xlu0 %8666, %v8986_v42  }
 0x344   : > { %8124 = vmatpush3.msra.mxu0 %v15801_v28  ;;  %8188 = vmatpush3.msra.mxu1 %v11769_v5  ;;  %v12181_v5 = vld [vmem:[%s9537_s13 + $0x10] sm:$0xff] }
 0x345   : > { %8040 = vmatmul.mubr.f32.gmra.mxu0 %v12000_v61  ;;  %8125 = vmatprep.subr.mxu0 %v15802_v38  ;;  %v8989_v61 = vld [vmem:[%s9515_s20 + $0x40] sm:$0xff] }
 0x346   : > { %8190 = vmatmul.mubr.f32.vlgmr.msra.gmra.mxu1 %v11841_v19  ;;  %8042 = vmatprep.mubr.f32.mxu0 %v12013_v26  ;;  %v15805_v26 = vld [vmem:[#allocation69_spill] sm:$0xff] }
 0x347   : > { %8126 = vmatpush3.msra.mxu0 %v15802_v38  ;;  %8192 = vmatprep.mubr.f32.mxu1 %v11853_v63  ;;  %v9009_v38 = vld [vmem:[%s9494_s1 + $0x18] sm:$0xff] }
 0x348   : > { %3821 = vperm.xlu1 %8667, %v8987_v52   ;;  %8127 = vmatprep.subr.mxu0 %v15803_v51 }
 0x349   : > { %8683 = vset.pattern.permute.xlu0 %v15180_v21  ;;  %8128 = vmatpush3.msra.mxu0 %v15803_v51 }
 0x34a   : > { %4607 = vperm.xlu0 %8683, %v12181_v5   ;;  %8043 = vmatmul.mubr.f32.gmra.mxu0 %v12024_v54  ;;  %v12203_v54 = vld [vmem:[%s9537_s13 + $0x40] sm:$0xff] }
 0x34b   : > { %8129 = vmatprep.subr.mxu0 %v15804_v43  ;;  %8193 = vmatmul.mubr.f32.gmra.mxu1 %v11839_v11 }
 0x34c   : > { %8130 = vmatpush3.msra.mxu0 %v15804_v43  ;;  %8133 = vmatprep.mubr.f32.mxu0 %v11826_v23  ;;  %v8991_v23 = vld [vmem:[%s9515_s20 + $0x50] sm:$0xff] }
 0x34d   : > { %8195 = vmatprep.mubr.f32.mxu1 %v11872_v56  ;;  %3825 = vperm.xlu1 %8667, %v8989_v61   ;;  %v9010_v61 = vld [vmem:[%s9494_s1 + $0x48] sm:$0xff] }
 0x34e   : > { %8131 = vmatprep.subr.mxu0 %v15805_v26  ;;  %4627 = vperm.xlu0 %8683, %v12193_v3  }
 0x34f   : > { %8132 = vmatpush3.msra.mxu0 %v15805_v26  ;;  %8196 = vmatmul.mubr.f32.gmra.mxu1 %v11863_v24 }
 0x350   : > { %8134 = vmatmul.mubr.f32.vlgmr.msra.gmra.mxu0 %v11841_v19  ;;  %8198 = vmatprep.mubr.f32.mxu1 %v11895_v33  ;;  %v8993_v19 = vld [vmem:[%s9515_s20 + $0x60] sm:$0xff] }
 0x351   : > { %8136 = vmatprep.mubr.f32.mxu0 %v11853_v63  ;;  %3833 = vperm.xlu1 %8667, %v8991_v23   ;;  %v12214_v63 = vld [vmem:[%s9537_s13 + $0x8] sm:$0xff] }
 0x352   : > { %4631 = vperm.xlu0 %8683, %v12203_v54  }
 0x353   : > { %8199 = vmatmul.mubr.f32.gmra.mxu1 %v11899_v57 }
 0x354   : > { %8137 = vmatmul.mubr.f32.gmra.mxu0 %v11839_v11  ;;  %8201 = vmatprep.mubr.f32.mxu1 %v11913_v13  ;;  %v8995_v11 = vld [vmem:[%s9515_s20 + $0x70] sm:$0xff]  ;;  %s7453_s20 = sld [smem:[#allocation10 + $0x1]] }
 0x355   : > { %8139 = vmatprep.mubr.f32.mxu0 %v11872_v56  ;;  %3841 = vperm.xlu1 %8667, %v8993_v19   ;;  %v15806_v56 = vld [vmem:[#allocation24_spill] sm:$0xff] }
 0x356   : > { %8716 = vset.pattern.permute.xlu0 %v15170_v53 }
 0x357   : > { %8202 = vmatmul.mubr.f32.gmra.mxu1 %v11928_v32  ;;  %4099 = vperm.xlu0 %8716, %v12214_v63  }
 0x358   : > { %8140 = vmatmul.mubr.f32.gmra.mxu0 %v11863_v24  ;;  %8204 = vmatprep.mubr.f32.mxu1 %v11941_v62  ;;  %v15174_v24 = vmov 8  }
 0x359   : > { %8142 = vmatprep.mubr.f32.mxu0 %v11895_v33  ;;  %3849 = vperm.xlu1 %8667, %v8995_v11   ;;  %v12236_v33 = vld [vmem:[%s9537_s13 + $0x20] sm:$0xff] }
 0x35a   : > { %v12336_v46 = vstv %s7453_s20  ;;  %s7468_s20 = sld [smem:[#allocation7 + $0xf]] }
 0x35b   : > { %8205 = vmatmul.mubr.f32.gmra.mxu1 %v15806_v56  ;;  %4107 = vperm.xlu0 %8716, %v12223_v27   ;;  %v3879_v25 = vmul.f32 %v9008_v7, %v12336_v46  ;;  %v3881_v52 = vmul.f32 %v9009_v38, %v12336_v46  ;;  %v3887_v26 = vmul.f32 %v9010_v61, %v12336_v46 }
 0x35c   : > { %8143 = vmatmul.mubr.f32.gmra.mxu0 %v11899_v57  ;;  %8207 = vmatprep.mubr.f32.mxu1 %v15807_v8  ;;  %v12253_v57 = vld [vmem:[%s9537_s13 + $0x30] sm:$0xff] }
 0x35d   : > { %8145 = vmatprep.mubr.f32.mxu0 %v11913_v13  ;;  %8668 = vset.pattern.permute.xlu1 %v15174_v24  ;;  %v12245_v13 = vld [vmem:[%s9537_s13 + $0x28] sm:$0xff] }
 0x35e   : > { %3927 = vperm.xlu1 %8668, %v12231_v59  }
 0x35f   : > { %8208 = vmatmul.mubr.f32.gmra.mxu1 %v11982_v41  ;;  %4111 = vperm.xlu0 %8716, %v12236_v33  }
 0x360   : > { %8146 = vmatmul.mubr.f32.gmra.mxu0 %v11928_v32  ;;  %8210 = vmatprep.mubr.f32.mxu1 %v11995_v44 }
 0x361   : > { %8148 = vmatprep.mubr.f32.mxu0 %v11941_v62  ;;  %v15168_v62 = vmov 10  }
 0x362   : > { %3935 = vperm.xlu1 %8668, %v12181_v5  }
 0x363   : > { %8211 = vmatmul.mubr.f32.gmra.mxu1 %v12009_v48  ;;  %4115 = vperm.xlu0 %8716, %v12245_v13  }
 0x364   : > { %8149 = vmatmul.mubr.f32.gmra.mxu0 %v15806_v56 }
 0x365   : > { %8151 = vmatprep.mubr.f32.mxu0 %v15807_v8  ;;  %v12258_v32 = vpop.xlane.xlu1 %2444 }
 0x366   : > { %8669 = vset.pattern.permute.xlu1 %v15170_v53  ;;  %15808 = vst [vmem:[#allocation68_spill] sm:$0xff] %v12258_v32 }
 0x367   : > { %4095 = vperm.xlu1 %8669, %v12231_v59   ;;  %4119 = vperm.xlu0 %8716, %v12253_v57  }
 0x368   : > { %8152 = vmatmul.mubr.f32.gmra.mxu0 %v11982_v41 }
 0x369   : > { %8154 = vmatprep.mubr.f32.mxu0 %v11995_v44  ;;  %v12272_v41 = vpop.xlane.xlu1 %2448  ;;  %v12281_v44 = vpop.xlane.xlu0 %2442 }
 0x36a   : > { %15809 = vst [vmem:[#allocation29_spill] sm:$0xff] %v12272_v41  ;;  %15811 = vst [vmem:[#allocation20_spill] sm:$0xff] %v12281_v44 }
 0x36b   : > { %8670 = vset.pattern.permute.xlu1 %v15168_v62  ;;  %4139 = vperm.xlu0 %8716, %v12262_v47  }
 0x36c   : > { %8155 = vmatmul.mubr.f32.gmra.mxu0 %v12009_v48  ;;  %4263 = vperm.xlu1 %8670, %v12231_v59  }
 0x36d   : > { %v12279_v48 = vpop.xlane.xlu1 %2452  ;;  %v12289_v39 = vpop.xlane.xlu0 %2446 }
 0x36e   : > { %15810 = vst [vmem:[#allocation70_spill] sm:$0xff] %v12279_v48  ;;  %15812 = vst [vmem:[#allocation72_spill] sm:$0xff] %v12289_v39 }
 0x36f   : > { %4143 = vperm.xlu0 %8716, %v12268_v55  }
 0x370   : > { %8671 = vset.pattern.permute.xlu1 %v15174_v24 }
 0x371   : > { %3939 = vperm.xlu1 %8671, %v12223_v27   ;;  %v12302_v30 = vpop.xlane.xlu0 %2450 }
 0x372   : > { %v12295_v50 = vpop.xlane.xlu1 %2456  ;;  %15814 = vst [vmem:[#allocation60_spill] sm:$0xff] %v12302_v30 }
 0x373   : > { %8721 = vset.pattern.permute.xlu0 %v15174_v24  ;;  %15813 = vst [vmem:[#allocation32_spill] sm:$0xff] %v12295_v50 }
 0x374   : > { %3931 = vperm.xlu0 %8721, %v12214_v63  }
 0x375   : > { %8672 = vset.pattern.permute.xlu1 %v15170_v53  ;;  %v12310_v9 = vpop.xlane.xlu0 %2454 }
 0x376   : > { %4103 = vperm.xlu1 %8672, %v12181_v5   ;;  %15816 = vst [vmem:[#allocation92_spill] sm:$0xff] %v12310_v9 }
 0x378   : > { %3963 = vperm.xlu0 %8721, %v12284_v22   ;;  %v12304_v36 = vpop.xlane.xlu1 %2460 }
 0x379   : > { %15815 = vst [vmem:[#allocation74_spill] sm:$0xff] %v12304_v36 }
 0x37a   : > { %8673 = vset.pattern.permute.xlu1 %v15176_v10  ;;  %v12322_v16 = vpop.xlane.xlu0 %2458 }
 0x37b   : > { %4431 = vperm.xlu1 %8673, %v12231_v59   ;;  %15818 = vst [vmem:[#allocation108_spill] sm:$0xff] %v12322_v16  ;;  %v15839_v16 = vmov 13  }
 0x37c   : > { %3967 = vperm.xlu0 %8721, %v12292_v18  }
 0x37f   : > { %4435 = vperm.xlu1 %8673, %v12214_v63   ;;  %v12313_v31 = vpop.xlane.xlu1 %2464 }
 0x380   : > { %3987 = vperm.xlu0 %8721, %v12299_v60   ;;  %15817 = vst [vmem:[#allocation33_spill] sm:$0xff] %v12313_v31  ;;  %v15836_v31 = vmov 11  }
 0x381   : > { %v12331_v0 = vpop.xlane.xlu0 %2462 }
 0x382   : > { %15820 = vst [vmem:[#allocation119_spill] sm:$0xff] %v12331_v0 }
 0x383   : > { %8674 = vset.pattern.permute.xlu1 %v15174_v24 }
 0x384   : > { %3943 = vperm.xlu1 %8674, %v12236_v33   ;;  %8730 = vset.pattern.permute.xlu0 %v15176_v10 }
 0x385   : > { %4459 = vperm.xlu0 %8730, %v12193_v3  }
 0x386   : > { %v12325_v14 = vpop.xlane.xlu1 %2468 }
 0x387   : > { %15819 = vst [vmem:[#allocation35_spill] sm:$0xff] %v12325_v14 }
 0x388   : > { %8675 = vset.pattern.permute.xlu1 %v15180_v21  ;;  %v12344_v35 = vpop.xlane.xlu0 %2466 }
 0x389   : > { %4599 = vperm.xlu1 %8675, %v12231_v59   ;;  %4463 = vperm.xlu0 %8730, %v12203_v54   ;;  %15823 = vst [vmem:[#allocation36_spill] sm:$0xff] %v12344_v35 }
 0x38d   : > { %8676 = vset.pattern.permute.xlu1 %v15174_v24  ;;  %4483 = vperm.xlu0 %8730, %v12319_v58   ;;  %v12333_v2 = vpop.xlane.xlu1 %2472 }
 0x38e   : > { %3947 = vperm.xlu1 %8676, %v12245_v13   ;;  %15821 = vst [vmem:[#allocation76_spill] sm:$0xff] %v12333_v2 }
 0x38f   : > { %v12355_v37 = vpop.xlane.xlu0 %2470 }
 0x390   : > { %15825 = vst [vmem:[#allocation78_spill] sm:$0xff] %v12355_v37  ;;  %v15833_v37 = vmov 14  }
 0x391   : > { %8737 = vset.pattern.permute.xlu0 %v15168_v62 }
 0x392   : > { %8677 = vset.pattern.permute.xlu1 %v15180_v21  ;;  %4267 = vperm.xlu0 %8737, %v12214_v63  }
 0x393   : > { %4603 = vperm.xlu1 %8677, %v12214_v63  }
 0x396   : > { %4271 = vperm.xlu0 %8737, %v12181_v5  }
 0x397   : > { %8678 = vset.pattern.permute.xlu1 %v15176_v10 }
 0x398   : > { %4439 = vperm.xlu1 %8678, %v12181_v5  }
 0x39a   : > { %4275 = vperm.xlu0 %8737, %v12223_v27   ;;  %v3798_v4 = vpop.permute.xlu1 %3797 }
 0x39b   : > { %v3861_v29 = vadd.f32 %v12341_v20, %v3798_v4 }
 0x39c   : > { %8679 = vset.pattern.permute.xlu1 %v15172_v40  ;;  %v9014_v40 = vld [vmem:[%s9494_s1 + $0x28] sm:$0xff] }
 0x39d   : > { %4767 = vperm.xlu1 %8679, %v12231_v59   ;;  %v12352_v6 = vadd.f32 %v3879_v25, %v3861_v29 }
 0x39e   : > { %4283 = vperm.xlu0 %8737, %v12245_v13   ;;  %v7967_v12 = vpop.f32.mrf.mxu1 }
 0x39f   : > { %15824 = vst [vmem:[#allocation38_spill] sm:$0xff] %v12352_v6 }
 0x3a0   : > { %v2862_v17 = vpop.f32.mrf.mxu1 }
 0x3a1   : > { %8680 = vset.pattern.permute.xlu1 %v15176_v10  ;;  %v12360_v15 = vpop.permute.xlu1 %3801 }
 0x3a2   : > { %4443 = vperm.xlu1 %8680, %v12223_v27   ;;  %4287 = vperm.xlu0 %8737, %v12253_v57   ;;  %15826 = vst [vmem:[#allocation83_spill] sm:$0xff] %v12360_v15  ;;  %v12362_v34 = vpop.permute.xlu0 %3793 }
 0x3a3   : > { %v7970_v45 = vpop.f32.mrf.mxu1 }
 0x3a5   : > { %v2874_v28 = vpop.f32.mrf.mxu1 }
 0x3a6   : > { %8681 = vset.pattern.permute.xlu1 %v15174_v24  ;;  %4307 = vperm.xlu0 %8737, %v12262_v47   ;;  %v7911_v42 = vpop.f32.mrf.mxu0 }
 0x3a7   : > { %3951 = vperm.xlu1 %8681, %v12253_v57   ;;  %v12369_v51 = vadd.f32 %v7967_v12, %v7911_v42  ;;  %v12385_v12 = vld [vmem:[%s9537_s13 + $0x70] sm:$0xff]  ;;  %v9012_v42 = vld [vmem:[%s9494_s1 + $0x20] sm:$0xff] }
 0x3a8   : > { %v3806_v43 = vpop.permute.xlu1 %3805  ;;  %v7973_v23 = vpop.f32.mrf.mxu1  ;;  %v3882_v38 = vmul.f32 %v9012_v42, %v12336_v46 }
 0x3a9   : > { %v3863_v19 = vadd.f32 %v12341_v20, %v3806_v43  ;;  %v3830_v11 = vpop.permute.xlu0 %3829  ;;  %v2561_v56 = vpop.f32.mrf.mxu0 }
 0x3aa   : > { %4311 = vperm.xlu0 %8737, %v12268_v55   ;;  %v3869_v8 = vadd.f32 %v12341_v20, %v3830_v11  ;;  %v12376_v1 = vadd.f32 %v2862_v17, %v2561_v56  ;;  %v2886_v7 = vpop.f32.mrf.mxu1  ;;  %v9013_v11 = vld [vmem:[%s9494_s1 + $0x58] sm:$0xff]  ;;  %v15178_v56 = vmov 14  }
 0x3ab   : > { %8682 = vset.pattern.permute.xlu1 %v15168_v62  ;;  %v12379_v25 = vadd.f32 %v3881_v52, %v3863_v19  ;;  %v3889_v52 = vmul.f32 %v9013_v11, %v12336_v46 }
 0x3ac   : > { %4279 = vperm.xlu1 %8682, %v12236_v33   ;;  %v12382_v4 = vadd.f32 %v3887_v26, %v3869_v8 }
 0x3ad   : > { %15827 = vst [vmem:[#allocation79_spill] sm:$0xff] %v12379_v25  ;;  %v7914_v29 = vpop.f32.mrf.mxu0 }
 0x3ae   : > { %15828 = vst [vmem:[#allocation40_spill] sm:$0xff] %v12382_v4  ;;  %4319 = vperm.xlu0 %8737, %v12385_v12   ;;  %v12390_v43 = vadd.f32 %v7970_v45, %v7914_v29  ;;  %v7976_v17 = vpop.f32.mrf.mxu1 }
 0x3af   : > { %v3810_v61 = vpop.permute.xlu1 %3809  ;;  %v2581_v19 = vpop.f32.mrf.mxu0 }
 0x3b0   : > { %8684 = vset.pattern.permute.xlu1 %v15178_v56  ;;  %v3864_v26 = vadd.f32 %v12341_v20, %v3810_v61  ;;  %v3838_v8 = vpop.permute.xlu0 %3837  ;;  %v12396_v62 = vadd.f32 %v2874_v28, %v2581_v19  ;;  %v2898_v29 = vpop.f32.mrf.mxu1  ;;  %v3883_v61 = vmul.f32 %v9014_v40, %v12336_v46 }
 0x3b1   : > { %4935 = vperm.xlu1 %8684, %v12231_v59   ;;  %v3871_v45 = vadd.f32 %v12341_v20, %v3838_v8 }
 0x3b2   : > { %4323 = vperm.xlu0 %8737, %v12299_v60   ;;  %v12401_v42 = vadd.f32 %v3882_v38, %v3864_v26  ;;  %v9015_v60 = vld [vmem:[%s9494_s1 + $0x68] sm:$0xff] }
 0x3b3   : > { %v12403_v11 = vadd.f32 %v3889_v52, %v3871_v45  ;;  %v3891_v38 = vmul.f32 %v9015_v60, %v12336_v46 }
 0x3b4   : > { %15829 = vst [vmem:[#allocation41_spill] sm:$0xff] %v12401_v42  ;;  %v7917_v53 = vpop.f32.mrf.mxu0 }
 0x3b5   : > { %15830 = vst [vmem:[#allocation82_spill] sm:$0xff] %v12403_v11  ;;  %8685 = vset.pattern.permute.xlu1 %v15174_v24  ;;  %v12408_v28 = vadd.f32 %v7973_v23, %v7917_v53  ;;  %v7979_v19 = vpop.f32.mrf.mxu1 }
 0x3b6   : > { %3955 = vperm.xlu1 %8685, %v12193_v3   ;;  %8742 = vset.pattern.permute.xlu0 %v15178_v56  ;;  %v3814_v8 = vpop.permute.xlu1 %3813  ;;  %v2601_v52 = vpop.f32.mrf.mxu0  ;;  %v9016_v56 = vld [vmem:[%s9494_s1 + $0x30] sm:$0xff] }
 0x3b7   : > { %4947 = vperm.xlu0 %8742, %v12223_v27   ;;  %v3865_v26 = vadd.f32 %v12341_v20, %v3814_v8  ;;  %v3846_v45 = vpop.permute.xlu0 %3845  ;;  %v12416_v40 = vadd.f32 %v2886_v7, %v2601_v52  ;;  %v2910_v23 = vpop.f32.mrf.mxu1  ;;  %v3884_v8 = vmul.f32 %v9016_v56, %v12336_v46 }
 0x3b8   : > { %v3873_v53 = vadd.f32 %v12341_v20, %v3846_v45  ;;  %v9017_v45 = vld [vmem:[%s9494_s1 + $0x78] sm:$0xff] }
 0x3b9   : > { %v12419_v24 = vadd.f32 %v3883_v61, %v3865_v26  ;;  %v3893_v61 = vmul.f32 %v9017_v45, %v12336_v46  ;;  %v9018_v45 = vld [vmem:[%s9494_s1 + $0x38] sm:$0xff] }
 0x3ba   : > { %8686 = vset.pattern.permute.xlu1 %v15180_v21  ;;  %v12422_v10 = vadd.f32 %v3891_v38, %v3873_v53 }
 0x3bb   : > { %15831 = vst [vmem:[#allocation42_spill] sm:$0xff] %v12419_v24  ;;  %4611 = vperm.xlu1 %8686, %v12223_v27   ;;  %4951 = vperm.xlu0 %8742, %v12236_v33   ;;  %v7920_v60 = vpop.f32.mrf.mxu0 }
 0x3bc   : > { %15832 = vst [vmem:[#allocation85_spill] sm:$0xff] %v12422_v10  ;;  %v12428_v2 = vadd.f32 %v7976_v17, %v7920_v60  ;;  %v7982_v7 = vpop.f32.mrf.mxu1 }
 0x3bd   : > { %v3818_v52 = vpop.permute.xlu1 %3817  ;;  %v2621_v26 = vpop.f32.mrf.mxu0 }
 0x3be   : > { %v3866_v38 = vadd.f32 %v12341_v20, %v3818_v52  ;;  %v3854_v53 = vpop.permute.xlu0 %3853  ;;  %v12433_v21 = vadd.f32 %v2898_v29, %v2621_v26  ;;  %v2922_v17 = vpop.f32.mrf.mxu1  ;;  %v3885_v52 = vmul.f32 %v9018_v45, %v12336_v46 }
 0x3bf   : > { %8687 = vset.pattern.permute.xlu1 %v15833_v37  ;;  %4971 = vperm.xlu0 %8742, %v12284_v22   ;;  %v3875_v56 = vadd.f32 %v12341_v20, %v3854_v53 }
 0x3c0   : > { %4939 = vperm.xlu1 %8687, %v12214_v63   ;;  %v12439_v60 = vadd.f32 %v3884_v8, %v3866_v38 }
 0x3c1   : > { %v12441_v14 = vadd.f32 %v3893_v61, %v3875_v56 }
 0x3c2   : > { %15834 = vst [vmem:[#allocation47_spill] sm:$0xff] %v12439_v60  ;;  %v7923_v35 = vpop.f32.mrf.mxu0 }
 0x3c3   : > { %15835 = vst [vmem:[#allocation43_spill] sm:$0xff] %v12441_v14  ;;  %4979 = vperm.xlu0 %8742, %v12262_v47   ;;  %v3822_v29 = vpop.permute.xlu1 %3821  ;;  %v12446_v26 = vadd.f32 %v7979_v19, %v7923_v35  ;;  %v7985_v0 = vpop.f32.mrf.mxu1  ;;  %v9019_v35 = vld [vmem:[%s9494_s1 + $0x40] sm:$0xff] }
 0x3c4   : > { %8688 = vset.pattern.permute.xlu1 %v15836_v31  ;;  %v3867_v53 = vadd.f32 %v12341_v20, %v3822_v29  ;;  %v2641_v36 = vpop.f32.mrf.mxu0  ;;  %v3886_v19 = vmul.f32 %v9019_v35, %v12336_v46 }
 0x3c5   : > { %4447 = vperm.xlu1 %8688, %v12236_v33   ;;  %v12451_v8 = vpop.permute.xlu0 %4607  ;;  %v12453_v61 = vadd.f32 %v2910_v23, %v2641_v36  ;;  %v2934_v56 = vpop.f32.mrf.mxu1 }
 0x3c6   : > { %15837 = vst [vmem:[#allocation44_spill] sm:$0xff] %v12451_v8  ;;  %v12455_v38 = vadd.f32 %v3885_v52, %v3867_v53  ;;  %v9020_v53 = vld [vmem:[%s9494_s1 + $0x50] sm:$0xff] }
 0x3c7   : > { %4983 = vperm.xlu0 %8742, %v12268_v55   ;;  %v3888_v35 = vmul.f32 %v9020_v53, %v12336_v46 }
 0x3c8   : > { %15838 = vst [vmem:[#allocation86_spill] sm:$0xff] %v12455_v38  ;;  %v3826_v45 = vpop.permute.xlu1 %3825 }
 0x3c9   : > { %8689 = vset.pattern.permute.xlu1 %v15839_v16  ;;  %v3868_v29 = vadd.f32 %v12341_v20, %v3826_v45  ;;  %v12462_v50 = vpop.permute.xlu0 %4627  ;;  %v7926_v9 = vpop.f32.mrf.mxu0 }
 0x3ca   : > { %15840 = vst [vmem:[#allocation90_spill] sm:$0xff] %v12462_v50  ;;  %4775 = vperm.xlu1 %8689, %v12181_v5   ;;  %v12465_v36 = vadd.f32 %v7982_v7, %v7926_v9  ;;  %v7988_v23 = vpop.f32.mrf.mxu1  ;;  %v15843_v7 = vmov 9  }
 0x3cb   : > { %v12467_v52 = vadd.f32 %v3886_v19, %v3868_v29  ;;  %8749 = vset.pattern.permute.xlu0 %v15839_v16  ;;  %v2661_v48 = vpop.f32.mrf.mxu0  ;;  %v9021_v29 = vld [vmem:[%s9494_s1 + $0x60] sm:$0xff] }
 0x3cc   : > { %v3834_v30 = vpop.permute.xlu1 %3833  ;;  %4771 = vperm.xlu0 %8749, %v12214_v63   ;;  %v12473_v45 = vadd.f32 %v2922_v17, %v2661_v48  ;;  %v2946_v41 = vpop.f32.mrf.mxu1  ;;  %v3890_v53 = vmul.f32 %v9021_v29, %v12336_v46  ;;  %v9022_v29 = vld [vmem:[%s9494_s1 + $0x70] sm:$0xff] }
 0x3cd   : > { %15841 = vst [vmem:[#allocation87_spill] sm:$0xff] %v12467_v52  ;;  %v3870_v39 = vadd.f32 %v12341_v20, %v3834_v30  ;;  %v12476_v9 = vpop.permute.xlu0 %4631  ;;  %v3892_v38 = vmul.f32 %v9022_v29, %v12336_v46 }
 0x3ce   : > { %15842 = vst [vmem:[#allocation95_spill] sm:$0xff] %v12476_v9  ;;  %8690 = vset.pattern.permute.xlu1 %v15843_v7 }
 0x3cf   : > { %v12479_v19 = vadd.f32 %v3888_v35, %v3870_v39  ;;  %4123 = vperm.xlu1 %8690, %v12193_v3   ;;  %v7929_v44 = vpop.f32.mrf.mxu0 }
 0x3d0   : > { %v3842_v32 = vpop.permute.xlu1 %3841  ;;  %4779 = vperm.xlu0 %8749, %v12223_v27   ;;  %v12485_v48 = vadd.f32 %v7985_v0, %v7929_v44  ;;  %v8079_v17 = vpop.f32.mrf.mxu1 }
 0x3d1   : > { %15844 = vst [vmem:[#allocation91_spill] sm:$0xff] %v12479_v19  ;;  %v3872_v30 = vadd.f32 %v12341_v20, %v3842_v32  ;;  %v2681_v10 = vpop.f32.mrf.mxu0 }
 0x3d2   : > { %v12488_v11 = vpop.permute.xlu0 %4099  ;;  %v12490_v39 = vadd.f32 %v2934_v56, %v2681_v10  ;;  %v3250_v35 = vpop.f32.mrf.mxu1 }
 0x3d3   : > { %15845 = vst [vmem:[#allocation93_spill] sm:$0xff] %v12488_v11  ;;  %v12492_v4 = vadd.f32 %v3890_v53, %v3872_v30  ;;  %8691 = vset.pattern.permute.xlu1 %v15836_v31 }
 0x3d4   : > { %4451 = vperm.xlu1 %8691, %v12245_v13   ;;  %v3850_v44 = vpop.permute.xlu1 %3849  ;;  %4783 = vperm.xlu0 %8749, %v12236_v33  }
 0x3d5   : > { %15846 = vst [vmem:[#allocation59_spill] sm:$0xff] %v12492_v4  ;;  %v3874_v32 = vadd.f32 %v12341_v20, %v3850_v44  ;;  %v7932_v0 = vpop.f32.mrf.mxu0  ;;  %v15182_v4 = vmov 15  }
 0x3d6   : > { %v12500_v50 = vpop.permute.xlu0 %4107  ;;  %v12502_v10 = vadd.f32 %v7988_v23, %v7932_v0  ;;  %v8082_v56 = vpop.f32.mrf.mxu1  ;;  %v15850_v0 = vmov 8  }
 0x3d7   : > { %15847 = vst [vmem:[#allocation45_spill] sm:$0xff] %v12500_v50  ;;  %v12504_v53 = vadd.f32 %v3892_v38, %v3874_v32  ;;  %v2701_v30 = vpop.f32.mrf.mxu0 }
 0x3d8   : > { %8692 = vset.pattern.permute.xlu1 %v15182_v4  ;;  %4803 = vperm.xlu0 %8749, %v12284_v22   ;;  %v12508_v29 = vadd.f32 %v2946_v41, %v2701_v30  ;;  %v3266_v24 = vpop.f32.mrf.mxu1 }
 0x3d9   : > { %15848 = vst [vmem:[#allocation48_spill] sm:$0xff] %v12504_v53  ;;  %5107 = vperm.xlu1 %8692, %v12214_v63   ;;  %v12511_v44 = vpop.permute.xlu1 %3927 }
 0x3da   : > { %v12513_v14 = vpop.permute.xlu0 %4111 }
 0x3db   : > { %15849 = vst [vmem:[#allocation94_spill] sm:$0xff] %v12513_v14  ;;  %v8023_v23 = vpop.f32.mrf.mxu0 }
 0x3dc   : > { %4807 = vperm.xlu0 %8749, %v12292_v18   ;;  %v3064_v38 = vadd.f32 %v8023_v23, %v12369_v51  ;;  %v8085_v32 = vpop.f32.mrf.mxu1  ;;  %v15852_v51 = vmov 12  }
 0x3dd   : > { %8693 = vset.pattern.permute.xlu1 %v15850_v0  ;;  %v12518_v4 = vpop.permute.xlu1 %3935  ;;  %v3056_v53 = vpop.f32.mrf.mxu0 }
 0x3de   : > { %3959 = vperm.xlu1 %8693, %v12203_v54   ;;  %v12521_v41 = vpop.permute.xlu0 %4115  ;;  %v3057_v63 = vadd.f32 %v3056_v53, %v12376_v1  ;;  %v12524_v30 = vadd.f32 %v8079_v17, %v3064_v38  ;;  %v3282_v19 = vpop.f32.mrf.mxu1 }
 0x3df   : > { %15851 = vst [vmem:[#allocation54_spill] sm:$0xff] %v12521_v41  ;;  %v15854_v41 = vmov 15  }
 0x3e0   : > { %4823 = vperm.xlu0 %8749, %v12385_v12   ;;  %v12527_v25 = vadd.f32 %v3250_v35, %v3057_v63 }
 0x3e2   : > { %8694 = vset.pattern.permute.xlu1 %v15852_v51  ;;  %v12530_v23 = vpop.permute.xlu1 %4095  ;;  %v12532_v50 = vpop.permute.xlu0 %4119 }
 0x3e3   : > { %15853 = vst [vmem:[#allocation96_spill] sm:$0xff] %v12532_v50  ;;  %4615 = vperm.xlu1 %8694, %v12236_v33   ;;  %v8026_v52 = vpop.f32.mrf.mxu0  ;;  %v8088_v9 = vpop.f32.mrf.mxu1 }
 0x3e4   : > { %8751 = vset.pattern.permute.xlu0 %v15854_v41  ;;  %v3078_v1 = vadd.f32 %v8026_v52, %v12390_v43 }
 0x3e5   : > { %5103 = vperm.xlu0 %8751, %v12231_v59   ;;  %v3070_v17 = vpop.f32.mrf.mxu0  ;;  %v3298_v53 = vpop.f32.mrf.mxu1 }
 0x3e6   : > { %v12538_v35 = vpop.permute.xlu0 %4139  ;;  %v3071_v38 = vadd.f32 %v3070_v17, %v12396_v62  ;;  %v12541_v63 = vadd.f32 %v8082_v56, %v3078_v1  ;;  %v15857_v62 = vmov 10  }
 0x3e7   : > { %15855 = vst [vmem:[#allocation50_spill] sm:$0xff] %v12538_v35  ;;  %8695 = vset.pattern.permute.xlu1 %v15833_v37  ;;  %v12544_v6 = vpop.permute.xlu1 %4263 }
 0x3e8   : > { %4943 = vperm.xlu1 %8695, %v12181_v5   ;;  %v12547_v11 = vadd.f32 %v3266_v24, %v3071_v38 }
 0x3e9   : > { %v8029_v60 = vpop.f32.mrf.mxu0  ;;  %v8091_v43 = vpop.f32.mrf.mxu1  ;;  %5123 = vperm.xlu0 %8751, %v12245_v13  }
 0x3ea   : > { %v12550_v59 = vpop.permute.xlu0 %4143  ;;  %v3092_v52 = vadd.f32 %v8029_v60, %v12408_v28 }
 0x3eb   : > { %15856 = vst [vmem:[#allocation97_spill] sm:$0xff] %v12550_v59  ;;  %v3084_v35 = vpop.f32.mrf.mxu0  ;;  %v3314_v17 = vpop.f32.mrf.mxu1 }
 0x3ec   : > { %8696 = vset.pattern.permute.xlu1 %v15857_v62  ;;  %v12554_v56 = vpop.permute.xlu1 %3939  ;;  %v3085_v1 = vadd.f32 %v3084_v35, %v12416_v40  ;;  %v12557_v50 = vadd.f32 %v8085_v32, %v3092_v52 }
 0x3ed   : > { %15858 = vst [vmem:[#allocation101_spill] sm:$0xff] %v12554_v56  ;;  %4291 = vperm.xlu1 %8696, %v12193_v3   ;;  %5127 = vperm.xlu0 %8751, %v12253_v57  }
 0x3ee   : > { %v12561_v24 = vadd.f32 %v3282_v19, %v3085_v1 }
 0x3ef   : > { %v12563_v38 = vpop.permute.xlu0 %3931 }
 0x3f0   : > { %15859 = vst [vmem:[#allocation51_spill] sm:$0xff] %v12563_v38  ;;  %v8032_v59 = vpop.f32.mrf.mxu0  ;;  %v8094_v28 = vpop.f32.mrf.mxu1 }
 0x3f1   : > { %8697 = vset.pattern.permute.xlu1 %v15852_v51  ;;  %v12566_v60 = vpop.permute.xlu1 %4103  ;;  %v3106_v56 = vadd.f32 %v8032_v59, %v12428_v2  ;;  %5143 = vperm.xlu0 %8751, %v12292_v18  }
 0x3f2   : > { %4619 = vperm.xlu1 %8697, %v12245_v13   ;;  %v3098_v40 = vpop.f32.mrf.mxu0  ;;  %v3330_v52 = vpop.f32.mrf.mxu1 }
 0x3f3   : > { %v12571_v32 = vpop.permute.xlu0 %3963  ;;  %v3099_v19 = vadd.f32 %v3098_v40, %v12433_v21  ;;  %v12574_v35 = vadd.f32 %v8088_v9, %v3106_v56 }
 0x3f4   : > { %15860 = vst [vmem:[#allocation55_spill] sm:$0xff] %v12571_v32 }
 0x3f5   : > { %v12576_v1 = vadd.f32 %v3298_v53, %v3099_v19  ;;  %5147 = vperm.xlu0 %8751, %v12262_v47  }
 0x3f6   : > { %8698 = vset.pattern.permute.xlu1 %v15843_v7  ;;  %v12580_v38 = vpop.permute.xlu1 %4431 }
 0x3f7   : > { %4127 = vperm.xlu1 %8698, %v12203_v54   ;;  %v12583_v2 = vpop.permute.xlu0 %3967  ;;  %v8035_v59 = vpop.f32.mrf.mxu0 }
 0x3f8   : > { %15861 = vst [vmem:[#allocation103_spill] sm:$0xff] %v12583_v2  ;;  %v8097_v42 = vpop.f32.mrf.mxu1  ;;  %v3120_v32 = vadd.f32 %v8035_v59, %v12446_v26 }
 0x3f9   : > { %v3112_v21 = vpop.f32.mrf.mxu0  ;;  %5155 = vperm.xlu0 %8751, %v12319_v58  }
 0x3fa   : > { %v12587_v9 = vpop.permute.xlu1 %4435  ;;  %v3113_v53 = vadd.f32 %v3112_v21, %v12453_v61  ;;  %v3346_v56 = vpop.f32.mrf.mxu1  ;;  %v12591_v40 = vadd.f32 %v8091_v43, %v3120_v32 }
 0x3fb   : > { %15862 = vst [vmem:[#allocation53_spill] sm:$0xff] %v12587_v9  ;;  %8699 = vset.pattern.permute.xlu1 %v15836_v31  ;;  %v12594_v19 = vpop.permute.xlu0 %3987 }
 0x3fc   : > { %4455 = vperm.xlu1 %8699, %v12253_v57   ;;  %15863 = vst [vmem:[#allocation98_spill] sm:$0xff] %v12594_v19  ;;  %v12596_v2 = vadd.f32 %v3314_v17, %v3113_v53 }
 0x3fd   : > { %5159 = vperm.xlu0 %8751, %v12385_v12  }
 0x3fe   : > { %v8038_v26 = vpop.f32.mrf.mxu0  ;;  %v8100_v59 = vpop.f32.mrf.mxu1 }
 0x3ff   : > { %v12599_v14 = vpop.permute.xlu1 %3943  ;;  %v3134_v9 = vadd.f32 %v8038_v26, %v12465_v36 }
 0x400   : > { %15864 = vst [vmem:[#allocation106_spill] sm:$0xff] %v12599_v14  ;;  %8700 = vset.pattern.permute.xlu1 %v15854_v41  ;;  %v12603_v61 = vpop.permute.xlu0 %4459  ;;  %v3126_v43 = vpop.f32.mrf.mxu0 }
 0x401   : > { %15865 = vst [vmem:[#allocation84_spill] sm:$0xff] %v12603_v61  ;;  %5111 = vperm.xlu1 %8700, %v12181_v5   ;;  %v3127_v32 = vadd.f32 %v3126_v43, %v12473_v45  ;;  %v12607_v21 = vadd.f32 %v8094_v28, %v3134_v9  ;;  %v3362_v17 = vpop.f32.mrf.mxu1 }
 0x403   : > { %v12609_v53 = vadd.f32 %v3330_v52, %v3127_v32 }
 0x404   : > { %v12611_v19 = vpop.permute.xlu1 %4599  ;;  %v12613_v8 = vpop.permute.xlu0 %4463 }
 0x405   : > { %15866 = vst [vmem:[#allocation104_spill] sm:$0xff] %v12613_v8  ;;  %8701 = vset.pattern.permute.xlu1 %v15843_v7  ;;  %v8041_v36 = vpop.f32.mrf.mxu0 }
 0x406   : > { %4131 = vperm.xlu1 %8701, %v12284_v22   ;;  %v3148_v26 = vadd.f32 %v8041_v36, %v12485_v48  ;;  %v8191_v61 = vpop.f32.mrf.mxu1 }
 0x407   : > { %v3140_v5 = vpop.f32.mrf.mxu0 }
 0x408   : > { %v3141_v45 = vadd.f32 %v3140_v5, %v12490_v39  ;;  %v3666_v28 = vpop.f32.mrf.mxu1  ;;  %v12619_v9 = vpop.permute.xlu0 %4483  ;;  %v12621_v52 = vadd.f32 %v8097_v42, %v3148_v26 }
 0x409   : > { %15867 = vst [vmem:[#allocation118_spill] sm:$0xff] %v12619_v9  ;;  %v12623_v43 = vpop.permute.xlu1 %3947 }
 0x40a   : > { %15868 = vst [vmem:[#allocation111_spill] sm:$0xff] %v12623_v43  ;;  %8702 = vset.pattern.permute.xlu1 %v15839_v16  ;;  %v8044_v32 = vpop.f32.mrf.mxu0  ;;  %v12626_v8 = vadd.f32 %v3346_v56, %v3141_v45 }
 0x40b   : > { %4787 = vperm.xlu1 %8702, %v12245_v13   ;;  %v3162_v48 = vadd.f32 %v8044_v32, %v12502_v10  ;;  %v8194_v36 = vpop.f32.mrf.mxu1 }
 0x40c   : > { %v3154_v14 = vpop.f32.mrf.mxu0 }
 0x40d   : > { %v3155_v39 = vadd.f32 %v3154_v14, %v12508_v29  ;;  %v3678_v5 = vpop.f32.mrf.mxu1  ;;  %v12631_v15 = vpop.permute.xlu0 %4267  ;;  %v12633_v42 = vadd.f32 %v8100_v59, %v3162_v48 }
 0x40e   : > { %15869 = vst [vmem:[#allocation109_spill] sm:$0xff] %v12631_v15  ;;  %v12635_v26 = vpop.permute.xlu1 %4603 }
 0x40f   : > { %15870 = vst [vmem:[#allocation89_spill] sm:$0xff] %v12635_v26  ;;  %8703 = vset.pattern.permute.xlu1 %v15854_v41  ;;  %v8197_v9 = vpop.f32.mrf.mxu1  ;;  %v12638_v56 = vadd.f32 %v3362_v17, %v3155_v39 }
 0x410   : > { %v8135_v45 = vpop.f32.mrf.mxu0  ;;  %5115 = vperm.xlu1 %8703, %v12223_v27  }
 0x411   : > { %15871 = vst [vmem:[#allocation22_spill] sm:$0xff] %v12638_v56  ;;  %v3496_v10 = vadd.f32 %v8135_v45, %v12524_v30  ;;  %v3690_v32 = vpop.f32.mrf.mxu1  ;;  %v12642_v43 = vpop.permute.xlu0 %4271 }
 0x412   : > { %v3489_v14 = vpop.f32.mrf.mxu0 }
 0x413   : > { %v12644_v29 = vadd.f32 %v8191_v61, %v3496_v10  ;;  %v3490_v59 = vadd.f32 %v3489_v14, %v12527_v25  ;;  %v12647_v48 = vpop.permute.xlu1 %4439  ;;  %v8200_v26 = vpop.f32.mrf.mxu1 }
 0x414   : > { %v8138_v15 = vpop.f32.mrf.mxu0  ;;  %8704 = vset.pattern.permute.xlu1 %v15857_v62 }
 0x415   : > { %15872 = vst [vmem:[#allocation110_spill] sm:$0xff] %v12644_v29  ;;  %v12650_v17 = vadd.f32 %v3666_v28, %v3490_v59  ;;  %v3508_v27 = vadd.f32 %v8138_v15, %v12541_v63  ;;  %4295 = vperm.xlu1 %8704, %v12203_v54   ;;  %v3702_v30 = vpop.f32.mrf.mxu1  ;;  %v12654_v39 = vpop.permute.xlu0 %4275 }
 0x416   : > { %15874 = vst [vmem:[#allocation135_spill] sm:$0xff] %v12654_v39  ;;  %v3501_v45 = vpop.f32.mrf.mxu0  ;;  %v9024_v39 = vld [vmem:[%s9492_s18] sm:$0xff] }
 0x417   : > { %15873 = vst [vmem:[#allocation63_spill] sm:$0xff] %v12650_v17  ;;  %v12656_v61 = vadd.f32 %v8194_v36, %v3508_v27  ;;  %v3502_v25 = vadd.f32 %v3501_v45, %v12547_v11  ;;  %v8203_v10 = vpop.f32.mrf.mxu1 }
 0x418   : > { %v8141_v14 = vpop.f32.mrf.mxu0  ;;  %v12659_v56 = vpop.permute.xlu1 %4767 }
 0x419   : > { %15875 = vst [vmem:[#allocation88_spill] sm:$0xff] %v12656_v61  ;;  %v12661_v29 = vadd.f32 %v3678_v5, %v3502_v25  ;;  %v3520_v28 = vadd.f32 %v8141_v14, %v12557_v50  ;;  %8705 = vset.pattern.permute.xlu1 %v15852_v51  ;;  %v3714_v15 = vpop.f32.mrf.mxu1  ;;  %v12666_v63 = vpop.permute.xlu0 %4283 }
 0x41a   : > { %v3513_v54 = vpop.f32.mrf.mxu0  ;;  %4623 = vperm.xlu1 %8705, %v12253_v57   ;;  %15877 = vst [vmem:[#allocation30_spill] sm:$0xff] %v12666_v63  ;;  %v12845_v63 = vstv %s12772_s9 }
 0x41b   : > { %15876 = vst [vmem:[#allocation18_spill] sm:$0xff] %v12661_v29  ;;  %v12668_v36 = vadd.f32 %v8197_v9, %v3520_v28  ;;  %v3514_v11 = vadd.f32 %v3513_v54, %v12561_v24  ;;  %v8206_v45 = vpop.f32.mrf.mxu1 }
 0x41c   : > { %v8144_v59 = vpop.f32.mrf.mxu0 }
 0x41d   : > { %15878 = vst [vmem:[#allocation116_spill] sm:$0xff] %v12668_v36  ;;  %v12671_v27 = vadd.f32 %v3690_v32, %v3514_v11  ;;  %v3532_v5 = vadd.f32 %v8144_v59, %v12574_v35  ;;  %v12674_v25 = vpop.permute.xlu1 %4443  ;;  %v12677_v14 = vpop.permute.xlu0 %4287 }
 0x41e   : > { %15880 = vst [vmem:[#allocation100_spill] sm:$0xff] %v12674_v25  ;;  %v3525_v50 = vpop.f32.mrf.mxu0  ;;  %8706 = vset.pattern.permute.xlu1 %v15850_v0  ;;  %15881 = vst [vmem:[#allocation66_spill] sm:$0xff] %v12677_v14  ;;  %v3726_v32 = vpop.f32.mrf.mxu1 }
 0x41f   : > { %15879 = vst [vmem:[#allocation73_spill] sm:$0xff] %v12671_v27  ;;  %v12679_v61 = vadd.f32 %v8200_v26, %v3532_v5  ;;  %v3526_v9 = vadd.f32 %v3525_v50, %v12576_v1  ;;  %3971 = vperm.xlu1 %8706, %v12262_v47   ;;  %v12797_v27 = vstv %s7458_s22  ;;  %s9234_s22 = smov 120  }
 0x420   : > { %v8147_v24 = vpop.f32.mrf.mxu0  ;;  %v8209_v5 = vpop.f32.mrf.mxu1 }
 0x421   : > { %15882 = vst [vmem:[#allocation34_spill] sm:$0xff] %v12679_v61  ;;  %v12683_v28 = vadd.f32 %v3702_v30, %v3526_v9  ;;  %v3544_v35 = vadd.f32 %v8147_v24, %v12591_v40  ;;  %v12692_v26 = vpop.permute.xlu0 %4307 }
 0x422   : > { %v3537_v54 = vpop.f32.mrf.mxu0  ;;  %v12686_v11 = vpop.permute.xlu1 %3951  ;;  %15886 = vst [vmem:[#allocation25_spill] sm:$0xff] %v12692_v26 }
 0x423   : > { %15883 = vst [vmem:[#allocation99_spill] sm:$0xff] %v12683_v28  ;;  %15884 = vst [vmem:[#allocation107_spill] sm:$0xff] %v12686_v11  ;;  %v12688_v59 = vadd.f32 %v8203_v10, %v3544_v35  ;;  %v3538_v36 = vadd.f32 %v3537_v54, %v12596_v2  ;;  %8707 = vset.pattern.permute.xlu1 %v15857_v62 }
 0x424   : > { %v8150_v1 = vpop.f32.mrf.mxu0  ;;  %4299 = vperm.xlu1 %8707, %v12284_v22  }
 0x425   : > { %15885 = vst [vmem:[#allocation75_spill] sm:$0xff] %v12688_v59  ;;  %v12695_v47 = vadd.f32 %v3714_v15, %v3538_v36  ;;  %v3556_v30 = vadd.f32 %v8150_v1, %v12607_v21  ;;  %v12703_v2 = vpop.permute.xlu0 %4311  ;;  %v3738_v21 = vpop.f32.mrf.mxu1  ;;  %v12779_v59 = vld [vmem:[%s9494_s1] sm:$0xff] }
 0x426   : > { %v3549_v40 = vpop.f32.mrf.mxu0  ;;  %15889 = vst [vmem:[#allocation37_spill] sm:$0xff] %v12703_v2 }
 0x427   : > { %15887 = vst [vmem:[#allocation52_spill] sm:$0xff] %v12695_v47  ;;  %v12698_v50 = vadd.f32 %v8206_v45, %v3556_v30  ;;  %v3550_v10 = vadd.f32 %v3549_v40, %v12609_v53  ;;  %v12701_v9 = vpop.permute.xlu1 %4279  ;;  %v15906_v47 = vld [vmem:[#allocation46_spill] sm:$0xff] }
 0x428   : > { %v8153_v24 = vpop.f32.mrf.mxu0  ;;  %8708 = vset.pattern.permute.xlu1 %v15833_v37  ;;  %v15907_v61 = vsub.s32 2, %v15906_v47  ;;  %v15910_v26 = vsub.s32 4, %v15906_v47 }
 0x429   : > { %15888 = vst [vmem:[#allocation127_spill] sm:$0xff] %v12698_v50  ;;  %v12706_v35 = vadd.f32 %v3726_v32, %v3550_v10  ;;  %v3568_v15 = vadd.f32 %v8153_v24, %v12621_v52  ;;  %4955 = vperm.xlu1 %8708, %v12245_v13   ;;  %v12713_v53 = vpop.permute.xlu0 %4319  ;;  %v8212_v52 = vpop.f32.mrf.mxu1 }
 0x42a   : > { %v3561_v36 = vpop.f32.mrf.mxu0  ;;  %15892 = vst [vmem:[#allocation124_spill] sm:$0xff] %v12713_v53 }
 0x42b   : > { %15890 = vst [vmem:[#allocation102_spill] sm:$0xff] %v12706_v35  ;;  %v12710_v54 = vadd.f32 %v8209_v5, %v3568_v15  ;;  %v3562_v45 = vadd.f32 %v3561_v36, %v12626_v8  ;;  %v12774_v35 = vstv %s7456_s11  ;;  %s7469_s11 = sld [smem:[#allocation8 + $0xf]] }
 0x42c   : > { %v8156_v1 = vpop.f32.mrf.mxu0  ;;  %v12715_v30 = vpop.permute.xlu1 %4935 }
 0x42d   : > { %15891 = vst [vmem:[#allocation128_spill] sm:$0xff] %v12710_v54  ;;  %v12717_v40 = vadd.f32 %v3738_v21, %v3562_v45  ;;  %v3580_v32 = vadd.f32 %v8156_v1, %v12633_v42  ;;  %8709 = vset.pattern.permute.xlu1 %v15843_v7  ;;  %v12724_v5 = vpop.permute.xlu0 %4323  ;;  %v12754_v1 = vld [vmem:[%s641_s16 + $0x8] sm:$0xff]  ;;  %v12766_v54 = vstv %s7454_s10  ;;  %s12790_s16 = sld [smem:[#allocation7 + $0xe]] }
 0x42e   : > { %4135 = vperm.xlu1 %8709, %v12292_v18   ;;  %15895 = vst [vmem:[#allocation117_spill] sm:$0xff] %v12724_v5  ;;  %v12788_v28 = vrot.slane %v12754_v1, %v15907_v61  ;;  %v15909_v61 = vsub.s32 3, %v15906_v47  ;;  %v15913_v5 = vsub.s32 6, %v15906_v47  ;;  %s7467_s10 = sld [smem:[#allocation8 + $0xe]] }
 0x42f   : > { %15893 = vst [vmem:[#allocation105_spill] sm:$0xff] %v12717_v40  ;;  %v12722_v13 = vadd.f32 %v8212_v52, %v3580_v32  ;;  %v15903_v52 = vld [vmem:[#allocation49_spill] sm:$0xff]  ;;  %v12770_v40 = vrot.slane %v12754_v1, %v15822_v49 }
 0x430   : > { %v12807_v17 = vrot.slane %v12754_v1, %v15909_v61  ;;  %v4330_v61 = vadd.f32 %v12788_v28, %v12544_v6  ;;  %v3860_v6 = vadd.f32 %v12341_v20, %v12362_v34 }
 0x431   : > { %15894 = vst [vmem:[#allocation39_spill] sm:$0xff] %v12722_v13  ;;  %v12726_v10 = vpop.permute.xlu1 %3955  ;;  %v12761_v13 = vrot.slane %v12754_v1, %v15903_v52  ;;  %v4012_v52 = vmul.f32 %v12779_v59, %v12766_v54  ;;  %v4162_v29 = vadd.f32 %v12770_v40, %v12530_v23  ;;  %v4348_v23 = vmul.f32 %v12779_v59, %v12797_v27 }
 0x432   : > { %15896 = vst [vmem:[#allocation120_spill] sm:$0xff] %v12726_v10  ;;  %8710 = vset.pattern.permute.xlu1 %v15839_v16  ;;  %v12730_v8 = vpop.permute.xlu0 %4947 }
 0x433   : > { %4791 = vperm.xlu1 %8710, %v12253_v57   ;;  %15897 = vst [vmem:[#allocation130_spill] sm:$0xff] %v12730_v8  ;;  %v12855_v8 = vrot.slane %v12754_v1, %v15913_v5 }
 0x436   : > { %v12732_v24 = vpop.permute.xlu1 %4611  ;;  %v12735_v42 = vpop.permute.xlu0 %4951 }
 0x437   : > { %15898 = vst [vmem:[#allocation113_spill] sm:$0xff] %v12732_v24  ;;  %8711 = vset.pattern.permute.xlu1 %v15854_v41  ;;  %v4852_v24 = vmul.f32 %v12779_v59, %v12845_v63 }
 0x438   : > { %5119 = vperm.xlu1 %8711, %v12236_v33  }
 0x43a   : > { %v12740_v21 = vpop.permute.xlu0 %4971 }
 0x43b   : > { %v12738_v15 = vpop.permute.xlu1 %4939  ;;  %15900 = vst [vmem:[#allocation129_spill] sm:$0xff] %v12740_v21  ;;  %v12814_v21 = vrot.slane %v12754_v1, %v15910_v26  ;;  %v3878_v26 = vmul.f32 %v12779_v59, %v12336_v46 }
 0x43c   : > { %15899 = vst [vmem:[#allocation80_spill] sm:$0xff] %v12738_v15  ;;  %8712 = vset.pattern.permute.xlu1 %v15836_v31 }
 0x43d   : > { %4467 = vperm.xlu1 %8712, %v12284_v22   ;;  %v3894_v5 = vadd.f32 %v3878_v26, %v3860_v6 }
 0x43e   : > { %v12744_v36 = vpop.permute.xlu0 %4979 }
 0x43f   : > { %15901 = vst [vmem:[#allocation61_spill] sm:$0xff] %v12744_v36  ;;  %v12809_v36 = vstv %s7460_s17 }
 0x440   : > { %v12746_v45 = vpop.permute.xlu1 %4447 }
 0x441   : > { %8713 = vset.pattern.permute.xlu1 %v15839_v16 }
 0x442   : > { %4795 = vperm.xlu1 %8713, %v12193_v3   ;;  %v12750_v33 = vpop.permute.xlu0 %4983 }
 0x443   : > { %15902 = vst [vmem:[#allocation112_spill] sm:$0xff] %v12750_v33  ;;  %v4516_v33 = vmul.f32 %v12779_v59, %v12809_v36 }
 0x445   : > { %v12756_v32 = vpop.permute.xlu1 %4775 }
 0x446   : > { %8714 = vset.pattern.permute.xlu1 %v15850_v0 }
 0x447   : > { %3975 = vperm.xlu1 %8714, %v12268_v55   ;;  %v12764_v3 = vpop.permute.xlu0 %4771  ;;  %v3994_v55 = vadd.f32 %v12761_v13, %v12511_v44  ;;  %v4180_v44 = vmul.f32 %v12779_v59, %v12774_v35 }
 0x448   : > { %15904 = vst [vmem:[#allocation115_spill] sm:$0xff] %v12764_v3 }
 0x449   : > { %v4028_v53 = vadd.f32 %v4012_v52, %v3994_v55  ;;  %v15912_v52 = vsub.s32 5, %v15906_v47  ;;  %v4196_v2 = vadd.f32 %v4180_v44, %v4162_v29  ;;  %v4364_v29 = vadd.f32 %v4348_v23, %v4330_v61 }
 0x44a   : > { %v12776_v50 = vpop.permute.xlu1 %4123  ;;  %v12860_v44 = vstv %s12790_s16  ;;  %v12879_v61 = vstv %s12816_s28  ;;  %s16199_s16 = sld [smem:[#allocation139_spill]] }
 0x44b   : > { %15905 = vst [vmem:[#allocation126_spill] sm:$0xff] %v12776_v50  ;;  %8715 = vset.pattern.permute.xlu1 %v15857_v62  ;;  %v12793_v49 = vpop.permute.xlu0 %4779  ;;  %v12837_v55 = vrot.slane %v12754_v1, %v15912_v52  ;;  %v4045_v34 = vmax.f32 %v4028_v53, 0.0  ;;  %v4213_v53 = vmax.f32 %v4196_v2, 0.0  ;;  %v4381_v26 = vmax.f32 %v4364_v29, 0.0 }
 0x44c   : > { %15908 = vst [vmem:[#allocation81_spill] sm:$0xff] %v12793_v49  ;;  %4303 = vperm.xlu1 %8715, %v12292_v18   ;;  %v12818_v18 = vstv %s7462_s14 }
 0x44d   : > { %v4684_v52 = vmul.f32 %v12779_v59, %v12818_v18  ;;  %v4230_v15 = vmul.f32 %v12879_v61, %v4213_v53 }
 0x44f   : > { %v12824_v50 = vpop.permute.xlu1 %4451  ;;  %v12826_v10 = vpop.permute.xlu0 %4783 }
 0x450   : > { %15911 = vst [vmem:[#allocation134_spill] sm:$0xff] %v12824_v50  ;;  %8717 = vset.pattern.permute.xlu1 %v15833_v37  ;;  %v4498_v50 = vadd.f32 %v12807_v17, %v12580_v38  ;;  %v4666_v38 = vadd.f32 %v12814_v21, %v12611_v19  ;;  %v4834_v19 = vadd.f32 %v12837_v55, %v12659_v56  ;;  %v12890_v56 = vstv %s12830_s24  ;;  %s16200_s24 = sld [smem:[#allocation142_spill]] }
 0x451   : > { %4959 = vperm.xlu1 %8717, %v12253_v57   ;;  %v12867_v57 = vstv %s12795_s25 }
 0x452   : > { %v4532_v23 = vadd.f32 %v4516_v33, %v4498_v50  ;;  %v4062_v2 = vmul.f32 %v12867_v57, %v4045_v34  ;;  %v4700_v50 = vadd.f32 %v4684_v52, %v4666_v38  ;;  %v5002_v33 = vadd.f32 %v12855_v8, %v12715_v30 }
 0x453   : > { %v12862_v49 = vpop.permute.xlu0 %4803  ;;  %v12897_v34 = vstv %s12848_s21  ;;  %v4398_v52 = vmul.f32 %v12890_v56, %v4381_v26 }
 0x454   : > { %15914 = vst [vmem:[#allocation121_spill] sm:$0xff] %v12862_v49  ;;  %v12871_v25 = vpop.permute.xlu1 %5107  ;;  %v5020_v49 = vmul.f32 %v12779_v59, %v12860_v44  ;;  %v4549_v3 = vmax.f32 %v4532_v23, 0.0  ;;  %v4717_v29 = vmax.f32 %v4700_v50, 0.0  ;;  %v12909_v23 = vstv %s12873_s19 }
 0x455   : > { %15915 = vst [vmem:[#allocation31_spill] sm:$0xff] %v12871_v25  ;;  %8718 = vset.pattern.permute.xlu1 %v15850_v0  ;;  %v3910_v25 = vadd.f32 %v9024_v39, %v3894_v5  ;;  %v12905_v39 = vstv %s12864_s15 }
 0x456   : > { %3979 = vperm.xlu1 %8718, %v12319_v58   ;;  %v4868_v58 = vadd.f32 %v4852_v24, %v4834_v19  ;;  %v5036_v38 = vadd.f32 %v5020_v49, %v5002_v33  ;;  %v4566_v24 = vmul.f32 %v12897_v34, %v4549_v3  ;;  %v15919_v19 = vsub.s32 7, %v15906_v47  ;;  %v9025_v47 = vld [vmem:[%s9537_s13 + $0x38] sm:$0xff]  ;;  %s14961_s21 = scalar_lea.vmem %s16200_s24, %s9509_s23 }
 0x457   : > { %v12887_v6 = vpop.permute.xlu0 %4807  ;;  %v4078_v30 = vadd.f32 %v4062_v2, %v3910_v25  ;;  %v12916_v2 = vstv %s7468_s20  ;;  %v4734_v26 = vmul.f32 %v12905_v39, %v4717_v29  ;;  %v12924_v3 = vstv %s7467_s10 }
 0x458   : > { %15916 = vst [vmem:[#allocation57_spill] sm:$0xff] %v12887_v6  ;;  %v4885_v53 = vmax.f32 %v4868_v58, 0.0  ;;  %v12914_v25 = vrot.slane %v12754_v1, %v15919_v19  ;;  %v5053_v50 = vmax.f32 %v5036_v38, 0.0  ;;  %v12934_v19 = vld [vmem:[%s9537_s13 + $0x50] sm:$0xff] }
 0x459   : > { %v12894_v14 = vpop.permute.xlu1 %3959  ;;  %v4246_v5 = vadd.f32 %v4230_v15, %v4078_v30  ;;  %v5188_v15 = vmul.f32 %v12779_v59, %v12916_v2 }
 0x45a   : > { %15917 = vst [vmem:[#allocation133_spill] sm:$0xff] %v12894_v14  ;;  %8719 = vset.pattern.permute.xlu1 %v15852_v51  ;;  %v4902_v58 = vmul.f32 %v12909_v23, %v4885_v53  ;;  %v5070_v29 = vmul.f32 %v12924_v3, %v5053_v50  ;;  %v12937_v53 = vstv %s7469_s11  ;;  %v9031_v14 = vld [vmem:[%s11465_s30 + $0x78] sm:$0xff] }
 0x45b   : > { %4635 = vperm.xlu1 %8719, %v12284_v22   ;;  %v12902_v6 = vpop.permute.xlu0 %4823  ;;  %v4414_v22 = vadd.f32 %v4398_v52, %v4246_v5 }
 0x45c   : > { %15918 = vst [vmem:[#allocation21_spill] sm:$0xff] %v12902_v6  ;;  %v4164_v6 = vadd.f32 %v12770_v40, %v12566_v60 }
 0x45d   : > { %v4582_v33 = vadd.f32 %v4566_v24, %v4414_v22 }
 0x45e   : > { %v12918_v49 = vpop.permute.xlu1 %4615 }
 0x45f   : > { %8720 = vset.pattern.permute.xlu1 %v15833_v37  ;;  %v4750_v52 = vadd.f32 %v4734_v26, %v4582_v33 }
 0x460   : > { %4963 = vperm.xlu1 %8720, %v9025_v47   ;;  %v5104_v1 = vpop.permute.xlu0 %5103 }
 0x461   : > { %v5170_v30 = vadd.f32 %v12914_v25, %v5104_v1  ;;  %v4918_v24 = vadd.f32 %v4902_v58, %v4750_v52  ;;  %v12954_v58 = vld [vmem:[%s9537_s13 + $0x68] sm:$0xff]  ;;  %v12961_v52 = vld [vmem:[%s9537_s13 + $0x58] sm:$0xff] }
 0x463   : > { %v5204_v38 = vadd.f32 %v5188_v15, %v5170_v30  ;;  %v12930_v5 = vpop.permute.xlu1 %4943  ;;  %v5086_v22 = vadd.f32 %v5070_v29, %v4918_v24  ;;  %v12946_v15 = vld [vmem:[%s9537_s13 + $0x40] sm:$0xff]  ;;  %v3996_v24 = vadd.f32 %v12761_v13, %v12518_v4 }
 0x464   : > { %8722 = vset.pattern.permute.xlu1 %v15836_v31 }
 0x465   : > { %v5221_v59 = vmax.f32 %v5204_v38, 0.0  ;;  %4471 = vperm.xlu1 %8722, %v12934_v19   ;;  %v9030_v38 = vld [vmem:[%s9494_s1 + $0x10] sm:$0xff] }
 0x466   : > { %v3880_v4 = vmul.f32 %v9030_v38, %v12336_v46  ;;  %v4686_v46 = vmul.f32 %v9030_v38, %v12818_v18 }
 0x467   : > { %v5238_v26 = vmul.f32 %v12937_v53, %v5221_v59  ;;  %v4014_v59 = vmul.f32 %v9030_v38, %v12766_v54 }
 0x468   : > { %v12940_v1 = vpop.permute.xlu1 %4291 }
 0x469   : > { %15920 = vst [vmem:[#allocation114_spill] sm:$0xff] %v12940_v1  ;;  %8723 = vset.pattern.permute.xlu1 %v15839_v16  ;;  %v12943_v50 = vadd.f32 %v5238_v26, %v5086_v22  ;;  %v4182_v26 = vmul.f32 %v9030_v38, %v12774_v35  ;;  %v4030_v1 = vadd.f32 %v4014_v59, %v3996_v24 }
 0x46a   : > { %4799 = vperm.xlu1 %8723, %v12946_v15   ;;  %v4500_v24 = vadd.f32 %v12807_v17, %v12647_v48 }
 0x46b   : > { %15921 = vst [vmem:[#allocation122_spill] sm:$0xff] %v12943_v50  ;;  %5270 = vmax.xlane.f32.xlu0 %v12943_v50  ;;  %v4198_v60 = vadd.f32 %v4182_v26, %v4164_v6 }
 0x46d   : > { %v12950_v33 = vpop.permute.xlu1 %4619 }
 0x46e   : > { %15922 = vst [vmem:[#allocation131_spill] sm:$0xff] %v12950_v33  ;;  %8724 = vset.pattern.permute.xlu1 %v15843_v7  ;;  %v4350_v33 = vmul.f32 %v9030_v38, %v12797_v27 }
 0x46f   : > { %4147 = vperm.xlu1 %8724, %v12954_v58  }
 0x472   : > { %v12957_v30 = vpop.permute.xlu1 %4127 }
 0x473   : > { %15923 = vst [vmem:[#allocation125_spill] sm:$0xff] %v12957_v30  ;;  %8725 = vset.pattern.permute.xlu1 %v15836_v31 }
 0x474   : > { %4475 = vperm.xlu1 %8725, %v12961_v52  }
 0x477   : > { %v12964_v29 = vpop.permute.xlu1 %4455 }
 0x478   : > { %15924 = vst [vmem:[#allocation123_spill] sm:$0xff] %v12964_v29  ;;  %8726 = vset.pattern.permute.xlu1 %v15854_v41 }
 0x479   : > { %5131 = vperm.xlu1 %8726, %v9025_v47   ;;  %v4332_v47 = vadd.f32 %v12788_v28, %v12642_v43  ;;  %v4518_v43 = vmul.f32 %v9030_v38, %v12809_v36 }
 0x47b   : > { %v4366_v59 = vadd.f32 %v4350_v33, %v4332_v47  ;;  %v4534_v33 = vadd.f32 %v4518_v43, %v4500_v24  ;;  %v9032_v47 = vld [vmem:[%s9492_s18 + $0x10] sm:$0xff]  ;;  %v5004_v43 = vadd.f32 %v12855_v8, %v12930_v5 }
 0x47c   : > { %v5112_v22 = vpop.permute.xlu1 %5111 }
 0x47d   : > { %8727 = vset.pattern.permute.xlu1 %v15850_v0  ;;  %v15926_v0 = vld [vmem:[#allocation83_spill] sm:$0xff] }
 0x47e   : > { %3983 = vperm.xlu1 %8727, %v12385_v12   ;;  %v3862_v50 = vadd.f32 %v12341_v20, %v15926_v0  ;;  %v4047_v12 = vmax.f32 %v4030_v1, 0.0  ;;  %v15928_v20 = vld [vmem:[#allocation44_spill] sm:$0xff]  ;;  %v4383_v1 = vmax.f32 %v4366_v59, 0.0  ;;  %v4551_v59 = vmax.f32 %v4534_v33, 0.0 }
 0x47f   : > { %v4668_v6 = vadd.f32 %v12814_v21, %v15928_v20  ;;  %v5022_v20 = vmul.f32 %v9030_v38, %v12860_v44 }
 0x480   : > { %v4064_v26 = vmul.f32 %v12867_v57, %v4047_v12  ;;  %v4400_v12 = vmul.f32 %v12890_v56, %v4383_v1 }
 0x481   : > { %v12979_v30 = vpop.permute.xlu1 %4131  ;;  %5428 = vrot.lane.b32.xlu0 %v9031_v14, %s9234_s22  ;;  %v4215_v14 = vmax.f32 %v4198_v60, 0.0  ;;  %v4702_v60 = vadd.f32 %v4686_v46, %v4668_v6  ;;  %v5038_v1 = vadd.f32 %v5022_v20, %v5004_v43  ;;  %v13034_v43 = vld [vmem:[%s9537_s13 + $0x60] sm:$0xff] }
 0x482   : > { %15925 = vst [vmem:[#allocation64_spill] sm:$0xff] %v12979_v30  ;;  %8728 = vset.pattern.permute.xlu1 %v15852_v51  ;;  %v3896_v30 = vadd.f32 %v3880_v4, %v3862_v50  ;;  %v4854_v50 = vmul.f32 %v9030_v38, %v12845_v63  ;;  %v4836_v4 = vadd.f32 %v12837_v55, %v12756_v32 }
 0x483   : > { %4639 = vperm.xlu1 %8728, %v12934_v19   ;;  %v4232_v48 = vmul.f32 %v12879_v61, %v4215_v14  ;;  %v5190_v32 = vmul.f32 %v9030_v38, %v12916_v2  ;;  %v5172_v14 = vadd.f32 %v12914_v25, %v5112_v22  ;;  %v4719_v46 = vmax.f32 %v4702_v60, 0.0 }
 0x484   : > { %v3912_v0 = vadd.f32 %v9032_v47, %v3896_v30  ;;  %v4870_v24 = vadd.f32 %v4854_v50, %v4836_v4  ;;  %v5055_v47 = vmax.f32 %v5038_v1, 0.0  ;;  %v13025_v50 = vld [vmem:[%s9537_s13 + $0x70] sm:$0xff]  ;;  %v9036_v1 = vld [vmem:[%s9494_s1 + $0x20] sm:$0xff] }
 0x486   : > { %v12991_v29 = vpop.permute.xlu1 %4787  ;;  %v4080_v11 = vadd.f32 %v4064_v26, %v3912_v0  ;;  %v4568_v26 = vmul.f32 %v12897_v34, %v4551_v59  ;;  %v4887_v5 = vmax.f32 %v4870_v24, 0.0  ;;  %v5072_v4 = vmul.f32 %v12924_v3, %v5055_v47 }
 0x487   : > { %15927 = vst [vmem:[#allocation28_spill] sm:$0xff] %v12991_v29  ;;  %8729 = vset.pattern.permute.xlu1 %v15833_v37 }
 0x488   : > { %4967 = vperm.xlu1 %8729, %v12946_v15   ;;  %v4248_v30 = vadd.f32 %v4232_v48, %v4080_v11  ;;  %v4736_v11 = vmul.f32 %v12905_v39, %v4719_v46  ;;  %v4904_v0 = vmul.f32 %v12909_v23, %v4887_v5  ;;  %v13048_v46 = vld [vmem:[%s9537_s13 + $0x78] sm:$0xff]  ;;  %v15932_v5 = vld [vmem:[#allocation106_spill] sm:$0xff] }
 0x48a   : > { %v4416_v6 = vadd.f32 %v4400_v12, %v4248_v30 }
 0x48b   : > { %v13005_v29 = vpop.permute.xlu1 %5115 }
 0x48c   : > { %8731 = vset.pattern.permute.xlu1 %v15857_v62  ;;  %v5206_v62 = vadd.f32 %v5190_v32, %v5172_v14  ;;  %v4584_v38 = vadd.f32 %v4568_v26, %v4416_v6 }
 0x48d   : > { %4315 = vperm.xlu1 %8731, %v12954_v58  }
 0x48e   : > { %v5223_v48 = vmax.f32 %v5206_v62, 0.0  ;;  %v4752_v60 = vadd.f32 %v4736_v11, %v4584_v38  ;;  %v3998_v62 = vadd.f32 %v12761_v13, %v15932_v5  ;;  %v4184_v11 = vmul.f32 %v9036_v1, %v12774_v35  ;;  %v15933_v38 = vld [vmem:[#allocation94_spill] sm:$0xff] }
 0x48f   : > { %v4166_v47 = vadd.f32 %v12770_v40, %v15933_v38 }
 0x490   : > { %v13015_v33 = vpop.permute.xlu1 %4295  ;;  %v4920_v12 = vadd.f32 %v4904_v0, %v4752_v60  ;;  %v5240_v59 = vmul.f32 %v12937_v53, %v5223_v48  ;;  %v4352_v48 = vmul.f32 %v9036_v1, %v12797_v27  ;;  %v9038_v60 = vld [vmem:[%s11465_s30 + $0x68] sm:$0xff] }
 0x491   : > { %8732 = vset.pattern.permute.xlu1 %v15852_v51 }
 0x492   : > { %4643 = vperm.xlu1 %8732, %v12961_v52   ;;  %v5088_v30 = vadd.f32 %v5072_v4, %v4920_v12  ;;  %v4334_v4 = vadd.f32 %v12788_v28, %v12701_v9  ;;  %v4200_v12 = vadd.f32 %v4184_v11, %v4166_v47  ;;  %v4670_v9 = vadd.f32 %v12814_v21, %v12918_v49 }
 0x494   : > { %v13037_v24 = vadd.f32 %v5240_v59, %v5088_v30  ;;  %v4520_v30 = vmul.f32 %v9036_v1, %v12809_v36  ;;  %v4217_v38 = vmax.f32 %v4200_v12, 0.0 }
 0x495   : > { %v13020_v22 = vpop.permute.xlu1 %4623 }
 0x496   : > { %8733 = vset.pattern.permute.xlu1 %v15843_v7  ;;  %15930 = vst [vmem:[#allocation136_spill] sm:$0xff] %v13037_v24  ;;  %v4234_v49 = vmul.f32 %v12879_v61, %v4217_v38  ;;  %v5192_v38 = vmul.f32 %v9036_v1, %v12916_v2 }
 0x497   : > { %4151 = vperm.xlu1 %8733, %v13025_v50  }
 0x49a   : > { %v13029_v20 = vpop.permute.xlu1 %3971 }
 0x49b   : > { %15929 = vst [vmem:[#allocation77_spill] sm:$0xff] %v13029_v20  ;;  %8734 = vset.pattern.permute.xlu1 %v15836_v31  ;;  %v4856_v20 = vmul.f32 %v9036_v1, %v12845_v63 }
 0x49c   : > { %4479 = vperm.xlu1 %8734, %v13034_v43  }
 0x49f   : > { %v13039_v32 = vpop.permute.xlu1 %4299 }
 0x4a0   : > { %15931 = vst [vmem:[#allocation137_spill] sm:$0xff] %v13039_v32  ;;  %8735 = vset.pattern.permute.xlu1 %v15854_v41  ;;  %5274 = vmax.xlane.f32.xlu0 %v13037_v24 }
 0x4a1   : > { %5135 = vperm.xlu1 %8735, %v12946_v15   ;;  %v4016_v15 = vmul.f32 %v9036_v1, %v12766_v54 }
 0x4a3   : > { %v4032_v0 = vadd.f32 %v4016_v15, %v3998_v62  ;;  %v4502_v15 = vadd.f32 %v12807_v17, %v12746_v45  ;;  %v4368_v62 = vadd.f32 %v4352_v48, %v4334_v4  ;;  %v4838_v48 = vadd.f32 %v12837_v55, %v12826_v10 }
 0x4a4   : > { %v13044_v14 = vpop.permute.xlu1 %4955 }
 0x4a5   : > { %8736 = vset.pattern.permute.xlu1 %v15843_v7  ;;  %v9037_v7 = vld [vmem:[%s9537_s13 + $0x48] sm:$0xff]  ;;  %v4049_v59 = vmax.f32 %v4032_v0, 0.0  ;;  %v4536_v47 = vadd.f32 %v4520_v30, %v4502_v15  ;;  %v9039_v0 = vld [vmem:[%s9492_s18 + $0x20] sm:$0xff]  ;;  %v4385_v45 = vmax.f32 %v4368_v62, 0.0  ;;  %v5006_v15 = vadd.f32 %v12855_v8, %v12735_v42 }
 0x4a6   : > { %4155 = vperm.xlu1 %8736, %v13048_v46   ;;  %v4872_v62 = vadd.f32 %v4856_v20, %v4838_v48 }
 0x4a7   : > { %v4066_v11 = vmul.f32 %v12867_v57, %v4049_v59  ;;  %v4553_v12 = vmax.f32 %v4536_v47, 0.0  ;;  %v5024_v59 = vmul.f32 %v9036_v1, %v12860_v44  ;;  %v4402_v30 = vmul.f32 %v12890_v56, %v4385_v45 }
 0x4a9   : > { %v13051_v6 = vpop.permute.xlu1 %4135  ;;  %v5040_v47 = vadd.f32 %v5024_v59, %v5006_v15 }
 0x4aa   : > { %8738 = vset.pattern.permute.xlu1 %v15839_v16 }
 0x4ab   : > { %4811 = vperm.xlu1 %8738, %v12961_v52  }
 0x4ae   : > { %v13055_v26 = vpop.permute.xlu1 %4791 }
 0x4af   : > { %8739 = vset.pattern.permute.xlu1 %v15854_v41 }
 0x4b0   : > { %5139 = vperm.xlu1 %8739, %v9037_v7   ;;  %v4688_v7 = vmul.f32 %v9036_v1, %v12818_v18 }
 0x4b2   : > { %v4704_v4 = vadd.f32 %v4688_v7, %v4670_v9 }
 0x4b3   : > { %v5120_v52 = vpop.permute.xlu1 %5119 }
 0x4b4   : > { %8740 = vset.pattern.permute.xlu1 %v15852_v51  ;;  %v4721_v10 = vmax.f32 %v4704_v4, 0.0  ;;  %v5057_v4 = vmax.f32 %v5040_v47, 0.0 }
 0x4b5   : > { %4647 = vperm.xlu1 %8740, %v13034_v43  }
 0x4b6   : > { %5424 = vrot.lane.b32.xlu0 %v9038_v60, %s9234_s22  ;;  %v15935_v60 = vld [vmem:[#allocation41_spill] sm:$0xff]  ;;  %v4738_v42 = vmul.f32 %v12905_v39, %v4721_v10 }
 0x4b7   : > { %v3914_v24 = vadd.f32 %v9039_v0, %v15935_v60  ;;  %v4570_v0 = vmul.f32 %v12897_v34, %v4553_v12  ;;  %v4889_v60 = vmax.f32 %v4872_v62, 0.0  ;;  %v5074_v12 = vmul.f32 %v12924_v3, %v5057_v4 }
 0x4b8   : > { %v13076_v5 = vpop.permute.xlu1 %4467 }
 0x4b9   : > { %15934 = vst [vmem:[#allocation132_spill] sm:$0xff] %v13076_v5  ;;  %8741 = vset.pattern.permute.xlu1 %v15833_v37  ;;  %v4906_v1 = vmul.f32 %v12909_v23, %v4889_v60  ;;  %v9040_v60 = vld [vmem:[%s9494_s1 + $0x30] sm:$0xff] }
 0x4ba   : > { %4975 = vperm.xlu1 %8741, %v12934_v19   ;;  %v4082_v19 = vadd.f32 %v4066_v11, %v3914_v24  ;;  %v5174_v24 = vadd.f32 %v12914_v25, %v5120_v52  ;;  %v4186_v4 = vmul.f32 %v9040_v60, %v12774_v35 }
 0x4bc   : > { %v4250_v9 = vadd.f32 %v4234_v49, %v4082_v19  ;;  %v5208_v45 = vadd.f32 %v5192_v38, %v5174_v24 }
 0x4bd   : > { %v13089_v5 = vpop.permute.xlu1 %4795 }
 0x4be   : > { %15936 = vst [vmem:[#allocation56_spill] sm:$0xff] %v13089_v5  ;;  %8743 = vset.pattern.permute.xlu1 %v15852_v51  ;;  %v4418_v11 = vadd.f32 %v4402_v30, %v4250_v9  ;;  %v5225_v52 = vmax.f32 %v5208_v45, 0.0  ;;  %v13123_v9 = vpop.permute.xlu0 %5123 }
 0x4bf   : > { %4651 = vperm.xlu1 %8743, %v12954_v58  }
 0x4c0   : > { %v4586_v20 = vadd.f32 %v4570_v0, %v4418_v11  ;;  %v5242_v30 = vmul.f32 %v12937_v53, %v5225_v52 }
 0x4c2   : > { %v13098_v7 = vpop.permute.xlu1 %3975  ;;  %v4754_v49 = vadd.f32 %v4738_v42, %v4586_v20  ;;  %v13129_v0 = vpop.permute.xlu0 %5127  ;;  %v15943_v42 = vld [vmem:[#allocation107_spill] sm:$0xff] }
 0x4c3   : > { %15937 = vst [vmem:[#allocation23_spill] sm:$0xff] %v13098_v7  ;;  %8744 = vset.pattern.permute.xlu1 %v15836_v31  ;;  %v4000_v20 = vadd.f32 %v12761_v13, %v15943_v42 }
 0x4c4   : > { %4487 = vperm.xlu1 %8744, %v13025_v50   ;;  %v4922_v59 = vadd.f32 %v4906_v1, %v4754_v49  ;;  %v15944_v1 = vld [vmem:[#allocation96_spill] sm:$0xff] }
 0x4c6   : > { %v5090_v62 = vadd.f32 %v5074_v12, %v4922_v59  ;;  %v13135_v24 = vpop.permute.xlu0 %5143 }
 0x4c7   : > { %v13106_v48 = vpop.permute.xlu1 %4303 }
 0x4c8   : > { %8745 = vset.pattern.permute.xlu1 %v15839_v16  ;;  %v13121_v10 = vadd.f32 %v5242_v30, %v5090_v62  ;;  %v4354_v30 = vmul.f32 %v9040_v60, %v12797_v27  ;;  %v15947_v62 = vld [vmem:[#allocation66_spill] sm:$0xff] }
 0x4c9   : > { %4815 = vperm.xlu1 %8745, %v13034_v43   ;;  %v4336_v42 = vadd.f32 %v12788_v28, %v15947_v62  ;;  %v4690_v62 = vmul.f32 %v9040_v60, %v12818_v18 }
 0x4ca   : > { %15939 = vst [vmem:[#allocation65_spill] sm:$0xff] %v13121_v10  ;;  %v13141_v47 = vpop.permute.xlu0 %5147 }
 0x4cb   : > { %15942 = vst [vmem:[#allocation19_spill] sm:$0xff] %v13141_v47  ;;  %v13181_v47 = vld [vmem:[%s9494_s1 + $0x8] sm:$0xff] }
 0x4cc   : > { %v13111_v19 = vpop.permute.xlu1 %4959 }
 0x4cd   : > { %8746 = vset.pattern.permute.xlu1 %v15836_v31 }
 0x4ce   : > { %4491 = vperm.xlu1 %8746, %v13048_v46   ;;  %v13154_v52 = vpop.permute.xlu0 %5155 }
 0x4cf   : > { %15945 = vst [vmem:[#allocation62_spill] sm:$0xff] %v13154_v52 }
 0x4d1   : > { %v13117_v15 = vpop.permute.xlu1 %3979 }
 0x4d2   : > { %15938 = vst [vmem:[#allocation26_spill] sm:$0xff] %v13117_v15  ;;  %8747 = vset.pattern.permute.xlu1 %v15839_v16  ;;  %v15951_v15 = vld [vmem:[#allocation47_spill] sm:$0xff] }
 0x4d3   : > { %4819 = vperm.xlu1 %8747, %v12954_v58  }
 0x4d5   : > { %5278 = vmax.xlane.f32.xlu0 %v13121_v10  ;;  %v9041_v10 = vld [vmem:[%s11465_s30 + $0x58] sm:$0xff] }
 0x4d6   : > { %v13126_v31 = vpop.permute.xlu1 %4635 }
 0x4d7   : > { %15940 = vst [vmem:[#allocation58_spill] sm:$0xff] %v13126_v31  ;;  %8748 = vset.pattern.permute.xlu1 %v15852_v51  ;;  %v4018_v51 = vmul.f32 %v9040_v60, %v12766_v54 }
 0x4d8   : > { %4655 = vperm.xlu1 %8748, %v13025_v50  }
 0x4d9   : > { %v4034_v49 = vadd.f32 %v4018_v51, %v4000_v20  ;;  %v4522_v51 = vmul.f32 %v9040_v60, %v12809_v36  ;;  %v15948_v20 = vld [vmem:[#allocation123_spill] sm:$0xff] }
 0x4db   : > { %v13132_v38 = vpop.permute.xlu1 %4963 }
 0x4dc   : > { %15941 = vst [vmem:[#allocation27_spill] sm:$0xff] %v13132_v38  ;;  %4659 = vperm.xlu1 %8748, %v13048_v46   ;;  %v15955_v38 = vld [vmem:[#allocation93_spill] sm:$0xff] }
 0x4e0   : > { %8750 = vset.pattern.permute.xlu1 %v15833_v37  ;;  %v13138_v11 = vpop.permute.xlu1 %4471 }
 0x4e1   : > { %4987 = vperm.xlu1 %8750, %v12954_v58   ;;  %v4168_v58 = vadd.f32 %v12770_v40, %v15944_v1  ;;  %v13168_v1 = vpop.permute.xlu0 %5159 }
 0x4e2   : > { %15949 = vst [vmem:[#allocation69_spill] sm:$0xff] %v13168_v1  ;;  %v15954_v1 = vld [vmem:[#allocation122_spill] sm:$0xff] }
 0x4e3   : > { %v4202_v59 = vadd.f32 %v4186_v4, %v4168_v58  ;;  %v4370_v58 = vadd.f32 %v4354_v30, %v4336_v42  ;;  %v4840_v42 = vadd.f32 %v12837_v55, %v13055_v26 }
 0x4e5   : > { %8752 = vset.pattern.permute.xlu1 %v15854_v41  ;;  %v13148_v45 = vpop.permute.xlu1 %4799  ;;  %v4219_v4 = vmax.f32 %v4202_v59, 0.0  ;;  %v4013_v59 = vmul.f32 %v13181_v47, %v12766_v54 }
 0x4e6   : > { %5151 = vperm.xlu1 %8752, %v13034_v43   ;;  %v4051_v43 = vmax.f32 %v4034_v49, 0.0 }
 0x4e8   : > { %v4068_v52 = vmul.f32 %v12867_v57, %v4051_v43  ;;  %v4236_v43 = vmul.f32 %v12879_v61, %v4219_v4  ;;  %v4181_v4 = vmul.f32 %v13181_v47, %v12774_v35 }
 0x4ea   : > { %8753 = vset.pattern.permute.xlu1 %v15839_v16  ;;  %v13157_v12 = vpop.permute.xlu1 %4147  ;;  %v4504_v16 = vadd.f32 %v12807_v17, %v15948_v20 }
 0x4eb   : > { %15946 = vst [vmem:[#allocation67_spill] sm:$0xff] %v13157_v12  ;;  %4827 = vperm.xlu1 %8753, %v13048_v46   ;;  %5420 = vrot.lane.b32.xlu0 %v9041_v10, %s9234_s22  ;;  %v4672_v10 = vadd.f32 %v12814_v21, %v13020_v22  ;;  %v9042_v12 = vld [vmem:[%s9492_s18 + $0x30] sm:$0xff] }
 0x4ec   : > { %v3916_v20 = vadd.f32 %v9042_v12, %v15951_v15  ;;  %v4538_v30 = vadd.f32 %v4522_v51, %v4504_v16  ;;  %v5026_v15 = vmul.f32 %v9040_v60, %v12860_v44  ;;  %v5008_v12 = vadd.f32 %v12855_v8, %v13111_v19 }
 0x4ed   : > { %v4706_v32 = vadd.f32 %v4690_v62, %v4672_v10 }
 0x4ee   : > { %v4084_v31 = vadd.f32 %v4068_v52, %v3916_v20  ;;  %v4555_v52 = vmax.f32 %v4538_v30, 0.0  ;;  %v5042_v7 = vadd.f32 %v5026_v15, %v5008_v12 }
 0x4ef   : > { %8754 = vset.pattern.permute.xlu1 %v15833_v37  ;;  %v13172_v49 = vpop.permute.xlu1 %4475  ;;  %v4858_v37 = vmul.f32 %v9040_v60, %v12845_v63  ;;  %v4723_v5 = vmax.f32 %v4706_v32, 0.0 }
 0x4f0   : > { %15950 = vst [vmem:[#allocation24_spill] sm:$0xff] %v13172_v49  ;;  %4991 = vperm.xlu1 %8754, %v13025_v50   ;;  %v15952_v49 = vld [vmem:[#allocation51_spill] sm:$0xff]  ;;  %v4387_v50 = vmax.f32 %v4370_v58, 0.0  ;;  %v4163_v58 = vadd.f32 %v12770_v40, %v15955_v38  ;;  %v4252_v20 = vadd.f32 %v4236_v43, %v4084_v31  ;;  %v4572_v32 = vmul.f32 %v12897_v34, %v4555_v52 }
 0x4f1   : > { %v3995_v22 = vadd.f32 %v12761_v13, %v15952_v49  ;;  %v4874_v49 = vadd.f32 %v4858_v37, %v4840_v42  ;;  %v15958_v37 = vld [vmem:[#allocation109_spill] sm:$0xff]  ;;  %v5059_v43 = vmax.f32 %v5042_v7, 0.0 }
 0x4f2   : > { %v4404_v10 = vmul.f32 %v12890_v56, %v4387_v50  ;;  %v4197_v30 = vadd.f32 %v4181_v4, %v4163_v58  ;;  %v15959_v7 = vld [vmem:[#allocation53_spill] sm:$0xff] }
 0x4f3   : > { %v4029_v62 = vadd.f32 %v4013_v59, %v3995_v22  ;;  %v4891_v31 = vmax.f32 %v4874_v49, 0.0  ;;  %v5076_v49 = vmul.f32 %v12924_v3, %v5059_v43 }
 0x4f4   : > { %4995 = vperm.xlu1 %8754, %v13048_v46   ;;  %v13195_v51 = vpop.permute.xlu1 %5131  ;;  %v5271_v16 = vpop.xlane.xlu0 %5270  ;;  %v4420_v42 = vadd.f32 %v4404_v10, %v4252_v20  ;;  %v9044_v10 = vld [vmem:[%s9492_s18 + $0x8] sm:$0xff] }
 0x4f5   : > { %15953 = vst [vmem:[#allocation17_spill] sm:$0xff] %v13195_v51  ;;  %v5302_v26 = vsub.f32 %v15954_v1, %v5271_v16  ;;  %v5194_v51 = vmul.f32 %v9040_v60, %v12916_v2  ;;  %v5176_v1 = vadd.f32 %v12914_v25, %v13129_v0  ;;  %v4046_v60 = vmax.f32 %v4029_v62, 0.0  ;;  %v15960_v20 = vld [vmem:[#allocation38_spill] sm:$0xff] }
 0x4f6   : > { %v4349_v0 = vmul.f32 %v13181_v47, %v12797_v27  ;;  %v4588_v50 = vadd.f32 %v4572_v32, %v4420_v42  ;;  %v4908_v15 = vmul.f32 %v12909_v23, %v4891_v31  ;;  %v4685_v32 = vmul.f32 %v13181_v47, %v12818_v18 }
 0x4f7   : > { %v5318_v19 = vmul.f32 1.442695, %v5302_v26  ;;  %v5210_v22 = vadd.f32 %v5194_v51, %v5176_v1  ;;  %v4214_v26 = vmax.f32 %v4197_v30, 0.0  ;;  %v4063_v58 = vmul.f32 %v12867_v57, %v4046_v60 }
 0x4f8   : > { %8755 = vset.pattern.permute.xlu1 %v15854_v41  ;;  %v13207_v16 = vpop.permute.xlu0 %5428  ;;  %v4331_v41 = vadd.f32 %v12788_v28, %v15958_v37  ;;  %v4499_v51 = vadd.f32 %v12807_v17, %v15959_v7 }
 0x4f9   : > { %8788 = vpow2.f32 %v5318_v19  ;;  %5163 = vperm.xlu1 %8755, %v13048_v46   ;;  %v13210_v38 = vpop.permute.xlu1 %3983  ;;  %v13213_v59 = vand.u32 4294901760, %v13207_v16  ;;  %v4740_v46 = vmul.f32 %v12905_v39, %v4723_v5  ;;  %v5227_v62 = vmax.f32 %v5210_v22, 0.0 }
 0x4fa   : > { %15956 = vst [vmem:[#allocation71_spill] sm:$0xff] %v13210_v38  ;;  %v4365_v4 = vadd.f32 %v4349_v0, %v4331_v41  ;;  %v4517_v5 = vmul.f32 %v13181_v47, %v12809_v36  ;;  %v3911_v19 = vadd.f32 %v9044_v10, %v15960_v20  ;;  %v4231_v60 = vmul.f32 %v12879_v61, %v4214_v26 }
 0x4fb   : > { %15957 = vst [vmem:[#allocation49_spill] sm:$0xff] %v13213_v59  ;;  %8213 = vmatprep.subr.mxu0 %v13213_v59  ;;  %v4756_v52 = vadd.f32 %v4740_v46, %v4588_v50  ;;  %v5244_v41 = vmul.f32 %v12937_v53, %v5227_v62  ;;  %v15961_v46 = vld [vmem:[#allocation89_spill] sm:$0xff]  ;;  %v4853_v22 = vmul.f32 %v13181_v47, %v12845_v63  ;;  %v15962_v50 = vld [vmem:[#allocation115_spill] sm:$0xff] }
 0x4fc   : > { %8214 = vmatpush3.msra.mxu0 %v13213_v59  ;;  %v4382_v31 = vmax.f32 %v4365_v4, 0.0  ;;  %v4079_v0 = vadd.f32 %v4063_v58, %v3911_v19  ;;  %v4533_v42 = vadd.f32 %v4517_v5, %v4499_v51  ;;  %v4667_v43 = vadd.f32 %v12814_v21, %v15961_v46 }
 0x4fd   : > { %v4924_v1 = vadd.f32 %v4908_v15, %v4756_v52  ;;  %v4835_v15 = vadd.f32 %v12837_v55, %v15962_v50  ;;  %v5021_v20 = vmul.f32 %v13181_v47, %v12860_v44  ;;  %v5189_v19 = vmul.f32 %v13181_v47, %v12916_v2 }
 0x4fe   : > { %v13224_v12 = vpop.permute.xlu1 %4639  ;;  %v4399_v4 = vmul.f32 %v12890_v56, %v4382_v31  ;;  %v4247_v58 = vadd.f32 %v4231_v60, %v4079_v0  ;;  %v4550_v5 = vmax.f32 %v4533_v42, 0.0  ;;  %v4701_v7 = vadd.f32 %v4685_v32, %v4667_v43  ;;  %v15968_v31 = vld [vmem:[#allocation80_spill] sm:$0xff]  ;;  %v15969_v32 = vld [vmem:[#allocation31_spill] sm:$0xff] }
 0x4ff   : > { %v5092_v37 = vadd.f32 %v5076_v49, %v4924_v1  ;;  %v4869_v51 = vadd.f32 %v4853_v22, %v4835_v15  ;;  %v5003_v60 = vadd.f32 %v12855_v8, %v15968_v31  ;;  %v5171_v0 = vadd.f32 %v12914_v25, %v15969_v32 }
 0x500   : > { %v4415_v1 = vadd.f32 %v4399_v4, %v4247_v58  ;;  %v4718_v42 = vmax.f32 %v4701_v7, 0.0 }
 0x501   : > { %v13254_v62 = vadd.f32 %v5244_v41, %v5092_v37  ;;  %v4567_v41 = vmul.f32 %v12897_v34, %v4550_v5  ;;  %v4886_v46 = vmax.f32 %v4869_v51, 0.0  ;;  %v5037_v50 = vadd.f32 %v5021_v20, %v5003_v60 }
 0x502   : > { %v5205_v15 = vadd.f32 %v5189_v19, %v5171_v0  ;;  %v4735_v58 = vmul.f32 %v12905_v39, %v4718_v42  ;;  %v15972_v0 = vld [vmem:[#allocation133_spill] sm:$0xff] }
 0x503   : > { %v13236_v30 = vpop.permute.xlu1 %4967  ;;  %15966 = vst [vmem:[#allocation106_spill] sm:$0xff] %v13254_v62  ;;  %v4583_v22 = vadd.f32 %v4567_v41, %v4415_v1  ;;  %v4903_v31 = vmul.f32 %v12909_v23, %v4886_v46  ;;  %v5054_v5 = vmax.f32 %v5037_v50, 0.0  ;;  %v9045_v1 = vld [vmem:[%s9494_s1 + $0x40] sm:$0xff]  ;;  %v4002_v41 = vadd.f32 %v12761_v13, %v15972_v0 }
 0x504   : > { %v5222_v7 = vmax.f32 %v5205_v15, 0.0  ;;  %v4020_v60 = vmul.f32 %v9045_v1, %v12766_v54 }
 0x505   : > { %v4751_v51 = vadd.f32 %v4735_v58, %v4583_v22  ;;  %v15974_v22 = vld [vmem:[#allocation125_spill] sm:$0xff] }
 0x506   : > { %v13246_v52 = vpop.eup %8788  ;;  %v5239_v20 = vmul.f32 %v12937_v53, %v5222_v7  ;;  %v4170_v50 = vadd.f32 %v12770_v40, %v15974_v22  ;;  %v4036_v15 = vadd.f32 %v4020_v60, %v4002_v41  ;;  %v15975_v7 = vld [vmem:[#allocation104_spill] sm:$0xff]  ;;  %v13307_v60 = vsub.f32 %v13207_v16, %v13213_v59 }
 0x507   : > { %15963 = vst [vmem:[#allocation46_spill] sm:$0xff] %v13246_v52  ;;  %v13250_v26 = vand.u32 4294901760, %v13246_v52  ;;  %v5028_v59 = vmul.f32 %v9045_v1, %v12860_v44 }
 0x508   : > { %v13252_v49 = vpop.permute.xlu1 %4315  ;;  %15976 = vst [vmem:[#allocation66_spill] sm:$0xff] %v13307_v60 }
 0x509   : > { %15964 = vst [vmem:[#allocation83_spill] sm:$0xff] %v13250_v26  ;;  %15965 = vst [vmem:[#allocation44_spill] sm:$0xff] %v13252_v49  ;;  %8301 = vmatprep.mubr.f32.mxu1 %v13250_v26  ;;  %v13259_v10 = vsub.f32 %v13246_v52, %v13250_v26  ;;  %v4919_v26 = vadd.f32 %v4903_v31, %v4751_v51  ;;  %v4506_v51 = vadd.f32 %v12807_v17, %v15975_v7 }
 0x50a   : > { %5282 = vmax.xlane.f32.xlu0 %v13254_v62  ;;  %v5071_v62 = vmul.f32 %v12924_v3, %v5054_v5  ;;  %v4524_v5 = vmul.f32 %v9045_v1, %v12809_v36  ;;  %v13316_v7 = vand.u32 4294901760, %v13307_v60 }
 0x50b   : > { %15967 = vst [vmem:[#allocation94_spill] sm:$0xff] %v13259_v10  ;;  %v15190_v37 = vand.u32 4294901760, %v13259_v10 }
 0x50c   : > { %v5087_v19 = vadd.f32 %v5071_v62, %v4919_v26  ;;  %v4338_v26 = vadd.f32 %v12788_v28, %v13015_v33  ;;  %v9046_v62 = vld [vmem:[%s11465_s30 + $0x48] sm:$0xff]  ;;  %v4540_v33 = vadd.f32 %v4524_v5, %v4506_v51  ;;  %15979 = vst [vmem:[#allocation47_spill] sm:$0xff] %v13316_v7  ;;  %v4842_v5 = vadd.f32 %v12837_v55, %v13148_v45 }
 0x50d   : > { %v13272_v43 = vpop.permute.xlu1 %4643  ;;  %v5530_v47 = vsub.f32 %v13259_v10, %v15190_v37  ;;  %v5196_v45 = vmul.f32 %v9045_v1, %v12916_v2 }
 0x50e   : > { %15970 = vst [vmem:[#allocation41_spill] sm:$0xff] %v13272_v43  ;;  %v13289_v42 = vadd.f32 %v5239_v20, %v5087_v19  ;;  %v4053_v20 = vmax.f32 %v4036_v15, 0.0  ;;  %v9047_v15 = vld [vmem:[%s9492_s18 + $0x40] sm:$0xff]  ;;  %v4557_v51 = vmax.f32 %v4540_v33, 0.0 }
 0x50f   : > { %v5531_v4 = vand.u32 4294901760, %v5530_v47  ;;  %v4188_v47 = vmul.f32 %v9045_v1, %v12774_v35 }
 0x510   : > { %15973 = vst [vmem:[#allocation96_spill] sm:$0xff] %v13289_v42  ;;  %v4070_v22 = vmul.f32 %v12867_v57, %v4053_v20  ;;  %v5691_v20 = vsub.f32 %v13307_v60, %v13316_v7  ;;  %v9049_v7 = vld [vmem:[%s11465_s30 + $0x70] sm:$0xff] }
 0x511   : > { %8245 = vmatprep.mubr.f32.mxu0 %v5531_v4  ;;  %v4356_v4 = vmul.f32 %v9045_v1, %v12797_v27  ;;  %v4204_v58 = vadd.f32 %v4188_v47, %v4170_v50  ;;  %v4692_v50 = vmul.f32 %v9045_v1, %v12818_v18 }
 0x512   : > { %v13279_v32 = vpop.permute.xlu1 %4151 }
 0x513   : > { %15971 = vst [vmem:[#allocation107_spill] sm:$0xff] %v13279_v32  ;;  %v4372_v19 = vadd.f32 %v4356_v4, %v4338_v26  ;;  %v4221_v0 = vmax.f32 %v4204_v58, 0.0  ;;  %v15980_v4 = vld [vmem:[#allocation87_spill] sm:$0xff]  ;;  %v4860_v58 = vmul.f32 %v9045_v1, %v12845_v63 }
 0x514   : > { %v3918_v26 = vadd.f32 %v9047_v15, %v15980_v4  ;;  %v5010_v15 = vadd.f32 %v12855_v8, %v13236_v30  ;;  %v4574_v30 = vmul.f32 %v12897_v34, %v4557_v51 }
 0x515   : > { %v4389_v47 = vmax.f32 %v4372_v19, 0.0  ;;  %v4238_v16 = vmul.f32 %v12879_v61, %v4221_v0  ;;  %v4876_v52 = vadd.f32 %v4860_v58, %v4842_v5  ;;  %v15984_v58 = vld [vmem:[#allocation45_spill] sm:$0xff] }
 0x516   : > { %v4086_v19 = vadd.f32 %v4070_v22, %v3918_v26  ;;  %v15982_v26 = vld [vmem:[#allocation101_spill] sm:$0xff]  ;;  %v4165_v5 = vadd.f32 %v12770_v40, %v15984_v58 }
 0x517   : > { %v13282_v37 = vpop.permute.xlu1 %4479 }
 0x518   : > { %v4254_v49 = vadd.f32 %v4238_v16, %v4086_v19 }
 0x51c   : > { %v5136_v46 = vpop.permute.xlu1 %5135 }
 0x51d   : > { %5272 = vmax.xlane.f32.xlu1 %v13289_v42  ;;  %v5692_v42 = vand.u32 4294901760, %v5691_v20  ;;  %v5178_v33 = vadd.f32 %v12914_v25, %v5136_v46  ;;  %v4893_v20 = vmax.f32 %v4876_v52, 0.0 }
 0x51f   : > { %8269 = vmatprep.subr.mxu1 %v5692_v42  ;;  %v5212_v19 = vadd.f32 %v5196_v45, %v5178_v33  ;;  %v4910_v51 = vmul.f32 %v12909_v23, %v4893_v20  ;;  %v15986_v45 = vld [vmem:[#allocation100_spill] sm:$0xff] }
 0x520   : > { %5416 = vrot.lane.b32.xlu0 %v9046_v62, %s9234_s22  ;;  %v15978_v62 = vld [vmem:[#allocation95_spill] sm:$0xff]  ;;  %8270 = vmatpush3.msra.mxu1 %v5692_v42  ;;  %v4501_v33 = vadd.f32 %v12807_v17, %v15986_v45 }
 0x521   : > { %v13300_v31 = vpop.permute.xlu1 %4155  ;;  %v4674_v10 = vadd.f32 %v12814_v21, %v15978_v62  ;;  %v4406_v62 = vmul.f32 %v12890_v56, %v4389_v47  ;;  %v3997_v47 = vadd.f32 %v12761_v13, %v15982_v26 }
 0x523   : > { %v4708_v4 = vadd.f32 %v4692_v50, %v4674_v10  ;;  %v4422_v10 = vadd.f32 %v4406_v62, %v4254_v49  ;;  %v5044_v50 = vadd.f32 %v5028_v59, %v5010_v15  ;;  %v5229_v62 = vmax.f32 %v5212_v19, 0.0 }
 0x525   : > { %v4725_v46 = vmax.f32 %v4708_v4, 0.0  ;;  %v4590_v60 = vadd.f32 %v4574_v30, %v4422_v10  ;;  %v5061_v43 = vmax.f32 %v5044_v50, 0.0  ;;  %v15987_v10 = vld [vmem:[#allocation113_spill] sm:$0xff]  ;;  %v5246_v58 = vmul.f32 %v12937_v53, %v5229_v62 }
 0x526   : > { %v13309_v41 = vpop.permute.xlu1 %4811  ;;  %v4669_v50 = vadd.f32 %v12814_v21, %v15987_v10 }
 0x527   : > { %15977 = vst [vmem:[#allocation123_spill] sm:$0xff] %v13309_v41  ;;  %v9048_v41 = vld [vmem:[%s9494_s1 + $0x18] sm:$0xff]  ;;  %v4742_v59 = vmul.f32 %v12905_v39, %v4725_v46 }
 0x528   : > { %v4015_v22 = vmul.f32 %v9048_v41, %v12766_v54  ;;  %v4183_v16 = vmul.f32 %v9048_v41, %v12774_v35  ;;  %v4519_v52 = vmul.f32 %v9048_v41, %v12809_v36  ;;  %v4855_v19 = vmul.f32 %v9048_v41, %v12845_v63 }
 0x52a   : > { %v4031_v26 = vadd.f32 %v4015_v22, %v3997_v47  ;;  %v4199_v42 = vadd.f32 %v4183_v16, %v4165_v5  ;;  %v5078_v22 = vmul.f32 %v12924_v3, %v5061_v43  ;;  %v4758_v47 = vadd.f32 %v4742_v59, %v4590_v60 }
 0x52b   : > { %v13330_v0 = vpop.permute.xlu1 %5139  ;;  %v4535_v20 = vadd.f32 %v4519_v52, %v4501_v33  ;;  %v15992_v33 = vld [vmem:[#allocation130_spill] sm:$0xff] }
 0x52c   : > { %15981 = vst [vmem:[#allocation51_spill] sm:$0xff] %v13330_v0  ;;  %v15985_v0 = vld [vmem:[#allocation135_spill] sm:$0xff]  ;;  %v4048_v4 = vmax.f32 %v4031_v26, 0.0  ;;  %v4216_v16 = vmax.f32 %v4199_v42, 0.0  ;;  %v4926_v46 = vadd.f32 %v4910_v51, %v4758_v47  ;;  %v15988_v26 = vld [vmem:[#allocation81_spill] sm:$0xff]  ;;  %v5023_v51 = vmul.f32 %v9048_v41, %v12860_v44 }
 0x52d   : > { %v4333_v49 = vadd.f32 %v12788_v28, %v15985_v0  ;;  %v4687_v0 = vmul.f32 %v9048_v41, %v12818_v18  ;;  %v4837_v45 = vadd.f32 %v12837_v55, %v15988_v26  ;;  %v4552_v52 = vmax.f32 %v4535_v20, 0.0 }
 0x52e   : > { %5426 = vrot.lane.b32.xlu1 %v9049_v7, %s9234_s22  ;;  %v4351_v7 = vmul.f32 %v9048_v41, %v12797_v27  ;;  %v4065_v5 = vmul.f32 %v12867_v57, %v4048_v4  ;;  %v5094_v60 = vadd.f32 %v5078_v22, %v4926_v46  ;;  %v4233_v42 = vmul.f32 %v12879_v61, %v4216_v16 }
 0x52f   : > { %v4703_v10 = vadd.f32 %v4687_v0, %v4669_v50  ;;  %v5005_v47 = vadd.f32 %v12855_v8, %v15992_v33  ;;  %v4871_v26 = vadd.f32 %v4855_v19, %v4837_v45  ;;  %v5191_v0 = vmul.f32 %v9048_v41, %v12916_v2  ;;  %v13394_v33 = vld [vmem:[%s9494_s1 + $0x50] sm:$0xff] }
 0x530   : > { %v13342_v1 = vpop.permute.xlu1 %4647  ;;  %v4367_v30 = vadd.f32 %v4351_v7, %v4333_v49  ;;  %v9050_v7 = vld [vmem:[%s9492_s18 + $0x18] sm:$0xff]  ;;  %v15990_v49 = vld [vmem:[#allocation79_spill] sm:$0xff]  ;;  %v13371_v62 = vadd.f32 %v5246_v58, %v5094_v60  ;;  %v5173_v50 = vadd.f32 %v12914_v25, %v13005_v29  ;;  %v4569_v46 = vmul.f32 %v12897_v34, %v4552_v52 }
 0x531   : > { %15983 = vst [vmem:[#allocation122_spill] sm:$0xff] %v13342_v1  ;;  %v3913_v59 = vadd.f32 %v9050_v7, %v15990_v49  ;;  %v5039_v58 = vadd.f32 %v5023_v51, %v5005_v47  ;;  %v4022_v47 = vmul.f32 %v13394_v33, %v12766_v54 }
 0x532   : > { %v4384_v32 = vmax.f32 %v4367_v30, 0.0  ;;  %15991 = vst [vmem:[#allocation109_spill] sm:$0xff] %v13371_v62  ;;  %v4720_v30 = vmax.f32 %v4703_v10, 0.0  ;;  %v5207_v45 = vadd.f32 %v5191_v0, %v5173_v50  ;;  %v4190_v0 = vmul.f32 %v13394_v33, %v12774_v35 }
 0x533   : > { %v4081_v4 = vadd.f32 %v4065_v5, %v3913_v59  ;;  %v4888_v5 = vmax.f32 %v4871_v26, 0.0  ;;  %v15996_v26 = vld [vmem:[#allocation103_spill] sm:$0xff]  ;;  %v4172_v50 = vadd.f32 %v12770_v40, %v13051_v6  ;;  %v4508_v6 = vadd.f32 %v12807_v17, %v13138_v11 }
 0x534   : > { %v4401_v22 = vmul.f32 %v12890_v56, %v4384_v32  ;;  %v4737_v19 = vmul.f32 %v12905_v39, %v4720_v30  ;;  %v5056_v32 = vmax.f32 %v5039_v58, 0.0  ;;  %v5224_v59 = vmax.f32 %v5207_v45, 0.0 }
 0x535   : > { %v13351_v15 = vpop.permute.xlu1 %4975  ;;  %v4249_v16 = vadd.f32 %v4233_v42, %v4081_v4  ;;  %v4905_v49 = vmul.f32 %v12909_v23, %v4888_v5  ;;  %v4340_v58 = vadd.f32 %v12788_v28, %v13106_v48  ;;  %v4526_v45 = vmul.f32 %v13394_v33, %v12809_v36 }
 0x536   : > { %v5073_v29 = vmul.f32 %v12924_v3, %v5056_v32  ;;  %v5241_v51 = vmul.f32 %v12937_v53, %v5224_v59  ;;  %v15999_v59 = vld [vmem:[#allocation98_spill] sm:$0xff] }
 0x537   : > { %v4417_v20 = vadd.f32 %v4401_v22, %v4249_v16  ;;  %v4004_v22 = vadd.f32 %v12761_v13, %v15996_v26  ;;  %v4542_v11 = vadd.f32 %v4526_v45, %v4508_v6  ;;  %v4862_v6 = vmul.f32 %v13394_v33, %v12845_v63 }
 0x539   : > { %v4585_v7 = vadd.f32 %v4569_v46, %v4417_v20  ;;  %v4038_v16 = vadd.f32 %v4022_v47, %v4004_v22  ;;  %v4358_v46 = vmul.f32 %v13394_v33, %v12797_v27  ;;  %v4206_v20 = vadd.f32 %v4190_v0, %v4172_v50  ;;  %v13431_v47 = vld [vmem:[%s9494_s1 + $0x28] sm:$0xff] }
 0x53a   : > { %v13365_v43 = vpop.permute.xlu1 %4651  ;;  %v4185_v26 = vmul.f32 %v13431_v47, %v12774_v35 }
 0x53b   : > { %15989 = vst [vmem:[#allocation93_spill] sm:$0xff] %v13365_v43  ;;  %v4753_v41 = vadd.f32 %v4737_v19, %v4585_v7  ;;  %v9052_v19 = vld [vmem:[%s11465_s30 + $0x38] sm:$0xff]  ;;  %v4055_v7 = vmax.f32 %v4038_v16, 0.0  ;;  %v4374_v32 = vadd.f32 %v4358_v46, %v4340_v58  ;;  %v4177_v58 = vadd.f32 %v12770_v40, %v13300_v31  ;;  %v16004_v43 = vld [vmem:[#allocation111_spill] sm:$0xff] }
 0x53c   : > { %v5030_v31 = vmul.f32 %v13394_v33, %v12860_v44 }
 0x53d   : > { %v4921_v42 = vadd.f32 %v4905_v49, %v4753_v41  ;;  %v13420_v41 = vld [vmem:[%s9494_s1 + $0x78] sm:$0xff]  ;;  %v4072_v22 = vmul.f32 %v12867_v57, %v4055_v7  ;;  %v4391_v0 = vmax.f32 %v4374_v32, 0.0 }
 0x53e   : > { %v4027_v48 = vmul.f32 %v13420_v41, %v12766_v54  ;;  %v4195_v46 = vmul.f32 %v13420_v41, %v12774_v35 }
 0x53f   : > { %v13375_v38 = vpop.permute.xlu1 %4487  ;;  %5286 = vmax.xlane.f32.xlu0 %v13371_v62  ;;  %v5089_v52 = vadd.f32 %v5073_v29, %v4921_v42  ;;  %v4009_v29 = vadd.f32 %v12761_v13, %v15999_v59  ;;  %v4694_v42 = vmul.f32 %v13394_v33, %v12818_v18  ;;  %v16002_v59 = vld [vmem:[#allocation57_spill] sm:$0xff]  ;;  %v4353_v62 = vmul.f32 %v13431_v47, %v12797_v27 }
 0x540   : > { %15993 = vst [vmem:[#allocation53_spill] sm:$0xff] %v13375_v38  ;;  %v4844_v7 = vadd.f32 %v12837_v55, %v16002_v59  ;;  %v4408_v59 = vmul.f32 %v12890_v56, %v4391_v0 }
 0x541   : > { %v13400_v30 = vadd.f32 %v5241_v51, %v5089_v52  ;;  %v4676_v51 = vadd.f32 %v12814_v21, %v13224_v12  ;;  %v4223_v52 = vmax.f32 %v4206_v20, 0.0  ;;  %v4043_v50 = vadd.f32 %v4027_v48, %v4009_v29  ;;  %v9055_v12 = vld [vmem:[%s9492_s18 + $0x50] sm:$0xff] }
 0x542   : > { %v16001_v20 = vld [vmem:[#allocation91_spill] sm:$0xff]  ;;  %v4017_v48 = vmul.f32 %v13431_v47, %v12766_v54  ;;  %v4559_v29 = vmax.f32 %v4542_v11, 0.0 }
 0x543   : > { %15997 = vst [vmem:[#allocation115_spill] sm:$0xff] %v13400_v30  ;;  %v4710_v16 = vadd.f32 %v4694_v42, %v4676_v51  ;;  %v3920_v45 = vadd.f32 %v9055_v12, %v16001_v20  ;;  %v4240_v32 = vmul.f32 %v12879_v61, %v4223_v52  ;;  %v5012_v42 = vadd.f32 %v12855_v8, %v13351_v15  ;;  %v16003_v51 = vld [vmem:[#allocation54_spill] sm:$0xff]  ;;  %v16005_v15 = vld [vmem:[#allocation117_spill] sm:$0xff] }
 0x544   : > { %v13384_v60 = vpop.permute.xlu1 %4815  ;;  %v4167_v12 = vadd.f32 %v12770_v40, %v16003_v51  ;;  %v4060_v52 = vmax.f32 %v4043_v50, 0.0  ;;  %v4878_v51 = vadd.f32 %v4862_v6, %v4844_v7  ;;  %v4576_v38 = vmul.f32 %v12897_v34, %v4559_v29  ;;  %v9056_v7 = vld [vmem:[%s11465_s30 + $0x60] sm:$0xff] }
 0x545   : > { %15994 = vst [vmem:[#allocation38_spill] sm:$0xff] %v13384_v60  ;;  %v4088_v20 = vadd.f32 %v4072_v22, %v3920_v45  ;;  %v4727_v11 = vmax.f32 %v4710_v16, 0.0  ;;  %v5046_v0 = vadd.f32 %v5030_v31, %v5012_v42  ;;  %v4531_v50 = vmul.f32 %v13420_v41, %v12809_v36  ;;  %v16008_v60 = vld [vmem:[#allocation30_spill] sm:$0xff] }
 0x546   : > { %v5180_v6 = vadd.f32 %v12914_v25, %v13135_v24  ;;  %v4699_v31 = vmul.f32 %v13420_v41, %v12818_v18 }
 0x547   : > { %v4256_v22 = vadd.f32 %v4240_v32, %v4088_v20  ;;  %v4744_v32 = vmul.f32 %v12905_v39, %v4727_v11  ;;  %v5063_v24 = vmax.f32 %v5046_v0, 0.0  ;;  %v9057_v11 = vld [vmem:[%s9492_s18 + $0x78] sm:$0xff] }
 0x549   : > { %v13387_v10 = vpop.permute.xlu1 %4491 }
 0x54a   : > { %v4513_v16 = vadd.f32 %v12807_v17, %v13387_v10 }
 0x54e   : > { %v13391_v4 = vpop.permute.xlu1 %4819 }
 0x54f   : > { %15995 = vst [vmem:[#allocation89_spill] sm:$0xff] %v13391_v4  ;;  %v4211_v4 = vadd.f32 %v4195_v46, %v4177_v58  ;;  %v4201_v46 = vadd.f32 %v4185_v26, %v4167_v12  ;;  %v4424_v58 = vadd.f32 %v4408_v59, %v4256_v22  ;;  %v4077_v26 = vmul.f32 %v12867_v57, %v4060_v52 }
 0x550   : > { %v4547_v59 = vadd.f32 %v4531_v50, %v4513_v16 }
 0x551   : > { %v4228_v29 = vmax.f32 %v4211_v4, 0.0  ;;  %v4592_v20 = vadd.f32 %v4576_v38, %v4424_v58  ;;  %v16007_v4 = vld [vmem:[#allocation43_spill] sm:$0xff] }
 0x552   : > { %5276 = vmax.xlane.f32.xlu1 %v13400_v30  ;;  %v3999_v30 = vadd.f32 %v12761_v13, %v16004_v43  ;;  %v5198_v43 = vmul.f32 %v13394_v33, %v12916_v2  ;;  %v4895_v33 = vmax.f32 %v4878_v51, 0.0  ;;  %v16009_v51 = vld [vmem:[#allocation42_spill] sm:$0xff] }
 0x553   : > { %v13411_v5 = vpop.permute.xlu1 %4655 }
 0x554   : > { %15998 = vst [vmem:[#allocation80_spill] sm:$0xff] %v13411_v5  ;;  %v4345_v5 = vadd.f32 %v12788_v28, %v16005_v15  ;;  %v4033_v42 = vadd.f32 %v4017_v48, %v3999_v30  ;;  %v4867_v15 = vmul.f32 %v13420_v41, %v12845_v63  ;;  %v5214_v30 = vadd.f32 %v5198_v43, %v5180_v6  ;;  %v9058_v48 = vld [vmem:[%s9492_s18 + $0x28] sm:$0xff] }
 0x555   : > { %5412 = vrot.lane.b32.xlu0 %v9052_v19, %s9234_s22  ;;  %v3915_v0 = vadd.f32 %v9058_v48, %v16009_v51  ;;  %v4912_v1 = vmul.f32 %v12909_v23, %v4895_v33  ;;  %v4521_v43 = vmul.f32 %v13431_v47, %v12809_v36  ;;  %v16010_v6 = vld [vmem:[#allocation134_spill] sm:$0xff] }
 0x556   : > { %v4050_v16 = vmax.f32 %v4033_v42, 0.0 }
 0x557   : > { %v4660_v49 = vpop.permute.xlu1 %4659 }
 0x558   : > { %v4681_v10 = vadd.f32 %v12814_v21, %v4660_v49  ;;  %v4335_v49 = vadd.f32 %v12788_v28, %v16008_v60 }
 0x55a   : > { %v4715_v38 = vadd.f32 %v4699_v31, %v4681_v10  ;;  %v5231_v31 = vmax.f32 %v5214_v30, 0.0  ;;  %v16012_v30 = vld [vmem:[#allocation28_spill] sm:$0xff] }
 0x55c   : > { %v13440_v19 = vpop.permute.xlu1 %4987 }
 0x55d   : > { %16000 = vst [vmem:[#allocation31_spill] sm:$0xff] %v13440_v19  ;;  %v4363_v19 = vmul.f32 %v13420_v41, %v12797_v27 }
 0x55f   : > { %v4379_v12 = vadd.f32 %v4363_v19, %v4345_v5  ;;  %v4760_v5 = vadd.f32 %v4744_v32, %v4592_v20  ;;  %v4245_v19 = vmul.f32 %v12879_v61, %v4228_v29  ;;  %v4503_v32 = vadd.f32 %v12807_v17, %v16010_v6 }
 0x561   : > { %v13466_v45 = vpop.permute.xlu1 %5151  ;;  %v4396_v58 = vmax.f32 %v4379_v12, 0.0  ;;  %v4928_v42 = vadd.f32 %v4912_v1, %v4760_v5  ;;  %v4067_v12 = vmul.f32 %v12867_v57, %v4050_v16  ;;  %v4857_v1 = vmul.f32 %v13431_v47, %v12845_v63 }
 0x562   : > { %16006 = vst [vmem:[#allocation133_spill] sm:$0xff] %v13466_v45  ;;  %v4218_v45 = vmax.f32 %v4201_v46, 0.0  ;;  %v5080_v46 = vmul.f32 %v12924_v3, %v5063_v24  ;;  %v4839_v5 = vadd.f32 %v12837_v55, %v16012_v30 }
 0x563   : > { %5422 = vrot.lane.b32.xlu1 %v9056_v7, %s9234_s22  ;;  %v3925_v7 = vadd.f32 %v9057_v11, %v16007_v4  ;;  %v4564_v11 = vmax.f32 %v4547_v59, 0.0  ;;  %v4413_v33 = vmul.f32 %v12890_v56, %v4396_v58  ;;  %v4083_v16 = vadd.f32 %v4067_v12, %v3915_v0 }
 0x564   : > { %v4235_v60 = vmul.f32 %v12879_v61, %v4218_v45  ;;  %v4689_v45 = vmul.f32 %v13431_v47, %v12818_v18 }
 0x565   : > { %v4093_v50 = vadd.f32 %v4077_v26, %v3925_v7  ;;  %v4732_v26 = vmax.f32 %v4715_v38, 0.0  ;;  %v4581_v24 = vmul.f32 %v12897_v34, %v4564_v11  ;;  %v5096_v7 = vadd.f32 %v5080_v46, %v4928_v42 }
 0x566   : > { %v4828_v22 = vpop.permute.xlu1 %4827  ;;  %v5025_v46 = vmul.f32 %v13431_v47, %v12860_v44  ;;  %v5007_v11 = vadd.f32 %v12855_v8, %v13044_v14 }
 0x567   : > { %v4849_v52 = vadd.f32 %v12837_v55, %v4828_v22  ;;  %v4369_v22 = vadd.f32 %v4353_v62, %v4335_v49  ;;  %v4261_v10 = vadd.f32 %v4245_v19, %v4093_v50  ;;  %v16011_v62 = vld [vmem:[#allocation131_spill] sm:$0xff]  ;;  %v4749_v48 = vmul.f32 %v12905_v39, %v4732_v26 }
 0x568   : > { %v4671_v20 = vadd.f32 %v12814_v21, %v16011_v62  ;;  %v5248_v50 = vmul.f32 %v12937_v53, %v5231_v31  ;;  %v5203_v26 = vmul.f32 %v13420_v41, %v12916_v2  ;;  %v5193_v31 = vmul.f32 %v13431_v47, %v12916_v2 }
 0x569   : > { %v4883_v4 = vadd.f32 %v4867_v15, %v4849_v52  ;;  %v5035_v15 = vmul.f32 %v13420_v41, %v12860_v44  ;;  %v4386_v49 = vmax.f32 %v4369_v22, 0.0  ;;  %v4537_v52 = vadd.f32 %v4521_v43, %v4503_v32 }
 0x56a   : > { %v4429_v38 = vadd.f32 %v4413_v33, %v4261_v10  ;;  %v4705_v58 = vadd.f32 %v4689_v45, %v4671_v20  ;;  %v13524_v6 = vadd.f32 %v5248_v50, %v5096_v7  ;;  %v4873_v10 = vadd.f32 %v4857_v1, %v4839_v5 }
 0x56b   : > { %v13501_v29 = vpop.permute.xlu1 %4991  ;;  %v4900_v59 = vmax.f32 %v4883_v4, 0.0  ;;  %v4554_v32 = vmax.f32 %v4537_v52, 0.0  ;;  %v4403_v0 = vmul.f32 %v12890_v56, %v4386_v49  ;;  %v5041_v45 = vadd.f32 %v5025_v46, %v5007_v11 }
 0x56c   : > { %v4597_v4 = vadd.f32 %v4581_v24, %v4429_v38  ;;  %v4722_v14 = vmax.f32 %v4705_v58, 0.0  ;;  %v5175_v62 = vadd.f32 %v12914_v25, %v13123_v9  ;;  %v4251_v24 = vadd.f32 %v4235_v60, %v4083_v16 }
 0x56d   : > { %v4917_v22 = vmul.f32 %v12909_v23, %v4900_v59  ;;  %v4890_v7 = vmax.f32 %v4873_v10, 0.0  ;;  %v5058_v30 = vmax.f32 %v5041_v45, 0.0 }
 0x56e   : > { %v4765_v42 = vadd.f32 %v4749_v48, %v4597_v4  ;;  %v4419_v49 = vadd.f32 %v4403_v0, %v4251_v24  ;;  %v4739_v1 = vmul.f32 %v12905_v39, %v4722_v14  ;;  %v5209_v5 = vadd.f32 %v5193_v31, %v5175_v62  ;;  %v9059_v4 = vld [vmem:[%s9494_s1 + $0x60] sm:$0xff] }
 0x56f   : > { %v4996_v19 = vpop.permute.xlu1 %4995  ;;  %v4907_v9 = vmul.f32 %v12909_v23, %v4890_v7  ;;  %v4192_v0 = vmul.f32 %v9059_v4, %v12774_v35  ;;  %v16014_v31 = vld [vmem:[#allocation97_spill] sm:$0xff]  ;;  %v4360_v45 = vmul.f32 %v9059_v4, %v12797_v27  ;;  %v4528_v24 = vmul.f32 %v9059_v4, %v12809_v36  ;;  %v16016_v7 = vld [vmem:[#allocation122_spill] sm:$0xff] }
 0x570   : > { %v5017_v51 = vadd.f32 %v12855_v8, %v4996_v19  ;;  %v4933_v59 = vadd.f32 %v4917_v22, %v4765_v42  ;;  %v5226_v50 = vmax.f32 %v5209_v5, 0.0  ;;  %v4024_v22 = vmul.f32 %v9059_v4, %v12766_v54  ;;  %v16015_v62 = vld [vmem:[#allocation37_spill] sm:$0xff] }
 0x571   : > { %v4174_v42 = vadd.f32 %v12770_v40, %v16014_v31  ;;  %v16020_v31 = vld [vmem:[#allocation133_spill] sm:$0xff] }
 0x572   : > { %v5051_v43 = vadd.f32 %v5035_v15, %v5017_v51  ;;  %v4571_v15 = vmul.f32 %v12897_v34, %v4554_v32  ;;  %v5075_v51 = vmul.f32 %v12924_v3, %v5058_v30  ;;  %v5243_v11 = vmul.f32 %v12937_v53, %v5226_v50 }
 0x573   : > { %v4208_v14 = vadd.f32 %v4192_v0, %v4174_v42  ;;  %v5200_v0 = vmul.f32 %v9059_v4, %v12916_v2  ;;  %v5182_v42 = vadd.f32 %v12914_v25, %v16020_v31 }
 0x574   : > { %v5068_v12 = vmax.f32 %v5051_v43, 0.0  ;;  %v5164_v33 = vpop.permute.xlu1 %5163  ;;  %5290 = vmax.xlane.f32.xlu0 %v13524_v6  ;;  %v4587_v38 = vadd.f32 %v4571_v15, %v4419_v49  ;;  %v16013_v43 = vld [vmem:[#allocation23_spill] sm:$0xff]  ;;  %v4696_v15 = vmul.f32 %v9059_v4, %v12818_v18  ;;  %v9061_v49 = vld [vmem:[%s9492_s18 + $0x60] sm:$0xff] }
 0x575   : > { %v5185_v20 = vadd.f32 %v12914_v25, %v5164_v33  ;;  %v4006_v32 = vadd.f32 %v12761_v13, %v16013_v43  ;;  %v4225_v30 = vmax.f32 %v4208_v14, 0.0  ;;  %v16021_v14 = vld [vmem:[#allocation120_spill] sm:$0xff] }
 0x576   : > { %v5085_v41 = vmul.f32 %v12924_v3, %v5068_v12  ;;  %v4755_v48 = vadd.f32 %v4739_v1, %v4587_v38  ;;  %v9060_v12 = vld [vmem:[%s11465_s30 + $0x28] sm:$0xff]  ;;  %v4864_v38 = vmul.f32 %v9059_v4, %v12845_v63 }
 0x577   : > { %v5219_v47 = vadd.f32 %v5203_v26, %v5185_v20  ;;  %v4040_v26 = vadd.f32 %v4024_v22, %v4006_v32  ;;  %v4342_v20 = vadd.f32 %v12788_v28, %v16015_v62  ;;  %v16019_v22 = vld [vmem:[#allocation112_spill] sm:$0xff]  ;;  %v9063_v62 = vld [vmem:[%s11465_s30 + $0x50] sm:$0xff] }
 0x578   : > { %v5101_v52 = vadd.f32 %v5085_v41, %v4933_v59  ;;  %v4923_v58 = vadd.f32 %v4907_v9, %v4755_v48  ;;  %v4510_v41 = vadd.f32 %v12807_v17, %v13282_v37  ;;  %v16018_v9 = vld [vmem:[#allocation38_spill] sm:$0xff]  ;;  %v5014_v43 = vadd.f32 %v12855_v8, %v16019_v22 }
 0x579   : > { %v5236_v19 = vmax.f32 %v5219_v47, 0.0  ;;  %v4057_v33 = vmax.f32 %v4040_v26, 0.0  ;;  %v4678_v47 = vadd.f32 %v12814_v21, %v16016_v7  ;;  %v4376_v5 = vadd.f32 %v4360_v45, %v4342_v20 }
 0x57a   : > { %v5091_v46 = vadd.f32 %v5075_v51, %v4923_v58  ;;  %v4242_v51 = vmul.f32 %v12879_v61, %v4225_v30  ;;  %v4001_v45 = vadd.f32 %v12761_v13, %v16021_v14 }
 0x57b   : > { %v5253_v60 = vmul.f32 %v12937_v53, %v5236_v19  ;;  %v4074_v59 = vmul.f32 %v12867_v57, %v4057_v33  ;;  %v4544_v19 = vadd.f32 %v4528_v24, %v4510_v41  ;;  %v4712_v48 = vadd.f32 %v4696_v15, %v4678_v47 }
 0x57c   : > { %v13548_v10 = vadd.f32 %v5243_v11, %v5091_v46  ;;  %v4393_v50 = vmax.f32 %v4376_v5, 0.0  ;;  %v5032_v11 = vmul.f32 %v9059_v4, %v12860_v44  ;;  %v16022_v4 = vld [vmem:[#allocation126_spill] sm:$0xff] }
 0x57d   : > { %v13541_v16 = vadd.f32 %v5253_v60, %v5101_v52  ;;  %v16017_v52 = vld [vmem:[#allocation59_spill] sm:$0xff]  ;;  %v4846_v60 = vadd.f32 %v12837_v55, %v16018_v9  ;;  %v4561_v58 = vmax.f32 %v4544_v19, 0.0  ;;  %v4729_v26 = vmax.f32 %v4712_v48, 0.0  ;;  %v16023_v5 = vld [vmem:[#allocation114_spill] sm:$0xff]  ;;  %v13595_v48 = vpop.xlane.xlu0 %5274 }
 0x57e   : > { %v3922_v1 = vadd.f32 %v9061_v49, %v16017_v52  ;;  %v4410_v20 = vmul.f32 %v12890_v56, %v4393_v50  ;;  %v4169_v15 = vadd.f32 %v12770_v40, %v16022_v4  ;;  %v5048_v7 = vadd.f32 %v5032_v11, %v5014_v43  ;;  %v9064_v4 = vld [vmem:[%s9492_s18 + $0x38] sm:$0xff] }
 0x57f   : > { %v4880_v46 = vadd.f32 %v4864_v38, %v4846_v60  ;;  %v4578_v24 = vmul.f32 %v12897_v34, %v4561_v58  ;;  %v4746_v49 = vmul.f32 %v12905_v39, %v4729_v26  ;;  %v5216_v52 = vadd.f32 %v5200_v0, %v5182_v42  ;;  %v16025_v0 = vld [vmem:[#allocation90_spill] sm:$0xff] }
 0x580   : > { %v4090_v37 = vadd.f32 %v4074_v59, %v3922_v1  ;;  %v4337_v19 = vadd.f32 %v12788_v28, %v16023_v5  ;;  %v5065_v58 = vmax.f32 %v5048_v7, 0.0  ;;  %v4673_v31 = vadd.f32 %v12814_v21, %v16025_v0 }
 0x581   : > { %v4897_v41 = vmax.f32 %v4880_v46, 0.0  ;;  %v5233_v11 = vmax.f32 %v5216_v52, 0.0  ;;  %v16028_v52 = vld [vmem:[#allocation56_spill] sm:$0xff] }
 0x582   : > { %v4258_v32 = vadd.f32 %v4242_v51, %v4090_v37  ;;  %v16024_v51 = vld [vmem:[#allocation84_spill] sm:$0xff] }
 0x583   : > { %v4914_v9 = vmul.f32 %v12909_v23, %v4897_v41  ;;  %v4505_v50 = vadd.f32 %v12807_v17, %v16024_v51 }
 0x584   : > { %v4426_v47 = vadd.f32 %v4410_v20, %v4258_v32  ;;  %v5250_v20 = vmul.f32 %v12937_v53, %v5233_v11 }
 0x586   : > { %v4594_v38 = vadd.f32 %v4578_v24, %v4426_v47 }
 0x587   : > { %5280 = vmax.xlane.f32.xlu1 %v13548_v10 }
 0x588   : > { %v4762_v46 = vadd.f32 %v4746_v49, %v4594_v38 }
 0x58a   : > { %5408 = vrot.lane.b32.xlu0 %v9060_v12, %s9234_s22  ;;  %v9062_v12 = vld [vmem:[%s9494_s1 + $0x38] sm:$0xff]  ;;  %v4930_v32 = vadd.f32 %v4914_v9, %v4762_v46 }
 0x58b   : > { %v4019_v33 = vmul.f32 %v9062_v12, %v12766_v54  ;;  %v4187_v59 = vmul.f32 %v9062_v12, %v12774_v35  ;;  %v4355_v30 = vmul.f32 %v9062_v12, %v12797_v27  ;;  %v4523_v60 = vmul.f32 %v9062_v12, %v12809_v36 }
 0x58c   : > { %v4691_v26 = vmul.f32 %v9062_v12, %v12818_v18  ;;  %v4859_v49 = vmul.f32 %v9062_v12, %v12845_v63  ;;  %v5027_v51 = vmul.f32 %v9062_v12, %v12860_v44 }
 0x58d   : > { %v4035_v1 = vadd.f32 %v4019_v33, %v4001_v45  ;;  %v4203_v37 = vadd.f32 %v4187_v59, %v4169_v15  ;;  %v4371_v43 = vadd.f32 %v4355_v30, %v4337_v19  ;;  %v5425_v33 = vpop.permute.xlu0 %5424  ;;  %v4539_v14 = vadd.f32 %v4523_v60, %v4505_v50  ;;  %v16027_v15 = vld [vmem:[#allocation86_spill] sm:$0xff]  ;;  %v16029_v50 = vld [vmem:[#allocation27_spill] sm:$0xff] }
 0x58e   : > { %v5082_v45 = vmul.f32 %v12924_v3, %v5065_v58  ;;  %v3917_v7 = vadd.f32 %v9064_v4, %v16027_v15  ;;  %v4707_v5 = vadd.f32 %v4691_v26, %v4673_v31  ;;  %v5009_v58 = vadd.f32 %v12855_v8, %v16029_v50  ;;  %v9065_v50 = vld [vmem:[%s9494_s1 + $0x70] sm:$0xff] }
 0x58f   : > { %v4052_v22 = vmax.f32 %v4035_v1, 0.0  ;;  %v4220_v42 = vmax.f32 %v4203_v37, 0.0  ;;  %v4388_v41 = vmax.f32 %v4371_v43, 0.0  ;;  %v4841_v1 = vadd.f32 %v12837_v55, %v16028_v52  ;;  %v16030_v43 = vld [vmem:[#allocation17_spill] sm:$0xff] }
 0x590   : > { %v5098_v59 = vadd.f32 %v5082_v45, %v4930_v32  ;;  %v4556_v19 = vmax.f32 %v4539_v14, 0.0  ;;  %v5177_v32 = vadd.f32 %v12914_v25, %v16030_v43  ;;  %v5043_v45 = vadd.f32 %v5027_v51, %v5009_v58 }
 0x591   : > { %v4069_v24 = vmul.f32 %v12867_v57, %v4052_v22  ;;  %v4237_v47 = vmul.f32 %v12879_v61, %v4220_v42  ;;  %v4405_v37 = vmul.f32 %v12890_v56, %v4388_v41  ;;  %v4875_v11 = vadd.f32 %v4859_v49, %v4841_v1 }
 0x592   : > { %v13618_v9 = vadd.f32 %v5250_v20, %v5098_v59  ;;  %v5195_v22 = vmul.f32 %v9062_v12, %v12916_v2  ;;  %v4724_v42 = vmax.f32 %v4707_v5, 0.0  ;;  %v4026_v58 = vmul.f32 %v9065_v50, %v12766_v54 }
 0x593   : > { %v4085_v60 = vadd.f32 %v4069_v24, %v3917_v7  ;;  %v4892_v12 = vmax.f32 %v4875_v11, 0.0  ;;  %v5060_v7 = vmax.f32 %v5043_v45, 0.0  ;;  %v4194_v43 = vmul.f32 %v9065_v50, %v12774_v35 }
 0x594   : > { %v5211_v24 = vadd.f32 %v5195_v22, %v5177_v32  ;;  %v4741_v4 = vmul.f32 %v12905_v39, %v4724_v42  ;;  %v16035_v32 = vld [vmem:[#allocation107_spill] sm:$0xff]  ;;  %v4362_v45 = vmul.f32 %v9065_v50, %v12797_v27 }
 0x595   : > { %v4253_v46 = vadd.f32 %v4237_v47, %v4085_v60  ;;  %v4909_v49 = vmul.f32 %v12909_v23, %v4892_v12  ;;  %v16036_v12 = vld [vmem:[#allocation124_spill] sm:$0xff] }
 0x596   : > { %v5228_v52 = vmax.f32 %v5211_v24, 0.0  ;;  %v4344_v24 = vadd.f32 %v12788_v28, %v16036_v12 }
 0x597   : > { %v4421_v14 = vadd.f32 %v4405_v37, %v4253_v46  ;;  %v16034_v46 = vld [vmem:[#allocation71_spill] sm:$0xff] }
 0x598   : > { %5418 = vrot.lane.b32.xlu1 %v9063_v62, %s9234_s22  ;;  %v13603_v62 = vand.u32 4294901760, %v5425_v33  ;;  %v5245_v51 = vmul.f32 %v12937_v53, %v5228_v52  ;;  %v4008_v11 = vadd.f32 %v12761_v13, %v16034_v46  ;;  %v4698_v52 = vmul.f32 %v9065_v50, %v12818_v18 }
 0x59a   : > { %16026 = vst [vmem:[#allocation125_spill] sm:$0xff] %v13603_v62  ;;  %v13616_v38 = vsub.f32 %v5425_v33, %v13603_v62  ;;  %v4573_v33 = vmul.f32 %v12897_v34, %v4556_v19  ;;  %v5077_v19 = vmul.f32 %v12924_v3, %v5060_v7  ;;  %v16037_v7 = vld [vmem:[#allocation53_spill] sm:$0xff] }
 0x59c   : > { %v13631_v31 = vand.u32 4294901760, %v13616_v38  ;;  %v4589_v15 = vadd.f32 %v4573_v33, %v4421_v14  ;;  %v4042_v33 = vadd.f32 %v4026_v58, %v4008_v11  ;;  %v16039_v58 = vld [vmem:[#allocation48_spill] sm:$0xff] }
 0x59e   : > { %16032 = vst [vmem:[#allocation95_spill] sm:$0xff] %v13631_v31  ;;  %v5705_v59 = vsub.f32 %v13616_v38, %v13631_v31  ;;  %v4757_v60 = vadd.f32 %v4741_v4, %v4589_v15  ;;  %v4059_v4 = vmax.f32 %v4042_v33, 0.0  ;;  %v4530_v15 = vmul.f32 %v9065_v50, %v12809_v36  ;;  %v9070_v31 = vld [vmem:[%s9492_s18 + $0x48] sm:$0xff] }
 0x5a0   : > { %v5706_v5 = vand.u32 4294901760, %v5705_v59  ;;  %v4925_v37 = vadd.f32 %v4909_v49, %v4757_v60  ;;  %v9066_v59 = vld [vmem:[%s11465_s30 + $0x18] sm:$0xff]  ;;  %v4076_v60 = vmul.f32 %v12867_v57, %v4059_v4 }
 0x5a2   : > { %v5093_v22 = vadd.f32 %v5077_v19, %v4925_v37  ;;  %v4378_v19 = vadd.f32 %v4362_v45, %v4344_v24  ;;  %v5034_v45 = vmul.f32 %v9065_v50, %v12860_v44  ;;  %v5016_v24 = vadd.f32 %v12855_v8, %v13501_v29  ;;  %v16042_v29 = vld [vmem:[#allocation69_spill] sm:$0xff] }
 0x5a4   : > { %v13659_v42 = vadd.f32 %v5245_v51, %v5093_v22  ;;  %v9067_v51 = vld [vmem:[%s9492_s18 + $0x70] sm:$0xff] }
 0x5a5   : > { %v3924_v46 = vadd.f32 %v9067_v51, %v16039_v58  ;;  %v5184_v51 = vadd.f32 %v12914_v25, %v16042_v29  ;;  %v13704_v29 = vpop.xlane.xlu0 %5278 }
 0x5a6   : > { %v13613_v30 = vpop.xlane.xlu1 %5272 }
 0x5a9   : > { %5294 = vmax.xlane.f32.xlu0 %v13618_v9 }
 0x5aa   : > { %v5427_v26 = vpop.permute.xlu1 %5426 }
 0x5ab   : > { %v13628_v0 = vand.u32 4294901760, %v5427_v26 }
 0x5ad   : > { %16031 = vst [vmem:[#allocation104_spill] sm:$0xff] %v13628_v0  ;;  %v13635_v20 = vsub.f32 %v5427_v26, %v13628_v0  ;;  %8215 = vmatprep.subr.mxu0 %v13628_v0  ;;  %v4176_v26 = vadd.f32 %v12770_v40, %v16035_v32  ;;  %v4866_v32 = vmul.f32 %v9065_v50, %v12845_v63 }
 0x5ae   : > { %8216 = vmatpush3.msra.mxu0 %v13628_v0 }
 0x5af   : > { %v13640_v41 = vand.u32 4294901760, %v13635_v20  ;;  %8217 = vmatprep.subr.mxu0 %v13603_v62  ;;  %v4210_v14 = vadd.f32 %v4194_v43, %v4176_v26  ;;  %v4395_v43 = vmax.f32 %v4378_v19, 0.0  ;;  %v16040_v26 = vld [vmem:[#allocation21_spill] sm:$0xff]  ;;  %v5050_v19 = vadd.f32 %v5034_v45, %v5016_v24 }
 0x5b0   : > { %8218 = vmatpush3.msra.mxu0 %v13603_v62  ;;  %v4848_v33 = vadd.f32 %v12837_v55, %v16040_v26  ;;  %v16044_v45 = vld [vmem:[#allocation137_spill] sm:$0xff] }
 0x5b1   : > { %16033 = vst [vmem:[#allocation87_spill] sm:$0xff] %v13640_v41  ;;  %v5698_v47 = vsub.f32 %v13635_v20, %v13640_v41  ;;  %v4227_v49 = vmax.f32 %v4210_v14, 0.0  ;;  %v4092_v14 = vadd.f32 %v4076_v60, %v3924_v46  ;;  %v9069_v60 = vld [vmem:[%s11465_s30 + $0x40] sm:$0xff]  ;;  %v16049_v41 = vld [vmem:[#allocation40_spill] sm:$0xff] }
 0x5b3   : > { %v5699_v1 = vand.u32 4294901760, %v5698_v47  ;;  %v4512_v47 = vadd.f32 %v12807_v17, %v16037_v7  ;;  %v4244_v11 = vmul.f32 %v12879_v61, %v4227_v49 }
 0x5b5   : > { %8271 = vmatprep.subr.mxu1 %v5699_v1  ;;  %v4546_v37 = vadd.f32 %v4530_v15, %v4512_v47  ;;  %v9068_v15 = vld [vmem:[%s9494_s1 + $0x48] sm:$0xff]  ;;  %v16041_v47 = vld [vmem:[#allocation55_spill] sm:$0xff] }
 0x5b6   : > { %8272 = vmatpush3.msra.mxu1 %v5699_v1  ;;  %v16038_v1 = vld [vmem:[#allocation80_spill] sm:$0xff]  ;;  %v4021_v7 = vmul.f32 %v9068_v15, %v12766_v54  ;;  %v4003_v49 = vadd.f32 %v12761_v13, %v16041_v47 }
 0x5b7   : > { %8273 = vmatprep.subr.mxu1 %v5706_v5  ;;  %v4563_v12 = vmax.f32 %v4546_v37, 0.0  ;;  %v5202_v37 = vmul.f32 %v9065_v50, %v12916_v2  ;;  %v4339_v50 = vadd.f32 %v12788_v28, %v16044_v45 }
 0x5b8   : > { %8274 = vmatpush3.msra.mxu1 %v5706_v5  ;;  %v4680_v5 = vadd.f32 %v12814_v21, %v16038_v1  ;;  %v4882_v1 = vadd.f32 %v4866_v32, %v4848_v33  ;;  %v4037_v32 = vadd.f32 %v4021_v7, %v4003_v49 }
 0x5b9   : > { %v5218_v24 = vadd.f32 %v5202_v37, %v5184_v51 }
 0x5ba   : > { %v4714_v22 = vadd.f32 %v4698_v52, %v4680_v5  ;;  %v4412_v52 = vmul.f32 %v12890_v56, %v4395_v43  ;;  %v4580_v5 = vmul.f32 %v12897_v34, %v4563_v12  ;;  %v4899_v26 = vmax.f32 %v4882_v1, 0.0 }
 0x5bb   : > { %v4357_v12 = vmul.f32 %v9068_v15, %v12797_v27  ;;  %v5235_v51 = vmax.f32 %v5218_v24, 0.0 }
 0x5bc   : > { %5284 = vmax.xlane.f32.xlu1 %v13659_v42  ;;  %v4731_v4 = vmax.f32 %v4714_v22, 0.0  ;;  %v16043_v22 = vld [vmem:[#allocation64_spill] sm:$0xff]  ;;  %v4916_v7 = vmul.f32 %v12909_v23, %v4899_v26  ;;  %v4861_v26 = vmul.f32 %v9068_v15, %v12845_v63 }
 0x5bd   : > { %v4171_v43 = vadd.f32 %v12770_v40, %v16043_v22  ;;  %v4054_v22 = vmax.f32 %v4037_v32, 0.0  ;;  %v4373_v1 = vadd.f32 %v4357_v12, %v4339_v50  ;;  %v5252_v24 = vmul.f32 %v12937_v53, %v5235_v51 }
 0x5be   : > { %v4748_v46 = vmul.f32 %v12905_v39, %v4731_v4  ;;  %v16045_v4 = vld [vmem:[#allocation132_spill] sm:$0xff] }
 0x5bf   : > { %5404 = vrot.lane.b32.xlu0 %v9066_v59, %s9234_s22  ;;  %v4260_v59 = vadd.f32 %v4244_v11, %v4092_v14  ;;  %v4189_v11 = vmul.f32 %v9068_v15, %v12774_v35  ;;  %v5067_v14 = vmax.f32 %v5050_v19, 0.0  ;;  %v16046_v19 = vld [vmem:[#allocation58_spill] sm:$0xff]  ;;  %v4390_v50 = vmax.f32 %v4373_v1, 0.0  ;;  %v16050_v1 = vld [vmem:[#allocation129_spill] sm:$0xff] }
 0x5c0   : > { %v4675_v37 = vadd.f32 %v12814_v21, %v16046_v19  ;;  %v3919_v19 = vadd.f32 %v9070_v31, %v16049_v41 }
 0x5c1   : > { %v4428_v58 = vadd.f32 %v4412_v52, %v4260_v59  ;;  %v4525_v59 = vmul.f32 %v9068_v15, %v12809_v36  ;;  %v4507_v52 = vadd.f32 %v12807_v17, %v16045_v4  ;;  %v5084_v49 = vmul.f32 %v12924_v3, %v5067_v14  ;;  %v16048_v14 = vld [vmem:[#allocation121_spill] sm:$0xff] }
 0x5c2   : > { %v4843_v12 = vadd.f32 %v12837_v55, %v16048_v14  ;;  %v4407_v31 = vmul.f32 %v12890_v56, %v4390_v50 }
 0x5c3   : > { %v4596_v33 = vadd.f32 %v4580_v5, %v4428_v58  ;;  %v4693_v5 = vmul.f32 %v9068_v15, %v12818_v18 }
 0x5c5   : > { %v4764_v47 = vadd.f32 %v4748_v46, %v4596_v33  ;;  %v4071_v33 = vmul.f32 %v12867_v57, %v4054_v22  ;;  %v4709_v4 = vadd.f32 %v4693_v5, %v4675_v37  ;;  %v5029_v22 = vmul.f32 %v9068_v15, %v12860_v44 }
 0x5c6   : > { %v5011_v5 = vadd.f32 %v12855_v8, %v16050_v1  ;;  %v4877_v37 = vadd.f32 %v4861_v26, %v4843_v12 }
 0x5c7   : > { %v4932_v58 = vadd.f32 %v4916_v7, %v4764_v47  ;;  %v4726_v41 = vmax.f32 %v4709_v4, 0.0 }
 0x5c8   : > { %v5045_v26 = vadd.f32 %v5029_v22, %v5011_v5  ;;  %v4894_v12 = vmax.f32 %v4877_v37, 0.0 }
 0x5c9   : > { %v5100_v32 = vadd.f32 %v5084_v49, %v4932_v58  ;;  %v4743_v4 = vmul.f32 %v12905_v39, %v4726_v41 }
 0x5ca   : > { %v4911_v22 = vmul.f32 %v12909_v23, %v4894_v12 }
 0x5cb   : > { %v13727_v49 = vadd.f32 %v5252_v24, %v5100_v32 }
 0x5cd   : > { %5414 = vrot.lane.b32.xlu1 %v9069_v60, %s9234_s22  ;;  %v4205_v60 = vadd.f32 %v4189_v11, %v4171_v43  ;;  %v4541_v11 = vadd.f32 %v4525_v59, %v4507_v52  ;;  %v5421_v43 = vpop.permute.xlu0 %5420  ;;  %v4087_v52 = vadd.f32 %v4071_v33, %v3919_v19 }
 0x5ce   : > { %v13712_v45 = vand.u32 4294901760, %v5421_v43 }
 0x5cf   : > { %v4222_v46 = vmax.f32 %v4205_v60, 0.0  ;;  %v4558_v60 = vmax.f32 %v4541_v11, 0.0  ;;  %v16051_v11 = vld [vmem:[#allocation51_spill] sm:$0xff] }
 0x5d0   : > { %16047 = vst [vmem:[#allocation101_spill] sm:$0xff] %v13712_v45  ;;  %v13725_v7 = vsub.f32 %v5421_v43, %v13712_v45  ;;  %v5179_v43 = vadd.f32 %v12914_v25, %v16051_v11 }
 0x5d1   : > { %v4239_v47 = vmul.f32 %v12879_v61, %v4222_v46  ;;  %v4575_v58 = vmul.f32 %v12897_v34, %v4558_v60  ;;  %v5197_v46 = vmul.f32 %v9068_v15, %v12916_v2 }
 0x5d2   : > { %v13740_v14 = vand.u32 4294901760, %v13725_v7 }
 0x5d3   : > { %v4255_v51 = vadd.f32 %v4239_v47, %v4087_v52  ;;  %v5213_v24 = vadd.f32 %v5197_v46, %v5179_v43  ;;  %v5062_v52 = vmax.f32 %v5045_v26, 0.0  ;;  %v9072_v26 = vld [vmem:[%s9494_s1 + $0x58] sm:$0xff] }
 0x5d4   : > { %16053 = vst [vmem:[#allocation135_spill] sm:$0xff] %v13740_v14  ;;  %v5719_v60 = vsub.f32 %v13725_v7, %v13740_v14  ;;  %v4023_v12 = vmul.f32 %v9072_v26, %v12766_v54 }
 0x5d5   : > { %v4423_v50 = vadd.f32 %v4407_v31, %v4255_v51  ;;  %v5230_v37 = vmax.f32 %v5213_v24, 0.0  ;;  %v5079_v51 = vmul.f32 %v12924_v3, %v5062_v52  ;;  %v9073_v52 = vld [vmem:[%s11465_s30 + $0x30] sm:$0xff] }
 0x5d6   : > { %v5720_v41 = vand.u32 4294901760, %v5719_v60 }
 0x5d7   : > { %v4591_v15 = vadd.f32 %v4575_v58, %v4423_v50  ;;  %v5247_v46 = vmul.f32 %v12937_v53, %v5230_v37  ;;  %v16055_v50 = vld [vmem:[#allocation77_spill] sm:$0xff] }
 0x5d9   : > { %v4759_v1 = vadd.f32 %v4743_v4, %v4591_v15  ;;  %v4005_v4 = vadd.f32 %v12761_v13, %v16055_v50  ;;  %v16056_v15 = vld [vmem:[#allocation136_spill] sm:$0xff] }
 0x5da   : > { %v5304_v24 = vsub.f32 %v16056_v15, %v13595_v48 }
 0x5db   : > { %v13721_v59 = vpop.xlane.xlu1 %5276  ;;  %v4927_v58 = vadd.f32 %v4911_v22, %v4759_v1  ;;  %v4039_v60 = vadd.f32 %v4023_v12, %v4005_v4  ;;  %v4191_v22 = vmul.f32 %v9072_v26, %v12774_v35  ;;  %v16057_v1 = vld [vmem:[#allocation50_spill] sm:$0xff]  ;;  %v16060_v12 = vld [vmem:[#allocation24_spill] sm:$0xff]  ;;  %v13784_v4 = vpop.xlane.xlu0 %5282 }
 0x5dc   : > { %v5322_v37 = vmul.f32 1.442695, %v5304_v24  ;;  %v4509_v50 = vadd.f32 %v12807_v17, %v16060_v12  ;;  %v16063_v12 = vld [vmem:[#allocation123_spill] sm:$0xff] }
 0x5dd   : > { %v5095_v11 = vadd.f32 %v5079_v51, %v4927_v58  ;;  %v4359_v51 = vmul.f32 %v9072_v26, %v12797_v27  ;;  %v16059_v58 = vld [vmem:[#allocation25_spill] sm:$0xff]  ;;  %v4056_v48 = vmax.f32 %v4039_v60, 0.0  ;;  %v16062_v60 = vld [vmem:[#allocation82_spill] sm:$0xff] }
 0x5de   : > { %5298 = vmax.xlane.f32.xlu0 %v13727_v49  ;;  %8790 = vpow2.f32 %v5322_v37 }
 0x5df   : > { %v5423_v33 = vpop.permute.xlu1 %5422  ;;  %v13760_v43 = vadd.f32 %v5247_v46, %v5095_v11  ;;  %v4341_v46 = vadd.f32 %v12788_v28, %v16059_v58  ;;  %v9074_v58 = vld [vmem:[%s9492_s18 + $0x58] sm:$0xff]  ;;  %v5417_v37 = vpop.permute.xlu0 %5416 }
 0x5e0   : > { %v13737_v32 = vand.u32 4294901760, %v5423_v33 }
 0x5e1   : > { %v4375_v24 = vadd.f32 %v4359_v51, %v4341_v46 }
 0x5e2   : > { %16052 = vst [vmem:[#allocation45_spill] sm:$0xff] %v13737_v32  ;;  %v13744_v19 = vsub.f32 %v5423_v33, %v13737_v32  ;;  %8219 = vmatprep.subr.mxu0 %v13737_v32  ;;  %v9071_v33 = vld [vmem:[%s11465_s30 + $0x8] sm:$0xff] }
 0x5e3   : > { %8220 = vmatpush3.msra.mxu0 %v13737_v32  ;;  %v4392_v51 = vmax.f32 %v4375_v24, 0.0 }
 0x5e4   : > { %v13749_v47 = vand.u32 4294901760, %v13744_v19  ;;  %8221 = vmatprep.subr.mxu0 %v13712_v45 }
 0x5e5   : > { %8222 = vmatpush3.msra.mxu0 %v13712_v45  ;;  %v4845_v45 = vadd.f32 %v12837_v55, %v16063_v12 }
 0x5e6   : > { %16054 = vst [vmem:[#allocation100_spill] sm:$0xff] %v13749_v47  ;;  %v5712_v5 = vsub.f32 %v13744_v19, %v13749_v47  ;;  %v4863_v47 = vmul.f32 %v9072_v26, %v12845_v63 }
 0x5e8   : > { %v5713_v31 = vand.u32 4294901760, %v5712_v5  ;;  %v4173_v5 = vadd.f32 %v12770_v40, %v16057_v1  ;;  %v16061_v1 = vld [vmem:[#allocation41_spill] sm:$0xff]  ;;  %v4879_v62 = vadd.f32 %v4863_v47, %v4845_v45 }
 0x5ea   : > { %8275 = vmatprep.subr.mxu1 %v5713_v31  ;;  %v4207_v11 = vadd.f32 %v4191_v22, %v4173_v5  ;;  %v3921_v22 = vadd.f32 %v9074_v58, %v16062_v60 }
 0x5eb   : > { %8276 = vmatpush3.msra.mxu1 %v5713_v31  ;;  %v16058_v31 = vld [vmem:[#allocation115_spill] sm:$0xff] }
 0x5ec   : > { %8277 = vmatprep.subr.mxu1 %v5720_v41  ;;  %v4224_v5 = vmax.f32 %v4207_v11, 0.0  ;;  %v5031_v11 = vmul.f32 %v9072_v26, %v12860_v44 }
 0x5ed   : > { %8278 = vmatpush3.msra.mxu1 %v5720_v41  ;;  %v5305_v41 = vsub.f32 %v16058_v31, %v13721_v59  ;;  %v4695_v59 = vmul.f32 %v9072_v26, %v12818_v18  ;;  %v4677_v31 = vadd.f32 %v12814_v21, %v16061_v1 }
 0x5ee   : > { %v4241_v32 = vmul.f32 %v12879_v61, %v4224_v5 }
 0x5ef   : > { %v5324_v15 = vmul.f32 1.442695, %v5305_v41  ;;  %v13795_v41 = vand.u32 4294901760, %v5417_v37 }
 0x5f1   : > { %5288 = vmax.xlane.f32.xlu1 %v13760_v43  ;;  %8792 = vpow2.f32 %v5324_v15  ;;  %v13802_v58 = vsub.f32 %v5417_v37, %v13795_v41  ;;  %v4409_v15 = vmul.f32 %v12890_v56, %v4392_v51  ;;  %v13813_v37 = vpop.eup %8790 }
 0x5f3   : > { %v13811_v12 = vand.u32 4294901760, %v13802_v58 }
 0x5f4   : > { %5400 = vrot.lane.b32.xlu0 %v9071_v33, %s9234_s22  ;;  %v4527_v33 = vmul.f32 %v9072_v26, %v12809_v36 }
 0x5f6   : > { %v4543_v14 = vadd.f32 %v4527_v33, %v4509_v50  ;;  %v16064_v33 = vld [vmem:[#allocation61_spill] sm:$0xff] }
 0x5f7   : > { %v5013_v50 = vadd.f32 %v12855_v8, %v16064_v33 }
 0x5f8   : > { %v4560_v1 = vmax.f32 %v4543_v14, 0.0  ;;  %v4896_v14 = vmax.f32 %v4879_v62, 0.0 }
 0x5fa   : > { %v4577_v45 = vmul.f32 %v12897_v34, %v4560_v1  ;;  %v4913_v1 = vmul.f32 %v12909_v23, %v4896_v14 }
 0x5fe   : > { %v13832_v33 = vpop.eup %8792 }
 0x602   : > { %5410 = vrot.lane.b32.xlu1 %v9073_v52, %s9234_s22  ;;  %v4073_v52 = vmul.f32 %v12867_v57, %v4056_v48  ;;  %v4711_v48 = vadd.f32 %v4695_v59, %v4677_v31  ;;  %v16065_v31 = vld [vmem:[#allocation46_spill] sm:$0xff] }
 0x604   : > { %v4089_v46 = vadd.f32 %v4073_v52, %v3921_v22  ;;  %v4728_v52 = vmax.f32 %v4711_v48, 0.0  ;;  %v5047_v22 = vadd.f32 %v5031_v11, %v5013_v50  ;;  %v5733_v11 = vsub.f32 %v13802_v58, %v13811_v12 }
 0x606   : > { %v4257_v24 = vadd.f32 %v4241_v32, %v4089_v46  ;;  %v4745_v46 = vmul.f32 %v12905_v39, %v4728_v52  ;;  %v5064_v50 = vmax.f32 %v5047_v22, 0.0 }
 0x608   : > { %v4425_v51 = vadd.f32 %v4409_v15, %v4257_v24 }
 0x60a   : > { %v4593_v48 = vadd.f32 %v4577_v45, %v4425_v51  ;;  %v5081_v45 = vmul.f32 %v12924_v3, %v5064_v50  ;;  %v16068_v50 = vld [vmem:[#allocation67_spill] sm:$0xff] }
 0x60c   : > { %v4761_v15 = vadd.f32 %v4745_v46, %v4593_v48  ;;  %v16067_v46 = vld [vmem:[#allocation26_spill] sm:$0xff] }
 0x60d   : > { %v4007_v48 = vadd.f32 %v12761_v13, %v16067_v46 }
 0x60e   : > { %v4929_v52 = vadd.f32 %v4913_v1, %v4761_v15  ;;  %v9076_v1 = vld [vmem:[%s11465_s30 + $0x20] sm:$0xff] }
 0x610   : > { %v5281_v0 = vpop.xlane.xlu1 %5280 }
 0x611   : > { %v5307_v60 = vsub.f32 %v13548_v10, %v5281_v0  ;;  %v5199_v10 = vmul.f32 %v9072_v26, %v12916_v2  ;;  %v16066_v0 = vld [vmem:[#allocation19_spill] sm:$0xff] }
 0x612   : > { %v5181_v32 = vadd.f32 %v12914_v25, %v16066_v0 }
 0x613   : > { %v5328_v59 = vmul.f32 1.442695, %v5307_v60  ;;  %5350 = vadd.xlane.f32.xlu0 %v16065_v31  ;;  %v5734_v31 = vand.u32 4294901760, %v5733_v11 }
 0x614   : > { %v5419_v47 = vpop.permute.xlu1 %5418  ;;  %v5215_v60 = vadd.f32 %v5199_v10, %v5181_v32  ;;  %v9075_v32 = vld [vmem:[%s9494_s1 + $0x68] sm:$0xff]  ;;  %s9235_s1 = smov 8  }
 0x615   : > { %8794 = vpow2.f32 %v5328_v59  ;;  %v13808_v5 = vand.u32 4294901760, %v5419_v47  ;;  %v4025_v51 = vmul.f32 %v9075_v32, %v12766_v54  ;;  %v4193_v11 = vmul.f32 %v9075_v32, %v12774_v35  ;;  %v13858_v54 = vpop.xlane.xlu0 %5286 }
 0x616   : > { %v5232_v14 = vmax.f32 %v5215_v60, 0.0  ;;  %v4175_v60 = vadd.f32 %v12770_v40, %v16068_v50  ;;  %v4697_v40 = vmul.f32 %v9075_v32, %v12818_v18  ;;  %v16072_v50 = vld [vmem:[#allocation89_spill] sm:$0xff] }
 0x617   : > { %v13820_v62 = vsub.f32 %v5419_v47, %v13808_v5  ;;  %8223 = vmatprep.subr.mxu0 %v13808_v5  ;;  %5354 = vadd.xlane.f32.xlu0 %v13813_v37  ;;  %v5097_v47 = vadd.f32 %v5081_v45, %v4929_v52  ;;  %v4041_v15 = vadd.f32 %v4025_v51, %v4007_v48  ;;  %v16069_v52 = vld [vmem:[#allocation44_spill] sm:$0xff]  ;;  %v16071_v51 = vld [vmem:[#allocation93_spill] sm:$0xff] }
 0x618   : > { %8224 = vmatpush3.msra.mxu0 %v13808_v5  ;;  %v5249_v10 = vmul.f32 %v12937_v53, %v5232_v14  ;;  %v4529_v14 = vmul.f32 %v9075_v32, %v12809_v36  ;;  %v4847_v36 = vadd.f32 %v12837_v55, %v16072_v50 }
 0x619   : > { %v13827_v26 = vand.u32 4294901760, %v13820_v62  ;;  %8225 = vmatprep.subr.mxu0 %v13795_v41  ;;  %v4058_v45 = vmax.f32 %v4041_v15, 0.0  ;;  %v5413_v46 = vpop.permute.xlu0 %5412  ;;  %v16073_v15 = vld [vmem:[#allocation85_spill] sm:$0xff] }
 0x61a   : > { %8226 = vmatpush3.msra.mxu0 %v13795_v41  ;;  %v13843_v0 = vadd.f32 %v5249_v10, %v5097_v47  ;;  %v16070_v47 = vld [vmem:[#allocation118_spill] sm:$0xff]  ;;  %v13866_v48 = vand.u32 4294901760, %v5413_v46 }
 0x61b   : > { %5356 = vadd.xlane.f32.xlu0 %v13832_v33  ;;  %v5726_v24 = vsub.f32 %v13820_v62, %v13827_v26  ;;  %v4511_v35 = vadd.f32 %v12807_v17, %v16070_v47 }
 0x61d   : > { %v5727_v59 = vand.u32 4294901760, %v5726_v24  ;;  %v4361_v24 = vmul.f32 %v9075_v32, %v12797_v27  ;;  %v4679_v27 = vadd.f32 %v12814_v21, %v16071_v51  ;;  %v5033_v21 = vmul.f32 %v9075_v32, %v12860_v44 }
 0x61f   : > { %8279 = vmatprep.subr.mxu1 %v5727_v59 }
 0x620   : > { %8280 = vmatpush3.msra.mxu1 %v5727_v59  ;;  %v4343_v59 = vadd.f32 %v12788_v28, %v16069_v52  ;;  %v4075_v28 = vmul.f32 %v12867_v57, %v4058_v45  ;;  %v4713_v52 = vadd.f32 %v4697_v40, %v4679_v27  ;;  %v13879_v57 = vsub.f32 %v5413_v46, %v13866_v48  ;;  %v16075_v46 = vld [vmem:[#allocation62_spill] sm:$0xff] }
 0x621   : > { %8281 = vmatprep.subr.mxu1 %v5734_v31  ;;  %v5201_v27 = vmul.f32 %v9075_v32, %v12916_v2 }
 0x622   : > { %v13839_v22 = vpop.eup %8794  ;;  %8282 = vmatpush3.msra.mxu1 %v5734_v31  ;;  %v4209_v31 = vadd.f32 %v4193_v11, %v4175_v60  ;;  %v4377_v13 = vadd.f32 %v4361_v24, %v4343_v59  ;;  %v4865_v11 = vmul.f32 %v9075_v32, %v12845_v63  ;;  %v9077_v60 = vld [vmem:[%s9492_s18 + $0x68] sm:$0xff]  ;;  %v4545_v24 = vadd.f32 %v4529_v14, %v4511_v35  ;;  %v16074_v59 = vld [vmem:[#allocation31_spill] sm:$0xff] }
 0x623   : > { %5360 = vadd.xlane.f32.xlu0 %v13839_v22  ;;  %v3923_v17 = vadd.f32 %v9077_v60, %v16073_v15 }
 0x624   : > { %v4226_v10 = vmax.f32 %v4209_v31, 0.0  ;;  %v5015_v31 = vadd.f32 %v12855_v8, %v16074_v59  ;;  %v4562_v14 = vmax.f32 %v4545_v24, 0.0  ;;  %v13886_v8 = vand.u32 4294901760, %v13879_v57 }
 0x625   : > { %v4091_v45 = vadd.f32 %v4075_v28, %v3923_v17 }
 0x626   : > { %5292 = vmax.xlane.f32.xlu1 %v13843_v0  ;;  %v4243_v18 = vmul.f32 %v12879_v61, %v4226_v10  ;;  %v4730_v61 = vmax.f32 %v4713_v52, 0.0  ;;  %v5049_v10 = vadd.f32 %v5033_v21, %v5015_v31 }
 0x628   : > { %v4259_v35 = vadd.f32 %v4243_v18, %v4091_v45  ;;  %v4747_v50 = vmul.f32 %v12905_v39, %v4730_v61 }
 0x637   : > { %5406 = vrot.lane.b32.xlu1 %v9076_v1, %s9234_s22  ;;  %v4394_v1 = vmax.f32 %v4377_v13, 0.0  ;;  %v4881_v13 = vadd.f32 %v4865_v11, %v4847_v36  ;;  %v4579_v11 = vmul.f32 %v12897_v34, %v4562_v14  ;;  %v5066_v36 = vmax.f32 %v5049_v10, 0.0 }
 0x639   : > { %v4411_v55 = vmul.f32 %v12890_v56, %v4394_v1  ;;  %v4898_v56 = vmax.f32 %v4881_v13, 0.0  ;;  %v5083_v17 = vmul.f32 %v12924_v3, %v5066_v36  ;;  %v9078_v3 = vld [vmem:[%s11465_s30 + $0x10] sm:$0xff] }
 0x63b   : > { %v4427_v28 = vadd.f32 %v4411_v55, %v4259_v35  ;;  %v4915_v15 = vmul.f32 %v12909_v23, %v4898_v56 }
 0x63d   : > { %v4595_v32 = vadd.f32 %v4579_v11, %v4427_v28  ;;  %v9079_v11 = vld [vmem:[%s11465_s30] sm:$0xff] }
 0x63f   : > { %v4763_v39 = vadd.f32 %v4747_v50, %v4595_v32 }
 0x641   : > { %v4931_v21 = vadd.f32 %v4915_v15, %v4763_v39 }
 0x643   : > { %v5099_v59 = vadd.f32 %v5083_v17, %v4931_v21 }
 0x645   : > { %v5285_v47 = vpop.xlane.xlu1 %5284 }
 0x646   : > { %v5309_v63 = vsub.f32 %v13659_v42, %v5285_v47  ;;  %v5183_v42 = vadd.f32 %v12914_v25, %v16075_v46  ;;  %v5747_v25 = vsub.f32 %v13879_v57, %v13886_v8 }
 0x648   : > { %v5332_v51 = vmul.f32 1.442695, %v5309_v63  ;;  %v5217_v2 = vadd.f32 %v5201_v27, %v5183_v42  ;;  %v5748_v18 = vand.u32 4294901760, %v5747_v25  ;;  %v13918_v63 = vpop.xlane.xlu0 %5290 }
 0x649   : > { %v5415_v40 = vpop.permute.xlu1 %5414 }
 0x64a   : > { %8796 = vpow2.f32 %v5332_v51  ;;  %v13883_v44 = vand.u32 4294901760, %v5415_v40  ;;  %v5234_v52 = vmax.f32 %v5217_v2, 0.0  ;;  %v16078_v2 = vld [vmem:[#allocation96_spill] sm:$0xff] }
 0x64b   : > { %v5303_v32 = vsub.f32 %v16078_v2, %v13613_v30 }
 0x64c   : > { %v13892_v1 = vsub.f32 %v5415_v40, %v13883_v44  ;;  %8227 = vmatprep.subr.mxu0 %v13883_v44  ;;  %v5251_v23 = vmul.f32 %v12937_v53, %v5234_v52  ;;  %v5409_v45 = vpop.permute.xlu0 %5408 }
 0x64d   : > { %8228 = vmatpush3.msra.mxu0 %v13883_v44  ;;  %v13920_v55 = vand.u32 4294901760, %v5409_v45  ;;  %v5320_v52 = vmul.f32 1.442695, %v5303_v32 }
 0x64e   : > { %v13899_v60 = vand.u32 4294901760, %v13892_v1  ;;  %8229 = vmatprep.subr.mxu0 %v13866_v48  ;;  %v13913_v47 = vadd.f32 %v5251_v23, %v5099_v59 }
 0x64f   : > { %8230 = vmatpush3.msra.mxu0 %v13866_v48  ;;  %v13923_v51 = vsub.f32 %v5409_v45, %v13920_v55 }
 0x650   : > { %v5740_v34 = vsub.f32 %v13892_v1, %v13899_v60  ;;  %v5295_v50 = vpop.xlane.xlu0 %5294 }
 0x651   : > { %v13929_v10 = vand.u32 4294901760, %v13923_v51  ;;  %v5314_v2 = vsub.f32 %v13618_v9, %v5295_v50 }
 0x652   : > { %v5741_v24 = vand.u32 4294901760, %v5740_v34 }
 0x653   : > { %16076 = vst [vmem:[#allocation113_spill] sm:$0xff] %v13929_v10 }
 0x654   : > { %8283 = vmatprep.subr.mxu1 %v5741_v24  ;;  %v5405_v36 = vpop.permute.xlu0 %5404 }
 0x655   : > { %8284 = vmatpush3.msra.mxu1 %v5741_v24  ;;  %v13951_v25 = vand.u32 4294901760, %v5405_v36  ;;  %v16079_v24 = vld [vmem:[#allocation65_spill] sm:$0xff] }
 0x656   : > { %8285 = vmatprep.subr.mxu1 %v5748_v18 }
 0x657   : > { %v13909_v31 = vpop.eup %8796  ;;  %8286 = vmatpush3.msra.mxu1 %v5748_v18  ;;  %v13956_v34 = vsub.f32 %v5405_v36, %v13951_v25  ;;  %v5306_v18 = vsub.f32 %v16079_v24, %v13704_v29 }
 0x658   : > { %5364 = vadd.xlane.f32.xlu0 %v13909_v31 }
 0x659   : > { %v13964_v23 = vand.u32 4294901760, %v13956_v34 }
 0x65b   : > { %5296 = vmax.xlane.f32.xlu1 %v13913_v47  ;;  %16080 = vst [vmem:[#allocation79_spill] sm:$0xff] %v13964_v23 }
 0x667   : > { %v5299_v32 = vpop.xlane.xlu0 %5298 }
 0x66b   : > { %v5401_v50 = vpop.permute.xlu0 %5400 }
 0x66c   : > { %5402 = vrot.lane.b32.xlu1 %v9078_v3, %s9234_s22  ;;  %v5326_v3 = vmul.f32 1.442695, %v5306_v18 }
 0x67a   : > { %v5289_v13 = vpop.xlane.xlu1 %5288 }
 0x67b   : > { %v5311_v53 = vsub.f32 %v13760_v43, %v5289_v13  ;;  %v5761_v43 = vsub.f32 %v13923_v51, %v13929_v10  ;;  %v5775_v13 = vsub.f32 %v13956_v34, %v13964_v23  ;;  %v16090_v10 = vld [vmem:[#allocation66_spill] sm:$0xff] }
 0x67d   : > { %v5336_v14 = vmul.f32 1.442695, %v5311_v53  ;;  %v5762_v28 = vand.u32 4294901760, %v5761_v43 }
 0x67e   : > { %v5411_v35 = vpop.permute.xlu1 %5410 }
 0x67f   : > { %8798 = vpow2.f32 %v5336_v14  ;;  %v13926_v61 = vand.u32 4294901760, %v5411_v35 }
 0x681   : > { %v13932_v40 = vsub.f32 %v5411_v35, %v13926_v61  ;;  %8231 = vmatprep.subr.mxu0 %v13926_v61 }
 0x682   : > { %8232 = vmatpush3.msra.mxu0 %v13926_v61 }
 0x683   : > { %v13937_v27 = vand.u32 4294901760, %v13932_v40  ;;  %8233 = vmatprep.subr.mxu0 %v13920_v55 }
 0x684   : > { %8234 = vmatpush3.msra.mxu0 %v13920_v55 }
 0x685   : > { %16077 = vst [vmem:[#allocation81_spill] sm:$0xff] %v13937_v27  ;;  %v5754_v46 = vsub.f32 %v13932_v40, %v13937_v27 }
 0x687   : > { %v5755_v42 = vand.u32 4294901760, %v5754_v46  ;;  %v5776_v46 = vand.u32 4294901760, %v5775_v13 }
 0x689   : > { %8287 = vmatprep.subr.mxu1 %v5755_v42 }
 0x68a   : > { %8288 = vmatpush3.msra.mxu1 %v5755_v42 }
 0x68b   : > { %8289 = vmatprep.subr.mxu1 %v5762_v28 }
 0x68c   : > { %v13945_v56 = vpop.eup %8798  ;;  %8290 = vmatpush3.msra.mxu1 %v5762_v28  ;;  %v5312_v28 = vsub.f32 %v13524_v6, %v13918_v63 }
 0x68d   : > { %5368 = vadd.xlane.f32.xlu0 %v13945_v56 }
 0x68e   : > { %v5338_v36 = vmul.f32 1.442695, %v5312_v28 }
 0x690   : > { %5300 = vmax.xlane.f32.xlu1 %v13541_v16 }
 0x6a1   : > { %5398 = vrot.lane.b32.xlu1 %v9079_v11, %s9234_s22 }
 0x6af   : > { %v5293_v15 = vpop.xlane.xlu1 %5292 }
 0x6b0   : > { %v5313_v39 = vsub.f32 %v13843_v0, %v5293_v15  ;;  %v16081_v0 = vld [vmem:[#allocation106_spill] sm:$0xff]  ;;  %v5342_v15 = vmul.f32 1.442695, %v5314_v2  ;;  %v14034_v2 = vand.u32 4294901760, %v13813_v37 }
 0x6b1   : > { %v5308_v45 = vsub.f32 %v16081_v0, %v13784_v4  ;;  %v16083_v4 = vld [vmem:[#allocation109_spill] sm:$0xff] }
 0x6b2   : > { %v5340_v17 = vmul.f32 1.442695, %v5313_v39  ;;  %v5310_v35 = vsub.f32 %v16083_v4, %v13858_v54  ;;  %v5316_v39 = vsub.f32 %v13727_v49, %v5299_v32 }
 0x6b3   : > { %v5407_v21 = vpop.permute.xlu1 %5406  ;;  %v5330_v14 = vmul.f32 1.442695, %v5308_v45 }
 0x6b4   : > { %8800 = vpow2.f32 %v5340_v17  ;;  %v13961_v59 = vand.u32 4294901760, %v5407_v21  ;;  %v5334_v42 = vmul.f32 1.442695, %v5310_v35  ;;  %v5346_v6 = vmul.f32 1.442695, %v5316_v39 }
 0x6b5   : > { %8802 = vpow2.f32 %v5320_v52  ;;  %v14003_v52 = vand.u32 4294901760, %v5401_v50  ;;  %v14044_v39 = vsub.f32 %v13813_v37, %v14034_v2 }
 0x6b6   : > { %v13967_v30 = vsub.f32 %v5407_v21, %v13961_v59  ;;  %8235 = vmatprep.subr.mxu0 %v13961_v59  ;;  %8804 = vpow2.f32 %v5326_v3 }
 0x6b7   : > { %8236 = vmatpush3.msra.mxu0 %v13961_v59  ;;  %8806 = vpow2.f32 %v5330_v14  ;;  %v14006_v3 = vsub.f32 %v5401_v50, %v14003_v52 }
 0x6b8   : > { %v13974_v29 = vand.u32 4294901760, %v13967_v30  ;;  %8237 = vmatprep.subr.mxu0 %v13951_v25  ;;  %8808 = vpow2.f32 %v5334_v42 }
 0x6b9   : > { %8238 = vmatpush3.msra.mxu0 %v13951_v25  ;;  %8810 = vpow2.f32 %v5338_v36  ;;  %v14012_v14 = vand.u32 4294901760, %v14006_v3 }
 0x6ba   : > { %16082 = vst [vmem:[#allocation130_spill] sm:$0xff] %v13974_v29  ;;  %v5768_v53 = vsub.f32 %v13967_v30, %v13974_v29  ;;  %8812 = vpow2.f32 %v5342_v15  ;;  %v14040_v15 = vand.u32 4294901760, %v13832_v33 }
 0x6bb   : > { %8814 = vpow2.f32 %v5346_v6  ;;  %16084 = vst [vmem:[#allocation103_spill] sm:$0xff] %v14012_v14 }
 0x6bc   : > { %v5769_v43 = vand.u32 4294901760, %v5768_v53 }
 0x6be   : > { %8291 = vmatprep.subr.mxu1 %v5769_v43 }
 0x6bf   : > { %8292 = vmatpush3.msra.mxu1 %v5769_v43 }
 0x6c0   : > { %8293 = vmatprep.subr.mxu1 %v5776_v46 }
 0x6c1   : > { %v13986_v11 = vpop.eup %8800  ;;  %8294 = vmatpush3.msra.mxu1 %v5776_v46 }
 0x6c2   : > { %5372 = vadd.xlane.f32.xlu0 %v13986_v11  ;;  %v8803_v54 = vpop.eup %8802 }
 0x6c3   : > { %v8805_v17 = vpop.eup %8804  ;;  %v14031_v36 = vand.u32 4294901760, %v8803_v54 }
 0x6c4   : > { %v8807_v63 = vpop.eup %8806  ;;  %v14046_v6 = vand.u32 4294901760, %v8805_v17 }
 0x6c5   : > { %5352 = vadd.xlane.f32.xlu1 %v8803_v54  ;;  %v13991_v24 = vpop.eup %8808  ;;  %v14037_v32 = vsub.f32 %v8803_v54, %v14031_v36 }
 0x6c6   : > { %v13994_v18 = vpop.eup %8810  ;;  %16086 = vst [vmem:[#allocation91_spill] sm:$0xff] %v14046_v6 }
 0x6c7   : > { %v13997_v9 = vpop.eup %8812  ;;  %v15221_v50 = vand.u32 4294901760, %v14037_v32  ;;  %v14128_v27 = vand.u32 4294901760, %v13994_v18 }
 0x6c8   : > { %v14000_v49 = vpop.eup %8814 }
 0x6c9   : > { %5358 = vadd.xlane.f32.xlu1 %v8805_v17 }
 0x6cd   : > { %5362 = vadd.xlane.f32.xlu1 %v8807_v63 }
 0x6d1   : > { %5366 = vadd.xlane.f32.xlu1 %v13991_v24 }
 0x6d5   : > { %5370 = vadd.xlane.f32.xlu1 %v13994_v18 }
 0x6d9   : > { %5374 = vadd.xlane.f32.xlu1 %v13997_v9 }
 0x6dd   : > { %5378 = vadd.xlane.f32.xlu1 %v14000_v49 }
 0x6e4   : > { %v5297_v21 = vpop.xlane.xlu1 %5296 }
 0x6e5   : > { %v5315_v0 = vsub.f32 %v13913_v47, %v5297_v21  ;;  %v5789_v47 = vsub.f32 %v14006_v3, %v14012_v14  ;;  %v14051_v21 = vsub.f32 %v13832_v33, %v14040_v15  ;;  %v14084_v33 = vand.u32 4294901760, %v13991_v24 }
 0x6e7   : > { %v5344_v45 = vmul.f32 1.442695, %v5315_v0  ;;  %v5790_v42 = vand.u32 4294901760, %v5789_v47  ;;  %v14054_v0 = vand.u32 4294901760, %v13839_v22  ;;  %v14061_v47 = vand.u32 4294901760, %v8807_v63 }
 0x6e8   : > { %v5403_v13 = vpop.permute.xlu1 %5402 }
 0x6e9   : > { %8816 = vpow2.f32 %v5344_v45  ;;  %v14009_v53 = vand.u32 4294901760, %v5403_v13  ;;  %16087 = vst [vmem:[#allocation57_spill] sm:$0xff] %v14054_v0  ;;  %v15222_v45 = vand.u32 4294901760, %v14044_v39 }
 0x6eb   : > { %v14015_v4 = vsub.f32 %v5403_v13, %v14009_v53  ;;  %8239 = vmatprep.subr.mxu0 %v14009_v53  ;;  %v14058_v13 = vsub.f32 %v8805_v17, %v14046_v6  ;;  %v5550_v17 = vsub.f32 %v14044_v39, %v15222_v45 }
 0x6ec   : > { %8240 = vmatpush3.msra.mxu0 %v14009_v53 }
 0x6ed   : > { %v14020_v35 = vand.u32 4294901760, %v14015_v4  ;;  %8241 = vmatprep.subr.mxu0 %v14003_v52  ;;  %v16089_v23 = vand.u32 4294901760, %v14058_v13 }
 0x6ee   : > { %8242 = vmatpush3.msra.mxu0 %v14003_v52 }
 0x6ef   : > { %16085 = vst [vmem:[#allocation98_spill] sm:$0xff] %v14020_v35  ;;  %v5782_v43 = vsub.f32 %v14015_v4, %v14020_v35  ;;  %v5570_v29 = vsub.f32 %v14058_v13, %v16089_v23 }
 0x6f1   : > { %v5783_v46 = vand.u32 4294901760, %v5782_v43 }
 0x6f3   : > { %8295 = vmatprep.subr.mxu1 %v5783_v46 }
 0x6f4   : > { %8296 = vmatpush3.msra.mxu1 %v5783_v46  ;;  %v5540_v46 = vsub.f32 %v14037_v32, %v15221_v50  ;;  %v14081_v50 = vand.u32 4294901760, %v13909_v31 }
 0x6f5   : > { %8297 = vmatprep.subr.mxu1 %v5790_v42 }
 0x6f6   : > { %v14028_v28 = vpop.eup %8816  ;;  %8298 = vmatpush3.msra.mxu1 %v5790_v42  ;;  %v14069_v42 = vsub.f32 %v13839_v22, %v14054_v0  ;;  %v5541_v45 = vand.u32 4294901760, %v5540_v46 }
 0x6f7   : > { %5376 = vadd.xlane.f32.xlu0 %v14028_v28 }
 0x6f8   : > { %v15237_v35 = vand.u32 4294901760, %v14069_v42 }
 0x6fa   : > { %v5580_v46 = vsub.f32 %v14069_v42, %v15237_v35  ;;  %v14178_v35 = vand.u32 4294901760, %v14028_v28 }
 0x719   : > { %v5301_v54 = vpop.xlane.xlu1 %5300 }
 0x71a   : > { %v5317_v37 = vsub.f32 %v13541_v16, %v5301_v54  ;;  %v16088_v16 = vand.u32 4294901760, %v14051_v21 }
 0x71c   : > { %v5348_v43 = vmul.f32 1.442695, %v5317_v37  ;;  %v14078_v37 = vsub.f32 %v8807_v63, %v14061_v47  ;;  %v5551_v63 = vand.u32 4294901760, %v5550_v17  ;;  %v14110_v17 = vsub.f32 %v13991_v24, %v14084_v33 }
 0x71d   : > { %v5399_v14 = vpop.permute.xlu1 %5398 }
 0x71e   : > { %8818 = vpow2.f32 %v5348_v43  ;;  %v14075_v54 = vand.u32 4294901760, %v5399_v14  ;;  %v5560_v43 = vsub.f32 %v14051_v21, %v16088_v16  ;;  %v14105_v16 = vsub.f32 %v13909_v31, %v14081_v50 }
 0x71f   : > { %v14119_v31 = vand.u32 4294901760, %v13945_v56 }
 0x720   : > { %v14087_v22 = vsub.f32 %v5399_v14, %v14075_v54  ;;  %8243 = vmatprep.subr.mxu0 %v14075_v54  ;;  %v5561_v23 = vand.u32 4294901760, %v5560_v43 }
 0x721   : > { %8244 = vmatpush3.msra.mxu0 %v14075_v54 }
 0x722   : > { %8246 = vmatmul.mubr.f32.vlgmr.msra.gmra.mxu0 %v5541_v45  ;;  %8325 = vmatprep.subr.mxu0 %v16090_v10  ;;  %v14100_v14 = vand.u32 4294901760, %v14087_v22 }
 0x723   : > { %8248 = vmatprep.mubr.f32.mxu0 %v5551_v63  ;;  %8326 = vmatpush3.msra.mxu0 %v16090_v10  ;;  %v5571_v10 = vand.u32 4294901760, %v5570_v29  ;;  %v16092_v63 = vand.u32 4294901760, %v14078_v37  ;;  %v15235_v29 = vand.u32 4294901760, %v14110_v17 }
 0x724   : > { %16091 = vst [vmem:[#allocation54_spill] sm:$0xff] %v14100_v14  ;;  %8327 = vmatprep.subr.mxu0 %v13635_v20  ;;  %v5796_v45 = vsub.f32 %v14087_v22, %v14100_v14  ;;  %v15236_v14 = vand.u32 4294901760, %v14105_v16 }
 0x725   : > { %8328 = vmatpush3.msra.mxu0 %v13635_v20  ;;  %v5590_v43 = vsub.f32 %v14078_v37, %v16092_v63  ;;  %v5581_v20 = vand.u32 4294901760, %v5580_v46  ;;  %v14144_v46 = vsub.f32 %v13994_v18, %v14128_v27  ;;  %v14157_v18 = vand.u32 4294901760, %v13997_v9 }
 0x726   : > { %8249 = vmatmul.mubr.f32.gmra.mxu0 %v5561_v23  ;;  %8329 = vmatprep.subr.mxu0 %v13616_v38  ;;  %v5797_v24 = vand.u32 4294901760, %v5796_v45  ;;  %v14135_v23 = vsub.f32 %v13945_v56, %v14119_v31 }
 0x727   : > { %8251 = vmatprep.mubr.f32.mxu0 %v5571_v10  ;;  %8330 = vmatpush3.msra.mxu0 %v13616_v38  ;;  %v5591_v45 = vand.u32 4294901760, %v5590_v43  ;;  %v5600_v38 = vsub.f32 %v14105_v16, %v15236_v14  ;;  %v14147_v10 = vand.u32 4294901760, %v13986_v11 }
 0x728   : > { %8299 = vmatprep.subr.mxu1 %v5797_v24  ;;  %8331 = vmatprep.subr.mxu0 %v13744_v19  ;;  %v15238_v63 = vand.u32 4294901760, %v14135_v23 }
 0x729   : > { %8300 = vmatpush3.msra.mxu1 %v5797_v24  ;;  %8332 = vmatpush3.msra.mxu0 %v13744_v19  ;;  %v16093_v24 = vld [vmem:[#allocation49_spill] sm:$0xff]  ;;  %v5610_v19 = vsub.f32 %v14110_v17, %v15235_v29  ;;  %v5601_v43 = vand.u32 4294901760, %v5600_v38  ;;  %v16094_v29 = vld [vmem:[#allocation104_spill] sm:$0xff]  ;;  %v14175_v38 = vsub.f32 %v13997_v9, %v14157_v18 }
 0x72a   : > { %8252 = vmatmul.mubr.f32.gmra.mxu0 %v5581_v20  ;;  %8302 = vmatmul.mubr.f32.vlgmr.msra.gmra.mxu1 %v14031_v36  ;;  %v15239_v20 = vand.u32 4294901760, %v14144_v46  ;;  %v5620_v14 = vsub.f32 %v14135_v23, %v15238_v63  ;;  %v14197_v63 = vsub.f32 %v14028_v28, %v14178_v35  ;;  %v16098_v28 = vld [vmem:[#allocation101_spill] sm:$0xff] }
 0x72b   : > { %v8819_v56 = vpop.eup %8818  ;;  %8333 = vmatprep.subr.mxu0 %v13725_v7  ;;  %8381 = vmatprep.subr.mxu1 %v16093_v24 }
 0x72c   : > { %8254 = vmatprep.mubr.f32.mxu0 %v5591_v45  ;;  %8304 = vmatprep.mubr.f32.mxu1 %v14034_v2  ;;  %v14165_v45 = vsub.f32 %v13986_v11, %v14147_v10  ;;  %v5630_v11 = vsub.f32 %v14144_v46, %v15239_v20  ;;  %v5621_v9 = vand.u32 4294901760, %v5620_v14  ;;  %v16096_v20 = vld [vmem:[#allocation45_spill] sm:$0xff] }
 0x72d   : > { %8334 = vmatpush3.msra.mxu0 %v13725_v7  ;;  %8382 = vmatpush3.msra.mxu1 %v16093_v24  ;;  %v5611_v7 = vand.u32 4294901760, %v5610_v19 }
 0x72e   : > { %5380 = vadd.xlane.f32.xlu0 %v8819_v56  ;;  %8335 = vmatprep.subr.mxu0 %v13820_v62  ;;  %v5631_v19 = vand.u32 4294901760, %v5630_v11 }
 0x72f   : > { %8383 = vmatprep.subr.mxu1 %v16094_v29  ;;  %8336 = vmatpush3.msra.mxu0 %v13820_v62  ;;  %v16095_v62 = vld [vmem:[#allocation125_spill] sm:$0xff] }
 0x730   : > { %8384 = vmatpush3.msra.mxu1 %v16094_v29  ;;  %8255 = vmatmul.mubr.f32.gmra.mxu0 %v5601_v43  ;;  %v14188_v43 = vand.u32 4294901760, %v14000_v49 }
 0x731   : > { %8305 = vmatmul.mubr.f32.gmra.mxu1 %v14040_v15  ;;  %8337 = vmatprep.subr.mxu0 %v13802_v58 }
 0x732   : > { %8385 = vmatprep.subr.mxu1 %v16095_v62  ;;  %8257 = vmatprep.mubr.f32.mxu0 %v5611_v7  ;;  %v14207_v14 = vsub.f32 %v14000_v49, %v14188_v43  ;;  %v14209_v7 = vand.u32 4294901760, %v8819_v56 }
 0x733   : > { %8307 = vmatprep.mubr.f32.mxu1 %v14046_v6  ;;  %8338 = vmatpush3.msra.mxu0 %v13802_v58  ;;  %v16097_v58 = vand.u32 4294901760, %v14165_v45 }
 0x734   : > { %8386 = vmatpush3.msra.mxu1 %v16095_v62  ;;  %8339 = vmatprep.subr.mxu0 %v13892_v1 }
 0x735   : > { %8387 = vmatprep.subr.mxu1 %v16096_v20  ;;  %8340 = vmatpush3.msra.mxu0 %v13892_v1  ;;  %v5640_v6 = vsub.f32 %v14165_v45, %v16097_v58  ;;  %v16099_v1 = vand.u32 4294901760, %v14175_v38  ;;  %v5669_v58 = vand.u32 4294901760, %v14207_v14 }
 0x736   : > { %8388 = vmatpush3.msra.mxu1 %v16096_v20  ;;  %8258 = vmatmul.mubr.f32.gmra.mxu0 %v5621_v9  ;;  %v5659_v9 = vand.u32 4294901760, %v14197_v63 }
 0x737   : > { %8308 = vmatmul.mubr.f32.gmra.mxu1 %v14054_v0  ;;  %8341 = vmatprep.subr.mxu0 %v13879_v57  ;;  %v5650_v11 = vsub.f32 %v14175_v38, %v16099_v1  ;;  %v5641_v49 = vand.u32 4294901760, %v5640_v6  ;;  %v14224_v0 = vsub.f32 %v8819_v56, %v14209_v7  ;;  %v5670_v6 = vsub.f32 %v14207_v14, %v5669_v58 }
 0x738   : > { %8389 = vmatprep.subr.mxu1 %v16098_v28  ;;  %8260 = vmatprep.mubr.f32.mxu0 %v5631_v19 }
 0x739   : > { %8310 = vmatprep.mubr.f32.mxu1 %v14061_v47  ;;  %8342 = vmatpush3.msra.mxu0 %v13879_v57  ;;  %v5651_v19 = vand.u32 4294901760, %v5650_v11  ;;  %v5660_v57 = vsub.f32 %v14197_v63, %v5659_v9  ;;  %v5671_v1 = vand.u32 4294901760, %v5670_v6  ;;  %v16108_v6 = vand.u32 4294901760, %v14044_v39 }
 0x73a   : > { %8390 = vmatpush3.msra.mxu1 %v16098_v28  ;;  %8343 = vmatprep.subr.mxu0 %v13932_v40 }
 0x73b   : > { %8391 = vmatprep.subr.mxu1 %v13808_v5  ;;  %8344 = vmatpush3.msra.mxu0 %v13932_v40  ;;  %v5679_v40 = vand.u32 4294901760, %v14224_v0  ;;  %v5661_v56 = vand.u32 4294901760, %v5660_v57  ;;  %v16107_v57 = vld [vmem:[#allocation135_spill] sm:$0xff] }
 0x73c   : > { %8392 = vmatpush3.msra.mxu1 %v13808_v5  ;;  %8261 = vmatmul.mubr.f32.gmra.mxu0 %v5641_v49  ;;  %v16105_v49 = vld [vmem:[#allocation100_spill] sm:$0xff] }
 0x73d   : > { %8311 = vmatmul.mubr.f32.gmra.mxu1 %v14081_v50  ;;  %8345 = vmatprep.subr.mxu0 %v13923_v51  ;;  %v5680_v11 = vsub.f32 %v14224_v0, %v5679_v40 }
 0x73e   : > { %8393 = vmatprep.subr.mxu1 %v13795_v41  ;;  %8263 = vmatprep.mubr.f32.mxu0 %v5651_v19  ;;  %v16106_v19 = vand.u32 4294901760, %v14037_v32 }
 0x73f   : > { %8313 = vmatprep.mubr.f32.mxu1 %v14084_v33  ;;  %8346 = vmatpush3.msra.mxu0 %v13923_v51  ;;  %v5681_v51 = vand.u32 4294901760, %v5680_v11 }
 0x740   : > { %8394 = vmatpush3.msra.mxu1 %v13795_v41  ;;  %8347 = vmatprep.subr.mxu0 %v13967_v30 }
 0x741   : > { %8395 = vmatprep.subr.mxu1 %v13883_v44  ;;  %8348 = vmatpush3.msra.mxu0 %v13967_v30  ;;  %v16101_v30 = vld [vmem:[#allocation47_spill] sm:$0xff] }
 0x742   : > { %8396 = vmatpush3.msra.mxu1 %v13883_v44  ;;  %8264 = vmatmul.mubr.f32.gmra.mxu0 %v5661_v56 }
 0x743   : > { %8314 = vmatmul.mubr.f32.gmra.mxu1 %v14119_v31  ;;  %8349 = vmatprep.subr.mxu0 %v13956_v34 }
 0x744   : > { %8397 = vmatprep.subr.mxu1 %v13866_v48  ;;  %8266 = vmatprep.mubr.f32.mxu0 %v5671_v1 }
 0x745   : > { %8316 = vmatprep.mubr.f32.mxu1 %v14128_v27  ;;  %8350 = vmatpush3.msra.mxu0 %v13956_v34  ;;  %v16100_v34 = vld [vmem:[#allocation94_spill] sm:$0xff] }
 0x746   : > { %8398 = vmatpush3.msra.mxu1 %v13866_v48  ;;  %8351 = vmatprep.subr.mxu0 %v14015_v4 }
 0x747   : > { %8399 = vmatprep.subr.mxu1 %v13926_v61  ;;  %8352 = vmatpush3.msra.mxu0 %v14015_v4  ;;  %v16103_v4 = vld [vmem:[#allocation95_spill] sm:$0xff] }
 0x748   : > { %8400 = vmatpush3.msra.mxu1 %v13926_v61  ;;  %8267 = vmatmul.mubr.f32.gmra.mxu0 %v5681_v51 }
 0x749   : > { %8317 = vmatmul.mubr.f32.gmra.mxu1 %v14147_v10  ;;  %8353 = vmatprep.subr.mxu0 %v14006_v3 }
 0x74a   : > { %8401 = vmatprep.subr.mxu1 %v13920_v55  ;;  %8319 = vmatprep.mubr.f32.mxu1 %v14157_v18 }
 0x74b   : > { %8354 = vmatpush3.msra.mxu0 %v14006_v3  ;;  %8357 = vmatprep.mubr.f32.mxu0 %v16100_v34  ;;  %v16102_v3 = vld [vmem:[#allocation87_spill] sm:$0xff] }
 0x74c   : > { %8402 = vmatpush3.msra.mxu1 %v13920_v55  ;;  %8355 = vmatprep.subr.mxu0 %v14087_v22 }
 0x74d   : > { %8403 = vmatprep.subr.mxu1 %v13961_v59  ;;  %8356 = vmatpush3.msra.mxu0 %v14087_v22  ;;  %v16104_v22 = vand.u32 4294901760, %v16100_v34 }
 0x74e   : > { %8404 = vmatpush3.msra.mxu1 %v13961_v59  ;;  %8358 = vmatmul.mubr.f32.vlgmr.msra.gmra.mxu0 %v14037_v32  ;;  %v16109_v32 = vand.u32 4294901760, %v14051_v21 }
 0x74f   : > { %8320 = vmatmul.mubr.f32.gmra.mxu1 %v14178_v35  ;;  %8405 = vmatprep.subr.mxu1 %v13951_v25 }
 0x750   : > { %8437 = vmatprep.subr.mxu0 %v16101_v30  ;;  %8322 = vmatprep.mubr.f32.mxu1 %v14188_v43 }
 0x751   : > { %8360 = vmatprep.mubr.f32.mxu0 %v14044_v39  ;;  %8406 = vmatpush3.msra.mxu1 %v13951_v25  ;;  %v16110_v39 = vand.u32 4294901760, %v14058_v13 }
 0x752   : > { %8438 = vmatpush3.msra.mxu0 %v16101_v30  ;;  %8407 = vmatprep.subr.mxu1 %v14009_v53 }
 0x753   : > { %8439 = vmatprep.subr.mxu0 %v16102_v3  ;;  %8408 = vmatpush3.msra.mxu1 %v14009_v53 }
 0x754   : > { %8440 = vmatpush3.msra.mxu0 %v16102_v3  ;;  %8323 = vmatmul.mubr.f32.gmra.mxu1 %v14209_v7 }
 0x755   : > { %8361 = vmatmul.mubr.f32.gmra.mxu0 %v14051_v21  ;;  %8409 = vmatprep.subr.mxu1 %v14003_v52  ;;  %v16114_v21 = vand.u32 4294901760, %v14105_v16 }
 0x756   : > { %8441 = vmatprep.subr.mxu0 %v16103_v4  ;;  %8363 = vmatprep.mubr.f32.mxu0 %v14058_v13  ;;  %v16115_v13 = vld [vmem:[#allocation113_spill] sm:$0xff] }
 0x757   : > { %8410 = vmatpush3.msra.mxu1 %v14003_v52  ;;  %8413 = vmatprep.mubr.f32.mxu1 %v16104_v22 }
 0x758   : > { %8442 = vmatpush3.msra.mxu0 %v16103_v4  ;;  %8411 = vmatprep.subr.mxu1 %v14075_v54 }
 0x759   : > { %8443 = vmatprep.subr.mxu0 %v16105_v49  ;;  %8412 = vmatpush3.msra.mxu1 %v14075_v54 }
 0x75a   : > { %8444 = vmatpush3.msra.mxu0 %v16105_v49  ;;  %8414 = vmatmul.mubr.f32.vlgmr.msra.gmra.mxu1 %v16106_v19 }
 0x75b   : > { %8364 = vmatmul.mubr.f32.gmra.mxu0 %v14069_v42  ;;  %8445 = vmatprep.subr.mxu0 %v16107_v57 }
 0x75c   : > { %8493 = vmatprep.subr.mxu1 %v16093_v24  ;;  %8366 = vmatprep.mubr.f32.mxu0 %v14078_v37 }
 0x75d   : > { %8416 = vmatprep.mubr.f32.mxu1 %v16108_v6  ;;  %8446 = vmatpush3.msra.mxu0 %v16107_v57 }
 0x75e   : > { %8494 = vmatpush3.msra.mxu1 %v16093_v24  ;;  %8447 = vmatprep.subr.mxu0 %v13827_v26 }
 0x75f   : > { %8495 = vmatprep.subr.mxu1 %v16094_v29  ;;  %8448 = vmatpush3.msra.mxu0 %v13827_v26  ;;  %v16111_v26 = vand.u32 4294901760, %v14069_v42  ;;  %v16117_v42 = vld [vmem:[#allocation130_spill] sm:$0xff] }
 0x760   : > { %8496 = vmatpush3.msra.mxu1 %v16094_v29  ;;  %8367 = vmatmul.mubr.f32.gmra.mxu0 %v14105_v16  ;;  %v16121_v16 = vld [vmem:[#allocation98_spill] sm:$0xff]  ;;  %v16124_v29 = vand.u32 4294901760, %v14175_v38 }
 0x761   : > { %8417 = vmatmul.mubr.f32.gmra.mxu1 %v16109_v32  ;;  %8449 = vmatprep.subr.mxu0 %v13811_v12 }
 0x762   : > { %8497 = vmatprep.subr.mxu1 %v16095_v62  ;;  %8369 = vmatprep.mubr.f32.mxu0 %v14110_v17 }
 0x763   : > { %8419 = vmatprep.mubr.f32.mxu1 %v16110_v39  ;;  %8450 = vmatpush3.msra.mxu0 %v13811_v12  ;;  %v16112_v12 = vand.u32 4294901760, %v14078_v37  ;;  %v16119_v37 = vld [vmem:[#allocation79_spill] sm:$0xff] }
 0x764   : > { %8498 = vmatpush3.msra.mxu1 %v16095_v62  ;;  %8451 = vmatprep.subr.mxu0 %v13899_v60 }
 0x765   : > { %8499 = vmatprep.subr.mxu1 %v16096_v20  ;;  %8452 = vmatpush3.msra.mxu0 %v13899_v60  ;;  %v16113_v60 = vld [vmem:[#allocation81_spill] sm:$0xff] }
 0x766   : > { %8500 = vmatpush3.msra.mxu1 %v16096_v20  ;;  %8370 = vmatmul.mubr.f32.gmra.mxu0 %v14135_v23 }
 0x767   : > { %8420 = vmatmul.mubr.f32.gmra.mxu1 %v16111_v26  ;;  %8453 = vmatprep.subr.mxu0 %v13886_v8 }
 0x768   : > { %8501 = vmatprep.subr.mxu1 %v16098_v28  ;;  %8372 = vmatprep.mubr.f32.mxu0 %v14144_v46 }
 0x769   : > { %8422 = vmatprep.mubr.f32.mxu1 %v16112_v12  ;;  %8454 = vmatpush3.msra.mxu0 %v13886_v8  ;;  %v16116_v8 = vand.u32 4294901760, %v14110_v17  ;;  %v16123_v17 = vld [vmem:[#allocation103_spill] sm:$0xff] }
 0x76a   : > { %8502 = vmatpush3.msra.mxu1 %v16098_v28  ;;  %8455 = vmatprep.subr.mxu0 %v16113_v60 }
 0x76b   : > { %8503 = vmatprep.subr.mxu1 %v13808_v5  ;;  %8456 = vmatpush3.msra.mxu0 %v16113_v60 }
 0x76c   : > { %8504 = vmatpush3.msra.mxu1 %v13808_v5  ;;  %8373 = vmatmul.mubr.f32.gmra.mxu0 %v14165_v45  ;;  %v16118_v5 = vand.u32 4294901760, %v14135_v23  ;;  %v16126_v23 = vld [vmem:[#allocation54_spill] sm:$0xff] }
 0x76d   : > { %8423 = vmatmul.mubr.f32.gmra.mxu1 %v16114_v21  ;;  %8457 = vmatprep.subr.mxu0 %v16115_v13 }
 0x76e   : > { %8505 = vmatprep.subr.mxu1 %v13795_v41  ;;  %8375 = vmatprep.mubr.f32.mxu0 %v14175_v38 }
 0x76f   : > { %8425 = vmatprep.mubr.f32.mxu1 %v16116_v8  ;;  %8458 = vmatpush3.msra.mxu0 %v16115_v13 }
 0x770   : > { %8506 = vmatpush3.msra.mxu1 %v13795_v41  ;;  %8459 = vmatprep.subr.mxu0 %v16117_v42  ;;  %v16120_v41 = vand.u32 4294901760, %v14144_v46 }
 0x771   : > { %8507 = vmatprep.subr.mxu1 %v13883_v44  ;;  %8460 = vmatpush3.msra.mxu0 %v16117_v42 }
 0x772   : > { %8508 = vmatpush3.msra.mxu1 %v13883_v44  ;;  %8376 = vmatmul.mubr.f32.gmra.mxu0 %v14197_v63  ;;  %v16122_v44 = vand.u32 4294901760, %v14165_v45 }
 0x773   : > { %8426 = vmatmul.mubr.f32.gmra.mxu1 %v16118_v5  ;;  %8461 = vmatprep.subr.mxu0 %v16119_v37 }
 0x774   : > { %8509 = vmatprep.subr.mxu1 %v13866_v48  ;;  %8378 = vmatprep.mubr.f32.mxu0 %v14207_v14 }
 0x775   : > { %8428 = vmatprep.mubr.f32.mxu1 %v16120_v41  ;;  %8462 = vmatpush3.msra.mxu0 %v16119_v37  ;;  %v5353_v41 = vpop.xlane.xlu1 %5352 }
 0x776   : > { %8510 = vmatpush3.msra.mxu1 %v13866_v48  ;;  %8463 = vmatprep.subr.mxu0 %v16121_v16  ;;  %v16125_v48 = vld [vmem:[#allocation83_spill] sm:$0xff]  ;;  %8820 = vrcp.f32 %v5353_v41 }
 0x777   : > { %8511 = vmatprep.subr.mxu1 %v13926_v61  ;;  %8464 = vmatpush3.msra.mxu0 %v16121_v16 }
 0x778   : > { %8512 = vmatpush3.msra.mxu1 %v13926_v61  ;;  %8379 = vmatmul.mubr.f32.gmra.mxu0 %v14224_v0  ;;  %v16128_v61 = vld [vmem:[#allocation57_spill] sm:$0xff] }
 0x779   : > { %8429 = vmatmul.mubr.f32.gmra.mxu1 %v16122_v44  ;;  %8465 = vmatprep.subr.mxu0 %v16123_v17 }
 0x77a   : > { %8513 = vmatprep.subr.mxu1 %v13920_v55  ;;  %8431 = vmatprep.mubr.f32.mxu1 %v16124_v29 }
 0x77b   : > { %8466 = vmatpush3.msra.mxu0 %v16123_v17  ;;  %8469 = vmatprep.mubr.f32.mxu0 %v16125_v48  ;;  %v5351_v17 = vpop.xlane.xlu0 %5350 }
 0x77c   : > { %8514 = vmatpush3.msra.mxu1 %v13920_v55  ;;  %8467 = vmatprep.subr.mxu0 %v16126_v23  ;;  %v16127_v55 = vld [vmem:[#allocation91_spill] sm:$0xff]  ;;  %8822 = vrcp.f32 %v5351_v17 }
 0x77d   : > { %8515 = vmatprep.subr.mxu1 %v13961_v59  ;;  %8468 = vmatpush3.msra.mxu0 %v16126_v23  ;;  %v5359_v23 = vpop.xlane.xlu1 %5358 }
 0x77e   : > { %8516 = vmatpush3.msra.mxu1 %v13961_v59  ;;  %8470 = vmatmul.mubr.f32.vlgmr.msra.gmra.mxu0 %v14031_v36 }
 0x77f   : > { %8432 = vmatmul.mubr.f32.gmra.mxu1 %v5659_v9  ;;  %8517 = vmatprep.subr.mxu1 %v13951_v25 }
 0x780   : > { %8434 = vmatprep.mubr.f32.mxu1 %v5669_v58  ;;  %8472 = vmatprep.mubr.f32.mxu0 %v14034_v2 }
 0x781   : > { %8518 = vmatpush3.msra.mxu1 %v13951_v25  ;;  %v14424_v25 = vpop.f32.mrf.mxu0 }
 0x782   : > { %8519 = vmatprep.subr.mxu1 %v14009_v53  ;;  %8473 = vmatmul.mubr.f32.gmra.mxu0 %v14040_v15  ;;  %16129 = vst [vmem:[#allocation111_spill] sm:$0xff] %v14424_v25 }
 0x783   : > { %8520 = vmatpush3.msra.mxu1 %v14009_v53  ;;  %8475 = vmatprep.mubr.f32.mxu0 %v16127_v55 }
 0x784   : > { %8435 = vmatmul.mubr.f32.gmra.mxu1 %v5679_v40  ;;  %8521 = vmatprep.subr.mxu1 %v14003_v52 }
 0x785   : > { %8522 = vmatpush3.msra.mxu1 %v14003_v52  ;;  %8525 = vmatprep.mubr.f32.mxu1 %v16125_v48 }
 0x786   : > { %8523 = vmatprep.subr.mxu1 %v14075_v54  ;;  %8476 = vmatmul.mubr.f32.gmra.mxu0 %v16128_v61 }
 0x787   : > { %8524 = vmatpush3.msra.mxu1 %v14075_v54  ;;  %8478 = vmatprep.mubr.f32.mxu0 %v14061_v47 }
 0x788   : > { %8526 = vmatmul.mubr.f32.vlgmr.msra.gmra.mxu1 %v14031_v36 }
 0x789   : > { %8528 = vmatprep.mubr.f32.mxu1 %v14034_v2 }
 0x78a   : > { %8479 = vmatmul.mubr.f32.gmra.mxu0 %v14081_v50 }
 0x78b   : > { %8481 = vmatprep.mubr.f32.mxu0 %v14084_v33 }
 0x78c   : > { %8529 = vmatmul.mubr.f32.gmra.mxu1 %v14040_v15 }
 0x78d   : > { %8531 = vmatprep.mubr.f32.mxu1 %v16127_v55 }
 0x78e   : > { %8482 = vmatmul.mubr.f32.gmra.mxu0 %v14119_v31 }
 0x78f   : > { %8484 = vmatprep.mubr.f32.mxu0 %v14128_v27 }
 0x790   : > { %8532 = vmatmul.mubr.f32.gmra.mxu1 %v16128_v61 }
 0x791   : > { %8534 = vmatprep.mubr.f32.mxu1 %v14061_v47 }
 0x792   : > { %8485 = vmatmul.mubr.f32.gmra.mxu0 %v14147_v10 }
 0x793   : > { %8487 = vmatprep.mubr.f32.mxu0 %v14157_v18 }
 0x794   : > { %8535 = vmatmul.mubr.f32.gmra.mxu1 %v14081_v50 }
 0x795   : > { %8537 = vmatprep.mubr.f32.mxu1 %v14084_v33 }
 0x796   : > { %8488 = vmatmul.mubr.f32.gmra.mxu0 %v14178_v35 }
 0x797   : > { %8490 = vmatprep.mubr.f32.mxu0 %v14188_v43 }
 0x798   : > { %8538 = vmatmul.mubr.f32.gmra.mxu1 %v14119_v31 }
 0x799   : > { %8540 = vmatprep.mubr.f32.mxu1 %v14128_v27  ;;  %v14432_v27 = vpop.f32.mrf.mxu1 }
 0x79a   : > { %8491 = vmatmul.mubr.f32.gmra.mxu0 %v14209_v7  ;;  %16130 = vst [vmem:[#allocation117_spill] sm:$0xff] %v14432_v27  ;;  %v5355_v27 = vpop.xlane.xlu0 %5354 }
 0x79b   : > { %8824 = vrcp.f32 %v5355_v27 }
 0x79c   : > { %8541 = vmatmul.mubr.f32.gmra.mxu1 %v14147_v10 }
 0x79d   : > { %8543 = vmatprep.mubr.f32.mxu1 %v14157_v18 }
 0x7a0   : > { %8544 = vmatmul.mubr.f32.gmra.mxu1 %v14178_v35 }
 0x7a1   : > { %8546 = vmatprep.mubr.f32.mxu1 %v14188_v43 }
 0x7a4   : > { %8547 = vmatmul.mubr.f32.gmra.mxu1 %v14209_v7 }
 0x7e2   : > { %v14426_v59 = vpop.f32.mrf.mxu0 }
 0x7e4   : > { %v14428_v52 = vpop.f32.mrf.mxu0 }
 0x7e6   : > { %v14430_v53 = vpop.f32.mrf.mxu0 }
 0x7e8   : > { %v14434_v36 = vpop.f32.mrf.mxu0 }
 0x7ea   : > { %v14436_v2 = vpop.f32.mrf.mxu0  ;;  %v14438_v15 = vpop.f32.mrf.mxu1 }
 0x7ec   : > { %v14440_v35 = vpop.f32.mrf.mxu0  ;;  %v14442_v50 = vpop.f32.mrf.mxu1 }
 0x7f0   : > { %v14444_v0 = vpop.f32.mrf.mxu0 }
 0x7f1   : > { %v14446_v47 = vpop.f32.mrf.mxu1 }
 0x7f2   : > { %v14448_v33 = vpop.f32.mrf.mxu0 }
 0x7f3   : > { %v14450_v54 = vpop.f32.mrf.mxu1 }
 0x7f6   : > { %v14452_v31 = vpop.f32.mrf.mxu0 }
 0x7f7   : > { %v14454_v46 = vpop.f32.mrf.mxu1 }
 0x7f8   : > { %v14456_v10 = vpop.f32.mrf.mxu0 }
 0x7f9   : > { %v14458_v24 = vpop.f32.mrf.mxu1 }
 0x7fc   : > { %v14460_v63 = vpop.f32.mrf.mxu0 }
 0x7fd   : > { %v14462_v18 = vpop.f32.mrf.mxu1 }
 0x7fe   : > { %v14464_v20 = vpop.f32.mrf.mxu0 }
 0x7ff   : > { %v14466_v45 = vpop.f32.mrf.mxu1 }
 0x802   : > { %v14468_v38 = vpop.f32.mrf.mxu0 }
 0x803   : > { %16131 = vst [vmem:[#allocation43_spill] sm:$0xff] %v14468_v38  ;;  %v14470_v62 = vpop.f32.mrf.mxu1 }
 0x804   : > { %v14472_v43 = vpop.f32.mrf.mxu0 }
 0x805   : > { %16132 = vst [vmem:[#allocation30_spill] sm:$0xff] %v14472_v43  ;;  %v14474_v7 = vpop.f32.mrf.mxu1 }
 0x808   : > { %v14476_v14 = vpop.f32.mrf.mxu0 }
 0x809   : > { %16133 = vst [vmem:[#allocation42_spill] sm:$0xff] %v14476_v14  ;;  %v14478_v28 = vpop.f32.mrf.mxu1  ;;  %v5363_v14 = vpop.xlane.xlu1 %5362 }
 0x80a   : > { %v14480_v9 = vpop.f32.mrf.mxu0 }
 0x80b   : > { %16134 = vst [vmem:[#allocation134_spill] sm:$0xff] %v14480_v9  ;;  %v14482_v58 = vpop.f32.mrf.mxu1  ;;  %v5357_v9 = vpop.xlane.xlu0 %5356 }
 0x80c   : > { %8826 = vrcp.f32 %v5357_v9 }
 0x80d   : > { %8828 = vrcp.f32 %v5359_v23  ;;  %v5859_v23 = vadd.f32 %v14458_v24, %v14440_v35 }
 0x80e   : > { %v8359_v40 = vpop.f32.mrf.mxu0 }
 0x80f   : > { %v14484_v56 = vpop.f32.mrf.mxu1  ;;  %v5361_v17 = vpop.xlane.xlu0 %5360 }
 0x810   : > { %16135 = vst [vmem:[#allocation131_spill] sm:$0xff] %v14484_v56  ;;  %v6028_v11 = vpop.f32.mrf.mxu0  ;;  %8830 = vrcp.f32 %v5361_v17 }
 0x811   : > { %v14486_v1 = vpop.f32.mrf.mxu1  ;;  %8832 = vrcp.f32 %v5363_v14 }
 0x812   : > { %16136 = vst [vmem:[#allocation28_spill] sm:$0xff] %v14486_v1 }
 0x814   : > { %v14488_v51 = vpop.f32.mrf.mxu1 }
 0x815   : > { %16137 = vst [vmem:[#allocation23_spill] sm:$0xff] %v14488_v51  ;;  %v14490_v34 = vpop.f32.mrf.mxu0 }
 0x816   : > { %v14492_v30 = vpop.f32.mrf.mxu1 }
 0x817   : > { %16138 = vst [vmem:[#allocation97_spill] sm:$0xff] %v14492_v30  ;;  %v6042_v3 = vpop.f32.mrf.mxu0 }
 0x81a   : > { %v8415_v4 = vpop.f32.mrf.mxu1 }
 0x81b   : > { %v14494_v22 = vpop.f32.mrf.mxu0 }
 0x81c   : > { %v6222_v19 = vpop.f32.mrf.mxu1 }
 0x81d   : > { %v14496_v49 = vpop.f32.mrf.mxu0 }
 0x81e   : > { %v6057_v14 = vadd.f32 %v14496_v49, %v5859_v23 }
 0x820   : > { %v14498_v57 = vpop.f32.mrf.mxu0 }
 0x821   : > { %v14500_v6 = vpop.f32.mrf.mxu1 }
 0x822   : > { %v14502_v32 = vpop.f32.mrf.mxu0 }
 0x823   : > { %v6238_v39 = vpop.f32.mrf.mxu1 }
 0x826   : > { %v14504_v26 = vpop.f32.mrf.mxu0 }
 0x827   : > { %v14506_v12 = vpop.f32.mrf.mxu1 }
 0x828   : > { %v14508_v60 = vpop.f32.mrf.mxu0 }
 0x829   : > { %v14510_v21 = vpop.f32.mrf.mxu1 }
 0x82c   : > { %v14512_v13 = vpop.f32.mrf.mxu0 }
 0x82d   : > { %16139 = vst [vmem:[#allocation37_spill] sm:$0xff] %v14512_v13  ;;  %v14514_v8 = vpop.f32.mrf.mxu1 }
 0x82e   : > { %v14516_v42 = vpop.f32.mrf.mxu0 }
 0x82f   : > { %v14518_v5 = vpop.f32.mrf.mxu1 }
 0x832   : > { %v14520_v37 = vpop.f32.mrf.mxu0 }
 0x833   : > { %16140 = vst [vmem:[#allocation122_spill] sm:$0xff] %v14520_v37  ;;  %v14522_v16 = vpop.f32.mrf.mxu1 }
 0x834   : > { %v14524_v44 = vpop.f32.mrf.mxu0 }
 0x835   : > { %16141 = vst [vmem:[#allocation59_spill] sm:$0xff] %v14524_v44  ;;  %v14526_v29 = vpop.f32.mrf.mxu1  ;;  %v5841_v44 = vadd.f32 %v14438_v15, %v14426_v59  ;;  %v5847_v59 = vadd.f32 %v14450_v54, %v14434_v36 }
 0x838   : > { %v14528_v48 = vpop.f32.mrf.mxu0 }
 0x839   : > { %16142 = vst [vmem:[#allocation38_spill] sm:$0xff] %v14528_v48  ;;  %v14530_v55 = vpop.f32.mrf.mxu1 }
 0x83a   : > { %16143 = vst [vmem:[#allocation112_spill] sm:$0xff] %v14530_v55  ;;  %v14532_v61 = vpop.f32.mrf.mxu0  ;;  %v6036_v55 = vadd.f32 %v8359_v40, %v5841_v44  ;;  %v5365_v40 = vpop.xlane.xlu0 %5364  ;;  %v5853_v44 = vadd.f32 %v14446_v47, %v14430_v53  ;;  %v5865_v53 = vadd.f32 %v14454_v46, %v14436_v2  ;;  %v6255_v46 = vadd.f32 %v14510_v21, %v6057_v14 }
 0x83b   : > { %16144 = vst [vmem:[#allocation133_spill] sm:$0xff] %v14532_v61  ;;  %v14534_v25 = vpop.f32.mrf.mxu1  ;;  %v5835_v61 = vadd.f32 %v14442_v50, %v14428_v52  ;;  %8834 = vrcp.f32 %v5365_v40 }
 0x83c   : > { %16145 = vst [vmem:[#allocation120_spill] sm:$0xff] %v14534_v25  ;;  %v5367_v25 = vpop.xlane.xlu1 %5366  ;;  %v6050_v54 = vadd.f32 %v14490_v34, %v5853_v44  ;;  %v5871_v34 = vadd.f32 %v14466_v45, %v14448_v33  ;;  %v6064_v2 = vadd.f32 %v14494_v22, %v5865_v53 }
 0x83d   : > { %v6029_v13 = vadd.f32 %v6028_v11, %v5835_v61  ;;  %v6043_v11 = vadd.f32 %v6042_v3, %v5847_v59  ;;  %8836 = vrcp.f32 %v5367_v25 }
 0x83e   : > { %v8471_v51 = vpop.f32.mrf.mxu0  ;;  %v6247_v35 = vadd.f32 %v14500_v6, %v6050_v54  ;;  %v5369_v59 = vpop.xlane.xlu0 %5368  ;;  %v6071_v25 = vadd.f32 %v14502_v32, %v5871_v34  ;;  %v16149_v34 = vld [vmem:[#allocation28_spill] sm:$0xff] }
 0x83f   : > { %v14536_v37 = vpop.f32.mrf.mxu1  ;;  %v6223_v27 = vadd.f32 %v6222_v19, %v6029_v13  ;;  %8838 = vrcp.f32 %v5369_v59  ;;  %v16150_v59 = vld [vmem:[#allocation37_spill] sm:$0xff] }
 0x840   : > { %16146 = vst [vmem:[#allocation126_spill] sm:$0xff] %v14536_v37  ;;  %v6461_v30 = vpop.f32.mrf.mxu0  ;;  %v6231_v37 = vadd.f32 %v8415_v4, %v6036_v55  ;;  %v8821_v55 = vpop.eup %8820  ;;  %v6271_v32 = vadd.f32 %v14518_v5, %v6071_v25  ;;  %v16153_v25 = vld [vmem:[#allocation131_spill] sm:$0xff] }
 0x841   : > { %v14540_v48 = vpop.f32.mrf.mxu1  ;;  %v6462_v4 = vadd.f32 %v6461_v30, %v6223_v27  ;;  %v5371_v36 = vpop.xlane.xlu1 %5370 }
 0x842   : > { %v8474_v56 = vpop.f32.mrf.mxu0  ;;  %v6468_v15 = vadd.f32 %v8471_v51, %v6231_v37  ;;  %v6239_v51 = vadd.f32 %v6238_v39, %v6043_v11  ;;  %v8823_v37 = vpop.eup %8822  ;;  %8840 = vrcp.f32 %v5371_v36 }
 0x843   : > { %v6480_v49 = vadd.f32 %v8474_v56, %v6247_v35  ;;  %v8825_v6 = vpop.eup %8824  ;;  %v5883_v56 = vadd.f32 %v14474_v7, %v14456_v10 }
 0x844   : > { %v14544_v38 = vpop.f32.mrf.mxu1  ;;  %v6473_v41 = vpop.f32.mrf.mxu0 }
 0x845   : > { %16147 = vst [vmem:[#allocation114_spill] sm:$0xff] %v14544_v38  ;;  %v6474_v24 = vadd.f32 %v6473_v41, %v6239_v51  ;;  %v5877_v41 = vadd.f32 %v14462_v18, %v14444_v0  ;;  %v5375_v45 = vpop.xlane.xlu1 %5374  ;;  %v8827_v0 = vpop.eup %8826  ;;  %v6085_v10 = vadd.f32 %v14508_v60, %v5883_v56 }
 0x846   : > { %v14546_v1 = vpop.f32.mrf.mxu1  ;;  %v14548_v43 = vpop.f32.mrf.mxu0 }
 0x847   : > { %v6078_v21 = vadd.f32 %v14498_v57, %v5877_v41  ;;  %v5373_v18 = vpop.xlane.xlu0 %5372  ;;  %v6287_v60 = vadd.f32 %v14526_v29, %v6085_v10  ;;  %v16152_v41 = vld [vmem:[#allocation43_spill] sm:$0xff] }
 0x848   : > { %v8527_v52 = vpop.f32.mrf.mxu1  ;;  %v6485_v50 = vpop.f32.mrf.mxu0  ;;  %8842 = vrcp.f32 %v5373_v18 }
 0x849   : > { %v6645_v9 = vadd.f32 %v8527_v52, %v6468_v15  ;;  %v6263_v52 = vadd.f32 %v14506_v12, %v6064_v2  ;;  %v6486_v40 = vadd.f32 %v6485_v50, %v6255_v46  ;;  %v8829_v50 = vpop.eup %8828  ;;  %v6279_v7 = vadd.f32 %v14514_v8, %v6078_v21 }
 0x84a   : > { %v6638_v61 = vpop.f32.mrf.mxu1  ;;  %v14556_v38 = vpop.f32.mrf.mxu0  ;;  %8844 = vrcp.f32 %v5375_v45 }
 0x84b   : > { %v6735_v19 = vmul.f32 %v8821_v55, %v6645_v9  ;;  %v6639_v13 = vadd.f32 %v6638_v61, %v6462_v4  ;;  %v6492_v9 = vadd.f32 %v14548_v43, %v6263_v52  ;;  %v5889_v55 = vadd.f32 %v14470_v62, %v14452_v31  ;;  %v8831_v61 = vpop.eup %8830  ;;  %v5379_v62 = vpop.xlane.xlu1 %5378  ;;  %v16155_v52 = vld [vmem:[#allocation112_spill] sm:$0xff] }
 0x84c   : > { %v8530_v47 = vpop.f32.mrf.mxu1  ;;  %v6497_v30 = vpop.f32.mrf.mxu0  ;;  %v5895_v43 = vadd.f32 %v14482_v58, %v14464_v20  ;;  %v6504_v8 = vadd.f32 %v14556_v38, %v6279_v7  ;;  %v5901_v20 = vadd.f32 %v14478_v28, %v14460_v63  ;;  %8846 = vrcp.f32 %v5379_v62  ;;  %v16148_v38 = vld [vmem:[#allocation30_spill] sm:$0xff]  ;;  %v16151_v63 = vld [vmem:[#allocation120_spill] sm:$0xff] }
 0x84d   : > { %v6733_v3 = vmul.f32 %v8823_v37, %v6639_v13  ;;  %6782 = vrot.lane.b32.xlu0 %v6735_v19, %s9235_s1  ;;  %v6657_v44 = vadd.f32 %v8530_v47, %v6480_v49  ;;  %v6498_v36 = vadd.f32 %v6497_v30, %v6271_v32  ;;  %v6092_v19 = vadd.f32 %v14504_v26, %v5889_v55  ;;  %v8833_v31 = vpop.eup %8832  ;;  %v5377_v47 = vpop.xlane.xlu0 %5376  ;;  %v16158_v32 = vld [vmem:[#allocation122_spill] sm:$0xff] }
 0x84e   : > { %v6650_v39 = vpop.f32.mrf.mxu1  ;;  %v14566_v17 = vpop.f32.mrf.mxu0  ;;  %v6099_v58 = vadd.f32 %v14516_v42, %v5895_v43  ;;  %v6106_v2 = vadd.f32 %v16150_v59, %v5901_v20  ;;  %8848 = vrcp.f32 %v5377_v47  ;;  %v16162_v43 = vld [vmem:[#allocation126_spill] sm:$0xff] }
 0x84f   : > { %v6651_v27 = vadd.f32 %v6650_v39, %v6474_v24  ;;  %6780 = vrot.lane.b32.xlu1 %v6733_v3, %s9235_s1  ;;  %v6739_v54 = vmul.f32 %v8827_v0, %v6657_v44  ;;  %v6295_v26 = vadd.f32 %v14522_v16, %v6092_v19  ;;  %v8835_v14 = vpop.eup %8834  ;;  %v5907_v39 = vadd.f32 %v16149_v34, %v16148_v38  ;;  %v16156_v0 = vld [vmem:[#allocation134_spill] sm:$0xff] }
 0x850   : > { %v8533_v15 = vpop.f32.mrf.mxu1  ;;  %v6509_v33 = vpop.f32.mrf.mxu0  ;;  %v6303_v28 = vadd.f32 %v16151_v63, %v6099_v58 }
 0x851   : > { %v6737_v22 = vmul.f32 %v8825_v6, %v6651_v27  ;;  %v6669_v51 = vadd.f32 %v8533_v15, %v6492_v9  ;;  %v6510_v24 = vadd.f32 %v6509_v33, %v6287_v60  ;;  %v8837_v27 = vpop.eup %8836  ;;  %v6516_v42 = vadd.f32 %v14566_v17, %v6295_v26  ;;  %v5381_v6 = vpop.xlane.xlu0 %5380  ;;  %v16154_v33 = vld [vmem:[#allocation59_spill] sm:$0xff]  ;;  %v16157_v17 = vld [vmem:[#allocation97_spill] sm:$0xff] }
 0x852   : > { %v6662_v11 = vpop.f32.mrf.mxu1  ;;  %v14578_v4 = vpop.f32.mrf.mxu0  ;;  %v5913_v15 = vadd.f32 %v16153_v25, %v16152_v41  ;;  %v6113_v45 = vadd.f32 %v16154_v33, %v5907_v39  ;;  %v5919_v18 = vadd.f32 %v16157_v17, %v16156_v0  ;;  %8850 = vrcp.f32 %v5381_v6  ;;  %v16166_v6 = vld [vmem:[#allocation20_spill] sm:$0xff]  ;;  %v16168_v25 = vld [vmem:[#allocation29_spill] sm:$0xff] }
 0x853   : > { %v6663_v12 = vadd.f32 %v6662_v11, %v6486_v40  ;;  %6784 = vrot.lane.b32.xlu1 %v6737_v22, %s9235_s1  ;;  %v6743_v35 = vmul.f32 %v8831_v61, %v6669_v51  ;;  %v6311_v40 = vadd.f32 %v16155_v52, %v6106_v2  ;;  %v8839_v55 = vpop.eup %8838  ;;  %v16159_v61 = vld [vmem:[#allocation42_spill] sm:$0xff]  ;;  %v16161_v51 = vld [vmem:[#allocation133_spill] sm:$0xff]  ;;  %v16167_v41 = vld [vmem:[#allocation72_spill] sm:$0xff] }
 0x854   : > { %v8536_v57 = vpop.f32.mrf.mxu1  ;;  %v6521_v23 = vpop.f32.mrf.mxu0  ;;  %v6120_v9 = vadd.f32 %v16158_v32, %v5913_v15  ;;  %v6319_v10 = vadd.f32 %v14540_v48, %v6113_v45  ;;  %v16169_v15 = vld [vmem:[#allocation60_spill] sm:$0xff]  ;;  %v16170_v45 = vld [vmem:[#allocation70_spill] sm:$0xff] }
 0x855   : > { %v6741_v5 = vmul.f32 %v8829_v50, %v6663_v12  ;;  %v6681_v29 = vadd.f32 %v8536_v57, %v6504_v8  ;;  %v6522_v56 = vadd.f32 %v6521_v23, %v6303_v28  ;;  %v6528_v7 = vadd.f32 %v14578_v4, %v6311_v40  ;;  %v8841_v23 = vpop.eup %8840  ;;  %v16163_v8 = vld [vmem:[#allocation38_spill] sm:$0xff]  ;;  %v16171_v52 = vld [vmem:[#allocation92_spill] sm:$0xff] }
 0x856   : > { %v6674_v13 = vpop.f32.mrf.mxu1  ;;  %v14590_v37 = vpop.f32.mrf.mxu0  ;;  %v6327_v19 = vadd.f32 %v16162_v43, %v6120_v9  ;;  %v16172_v40 = vld [vmem:[#allocation110_spill] sm:$0xff]  ;;  %v16179_v43 = vld [vmem:[#allocation119_spill] sm:$0xff] }
 0x857   : > { %v6675_v53 = vadd.f32 %v6674_v13, %v6498_v36  ;;  %6788 = vrot.lane.b32.xlu0 %v6741_v5, %s9235_s1  ;;  %6786 = vrot.lane.b32.xlu1 %v6739_v54, %s9235_s1  ;;  %v6747_v22 = vmul.f32 %v8835_v14, %v6681_v29  ;;  %v16160_v54 = vld [vmem:[#allocation23_spill] sm:$0xff]  ;;  %v6127_v5 = vadd.f32 %v16161_v51, %v5919_v18  ;;  %v8843_v20 = vpop.eup %8842  ;;  %v16174_v18 = vld [vmem:[#allocation32_spill] sm:$0xff] }
 0x858   : > { %v8539_v30 = vpop.f32.mrf.mxu1  ;;  %v6533_v46 = vpop.f32.mrf.mxu0  ;;  %v5925_v36 = vadd.f32 %v16160_v54, %v16159_v61  ;;  %v6540_v26 = vadd.f32 %v14590_v37, %v6327_v19  ;;  %v16178_v61 = vld [vmem:[#allocation18_spill] sm:$0xff] }
 0x859   : > { %v6745_v3 = vmul.f32 %v8833_v31, %v6675_v53  ;;  %v6693_v21 = vadd.f32 %v8539_v30, %v6516_v42  ;;  %v6534_v62 = vadd.f32 %v6533_v46, %v6319_v10  ;;  %v6335_v58 = vadd.f32 %v14546_v1, %v6127_v5  ;;  %v8845_v14 = vpop.eup %8844  ;;  %v16176_v10 = vld [vmem:[#allocation74_spill] sm:$0xff] }
 0x85a   : > { %v6686_v49 = vpop.f32.mrf.mxu1  ;;  %v8492_v12 = vpop.f32.mrf.mxu0  ;;  %v6134_v4 = vadd.f32 %v16163_v8, %v5925_v36 }
 0x85b   : > { %v6687_v16 = vadd.f32 %v6686_v49, %v6510_v24  ;;  %6792 = vrot.lane.b32.xlu0 %v6745_v3, %s9235_s1  ;;  %6790 = vrot.lane.b32.xlu1 %v6743_v35, %s9235_s1  ;;  %v6751_v31 = vmul.f32 %v8839_v55, %v6693_v21  ;;  %v16164_v35 = vld [vmem:[#allocation114_spill] sm:$0xff]  ;;  %v8847_v2 = vpop.eup %8846 }
 0x85c   : > { %v8542_v44 = vpop.f32.mrf.mxu1  ;;  %v6545_v53 = vpop.f32.mrf.mxu0  ;;  %v6343_v24 = vadd.f32 %v16164_v35, %v6134_v4 }
 0x85d   : > { %v6749_v11 = vmul.f32 %v8837_v27, %v6687_v16  ;;  %v6705_v60 = vadd.f32 %v8542_v44, %v6528_v7  ;;  %v6546_v38 = vadd.f32 %v6545_v53, %v6335_v58  ;;  %v8849_v1 = vpop.eup %8848  ;;  %v16165_v16 = vld [vmem:[#allocation68_spill] sm:$0xff] }
 0x85e   : > { %v6698_v50 = vpop.f32.mrf.mxu1  ;;  %v6552_v46 = vadd.f32 %v8492_v12, %v6343_v24  ;;  %8852 = vrcp.f32 %v16165_v16  ;;  %v16175_v12 = vld [vmem:[#allocation108_spill] sm:$0xff] }
 0x85f   : > { %v6699_v57 = vadd.f32 %v6698_v50, %v6522_v56  ;;  %6796 = vrot.lane.b32.xlu0 %v6749_v11, %s9235_s1  ;;  %6794 = vrot.lane.b32.xlu1 %v6747_v22, %s9235_s1  ;;  %v6755_v3 = vmul.f32 %v8843_v20, %v6705_v60  ;;  %v8851_v28 = vpop.eup %8850  ;;  %8854 = vrcp.f32 %v16166_v6  ;;  %v14644_v22 = vld [vmem:[%s15066_s7] ss:$0 sm:$0xff]  ;;  %v16173_v11 = vld [vmem:[#allocation63_spill] sm:$0xff]  ;;  %v16182_v58 = vld [vmem:[#allocation36_spill] sm:$0xff] }
 0x860   : > { %v8545_v13 = vpop.f32.mrf.mxu1  ;;  %8856 = vrcp.f32 %v16167_v41  ;;  %v16187_v41 = vld [vmem:[#allocation34_spill] sm:$0xff] }
 0x861   : > { %v6753_v48 = vmul.f32 %v8841_v23, %v6699_v57  ;;  %v6717_v34 = vadd.f32 %v8545_v13, %v6540_v26  ;;  %8858 = vrcp.f32 %v16168_v25  ;;  %v16177_v23 = vld [vmem:[#allocation33_spill] sm:$0xff] }
 0x862   : > { %v6710_v47 = vpop.f32.mrf.mxu1  ;;  %8860 = vrcp.f32 %v16169_v15  ;;  %v16188_v15 = vld [vmem:[#allocation52_spill] sm:$0xff] }
 0x863   : > { %v6711_v30 = vadd.f32 %v6710_v47, %v6534_v62  ;;  %6800 = vrot.lane.b32.xlu0 %v6753_v48, %s9235_s1  ;;  %6798 = vrot.lane.b32.xlu1 %v6751_v31, %s9235_s1  ;;  %v6759_v37 = vmul.f32 %v8849_v1, %v6717_v34  ;;  %8862 = vrcp.f32 %v16170_v45  ;;  %v16180_v62 = vld [vmem:[#allocation88_spill] sm:$0xff]  ;;  %v16181_v48 = vld [vmem:[#allocation73_spill] sm:$0xff] }
 0x864   : > { %v8548_v29 = vpop.f32.mrf.mxu1  ;;  %8864 = vrcp.f32 %v16171_v52  ;;  %v16189_v52 = vld [vmem:[#allocation76_spill] sm:$0xff] }
 0x865   : > { %v6757_v39 = vmul.f32 %v8845_v14, %v6711_v30  ;;  %v6729_v27 = vadd.f32 %v8548_v29, %v6552_v46  ;;  %8866 = vrcp.f32 %v16174_v18  ;;  %v16183_v29 = vld [vmem:[#allocation116_spill] sm:$0xff]  ;;  %v16191_v18 = vld [vmem:[#allocation127_spill] sm:$0xff] }
 0x866   : > { %v6722_v59 = vpop.f32.mrf.mxu1  ;;  %8868 = vrcp.f32 %v16175_v12 }
 0x867   : > { %v6723_v49 = vadd.f32 %v6722_v59, %v6546_v38  ;;  %6804 = vrot.lane.b32.xlu0 %v6757_v39, %s9235_s1  ;;  %6802 = vrot.lane.b32.xlu1 %v6755_v3, %s9235_s1  ;;  %v6763_v42 = vmul.f32 %v8851_v28, %v6729_v27  ;;  %8870 = vrcp.f32 %v16176_v10  ;;  %v16184_v38 = vld [vmem:[#allocation99_spill] sm:$0xff] }
 0x868   : > { %8872 = vrcp.f32 %v16177_v23  ;;  %v16185_v39 = vld [vmem:[#allocation35_spill] sm:$0xff] }
 0x869   : > { %v6761_v63 = vmul.f32 %v8847_v2, %v6723_v49 }
 0x86b   : > { %6808 = vrot.lane.b32.xlu0 %v6761_v63, %s9235_s1  ;;  %6806 = vrot.lane.b32.xlu1 %v6759_v37, %s9235_s1  ;;  %v8853_v33 = vpop.eup %8852  ;;  %v16186_v37 = vld [vmem:[#allocation78_spill] sm:$0xff] }
 0x86c   : > { %v3763_v44 = vmul.f32 %v8853_v33, %v16172_v40  ;;  %v8855_v56 = vpop.eup %8854  ;;  %v16190_v40 = vld [vmem:[#allocation75_spill] sm:$0xff] }
 0x86d   : > { %v3761_v0 = vmul.f32 %v8855_v56, %v16173_v11  ;;  %v8857_v55 = vpop.eup %8856 }
 0x86e   : > { %v3765_v54 = vmul.f32 %v8857_v55, %v16178_v61  ;;  %v8859_v5 = vpop.eup %8858 }
 0x86f   : > { %6810 = vrot.lane.b32.xlu1 %v6763_v42, %s9235_s1  ;;  %v8861_v13 = vpop.eup %8860  ;;  %v3767_v60 = vmul.f32 %v8859_v5, %v16180_v62  ;;  %v16194_v5 = vld [vmem:[#allocation111_spill] sm:$0xff] }
 0x870   : > { %v3769_v8 = vmul.f32 %v8861_v13, %v16181_v48  ;;  %v8863_v20 = vpop.eup %8862 }
 0x871   : > { %v8865_v14 = vpop.eup %8864  ;;  %v3771_v3 = vmul.f32 %v8863_v20, %v16183_v29 }
 0x872   : > { %v3773_v34 = vmul.f32 %v8865_v14, %v16184_v38  ;;  %v8867_v1 = vpop.eup %8866  ;;  %v16195_v14 = vld [vmem:[#allocation105_spill] sm:$0xff] }
 0x873   : > { %v8869_v28 = vpop.eup %8868  ;;  %v3775_v25 = vmul.f32 %v8867_v1, %v16187_v41 }
 0x874   : > { %v8871_v6 = vpop.eup %8870  ;;  %v3777_v33 = vmul.f32 %v8869_v28, %v16188_v15 }
 0x875   : > { %v8873_v45 = vpop.eup %8872 }
 0x8bf   : > { %v6783_v21 = vpop.permute.xlu0 %6782 }
 0x8c0   : > { %v6830_v17 = vsel %vm6828_vm0, %v3763_v44, %v6783_v21  ;;  %v3779_v44 = vmul.f32 %v8871_v6, %v16190_v40 }
 0x8c1   : > { %v14650_v32 = vadd.f32 %v14644_v22, %v6830_v17  ;;  %v6781_v9 = vpop.permute.xlu1 %6780 }
 0x8c2   : > { %v6829_v50 = vsel %vm6828_vm0, %v3761_v0, %v6781_v9  ;;  %v3783_v9 = vmul.f32 %v8873_v45, %v16191_v18 }
 0x8c3   : > { %v6886_v7 = vmul.f32 1.442695, %v14650_v32  ;;  %v14657_v57 = vadd.f32 %v14644_v22, %v6829_v50  ;;  %vm6869_vm2 = vcmp.gt.f32.partialorder %v14650_v32, 0.0 }
 0x8c5   : > { %8874 = vpow2.f32 %v6886_v7  ;;  %v6884_v36 = vmul.f32 1.442695, %v14657_v57  ;;  %v6785_v51 = vpop.permute.xlu1 %6784  ;;  %vm6868_vm3 = vcmp.gt.f32.partialorder %v14657_v57, 0.0 }
 0x8c6   : > { %8876 = vrcp.f32 %v16179_v43  ;;  %v6831_v19 = vsel %vm6828_vm0, %v3765_v54, %v6785_v51  ;;  %v16192_v54 = vld [vmem:[#allocation102_spill] sm:$0xff] }
 0x8c7   : > { %8878 = vpow2.f32 %v6884_v36  ;;  %v14665_v31 = vadd.f32 %v14644_v22, %v6831_v19  ;;  %v16193_v51 = vld [vmem:[#allocation22_spill] sm:$0xff] }
 0x8c8   : > { %8880 = vrcp.f32 %v16182_v58  ;;  %v3574_v43 = vadd.f32 %v16194_v5, %v16193_v51 }
 0x8c9   : > { %v6888_v4 = vmul.f32 1.442695, %v14665_v31  ;;  %v6787_v53 = vpop.permute.xlu1 %6786  ;;  %v6789_v47 = vpop.permute.xlu0 %6788  ;;  %vm6870_vm4 = vcmp.gt.f32.partialorder %v14665_v31, 0.0 }
 0x8ca   : > { %v6832_v26 = vsel %vm6828_vm0, %v3767_v60, %v6787_v53  ;;  %v6833_v30 = vsel %vm6828_vm0, %v3769_v8, %v6789_v47 }
 0x8cb   : > { %8882 = vpow2.f32 %v6888_v4  ;;  %v14674_v35 = vadd.f32 %v14644_v22, %v6832_v26  ;;  %v14677_v24 = vadd.f32 %v14644_v22, %v6833_v30 }
 0x8cc   : > { %8884 = vrcp.f32 %v16185_v39 }
 0x8cd   : > { %v6890_v59 = vmul.f32 1.442695, %v14674_v35  ;;  %v6892_v2 = vmul.f32 1.442695, %v14677_v24  ;;  %v6791_v46 = vpop.permute.xlu1 %6790  ;;  %v6793_v49 = vpop.permute.xlu0 %6792  ;;  %8886 = vrcp.f32 %v16186_v37  ;;  %vm6871_vm5 = vcmp.gt.f32.partialorder %v14674_v35, 0.0 }
 0x8ce   : > { %v6834_v27 = vsel %vm6828_vm0, %v3771_v3, %v6791_v46  ;;  %v6835_v63 = vsel %vm6828_vm0, %v3773_v34, %v6793_v49  ;;  %v16196_v3 = vld [vmem:[#allocation117_spill] sm:$0xff]  ;;  %vm6872_vm6 = vcmp.gt.f32.partialorder %v14677_v24, 0.0 }
 0x8cf   : > { %8888 = vpow2.f32 %v6890_v59  ;;  %v14688_v42 = vadd.f32 %v14644_v22, %v6834_v27  ;;  %v14691_v16 = vadd.f32 %v14644_v22, %v6835_v63  ;;  %v3751_v38 = vadd.f32 %v16196_v3, %v3574_v43 }
 0x8d0   : > { %8890 = vpow2.f32 %v6892_v2 }
 0x8d1   : > { %8892 = vrcp.f32 %v16189_v52  ;;  %v6894_v56 = vmul.f32 1.442695, %v14688_v42  ;;  %v6896_v21 = vmul.f32 1.442695, %v14691_v16  ;;  %v6795_v11 = vpop.permute.xlu1 %6794  ;;  %v6797_v0 = vpop.permute.xlu0 %6796  ;;  %vm6873_vm7 = vcmp.gt.f32.partialorder %v14688_v42, 0.0 }
 0x8d2   : > { %v8875_v17 = vpop.eup %8874  ;;  %v6836_v12 = vsel %vm6828_vm0, %v3775_v25, %v6795_v11  ;;  %v6837_v50 = vsel %vm6828_vm0, %v3777_v33, %v6797_v0  ;;  %v16197_v25 = vld [vmem:[#allocation128_spill] sm:$0xff]  ;;  %vm6874_vm8 = vcmp.gt.f32.partialorder %v14691_v16, 0.0 }
 0x8d3   : > { %v8877_v55 = vpop.eup %8876  ;;  %8894 = vpow2.f32 %v6894_v56  ;;  %v14703_v10 = vadd.f32 %v14644_v22, %v6836_v12  ;;  %v14706_v7 = vadd.f32 %v14644_v22, %v6837_v50  ;;  %v7472_v23 = vadd.f32 -1.0, %v8875_v17 }
 0x8d4   : > { %v8879_v61 = vpop.eup %8878  ;;  %v3781_v36 = vmul.f32 %v8877_v55, %v16192_v54  ;;  %8896 = vpow2.f32 %v6896_v21 }
 0x8d5   : > { %v6898_v19 = vmul.f32 1.442695, %v14703_v10  ;;  %v6900_v13 = vmul.f32 1.442695, %v14706_v7  ;;  %v6799_v62 = vpop.permute.xlu1 %6798  ;;  %v6801_v60 = vpop.permute.xlu0 %6800  ;;  %v14715_v48 = vsel %vm6869_vm2, %v14650_v32, %v7472_v23  ;;  %v7471_v8 = vadd.f32 -1.0, %v8879_v61  ;;  %v16198_v23 = vld [vmem:[#allocation39_spill] sm:$0xff] }
 0x8d6   : > { %v6838_v4 = vsel %vm6828_vm0, %v3779_v44, %v6799_v62  ;;  %v6839_v53 = vsel %vm6828_vm0, %v3781_v36, %v6801_v60  ;;  %v6952_v47 = vsel %vm6948_vm1, %v14715_v48, 0.0  ;;  %v8881_v20 = vpop.eup %8880  ;;  %vm6875_vm9 = vcmp.gt.f32.partialorder %v14703_v10, 0.0 }
 0x8d7   : > { %8898 = vpow2.f32 %v6898_v19  ;;  %v14723_v58 = vadd.f32 %v14644_v22, %v6838_v4  ;;  %v14726_v26 = vadd.f32 %v14644_v22, %v6839_v53  ;;  %6953 = vadd.xlane.f32.xlu1 %v6952_v47  ;;  %v14729_v32 = vsel %vm6868_vm3, %v14657_v57, %v7471_v8 }
 0x8d8   : > { %v8883_v30 = vpop.eup %8882  ;;  %v3785_v29 = vmul.f32 %v8881_v20, %v16195_v14  ;;  %8900 = vpow2.f32 %v6900_v13  ;;  %v6949_v34 = vsel %vm6948_vm1, %v14729_v32, 0.0  ;;  %vm6876_vm10 = vcmp.gt.f32.partialorder %v14706_v7, 0.0 }
 0x8d9   : > { %v6902_v39 = vmul.f32 1.442695, %v14723_v58  ;;  %v6904_v59 = vmul.f32 1.442695, %v14726_v26  ;;  %6950 = vadd.xlane.f32.xlu0 %v6949_v34  ;;  %v6803_v2 = vpop.permute.xlu1 %6802  ;;  %v6805_v46 = vpop.permute.xlu0 %6804  ;;  %v7473_v49 = vadd.f32 -1.0, %v8883_v30  ;;  %vm6877_vm11 = vcmp.gt.f32.partialorder %v14723_v58, 0.0 }
 0x8da   : > { %v8885_v1 = vpop.eup %8884  ;;  %v6840_v57 = vsel %vm6828_vm0, %v3783_v9, %v6803_v2  ;;  %v6841_v37 = vsel %vm6828_vm0, %v3785_v29, %v6805_v46  ;;  %vm6878_vm12 = vcmp.gt.f32.partialorder %v14726_v26, 0.0 }
 0x8db   : > { %v8887_v27 = vpop.eup %8886  ;;  %8902 = vpow2.f32 %v6902_v39  ;;  %v14741_v63 = vadd.f32 %v14644_v22, %v6840_v57  ;;  %v14744_v28 = vadd.f32 %v14644_v22, %v6841_v37  ;;  %v14747_v6 = vsel %vm6870_vm4, %v14665_v31, %v7473_v49 }
 0x8dc   : > { %v8889_v41 = vpop.eup %8888  ;;  %v3787_v15 = vmul.f32 %v8885_v1, %v16197_v25  ;;  %v3789_v33 = vmul.f32 %v8887_v27, %v3751_v38  ;;  %8904 = vpow2.f32 %v6904_v59  ;;  %v6955_v45 = vsel %vm6948_vm1, %v14747_v6, 0.0 }
 0x8dd   : > { %v8891_v52 = vpop.eup %8890  ;;  %v6906_v40 = vmul.f32 1.442695, %v14741_v63  ;;  %v6908_v44 = vmul.f32 1.442695, %v14744_v28  ;;  %6956 = vadd.xlane.f32.xlu0 %v6955_v45  ;;  %v6807_v56 = vpop.permute.xlu1 %6806  ;;  %v7474_v31 = vadd.f32 -1.0, %v8889_v41  ;;  %vm6879_vm13 = vcmp.gt.f32.partialorder %v14741_v63, 0.0 }
 0x8de   : > { %v6809_v21 = vpop.permute.xlu0 %6808  ;;  %v8893_v11 = vpop.eup %8892  ;;  %v6842_v0 = vsel %vm6828_vm0, %v3787_v15, %v6807_v56  ;;  %v7475_v18 = vadd.f32 -1.0, %v8891_v52  ;;  %vm6880_vm14 = vcmp.gt.f32.partialorder %v14744_v28, 0.0 }
 0x8df   : > { %v6843_v17 = vsel %vm6828_vm0, %v3789_v33, %v6809_v21  ;;  %8906 = vpow2.f32 %v6906_v40  ;;  %v14759_v9 = vadd.f32 %v14644_v22, %v6842_v0  ;;  %v14765_v50 = vsel %vm6871_vm5, %v14674_v35, %v7474_v31 }
 0x8e0   : > { %v14762_v12 = vadd.f32 %v14644_v22, %v6843_v17  ;;  %v8895_v55 = vpop.eup %8894  ;;  %v3791_v61 = vmul.f32 %v8893_v11, %v16198_v23  ;;  %8908 = vpow2.f32 %v6908_v44  ;;  %v6958_v54 = vsel %vm6948_vm1, %v14765_v50, 0.0 }
 0x8e1   : > { %v14771_v36 = vsel %vm6872_vm6, %v14677_v24, %v7475_v18  ;;  %v8897_v51 = vpop.eup %8896  ;;  %v6910_v5 = vmul.f32 1.442695, %v14759_v9  ;;  %6959 = vadd.xlane.f32.xlu0 %v6958_v54  ;;  %v6811_v19 = vpop.permute.xlu1 %6810  ;;  %v7476_v13 = vadd.f32 -1.0, %v8895_v55  ;;  %vm6881_vm15 = vcmp.gt.f32.partialorder %v14759_v9, 0.0 }
 0x8e2   : > { %v6912_v43 = vmul.f32 1.442695, %v14762_v12  ;;  %v6961_v35 = vsel %vm6948_vm1, %v14771_v36, 0.0  ;;  %v6844_v62 = vsel %vm6828_vm0, %v3791_v61, %v6811_v19  ;;  %v7477_v60 = vadd.f32 -1.0, %v8897_v51 }
 0x8e3   : > { %6962 = vadd.xlane.f32.xlu1 %v6961_v35  ;;  %8910 = vpow2.f32 %v6910_v5  ;;  %v14780_v24 = vadd.f32 %v14644_v22, %v6844_v62  ;;  %v14783_v8 = vsel %vm6873_vm7, %v14688_v42, %v7476_v13  ;;  %vm6882_vm0 = vcmp.gt.f32.partialorder %v14762_v12, 0.0 }
 0x8e4   : > { %v8899_v4 = vpop.eup %8898  ;;  %8912 = vpow2.f32 %v6912_v43  ;;  %v6964_v53 = vsel %vm6948_vm1, %v14783_v8, 0.0  ;;  %v14789_v47 = vsel %vm6874_vm8, %v14691_v16, %v7477_v60 }
 0x8e5   : > { %v8901_v20 = vpop.eup %8900  ;;  %v6914_v30 = vmul.f32 1.442695, %v14780_v24  ;;  %6965 = vadd.xlane.f32.xlu0 %v6964_v53  ;;  %v6967_v22 = vsel %vm6948_vm1, %v14789_v47, 0.0  ;;  %v7478_v14 = vadd.f32 -1.0, %v8899_v4  ;;  %vm6883_vm2 = vcmp.gt.f32.partialorder %v14780_v24, 0.0 }
 0x8e6   : > { %v7479_v42 = vadd.f32 -1.0, %v8901_v20 }
 0x8e7   : > { %6968 = vadd.xlane.f32.xlu1 %v6967_v22  ;;  %8914 = vpow2.f32 %v6914_v30  ;;  %v14796_v29 = vsel %vm6875_vm9, %v14703_v10, %v7478_v14 }
 0x8e8   : > { %v8903_v16 = vpop.eup %8902  ;;  %v6970_v3 = vsel %vm6948_vm1, %v14796_v29, 0.0  ;;  %v14802_v38 = vsel %vm6876_vm10, %v14706_v7, %v7479_v42 }
 0x8e9   : > { %v8905_v34 = vpop.eup %8904  ;;  %6971 = vadd.xlane.f32.xlu0 %v6970_v3  ;;  %v6973_v39 = vsel %vm6948_vm1, %v14802_v38, 0.0  ;;  %v7480_v59 = vadd.f32 -1.0, %v8903_v16 }
 0x8ea   : > { %v7481_v10 = vadd.f32 -1.0, %v8905_v34 }
 0x8eb   : > { %6974 = vadd.xlane.f32.xlu1 %v6973_v39  ;;  %v14808_v2 = vsel %vm6877_vm11, %v14723_v58, %v7480_v59 }
 0x8ec   : > { %v8907_v46 = vpop.eup %8906  ;;  %v6976_v7 = vsel %vm6948_vm1, %v14808_v2, 0.0  ;;  %v14814_v49 = vsel %vm6878_vm12, %v14726_v26, %v7481_v10 }
 0x8ed   : > { %v8909_v1 = vpop.eup %8908  ;;  %6977 = vadd.xlane.f32.xlu0 %v6976_v7  ;;  %v6979_v57 = vsel %vm6948_vm1, %v14814_v49, 0.0  ;;  %v7482_v37 = vadd.f32 -1.0, %v8907_v46 }
 0x8ee   : > { %v7483_v58 = vadd.f32 -1.0, %v8909_v1 }
 0x8ef   : > { %6980 = vadd.xlane.f32.xlu1 %v6979_v57  ;;  %v14820_v27 = vsel %vm6879_vm13, %v14741_v63, %v7482_v37 }
 0x8f0   : > { %v8911_v41 = vpop.eup %8910  ;;  %v6982_v26 = vsel %vm6948_vm1, %v14820_v27, 0.0  ;;  %v14826_v25 = vsel %vm6880_vm14, %v14744_v28, %v7483_v58 }
 0x8f1   : > { %v8913_v15 = vpop.eup %8912  ;;  %6983 = vadd.xlane.f32.xlu0 %v6982_v26  ;;  %v6985_v33 = vsel %vm6948_vm1, %v14826_v25, 0.0  ;;  %v7484_v45 = vadd.f32 -1.0, %v8911_v41 }
 0x8f2   : > { %v7485_v63 = vadd.f32 -1.0, %v8913_v15 }
 0x8f3   : > { %6986 = vadd.xlane.f32.xlu1 %v6985_v33  ;;  %v14832_v52 = vsel %vm6881_vm15, %v14759_v9, %v7484_v45 }
 0x8f4   : > { %v8915_v40 = vpop.eup %8914  ;;  %v6988_v28 = vsel %vm6948_vm1, %v14832_v52, 0.0  ;;  %v14838_v44 = vsel %vm6882_vm0, %v14762_v12, %v7485_v63 }
 0x8f5   : > { %6989 = vadd.xlane.f32.xlu0 %v6988_v28  ;;  %v6991_v56 = vsel %vm6948_vm1, %v14838_v44, 0.0  ;;  %v7486_v21 = vadd.f32 -1.0, %v8915_v40 }
 0x8f7   : > { %6992 = vadd.xlane.f32.xlu1 %v6991_v56  ;;  %v14844_v31 = vsel %vm6883_vm2, %v14780_v24, %v7486_v21 }
 0x8f8   : > { %v6994_v11 = vsel %vm6948_vm1, %v14844_v31, 0.0 }
 0x8f9   : > { %6995 = vadd.xlane.f32.xlu0 %v6994_v11 }
 0x960   : > { %v6954_v0 = vpop.xlane.xlu1 %6953 }
 0x961   : > { %v6999_v17 = vmul.f32 0.0625, %v6954_v0 }
 0x962   : > { %v6951_v18 = vpop.xlane.xlu0 %6950 }
 0x963   : > { %v14849_v9 = vsub.f32 %v14715_v48, %v6999_v17  ;;  %v6998_v12 = vmul.f32 0.0625, %v6951_v18 }
 0x965   : > { %v14852_v55 = vsub.f32 %v14729_v32, %v6998_v12  ;;  %v7031_v23 = vmul.f32 %v14849_v9, %v14849_v9 }
 0x966   : > { %v6957_v61 = vpop.xlane.xlu0 %6956 }
 0x967   : > { %v7000_v54 = vmul.f32 0.0625, %v6957_v61  ;;  %v7049_v51 = vsel %vm6948_vm1, %v7031_v23, 0.0  ;;  %v7030_v5 = vmul.f32 %v14852_v55, %v14852_v55 }
 0x968   : > { %7050 = vadd.xlane.f32.xlu0 %v7049_v51 }
 0x969   : > { %v14860_v43 = vsub.f32 %v14747_v6, %v7000_v54  ;;  %v7046_v48 = vsel %vm6948_vm1, %v7030_v5, 0.0 }
 0x96a   : > { %7047 = vadd.xlane.f32.xlu1 %v7046_v48  ;;  %v6960_v19 = vpop.xlane.xlu0 %6959 }
 0x96b   : > { %v7001_v35 = vmul.f32 0.0625, %v6960_v19  ;;  %v7032_v13 = vmul.f32 %v14860_v43, %v14860_v43 }
 0x96c   : > { %v6963_v32 = vpop.xlane.xlu1 %6962 }
 0x96d   : > { %v7002_v62 = vmul.f32 0.0625, %v6963_v32  ;;  %v14866_v60 = vsub.f32 %v14765_v50, %v7001_v35  ;;  %v7052_v24 = vsel %vm6948_vm1, %v7032_v13, 0.0 }
 0x96e   : > { %7053 = vadd.xlane.f32.xlu1 %v7052_v24  ;;  %v6966_v6 = vpop.xlane.xlu0 %6965 }
 0x96f   : > { %v14870_v4 = vsub.f32 %v14771_v36, %v7002_v62  ;;  %v7003_v20 = vmul.f32 0.0625, %v6966_v6  ;;  %v7033_v30 = vmul.f32 %v14866_v60, %v14866_v60 }
 0x970   : > { %v6969_v53 = vpop.xlane.xlu1 %6968 }
 0x971   : > { %v7004_v22 = vmul.f32 0.0625, %v6969_v53  ;;  %v7034_v14 = vmul.f32 %v14870_v4, %v14870_v4  ;;  %v14877_v42 = vsub.f32 %v14783_v8, %v7003_v20  ;;  %v7055_v50 = vsel %vm6948_vm1, %v7033_v30, 0.0 }
 0x972   : > { %7056 = vadd.xlane.f32.xlu0 %v7055_v50  ;;  %v6972_v3 = vpop.xlane.xlu0 %6971 }
 0x973   : > { %v14881_v16 = vsub.f32 %v14789_v47, %v7004_v22  ;;  %v7058_v36 = vsel %vm6948_vm1, %v7034_v14, 0.0  ;;  %v7005_v39 = vmul.f32 0.0625, %v6972_v3  ;;  %v7035_v59 = vmul.f32 %v14877_v42, %v14877_v42 }
 0x974   : > { %v6975_v34 = vpop.xlane.xlu1 %6974  ;;  %7059 = vadd.xlane.f32.xlu1 %v7058_v36 }
 0x975   : > { %v7006_v10 = vmul.f32 0.0625, %v6975_v34  ;;  %v7036_v8 = vmul.f32 %v14881_v16, %v14881_v16  ;;  %v14889_v46 = vsub.f32 %v14796_v29, %v7005_v39  ;;  %v7061_v47 = vsel %vm6948_vm1, %v7035_v59, 0.0 }
 0x976   : > { %7062 = vadd.xlane.f32.xlu0 %v7061_v47  ;;  %v6978_v57 = vpop.xlane.xlu0 %6977 }
 0x977   : > { %v14893_v7 = vsub.f32 %v14802_v38, %v7006_v10  ;;  %v7064_v1 = vsel %vm6948_vm1, %v7036_v8, 0.0  ;;  %v7007_v58 = vmul.f32 0.0625, %v6978_v57  ;;  %v7037_v41 = vmul.f32 %v14889_v46, %v14889_v46 }
 0x978   : > { %v6981_v37 = vpop.xlane.xlu1 %6980  ;;  %7065 = vadd.xlane.f32.xlu1 %v7064_v1 }
 0x979   : > { %v7008_v26 = vmul.f32 0.0625, %v6981_v37  ;;  %v7038_v29 = vmul.f32 %v14893_v7, %v14893_v7  ;;  %v14901_v15 = vsub.f32 %v14808_v2, %v7007_v58  ;;  %v7067_v38 = vsel %vm6948_vm1, %v7037_v41, 0.0 }
 0x97a   : > { %7068 = vadd.xlane.f32.xlu0 %v7067_v38  ;;  %v6984_v63 = vpop.xlane.xlu0 %6983 }
 0x97b   : > { %v14905_v33 = vsub.f32 %v14814_v49, %v7008_v26  ;;  %v7070_v45 = vsel %vm6948_vm1, %v7038_v29, 0.0  ;;  %v7009_v28 = vmul.f32 0.0625, %v6984_v63  ;;  %v7039_v56 = vmul.f32 %v14901_v15, %v14901_v15  ;;  %v14947_v29 = vld [vmem:[%s15067_s8] ss:$0 sm:$0xff] }
 0x97c   : > { %v6987_v40 = vpop.xlane.xlu1 %6986  ;;  %7071 = vadd.xlane.f32.xlu1 %v7070_v45 }
 0x97d   : > { %v7010_v21 = vmul.f32 0.0625, %v6987_v40  ;;  %v7040_v2 = vmul.f32 %v14905_v33, %v14905_v33  ;;  %v14913_v11 = vsub.f32 %v14820_v27, %v7009_v28  ;;  %v7073_v49 = vsel %vm6948_vm1, %v7039_v56, 0.0 }
 0x97e   : > { %7074 = vadd.xlane.f32.xlu0 %v7073_v49  ;;  %v6990_v18 = vpop.xlane.xlu0 %6989 }
 0x97f   : > { %v14917_v0 = vsub.f32 %v14826_v25, %v7010_v21  ;;  %v7076_v17 = vsel %vm6948_vm1, %v7040_v2, 0.0  ;;  %v7011_v23 = vmul.f32 0.0625, %v6990_v18  ;;  %v7041_v61 = vmul.f32 %v14913_v11, %v14913_v11  ;;  %v14953_v21 = vld [vmem:[%s16199_s16] ss:$0 sm:$0xff] }
 0x980   : > { %v6993_v12 = vpop.xlane.xlu1 %6992  ;;  %7077 = vadd.xlane.f32.xlu1 %v7076_v17 }
 0x981   : > { %v7012_v54 = vmul.f32 0.0625, %v6993_v12  ;;  %v7042_v27 = vmul.f32 %v14917_v0, %v14917_v0  ;;  %v14925_v51 = vsub.f32 %v14832_v52, %v7011_v23  ;;  %v7079_v25 = vsel %vm6948_vm1, %v7041_v61, 0.0 }
 0x982   : > { %7080 = vadd.xlane.f32.xlu0 %v7079_v25  ;;  %v6996_v19 = vpop.xlane.xlu0 %6995 }
 0x983   : > { %v14929_v5 = vsub.f32 %v14838_v44, %v7012_v54  ;;  %v7082_v48 = vsel %vm6948_vm1, %v7042_v27, 0.0  ;;  %v7013_v32 = vmul.f32 0.0625, %v6996_v19  ;;  %v7043_v35 = vmul.f32 %v14925_v51, %v14925_v51 }
 0x984   : > { %7083 = vadd.xlane.f32.xlu1 %v7082_v48 }
 0x985   : > { %v7044_v13 = vmul.f32 %v14929_v5, %v14929_v5  ;;  %v14937_v52 = vsub.f32 %v14844_v31, %v7013_v32  ;;  %v7085_v62 = vsel %vm6948_vm1, %v7043_v35, 0.0 }
 0x986   : > { %7086 = vadd.xlane.f32.xlu0 %v7085_v62 }
 0x987   : > { %v7088_v44 = vsel %vm6948_vm1, %v7044_v13, 0.0  ;;  %v7045_v24 = vmul.f32 %v14937_v52, %v14937_v52 }
 0x988   : > { %7089 = vadd.xlane.f32.xlu1 %v7088_v44 }
 0x989   : > { %v7091_v6 = vsel %vm6948_vm1, %v7045_v24, 0.0 }
 0x98a   : > { %7092 = vadd.xlane.f32.xlu0 %v7091_v6 }
 0x9f1   : > { %v7051_v53 = vpop.xlane.xlu0 %7050 }
 0x9f2   : > { %v7095_v20 = vmul.f32 0.0625, %v7051_v53 }
 0x9f3   : > { %v7048_v30 = vpop.xlane.xlu1 %7047 }
 0x9f4   : > { %v7111_v22 = vadd.f32 1e-05, %v7095_v20  ;;  %v7094_v14 = vmul.f32 0.0625, %v7048_v30 }
 0x9f6   : > { %8916 = vrsqrt.f32 %v7111_v22  ;;  %v7110_v31 = vadd.f32 1e-05, %v7094_v14 }
 0x9f7   : > { %v7054_v50 = vpop.xlane.xlu1 %7053 }
 0x9f8   : > { %8918 = vrsqrt.f32 %v7110_v31  ;;  %v7096_v36 = vmul.f32 0.0625, %v7054_v50 }
 0x9fa   : > { %v7112_v3 = vadd.f32 1e-05, %v7096_v36 }
 0x9fb   : > { %v7057_v34 = vpop.xlane.xlu0 %7056 }
 0x9fc   : > { %8920 = vrsqrt.f32 %v7112_v3  ;;  %v7097_v59 = vmul.f32 0.0625, %v7057_v34 }
 0x9fd   : > { %v7060_v39 = vpop.xlane.xlu1 %7059 }
 0x9fe   : > { %v7098_v10 = vmul.f32 0.0625, %v7060_v39  ;;  %v7113_v8 = vadd.f32 1e-05, %v7097_v59 }
 0x9ff   : > { %v7063_v1 = vpop.xlane.xlu0 %7062 }
 0xa00   : > { %v7114_v47 = vadd.f32 1e-05, %v7098_v10  ;;  %8922 = vrsqrt.f32 %v7113_v8  ;;  %v7099_v37 = vmul.f32 0.0625, %v7063_v1 }
 0xa01   : > { %v7066_v57 = vpop.xlane.xlu1 %7065 }
 0xa02   : > { %8924 = vrsqrt.f32 %v7114_v47  ;;  %v7100_v58 = vmul.f32 0.0625, %v7066_v57  ;;  %v7115_v41 = vadd.f32 1e-05, %v7099_v37 }
 0xa03   : > { %v8917_v26 = vpop.eup %8916  ;;  %v7069_v45 = vpop.xlane.xlu0 %7068 }
 0xa04   : > { %v7116_v38 = vadd.f32 1e-05, %v7100_v58  ;;  %v7143_v63 = vmul.f32 %v8917_v26, %v14849_v9  ;;  %8926 = vrsqrt.f32 %v7115_v41  ;;  %v7101_v28 = vmul.f32 0.0625, %v7069_v45 }
 0xa05   : > { %v7072_v40 = vpop.xlane.xlu1 %7071  ;;  %v8919_v56 = vpop.eup %8918 }
 0xa06   : > { %8928 = vrsqrt.f32 %v7116_v38  ;;  %v7102_v2 = vmul.f32 0.0625, %v7072_v40  ;;  %v7166_v49 = vmul.f32 %v14947_v29, %v7143_v63  ;;  %v7142_v17 = vmul.f32 %v8919_v56, %v14852_v55 }
 0xa07   : > { %v7117_v18 = vadd.f32 1e-05, %v7101_v28  ;;  %v7075_v12 = vpop.xlane.xlu0 %7074 }
 0xa08   : > { %v7118_v9 = vadd.f32 1e-05, %v7102_v2  ;;  %v7189_v23 = vadd.f32 %v14953_v21, %v7166_v49  ;;  %v7165_v61 = vmul.f32 %v14947_v29, %v7142_v17  ;;  %v7103_v27 = vmul.f32 0.0625, %v7075_v12 }
 0xa09   : > { %8930 = vrsqrt.f32 %v7117_v18  ;;  %v7078_v54 = vpop.xlane.xlu1 %7077  ;;  %v8921_v25 = vpop.eup %8920 }
 0xa0a   : > { %8932 = vrsqrt.f32 %v7118_v9  ;;  %v7104_v55 = vmul.f32 0.0625, %v7078_v54  ;;  %7205 = vst.msk [vmem:[%s14961_s21 + $0x8] sm:$0xff] %vm6948_vm1, %v7189_v23  ;;  %v7188_v48 = vadd.f32 %v14953_v21, %v7165_v61  ;;  %v7144_v19 = vmul.f32 %v8921_v25, %v14860_v43 }
 0xa0b   : > { %v7119_v32 = vadd.f32 1e-05, %v7103_v27  ;;  %v7081_v13 = vpop.xlane.xlu0 %7080 }
 0xa0c   : > { %v7120_v35 = vadd.f32 1e-05, %v7104_v55  ;;  %7204 = vst.msk [vmem:[%s14961_s21] sm:$0xff] %vm6948_vm1, %v7188_v48  ;;  %v7167_v62 = vmul.f32 %v14947_v29, %v7144_v19  ;;  %v7105_v24 = vmul.f32 0.0625, %v7081_v13 }
 0xa0d   : > { %8934 = vrsqrt.f32 %v7119_v32  ;;  %v7084_v44 = vpop.xlane.xlu1 %7083  ;;  %v8923_v6 = vpop.eup %8922 }
 0xa0e   : > { %8936 = vrsqrt.f32 %v7120_v35  ;;  %v7106_v53 = vmul.f32 0.0625, %v7084_v44  ;;  %v7190_v30 = vadd.f32 %v14953_v21, %v7167_v62  ;;  %v7145_v22 = vmul.f32 %v8923_v6, %v14866_v60 }
 0xa0f   : > { %v8925_v20 = vpop.eup %8924  ;;  %v7121_v43 = vadd.f32 1e-05, %v7105_v24  ;;  %v7087_v50 = vpop.xlane.xlu0 %7086 }
 0xa10   : > { %v7146_v14 = vmul.f32 %v8925_v20, %v14870_v4  ;;  %v7122_v31 = vadd.f32 1e-05, %v7106_v53  ;;  %7206 = vst.msk [vmem:[%s14961_s21 + $0x10] sm:$0xff] %vm6948_vm1, %v7190_v30  ;;  %v7168_v36 = vmul.f32 %v14947_v29, %v7145_v22  ;;  %v7107_v34 = vmul.f32 0.0625, %v7087_v50 }
 0xa11   : > { %8938 = vrsqrt.f32 %v7121_v43  ;;  %v7090_v3 = vpop.xlane.xlu1 %7089  ;;  %v8927_v39 = vpop.eup %8926 }
 0xa12   : > { %v7169_v59 = vmul.f32 %v14947_v29, %v7146_v14  ;;  %8940 = vrsqrt.f32 %v7122_v31  ;;  %v7108_v10 = vmul.f32 0.0625, %v7090_v3  ;;  %v7191_v8 = vadd.f32 %v14953_v21, %v7168_v36 }
 0xa13   : > { %v8929_v60 = vpop.eup %8928  ;;  %v7147_v4 = vmul.f32 %v8927_v39, %v14877_v42  ;;  %v7123_v47 = vadd.f32 1e-05, %v7107_v34  ;;  %v7093_v58 = vpop.xlane.xlu0 %7092 }
 0xa14   : > { %v7192_v1 = vadd.f32 %v14953_v21, %v7169_v59  ;;  %v7148_v57 = vmul.f32 %v8929_v60, %v14881_v16  ;;  %v7124_v37 = vadd.f32 1e-05, %v7108_v10  ;;  %7207 = vst.msk [vmem:[%s14961_s21 + $0x18] sm:$0xff] %vm6948_vm1, %v7191_v8  ;;  %v7109_v26 = vmul.f32 0.0625, %v7093_v58 }
 0xa15   : > { %v7170_v41 = vmul.f32 %v14947_v29, %v7147_v4  ;;  %8942 = vrsqrt.f32 %v7123_v47 }
 0xa16   : > { %v8931_v38 = vpop.eup %8930  ;;  %7208 = vst.msk [vmem:[%s14961_s21 + $0x20] sm:$0xff] %vm6948_vm1, %v7192_v1  ;;  %v7171_v42 = vmul.f32 %v14947_v29, %v7148_v57  ;;  %8944 = vrsqrt.f32 %v7124_v37  ;;  %v7125_v40 = vadd.f32 1e-05, %v7109_v26 }
 0xa17   : > { %v8933_v45 = vpop.eup %8932  ;;  %v7193_v63 = vadd.f32 %v14953_v21, %v7170_v41  ;;  %v7149_v16 = vmul.f32 %v8931_v38, %v14889_v46 }
 0xa18   : > { %v7194_v28 = vadd.f32 %v14953_v21, %v7171_v42  ;;  %v7150_v56 = vmul.f32 %v8933_v45, %v14893_v7  ;;  %8946 = vrsqrt.f32 %v7125_v40 }
 0xa19   : > { %7209 = vst.msk [vmem:[%s14961_s21 + $0x28] sm:$0xff] %vm6948_vm1, %v7193_v63  ;;  %v7172_v2 = vmul.f32 %v14947_v29, %v7149_v16 }
 0xa1a   : > { %v8935_v49 = vpop.eup %8934  ;;  %7210 = vst.msk [vmem:[%s14961_s21 + $0x30] sm:$0xff] %vm6948_vm1, %v7194_v28  ;;  %v7173_v17 = vmul.f32 %v14947_v29, %v7150_v56 }
 0xa1b   : > { %v8937_v18 = vpop.eup %8936  ;;  %v7195_v46 = vadd.f32 %v14953_v21, %v7172_v2  ;;  %v7151_v9 = vmul.f32 %v8935_v49, %v14901_v15 }
 0xa1c   : > { %v7196_v12 = vadd.f32 %v14953_v21, %v7173_v17  ;;  %v7152_v7 = vmul.f32 %v8937_v18, %v14905_v33 }
 0xa1d   : > { %7211 = vst.msk [vmem:[%s14961_s21 + $0x38] sm:$0xff] %vm6948_vm1, %v7195_v46  ;;  %v7174_v23 = vmul.f32 %v14947_v29, %v7151_v9 }
 0xa1e   : > { %v8939_v61 = vpop.eup %8938  ;;  %7212 = vst.msk [vmem:[%s14961_s21 + $0x40] sm:$0xff] %vm6948_vm1, %v7196_v12  ;;  %v7175_v54 = vmul.f32 %v14947_v29, %v7152_v7 }
 0xa1f   : > { %v8941_v27 = vpop.eup %8940  ;;  %v7197_v25 = vadd.f32 %v14953_v21, %v7174_v23  ;;  %v7153_v15 = vmul.f32 %v8939_v61, %v14913_v11 }
 0xa20   : > { %v7198_v55 = vadd.f32 %v14953_v21, %v7175_v54  ;;  %v7154_v33 = vmul.f32 %v8941_v27, %v14917_v0 }
 0xa21   : > { %7213 = vst.msk [vmem:[%s14961_s21 + $0x48] sm:$0xff] %vm6948_vm1, %v7197_v25  ;;  %v7176_v48 = vmul.f32 %v14947_v29, %v7153_v15 }
 0xa22   : > { %v8943_v19 = vpop.eup %8942  ;;  %7214 = vst.msk [vmem:[%s14961_s21 + $0x50] sm:$0xff] %vm6948_vm1, %v7198_v55  ;;  %v7177_v32 = vmul.f32 %v14947_v29, %v7154_v33 }
 0xa23   : > { %v8945_v35 = vpop.eup %8944  ;;  %v7199_v13 = vadd.f32 %v14953_v21, %v7176_v48  ;;  %v7155_v11 = vmul.f32 %v8943_v19, %v14925_v51 }
 0xa24   : > { %v7200_v62 = vadd.f32 %v14953_v21, %v7177_v32  ;;  %v7156_v0 = vmul.f32 %v8945_v35, %v14929_v5 }
 0xa25   : > { %7215 = vst.msk [vmem:[%s14961_s21 + $0x58] sm:$0xff] %vm6948_vm1, %v7199_v13  ;;  %v7178_v44 = vmul.f32 %v14947_v29, %v7155_v11  ;;  %v8947_v24 = vpop.eup %8946 }
 0xa26   : > { %7216 = vst.msk [vmem:[%s14961_s21 + $0x60] sm:$0xff] %vm6948_vm1, %v7200_v62  ;;  %v7179_v6 = vmul.f32 %v14947_v29, %v7156_v0  ;;  %v7157_v20 = vmul.f32 %v8947_v24, %v14937_v52 }
 0xa27   : > { %v7201_v53 = vadd.f32 %v14953_v21, %v7178_v44 }
 0xa28   : > { %v7202_v30 = vadd.f32 %v14953_v21, %v7179_v6  ;;  %v7180_v51 = vmul.f32 %v14947_v29, %v7157_v20 }
 0xa29   : > { %7217 = vst.msk [vmem:[%s14961_s21 + $0x68] sm:$0xff] %vm6948_vm1, %v7201_v53 }
 0xa2a   : > { %7218 = vst.msk [vmem:[%s14961_s21 + $0x70] sm:$0xff] %vm6948_vm1, %v7202_v30  ;;  %v7203_v5 = vadd.f32 %v14953_v21, %v7180_v51 }
 0xa2c   : > { %7219 = vst.msk [vmem:[%s14961_s21 + $0x78] sm:$0xff] %vm6948_vm1, %v7203_v5 }
 0xa2d PF: > { %s16201_s30 = sld [smem:[#allocation14_spill]]  ;;  %s16204_s25 = smov %s9193_s26 }
 0xa2e   : > { %s16202_s23 = sld [smem:[#allocation16_spill]]  ;;  %s16205_s26 = smov %s9197_s27 }
 0xa2f   : > { %s16203_s15 = sld [smem:[#allocation15_spill]]  ;;  %s16207_s28 = smov %s9205_s29 }
 0xa33   : > { %p25_p3 = scmp.ge.s32.totalorder %s16201_s30, 4  }
 0xa34   : > { %s16206_s27 = smov %s16202_s23 }
 0xa35   : > { %s16208_s29 = smov %s16203_s15  ;;  %27 = sbr.rel (!%p25_p3) target bundleno = 12 (0xc), region = 229 }
 0xa3a   :  { %7242 = vsyncpa [#allocation5], 1 }
 0xa3b   :  { %7244 = vsyncpa [#allocation5 + $0x1], 1 }
 0xa3c   :  { %7245 = vsyncpa [#allocation6], 1 }
 0xa3d   :  { %7247 = vsyncpa [#allocation6 + $0x1], 1 }
 0xa3e   :  { %7248 = vsyncpa [#allocation9], 1 }

</bundles_post_ra>
